<compile_context>
chip_gen: v5e
topology: v5e:2x2
jax: 0.10.0
libtpu: 0.0.40
codegen_flags: <defaults>
</compile_context>

<pallas_src>
import functools

import jax
import jax.numpy as jnp
import numpy as np
from jax.experimental import pallas as pl
from jax.experimental.pallas import tpu as pltpu

n_layers = 1
n_qubits = 4
N_STATES = 2 ** n_qubits   # 16
KERNEL_SIZE = n_qubits     # 4
STRIDE = 2
LANE = 128                 # lanes per vreg (one patch per lane)
SUB = 8                    # sublanes per working tile
MAX_TSUB = 32              # max sublane rows per grid block
INV_SQRT2 = 0.7071067811865476


def _bit(s, q):
    return (s >> q) & 1


def quanv_kernel(x_ref, cw_ref, sw_ref, o_ref):
    """Simulate the 4-qubit circuit for a block of patches.

    x_ref : VMEM (P, TSUB, 128)         -- encoding angles, one patch per lane
    cw_ref: SMEM (n_layers, 2*n_qubits) -- cos(weights/2)
    sw_ref: SMEM (n_layers, 2*n_qubits) -- sin(weights/2)
    o_ref : VMEM (n_qubits, TSUB, 128)  -- PauliZ expectation per qubit per patch
    """
    P, tsub, _ = x_ref.shape
    n_sub = tsub // SUB
    vpq = P // n_qubits + 1    # var_per_qubit

    # hoist the scalar variational weights out of the sub-tile loop
    cws = [[cw_ref[l, j] for j in range(2 * n_qubits)] for l in range(n_layers)]
    sws = [[sw_ref[l, j] for j in range(2 * n_qubits)] for l in range(n_layers)]

    for s in range(n_sub):                      # static unroll over (8,128) sub-tiles
        r0, r1 = s * SUB, (s + 1) * SUB
        ang = x_ref[:, r0:r1, :]                # (P, 8, 128)
        c_all = jnp.cos(ang * 0.5)              # one EUP push for every angle
        s_all = jnp.sin(ang * 0.5)

        # ---- encoding: four independent single-qubit (2-amplitude) states ----
        qubit_states = []
        for q in range(n_qubits):
            base = q * vpq
            if base < P:
                # first gate is always RZ applied to the post-Hadamard |+> state (real)
                c = c_all[base]
                sn = s_all[base]
                cr = INV_SQRT2 * c
                si = INV_SQRT2 * sn
                ar = [cr, cr]
                ai = [-si, si]
                first_i = 1
            else:                               # qubit got no encoding gates
                ar = [jnp.full((SUB, LANE), INV_SQRT2, jnp.float32)] * 2
                ai = [jnp.zeros((SUB, LANE), jnp.float32)] * 2
                first_i = vpq
            for i in range(first_i, vpq):
                idx = base + i
                if idx >= P:
                    break
                c = c_all[idx]
                sn = s_all[idx]
                if i % 2 == 0:
                    # RZ(theta): a0 *= exp(-i t/2), a1 *= exp(+i t/2)
                    ar, ai = (
                        [ar[0] * c + ai[0] * sn, ar[1] * c - ai[1] * sn],
                        [ai[0] * c - ar[0] * sn, ai[1] * c + ar[1] * sn],
                    )
                else:
                    # RY(theta): real rotation [[c, -s], [s, c]]
                    ar, ai = (
                        [c * ar[0] - sn * ar[1], sn * ar[0] + c * ar[1]],
                        [c * ai[0] - sn * ai[1], sn * ai[0] + c * ai[1]],
                    )
            qubit_states.append((ar, ai))

        # ---- tensor-expand the product state to 16 amplitudes (qubit 0 = LSB) ----
        re = list(qubit_states[0][0])
        im = list(qubit_states[0][1])
        for q in range(1, n_qubits):
            br, bi = qubit_states[q]
            nre, nim = [], []
            for b in (0, 1):
                for st in range(len(re)):
                    nre.append(re[st] * br[b] - im[st] * bi[b])
                    nim.append(re[st] * bi[b] + im[st] * br[b])
            re, im = nre, nim

        # ---- variational layer(s): CRZ ring + RY (scalar weights from SMEM) ----
        for l in range(n_layers):
            for i in range(n_qubits):
                ctrl, tgt = i, (i + 1) % n_qubits
                cw, sw = cws[l][i], sws[l][i]
                for st in range(N_STATES):
                    if not _bit(st, ctrl):
                        continue
                    if _bit(st, tgt):          # *= exp(+i w/2)
                        nr = re[st] * cw - im[st] * sw
                        ni = re[st] * sw + im[st] * cw
                    else:                      # *= exp(-i w/2)
                        nr = re[st] * cw + im[st] * sw
                        ni = im[st] * cw - re[st] * sw
                    re[st], im[st] = nr, ni
            for j in range(n_qubits, 2 * n_qubits):
                q = j % n_qubits
                cw, sw = cws[l][j], sws[l][j]
                nre, nim = list(re), list(im)
                for s0 in range(N_STATES):
                    if _bit(s0, q):
                        continue
                    s1 = s0 | (1 << q)
                    nre[s0] = cw * re[s0] - sw * re[s1]
                    nim[s0] = cw * im[s0] - sw * im[s1]
                    nre[s1] = sw * re[s0] + cw * re[s1]
                    nim[s1] = sw * im[s0] + cw * im[s1]
                re, im = nre, nim

        # ---- <Z_q>: probabilities once, then four signed sums ----
        prob = [re[st] * re[st] + im[st] * im[st] for st in range(N_STATES)]
        for q in range(n_qubits):
            pos = prob[0]                      # state 0 always has bit q == 0
            neg = None
            for st in range(1, N_STATES):
                if _bit(st, q):
                    neg = prob[st] if neg is None else neg + prob[st]
                else:
                    pos = pos + prob[st]
            o_ref[q, r0:r1, :] = pos - neg


def _extract_patches(X, kernel_size, stride):
    """(bs, C, H, W) -> (P, N) angle matrix.

    Rows: flattened patch variable in torch.flatten order (c, ki, kj).
    Columns: patch id, batch-major then row-major over output positions,
    matching the PyTorch forward exactly.  Uses k*k strided slices (exact, no conv).
    """
    bs, C, H, W = X.shape
    out_x = (H - kernel_size) // stride + 1
    out_y = (W - kernel_size) // stride + 1
    cols = []
    for ki in range(kernel_size):
        for kj in range(kernel_size):
            v = X[:, :, ki::stride, kj::stride][:, :, :out_x, :out_y]   # (bs,C,ox,oy)
            cols.append(v)
    pat = jnp.stack(cols, axis=2)                                       # (bs,C,k*k,ox,oy)
    P = C * kernel_size * kernel_size
    pat = pat.reshape(bs, P, out_x * out_y)
    flat = jnp.transpose(pat, (1, 0, 2)).reshape(P, bs * out_x * out_y)
    return flat, out_x, out_y


@functools.partial(jax.jit, static_argnames=("kernel_size", "stride"))
def quanv2d_forward(X, weights, kernel_size=KERNEL_SIZE, stride=STRIDE):
    # layout: X is NCHW (bs, C, H, W), matching the PyTorch module.
    X = X.astype(jnp.float32)
    weights = weights.astype(jnp.float32)
    bs = X.shape[0]

    flat, out_x, out_y = _extract_patches(X, kernel_size, stride)
    P, N = flat.shape
    n_patches = out_x * out_y

    # Block sizing: tsub sublane rows of 128 patches each (multiple of 8, <= MAX_TSUB).
    # Aim for >= 2 grid steps when there is enough work (v7x has 2 TensorCores).
    col_groups = -(-N // LANE)
    half_groups = -(-col_groups // 2)
    tsub = max(SUB, min(MAX_TSUB, SUB * (-(-half_groups // SUB))))
    blk_cols = tsub * LANE
    n_blocks = -(-N // blk_cols)
    N_pad = n_blocks * blk_cols

    x_t = jnp.pad(flat, ((0, 0), (0, N_pad - N)))
    x_t = x_t.reshape(P, N_pad // LANE, LANE)

    cw = jnp.cos(weights * 0.5)
    sw = jnp.sin(weights * 0.5)

    out = pl.pallas_call(
        quanv_kernel,
        out_shape=jax.ShapeDtypeStruct((n_qubits, N_pad // LANE, LANE), jnp.float32),
        grid_spec=pltpu.PrefetchScalarGridSpec(
            num_scalar_prefetch=0,
            grid=(n_blocks,),
            in_specs=[
                pl.BlockSpec((P, tsub, LANE), lambda n: (0, n, 0)),
                pl.BlockSpec(memory_space=pltpu.MemorySpace.SMEM),
                pl.BlockSpec(memory_space=pltpu.MemorySpace.SMEM),
            ],
            out_specs=pl.BlockSpec((n_qubits, tsub, LANE), lambda n: (0, n, 0)),
        ),
        compiler_params=pltpu.CompilerParams(dimension_semantics=("parallel",)),
    )(x_t, cw, sw)

    # reproduce torch.cat(patches, dim=1).view(bs, n_qubits, out_x, out_y)
    expvals = out.reshape(n_qubits, N_pad)[:, :N].T          # (N, n_qubits)
    flat_out = expvals.reshape(bs, n_patches * n_qubits)
    return flat_out.reshape(bs, n_qubits, out_x, out_y)


# ---------------- independent numpy statevector reference ----------------
def _np_circuit(inputs, weights):
    n = n_qubits
    dim = 2 ** n

    def emb(g, q):  # single-qubit gate g on wire q (wire 0 = LSB)
        return np.kron(np.kron(np.eye(2 ** (n - 1 - q)), g), np.eye(2 ** q))

    def rz(t):
        return np.array([[np.exp(-1j * t / 2), 0], [0, np.exp(1j * t / 2)]])

    def ry(t):
        c, s = np.cos(t / 2), np.sin(t / 2)
        return np.array([[c, -s], [s, c]], dtype=complex)

    Hm = np.array([[1, 1], [1, -1]], dtype=complex) / np.sqrt(2)
    state = np.zeros(dim, complex)
    state[0] = 1.0
    L = len(inputs)
    vpq = int(L / n) + 1
    for q in range(n):
        state = emb(Hm, q) @ state
        for i in range(vpq):
            idx = q * vpq + i
            if idx < L:
                g = rz(inputs[idx]) if i % 2 == 0 else ry(inputs[idx])
                state = emb(g, q) @ state
    for l in range(n_layers):
        for i in range(n):
            c, t = i, (i + 1) % n
            theta = weights[l, i]
            diag = np.ones(dim, complex)
            for s_idx in range(dim):
                if (s_idx >> c) & 1:
                    diag[s_idx] = np.exp(1j * theta / 2) if ((s_idx >> t) & 1) else np.exp(-1j * theta / 2)
            state = diag * state
        for j in range(n, 2 * n):
            state = emb(ry(weights[l, j]), j % n) @ state
    probs = np.abs(state) ** 2
    return np.array([np.sum(probs * np.array([1.0 if not ((s >> q) & 1) else -1.0
                                              for s in range(dim)]))
                     for q in range(n)])


def _np_forward(X, weights, kernel_size=KERNEL_SIZE, stride=STRIDE):
    X = np.asarray(X, np.float64)
    weights = np.asarray(weights, np.float64)
    bs, C, H, W = X.shape
    out_x = (H - kernel_size) // stride + 1
    out_y = (W - kernel_size) // stride + 1
    cols = []
    for i in range(0, H - kernel_size + 1, stride):
        for j in range(0, W - kernel_size + 1, stride):
            patch = X[:, :, i:i + kernel_size, j:j + kernel_size].reshape(bs, -1)
            cols.append(np.stack([_np_circuit(patch[b], weights) for b in range(bs)]))
    flat = np.concatenate(cols, axis=1)
    return flat.reshape(bs, n_qubits, out_x, out_y)


if __name__ == "__main__":
    key = jax.random.PRNGKey(0)
    kx, kw = jax.random.split(key)
    # MNIST-like single-channel input; kernel_size = n_qubits = 4, stride = 2.
    X = jax.random.normal(kx, (2, 1, 16, 16), dtype=jnp.float32)
    # TorchLayer default init: uniform(0, 2*pi) over weight_shapes (n_layers, 2*n_qubits)
    weights = jax.random.uniform(kw, (n_layers, 2 * n_qubits),
                                 minval=0.0, maxval=2.0 * np.pi, dtype=jnp.float32)

    out = quanv2d_forward(X, weights)
    out = jax.block_until_ready(out)

    assert out.shape == (2, n_qubits, 7, 7), out.shape
    ref = _np_forward(np.asarray(X), np.asarray(weights))
    np.testing.assert_allclose(np.asarray(out), ref, rtol=1e-3, atol=1e-4)

    print("KERNEL_OK")
</pallas_src>

<mosaic_0001>
module attributes {stable_mosaic.version = 11 : i64} {
  func.func @quanv_kernel(%arg0: i32, %arg1: memref<16x8x128xf32, #tpu.memory_space<vmem>>, %arg2: memref<1x8xf32, #tpu.memory_space<smem>>, %arg3: memref<1x8xf32, #tpu.memory_space<smem>>, %arg4: memref<4x8x128xf32, #tpu.memory_space<vmem>>) attributes {dimension_semantics = [#tpu.dimension_semantics<parallel>], iteration_bounds = array<i64: 1>, scalar_prefetch = 0 : i64, scratch_operands = 0 : i64, tpu.core_type = #tpu.core_type<tc>, window_params = [{transform_indices = @transform_0, window_bounds = array<i64: 16, 8, 128>}, {transform_indices = @transform_1, window_bounds = array<i64: 1, 8>}, {transform_indices = @transform_2, window_bounds = array<i64: 1, 8>}, {transform_indices = @transform_3, window_bounds = array<i64: 4, 8, 128>}]} {
    %c0 = arith.constant 0 : index
    %c0_0 = arith.constant 0 : index
    %0 = memref.load %arg2[%c0, %c0_0] : memref<1x8xf32, #tpu.memory_space<smem>>
    %c0_1 = arith.constant 0 : index
    %c1 = arith.constant 1 : index
    %1 = memref.load %arg2[%c0_1, %c1] : memref<1x8xf32, #tpu.memory_space<smem>>
    %c0_2 = arith.constant 0 : index
    %c2 = arith.constant 2 : index
    %2 = memref.load %arg2[%c0_2, %c2] : memref<1x8xf32, #tpu.memory_space<smem>>
    %c0_3 = arith.constant 0 : index
    %c3 = arith.constant 3 : index
    %3 = memref.load %arg2[%c0_3, %c3] : memref<1x8xf32, #tpu.memory_space<smem>>
    %c0_4 = arith.constant 0 : index
    %c4 = arith.constant 4 : index
    %4 = memref.load %arg2[%c0_4, %c4] : memref<1x8xf32, #tpu.memory_space<smem>>
    %c0_5 = arith.constant 0 : index
    %c5 = arith.constant 5 : index
    %5 = memref.load %arg2[%c0_5, %c5] : memref<1x8xf32, #tpu.memory_space<smem>>
    %c0_6 = arith.constant 0 : index
    %c6 = arith.constant 6 : index
    %6 = memref.load %arg2[%c0_6, %c6] : memref<1x8xf32, #tpu.memory_space<smem>>
    %c0_7 = arith.constant 0 : index
    %c7 = arith.constant 7 : index
    %7 = memref.load %arg2[%c0_7, %c7] : memref<1x8xf32, #tpu.memory_space<smem>>
    %c0_8 = arith.constant 0 : index
    %c0_9 = arith.constant 0 : index
    %8 = memref.load %arg3[%c0_8, %c0_9] : memref<1x8xf32, #tpu.memory_space<smem>>
    %c0_10 = arith.constant 0 : index
    %c1_11 = arith.constant 1 : index
    %9 = memref.load %arg3[%c0_10, %c1_11] : memref<1x8xf32, #tpu.memory_space<smem>>
    %c0_12 = arith.constant 0 : index
    %c2_13 = arith.constant 2 : index
    %10 = memref.load %arg3[%c0_12, %c2_13] : memref<1x8xf32, #tpu.memory_space<smem>>
    %c0_14 = arith.constant 0 : index
    %c3_15 = arith.constant 3 : index
    %11 = memref.load %arg3[%c0_14, %c3_15] : memref<1x8xf32, #tpu.memory_space<smem>>
    %c0_16 = arith.constant 0 : index
    %c4_17 = arith.constant 4 : index
    %12 = memref.load %arg3[%c0_16, %c4_17] : memref<1x8xf32, #tpu.memory_space<smem>>
    %c0_18 = arith.constant 0 : index
    %c5_19 = arith.constant 5 : index
    %13 = memref.load %arg3[%c0_18, %c5_19] : memref<1x8xf32, #tpu.memory_space<smem>>
    %c0_20 = arith.constant 0 : index
    %c6_21 = arith.constant 6 : index
    %14 = memref.load %arg3[%c0_20, %c6_21] : memref<1x8xf32, #tpu.memory_space<smem>>
    %c0_22 = arith.constant 0 : index
    %c7_23 = arith.constant 7 : index
    %15 = memref.load %arg3[%c0_22, %c7_23] : memref<1x8xf32, #tpu.memory_space<smem>>
    %c0_24 = arith.constant 0 : index
    %c0_25 = arith.constant 0 : index
    %c0_26 = arith.constant 0 : index
    %16 = vector.load %arg1[%c0_24, %c0_25, %c0_26] : memref<16x8x128xf32, #tpu.memory_space<vmem>>, vector<16x8x128xf32>
    %cst = arith.constant 5.000000e-01 : f32
    %17 = vector.broadcast %cst : f32 to vector<16x8x128xf32>
    %18 = arith.mulf %16, %17 : vector<16x8x128xf32>
    %19 = math.cos %18 : vector<16x8x128xf32>
    %cst_27 = arith.constant 5.000000e-01 : f32
    %20 = vector.broadcast %cst_27 : f32 to vector<16x8x128xf32>
    %21 = arith.mulf %16, %20 : vector<16x8x128xf32>
    %22 = math.sin %21 : vector<16x8x128xf32>
    %23 = vector.extract_strided_slice %19 {offsets = [0, 0, 0], sizes = [1, 8, 128], strides = [1, 1, 1]} : vector<16x8x128xf32> to vector<1x8x128xf32>
    %24 = vector.shape_cast %23 : vector<1x8x128xf32> to vector<8x128xf32>
    %25 = vector.extract_strided_slice %22 {offsets = [0, 0, 0], sizes = [1, 8, 128], strides = [1, 1, 1]} : vector<16x8x128xf32> to vector<1x8x128xf32>
    %26 = vector.shape_cast %25 : vector<1x8x128xf32> to vector<8x128xf32>
    %cst_28 = arith.constant 0.707106769 : f32
    %27 = vector.broadcast %cst_28 : f32 to vector<8x128xf32>
    %28 = arith.mulf %27, %24 : vector<8x128xf32>
    %cst_29 = arith.constant 0.707106769 : f32
    %29 = vector.broadcast %cst_29 : f32 to vector<8x128xf32>
    %30 = arith.mulf %29, %26 : vector<8x128xf32>
    %cst_30 = arith.constant 0.000000e+00 : f32
    %31 = vector.broadcast %cst_30 : f32 to vector<8x128xf32>
    %32 = arith.subf %31, %30 : vector<8x128xf32>
    %33 = vector.extract_strided_slice %19 {offsets = [1, 0, 0], sizes = [1, 8, 128], strides = [1, 1, 1]} : vector<16x8x128xf32> to vector<1x8x128xf32>
    %34 = vector.shape_cast %33 : vector<1x8x128xf32> to vector<8x128xf32>
    %35 = vector.extract_strided_slice %22 {offsets = [1, 0, 0], sizes = [1, 8, 128], strides = [1, 1, 1]} : vector<16x8x128xf32> to vector<1x8x128xf32>
    %36 = vector.shape_cast %35 : vector<1x8x128xf32> to vector<8x128xf32>
    %37 = arith.mulf %34, %28 : vector<8x128xf32>
    %38 = arith.mulf %36, %28 : vector<8x128xf32>
    %39 = arith.subf %37, %38 : vector<8x128xf32>
    %40 = arith.mulf %36, %28 : vector<8x128xf32>
    %41 = arith.mulf %34, %28 : vector<8x128xf32>
    %42 = arith.addf %40, %41 : vector<8x128xf32>
    %43 = arith.mulf %34, %32 : vector<8x128xf32>
    %44 = arith.mulf %36, %30 : vector<8x128xf32>
    %45 = arith.subf %43, %44 : vector<8x128xf32>
    %46 = arith.mulf %36, %32 : vector<8x128xf32>
    %47 = arith.mulf %34, %30 : vector<8x128xf32>
    %48 = arith.addf %46, %47 : vector<8x128xf32>
    %49 = vector.extract_strided_slice %19 {offsets = [2, 0, 0], sizes = [1, 8, 128], strides = [1, 1, 1]} : vector<16x8x128xf32> to vector<1x8x128xf32>
    %50 = vector.shape_cast %49 : vector<1x8x128xf32> to vector<8x128xf32>
    %51 = vector.extract_strided_slice %22 {offsets = [2, 0, 0], sizes = [1, 8, 128], strides = [1, 1, 1]} : vector<16x8x128xf32> to vector<1x8x128xf32>
    %52 = vector.shape_cast %51 : vector<1x8x128xf32> to vector<8x128xf32>
    %53 = arith.mulf %39, %50 : vector<8x128xf32>
    %54 = arith.mulf %45, %52 : vector<8x128xf32>
    %55 = arith.addf %53, %54 : vector<8x128xf32>
    %56 = arith.mulf %42, %50 : vector<8x128xf32>
    %57 = arith.mulf %48, %52 : vector<8x128xf32>
    %58 = arith.subf %56, %57 : vector<8x128xf32>
    %59 = arith.mulf %45, %50 : vector<8x128xf32>
    %60 = arith.mulf %39, %52 : vector<8x128xf32>
    %61 = arith.subf %59, %60 : vector<8x128xf32>
    %62 = arith.mulf %48, %50 : vector<8x128xf32>
    %63 = arith.mulf %42, %52 : vector<8x128xf32>
    %64 = arith.addf %62, %63 : vector<8x128xf32>
    %65 = vector.extract_strided_slice %19 {offsets = [3, 0, 0], sizes = [1, 8, 128], strides = [1, 1, 1]} : vector<16x8x128xf32> to vector<1x8x128xf32>
    %66 = vector.shape_cast %65 : vector<1x8x128xf32> to vector<8x128xf32>
    %67 = vector.extract_strided_slice %22 {offsets = [3, 0, 0], sizes = [1, 8, 128], strides = [1, 1, 1]} : vector<16x8x128xf32> to vector<1x8x128xf32>
    %68 = vector.shape_cast %67 : vector<1x8x128xf32> to vector<8x128xf32>
    %69 = arith.mulf %66, %55 : vector<8x128xf32>
    %70 = arith.mulf %68, %58 : vector<8x128xf32>
    %71 = arith.subf %69, %70 : vector<8x128xf32>
    %72 = arith.mulf %68, %55 : vector<8x128xf32>
    %73 = arith.mulf %66, %58 : vector<8x128xf32>
    %74 = arith.addf %72, %73 : vector<8x128xf32>
    %75 = arith.mulf %66, %61 : vector<8x128xf32>
    %76 = arith.mulf %68, %64 : vector<8x128xf32>
    %77 = arith.subf %75, %76 : vector<8x128xf32>
    %78 = arith.mulf %68, %61 : vector<8x128xf32>
    %79 = arith.mulf %66, %64 : vector<8x128xf32>
    %80 = arith.addf %78, %79 : vector<8x128xf32>
    %81 = vector.extract_strided_slice %19 {offsets = [4, 0, 0], sizes = [1, 8, 128], strides = [1, 1, 1]} : vector<16x8x128xf32> to vector<1x8x128xf32>
    %82 = vector.shape_cast %81 : vector<1x8x128xf32> to vector<8x128xf32>
    %83 = vector.extract_strided_slice %22 {offsets = [4, 0, 0], sizes = [1, 8, 128], strides = [1, 1, 1]} : vector<16x8x128xf32> to vector<1x8x128xf32>
    %84 = vector.shape_cast %83 : vector<1x8x128xf32> to vector<8x128xf32>
    %85 = arith.mulf %71, %82 : vector<8x128xf32>
    %86 = arith.mulf %77, %84 : vector<8x128xf32>
    %87 = arith.addf %85, %86 : vector<8x128xf32>
    %88 = arith.mulf %74, %82 : vector<8x128xf32>
    %89 = arith.mulf %80, %84 : vector<8x128xf32>
    %90 = arith.subf %88, %89 : vector<8x128xf32>
    %91 = arith.mulf %77, %82 : vector<8x128xf32>
    %92 = arith.mulf %71, %84 : vector<8x128xf32>
    %93 = arith.subf %91, %92 : vector<8x128xf32>
    %94 = arith.mulf %80, %82 : vector<8x128xf32>
    %95 = arith.mulf %74, %84 : vector<8x128xf32>
    %96 = arith.addf %94, %95 : vector<8x128xf32>
    %97 = vector.extract_strided_slice %19 {offsets = [5, 0, 0], sizes = [1, 8, 128], strides = [1, 1, 1]} : vector<16x8x128xf32> to vector<1x8x128xf32>
    %98 = vector.shape_cast %97 : vector<1x8x128xf32> to vector<8x128xf32>
    %99 = vector.extract_strided_slice %22 {offsets = [5, 0, 0], sizes = [1, 8, 128], strides = [1, 1, 1]} : vector<16x8x128xf32> to vector<1x8x128xf32>
    %100 = vector.shape_cast %99 : vector<1x8x128xf32> to vector<8x128xf32>
    %cst_31 = arith.constant 0.707106769 : f32
    %101 = vector.broadcast %cst_31 : f32 to vector<8x128xf32>
    %102 = arith.mulf %101, %98 : vector<8x128xf32>
    %cst_32 = arith.constant 0.707106769 : f32
    %103 = vector.broadcast %cst_32 : f32 to vector<8x128xf32>
    %104 = arith.mulf %103, %100 : vector<8x128xf32>
    %cst_33 = arith.constant 0.000000e+00 : f32
    %105 = vector.broadcast %cst_33 : f32 to vector<8x128xf32>
    %106 = arith.subf %105, %104 : vector<8x128xf32>
    %107 = vector.extract_strided_slice %19 {offsets = [6, 0, 0], sizes = [1, 8, 128], strides = [1, 1, 1]} : vector<16x8x128xf32> to vector<1x8x128xf32>
    %108 = vector.shape_cast %107 : vector<1x8x128xf32> to vector<8x128xf32>
    %109 = vector.extract_strided_slice %22 {offsets = [6, 0, 0], sizes = [1, 8, 128], strides = [1, 1, 1]} : vector<16x8x128xf32> to vector<1x8x128xf32>
    %110 = vector.shape_cast %109 : vector<1x8x128xf32> to vector<8x128xf32>
    %111 = arith.mulf %108, %102 : vector<8x128xf32>
    %112 = arith.mulf %110, %102 : vector<8x128xf32>
    %113 = arith.subf %111, %112 : vector<8x128xf32>
    %114 = arith.mulf %110, %102 : vector<8x128xf32>
    %115 = arith.mulf %108, %102 : vector<8x128xf32>
    %116 = arith.addf %114, %115 : vector<8x128xf32>
    %117 = arith.mulf %108, %106 : vector<8x128xf32>
    %118 = arith.mulf %110, %104 : vector<8x128xf32>
    %119 = arith.subf %117, %118 : vector<8x128xf32>
    %120 = arith.mulf %110, %106 : vector<8x128xf32>
    %121 = arith.mulf %108, %104 : vector<8x128xf32>
    %122 = arith.addf %120, %121 : vector<8x128xf32>
    %123 = vector.extract_strided_slice %19 {offsets = [7, 0, 0], sizes = [1, 8, 128], strides = [1, 1, 1]} : vector<16x8x128xf32> to vector<1x8x128xf32>
    %124 = vector.shape_cast %123 : vector<1x8x128xf32> to vector<8x128xf32>
    %125 = vector.extract_strided_slice %22 {offsets = [7, 0, 0], sizes = [1, 8, 128], strides = [1, 1, 1]} : vector<16x8x128xf32> to vector<1x8x128xf32>
    %126 = vector.shape_cast %125 : vector<1x8x128xf32> to vector<8x128xf32>
    %127 = arith.mulf %113, %124 : vector<8x128xf32>
    %128 = arith.mulf %119, %126 : vector<8x128xf32>
    %129 = arith.addf %127, %128 : vector<8x128xf32>
    %130 = arith.mulf %116, %124 : vector<8x128xf32>
    %131 = arith.mulf %122, %126 : vector<8x128xf32>
    %132 = arith.subf %130, %131 : vector<8x128xf32>
    %133 = arith.mulf %119, %124 : vector<8x128xf32>
    %134 = arith.mulf %113, %126 : vector<8x128xf32>
    %135 = arith.subf %133, %134 : vector<8x128xf32>
    %136 = arith.mulf %122, %124 : vector<8x128xf32>
    %137 = arith.mulf %116, %126 : vector<8x128xf32>
    %138 = arith.addf %136, %137 : vector<8x128xf32>
    %139 = vector.extract_strided_slice %19 {offsets = [8, 0, 0], sizes = [1, 8, 128], strides = [1, 1, 1]} : vector<16x8x128xf32> to vector<1x8x128xf32>
    %140 = vector.shape_cast %139 : vector<1x8x128xf32> to vector<8x128xf32>
    %141 = vector.extract_strided_slice %22 {offsets = [8, 0, 0], sizes = [1, 8, 128], strides = [1, 1, 1]} : vector<16x8x128xf32> to vector<1x8x128xf32>
    %142 = vector.shape_cast %141 : vector<1x8x128xf32> to vector<8x128xf32>
    %143 = arith.mulf %140, %129 : vector<8x128xf32>
    %144 = arith.mulf %142, %132 : vector<8x128xf32>
    %145 = arith.subf %143, %144 : vector<8x128xf32>
    %146 = arith.mulf %142, %129 : vector<8x128xf32>
    %147 = arith.mulf %140, %132 : vector<8x128xf32>
    %148 = arith.addf %146, %147 : vector<8x128xf32>
    %149 = arith.mulf %140, %135 : vector<8x128xf32>
    %150 = arith.mulf %142, %138 : vector<8x128xf32>
    %151 = arith.subf %149, %150 : vector<8x128xf32>
    %152 = arith.mulf %142, %135 : vector<8x128xf32>
    %153 = arith.mulf %140, %138 : vector<8x128xf32>
    %154 = arith.addf %152, %153 : vector<8x128xf32>
    %155 = vector.extract_strided_slice %19 {offsets = [9, 0, 0], sizes = [1, 8, 128], strides = [1, 1, 1]} : vector<16x8x128xf32> to vector<1x8x128xf32>
    %156 = vector.shape_cast %155 : vector<1x8x128xf32> to vector<8x128xf32>
    %157 = vector.extract_strided_slice %22 {offsets = [9, 0, 0], sizes = [1, 8, 128], strides = [1, 1, 1]} : vector<16x8x128xf32> to vector<1x8x128xf32>
    %158 = vector.shape_cast %157 : vector<1x8x128xf32> to vector<8x128xf32>
    %159 = arith.mulf %145, %156 : vector<8x128xf32>
    %160 = arith.mulf %151, %158 : vector<8x128xf32>
    %161 = arith.addf %159, %160 : vector<8x128xf32>
    %162 = arith.mulf %148, %156 : vector<8x128xf32>
    %163 = arith.mulf %154, %158 : vector<8x128xf32>
    %164 = arith.subf %162, %163 : vector<8x128xf32>
    %165 = arith.mulf %151, %156 : vector<8x128xf32>
    %166 = arith.mulf %145, %158 : vector<8x128xf32>
    %167 = arith.subf %165, %166 : vector<8x128xf32>
    %168 = arith.mulf %154, %156 : vector<8x128xf32>
    %169 = arith.mulf %148, %158 : vector<8x128xf32>
    %170 = arith.addf %168, %169 : vector<8x128xf32>
    %171 = vector.extract_strided_slice %19 {offsets = [10, 0, 0], sizes = [1, 8, 128], strides = [1, 1, 1]} : vector<16x8x128xf32> to vector<1x8x128xf32>
    %172 = vector.shape_cast %171 : vector<1x8x128xf32> to vector<8x128xf32>
    %173 = vector.extract_strided_slice %22 {offsets = [10, 0, 0], sizes = [1, 8, 128], strides = [1, 1, 1]} : vector<16x8x128xf32> to vector<1x8x128xf32>
    %174 = vector.shape_cast %173 : vector<1x8x128xf32> to vector<8x128xf32>
    %cst_34 = arith.constant 0.707106769 : f32
    %175 = vector.broadcast %cst_34 : f32 to vector<8x128xf32>
    %176 = arith.mulf %175, %172 : vector<8x128xf32>
    %cst_35 = arith.constant 0.707106769 : f32
    %177 = vector.broadcast %cst_35 : f32 to vector<8x128xf32>
    %178 = arith.mulf %177, %174 : vector<8x128xf32>
    %cst_36 = arith.constant 0.000000e+00 : f32
    %179 = vector.broadcast %cst_36 : f32 to vector<8x128xf32>
    %180 = arith.subf %179, %178 : vector<8x128xf32>
    %181 = vector.extract_strided_slice %19 {offsets = [11, 0, 0], sizes = [1, 8, 128], strides = [1, 1, 1]} : vector<16x8x128xf32> to vector<1x8x128xf32>
    %182 = vector.shape_cast %181 : vector<1x8x128xf32> to vector<8x128xf32>
    %183 = vector.extract_strided_slice %22 {offsets = [11, 0, 0], sizes = [1, 8, 128], strides = [1, 1, 1]} : vector<16x8x128xf32> to vector<1x8x128xf32>
    %184 = vector.shape_cast %183 : vector<1x8x128xf32> to vector<8x128xf32>
    %185 = arith.mulf %182, %176 : vector<8x128xf32>
    %186 = arith.mulf %184, %176 : vector<8x128xf32>
    %187 = arith.subf %185, %186 : vector<8x128xf32>
    %188 = arith.mulf %184, %176 : vector<8x128xf32>
    %189 = arith.mulf %182, %176 : vector<8x128xf32>
    %190 = arith.addf %188, %189 : vector<8x128xf32>
    %191 = arith.mulf %182, %180 : vector<8x128xf32>
    %192 = arith.mulf %184, %178 : vector<8x128xf32>
    %193 = arith.subf %191, %192 : vector<8x128xf32>
    %194 = arith.mulf %184, %180 : vector<8x128xf32>
    %195 = arith.mulf %182, %178 : vector<8x128xf32>
    %196 = arith.addf %194, %195 : vector<8x128xf32>
    %197 = vector.extract_strided_slice %19 {offsets = [12, 0, 0], sizes = [1, 8, 128], strides = [1, 1, 1]} : vector<16x8x128xf32> to vector<1x8x128xf32>
    %198 = vector.shape_cast %197 : vector<1x8x128xf32> to vector<8x128xf32>
    %199 = vector.extract_strided_slice %22 {offsets = [12, 0, 0], sizes = [1, 8, 128], strides = [1, 1, 1]} : vector<16x8x128xf32> to vector<1x8x128xf32>
    %200 = vector.shape_cast %199 : vector<1x8x128xf32> to vector<8x128xf32>
    %201 = arith.mulf %187, %198 : vector<8x128xf32>
    %202 = arith.mulf %193, %200 : vector<8x128xf32>
    %203 = arith.addf %201, %202 : vector<8x128xf32>
    %204 = arith.mulf %190, %198 : vector<8x128xf32>
    %205 = arith.mulf %196, %200 : vector<8x128xf32>
    %206 = arith.subf %204, %205 : vector<8x128xf32>
    %207 = arith.mulf %193, %198 : vector<8x128xf32>
    %208 = arith.mulf %187, %200 : vector<8x128xf32>
    %209 = arith.subf %207, %208 : vector<8x128xf32>
    %210 = arith.mulf %196, %198 : vector<8x128xf32>
    %211 = arith.mulf %190, %200 : vector<8x128xf32>
    %212 = arith.addf %210, %211 : vector<8x128xf32>
    %213 = vector.extract_strided_slice %19 {offsets = [13, 0, 0], sizes = [1, 8, 128], strides = [1, 1, 1]} : vector<16x8x128xf32> to vector<1x8x128xf32>
    %214 = vector.shape_cast %213 : vector<1x8x128xf32> to vector<8x128xf32>
    %215 = vector.extract_strided_slice %22 {offsets = [13, 0, 0], sizes = [1, 8, 128], strides = [1, 1, 1]} : vector<16x8x128xf32> to vector<1x8x128xf32>
    %216 = vector.shape_cast %215 : vector<1x8x128xf32> to vector<8x128xf32>
    %217 = arith.mulf %214, %203 : vector<8x128xf32>
    %218 = arith.mulf %216, %206 : vector<8x128xf32>
    %219 = arith.subf %217, %218 : vector<8x128xf32>
    %220 = arith.mulf %216, %203 : vector<8x128xf32>
    %221 = arith.mulf %214, %206 : vector<8x128xf32>
    %222 = arith.addf %220, %221 : vector<8x128xf32>
    %223 = arith.mulf %214, %209 : vector<8x128xf32>
    %224 = arith.mulf %216, %212 : vector<8x128xf32>
    %225 = arith.subf %223, %224 : vector<8x128xf32>
    %226 = arith.mulf %216, %209 : vector<8x128xf32>
    %227 = arith.mulf %214, %212 : vector<8x128xf32>
    %228 = arith.addf %226, %227 : vector<8x128xf32>
    %229 = vector.extract_strided_slice %19 {offsets = [14, 0, 0], sizes = [1, 8, 128], strides = [1, 1, 1]} : vector<16x8x128xf32> to vector<1x8x128xf32>
    %230 = vector.shape_cast %229 : vector<1x8x128xf32> to vector<8x128xf32>
    %231 = vector.extract_strided_slice %22 {offsets = [14, 0, 0], sizes = [1, 8, 128], strides = [1, 1, 1]} : vector<16x8x128xf32> to vector<1x8x128xf32>
    %232 = vector.shape_cast %231 : vector<1x8x128xf32> to vector<8x128xf32>
    %233 = arith.mulf %219, %230 : vector<8x128xf32>
    %234 = arith.mulf %225, %232 : vector<8x128xf32>
    %235 = arith.addf %233, %234 : vector<8x128xf32>
    %236 = arith.mulf %222, %230 : vector<8x128xf32>
    %237 = arith.mulf %228, %232 : vector<8x128xf32>
    %238 = arith.subf %236, %237 : vector<8x128xf32>
    %239 = arith.mulf %225, %230 : vector<8x128xf32>
    %240 = arith.mulf %219, %232 : vector<8x128xf32>
    %241 = arith.subf %239, %240 : vector<8x128xf32>
    %242 = arith.mulf %228, %230 : vector<8x128xf32>
    %243 = arith.mulf %222, %232 : vector<8x128xf32>
    %244 = arith.addf %242, %243 : vector<8x128xf32>
    %245 = vector.extract_strided_slice %19 {offsets = [15, 0, 0], sizes = [1, 8, 128], strides = [1, 1, 1]} : vector<16x8x128xf32> to vector<1x8x128xf32>
    %246 = vector.shape_cast %245 : vector<1x8x128xf32> to vector<8x128xf32>
    %247 = vector.extract_strided_slice %22 {offsets = [15, 0, 0], sizes = [1, 8, 128], strides = [1, 1, 1]} : vector<16x8x128xf32> to vector<1x8x128xf32>
    %248 = vector.shape_cast %247 : vector<1x8x128xf32> to vector<8x128xf32>
    %cst_37 = arith.constant 0.707106769 : f32
    %249 = vector.broadcast %cst_37 : f32 to vector<8x128xf32>
    %250 = arith.mulf %249, %246 : vector<8x128xf32>
    %cst_38 = arith.constant 0.707106769 : f32
    %251 = vector.broadcast %cst_38 : f32 to vector<8x128xf32>
    %252 = arith.mulf %251, %248 : vector<8x128xf32>
    %cst_39 = arith.constant 0.000000e+00 : f32
    %253 = vector.broadcast %cst_39 : f32 to vector<8x128xf32>
    %254 = arith.subf %253, %252 : vector<8x128xf32>
    %255 = arith.mulf %87, %161 : vector<8x128xf32>
    %256 = arith.mulf %93, %167 : vector<8x128xf32>
    %257 = arith.subf %255, %256 : vector<8x128xf32>
    %258 = arith.mulf %87, %167 : vector<8x128xf32>
    %259 = arith.mulf %93, %161 : vector<8x128xf32>
    %260 = arith.addf %258, %259 : vector<8x128xf32>
    %261 = arith.mulf %90, %161 : vector<8x128xf32>
    %262 = arith.mulf %96, %167 : vector<8x128xf32>
    %263 = arith.subf %261, %262 : vector<8x128xf32>
    %264 = arith.mulf %90, %167 : vector<8x128xf32>
    %265 = arith.mulf %96, %161 : vector<8x128xf32>
    %266 = arith.addf %264, %265 : vector<8x128xf32>
    %267 = arith.mulf %87, %164 : vector<8x128xf32>
    %268 = arith.mulf %93, %170 : vector<8x128xf32>
    %269 = arith.subf %267, %268 : vector<8x128xf32>
    %270 = arith.mulf %87, %170 : vector<8x128xf32>
    %271 = arith.mulf %93, %164 : vector<8x128xf32>
    %272 = arith.addf %270, %271 : vector<8x128xf32>
    %273 = arith.mulf %90, %164 : vector<8x128xf32>
    %274 = arith.mulf %96, %170 : vector<8x128xf32>
    %275 = arith.subf %273, %274 : vector<8x128xf32>
    %276 = arith.mulf %90, %170 : vector<8x128xf32>
    %277 = arith.mulf %96, %164 : vector<8x128xf32>
    %278 = arith.addf %276, %277 : vector<8x128xf32>
    %279 = arith.mulf %257, %235 : vector<8x128xf32>
    %280 = arith.mulf %260, %241 : vector<8x128xf32>
    %281 = arith.subf %279, %280 : vector<8x128xf32>
    %282 = arith.mulf %257, %241 : vector<8x128xf32>
    %283 = arith.mulf %260, %235 : vector<8x128xf32>
    %284 = arith.addf %282, %283 : vector<8x128xf32>
    %285 = arith.mulf %263, %235 : vector<8x128xf32>
    %286 = arith.mulf %266, %241 : vector<8x128xf32>
    %287 = arith.subf %285, %286 : vector<8x128xf32>
    %288 = arith.mulf %263, %241 : vector<8x128xf32>
    %289 = arith.mulf %266, %235 : vector<8x128xf32>
    %290 = arith.addf %288, %289 : vector<8x128xf32>
    %291 = arith.mulf %269, %235 : vector<8x128xf32>
    %292 = arith.mulf %272, %241 : vector<8x128xf32>
    %293 = arith.subf %291, %292 : vector<8x128xf32>
    %294 = arith.mulf %269, %241 : vector<8x128xf32>
    %295 = arith.mulf %272, %235 : vector<8x128xf32>
    %296 = arith.addf %294, %295 : vector<8x128xf32>
    %297 = arith.mulf %275, %235 : vector<8x128xf32>
    %298 = arith.mulf %278, %241 : vector<8x128xf32>
    %299 = arith.subf %297, %298 : vector<8x128xf32>
    %300 = arith.mulf %275, %241 : vector<8x128xf32>
    %301 = arith.mulf %278, %235 : vector<8x128xf32>
    %302 = arith.addf %300, %301 : vector<8x128xf32>
    %303 = arith.mulf %257, %238 : vector<8x128xf32>
    %304 = arith.mulf %260, %244 : vector<8x128xf32>
    %305 = arith.subf %303, %304 : vector<8x128xf32>
    %306 = arith.mulf %257, %244 : vector<8x128xf32>
    %307 = arith.mulf %260, %238 : vector<8x128xf32>
    %308 = arith.addf %306, %307 : vector<8x128xf32>
    %309 = arith.mulf %263, %238 : vector<8x128xf32>
    %310 = arith.mulf %266, %244 : vector<8x128xf32>
    %311 = arith.subf %309, %310 : vector<8x128xf32>
    %312 = arith.mulf %263, %244 : vector<8x128xf32>
    %313 = arith.mulf %266, %238 : vector<8x128xf32>
    %314 = arith.addf %312, %313 : vector<8x128xf32>
    %315 = arith.mulf %269, %238 : vector<8x128xf32>
    %316 = arith.mulf %272, %244 : vector<8x128xf32>
    %317 = arith.subf %315, %316 : vector<8x128xf32>
    %318 = arith.mulf %269, %244 : vector<8x128xf32>
    %319 = arith.mulf %272, %238 : vector<8x128xf32>
    %320 = arith.addf %318, %319 : vector<8x128xf32>
    %321 = arith.mulf %275, %238 : vector<8x128xf32>
    %322 = arith.mulf %278, %244 : vector<8x128xf32>
    %323 = arith.subf %321, %322 : vector<8x128xf32>
    %324 = arith.mulf %275, %244 : vector<8x128xf32>
    %325 = arith.mulf %278, %238 : vector<8x128xf32>
    %326 = arith.addf %324, %325 : vector<8x128xf32>
    %327 = arith.mulf %281, %250 : vector<8x128xf32>
    %328 = arith.mulf %284, %254 : vector<8x128xf32>
    %329 = arith.subf %327, %328 : vector<8x128xf32>
    %330 = arith.mulf %281, %254 : vector<8x128xf32>
    %331 = arith.mulf %284, %250 : vector<8x128xf32>
    %332 = arith.addf %330, %331 : vector<8x128xf32>
    %333 = arith.mulf %287, %250 : vector<8x128xf32>
    %334 = arith.mulf %290, %254 : vector<8x128xf32>
    %335 = arith.subf %333, %334 : vector<8x128xf32>
    %336 = arith.mulf %287, %254 : vector<8x128xf32>
    %337 = arith.mulf %290, %250 : vector<8x128xf32>
    %338 = arith.addf %336, %337 : vector<8x128xf32>
    %339 = arith.mulf %293, %250 : vector<8x128xf32>
    %340 = arith.mulf %296, %254 : vector<8x128xf32>
    %341 = arith.subf %339, %340 : vector<8x128xf32>
    %342 = arith.mulf %293, %254 : vector<8x128xf32>
    %343 = arith.mulf %296, %250 : vector<8x128xf32>
    %344 = arith.addf %342, %343 : vector<8x128xf32>
    %345 = arith.mulf %299, %250 : vector<8x128xf32>
    %346 = arith.mulf %302, %254 : vector<8x128xf32>
    %347 = arith.subf %345, %346 : vector<8x128xf32>
    %348 = arith.mulf %299, %254 : vector<8x128xf32>
    %349 = arith.mulf %302, %250 : vector<8x128xf32>
    %350 = arith.addf %348, %349 : vector<8x128xf32>
    %351 = arith.mulf %305, %250 : vector<8x128xf32>
    %352 = arith.mulf %308, %254 : vector<8x128xf32>
    %353 = arith.subf %351, %352 : vector<8x128xf32>
    %354 = arith.mulf %305, %254 : vector<8x128xf32>
    %355 = arith.mulf %308, %250 : vector<8x128xf32>
    %356 = arith.addf %354, %355 : vector<8x128xf32>
    %357 = arith.mulf %311, %250 : vector<8x128xf32>
    %358 = arith.mulf %314, %254 : vector<8x128xf32>
    %359 = arith.subf %357, %358 : vector<8x128xf32>
    %360 = arith.mulf %311, %254 : vector<8x128xf32>
    %361 = arith.mulf %314, %250 : vector<8x128xf32>
    %362 = arith.addf %360, %361 : vector<8x128xf32>
    %363 = arith.mulf %317, %250 : vector<8x128xf32>
    %364 = arith.mulf %320, %254 : vector<8x128xf32>
    %365 = arith.subf %363, %364 : vector<8x128xf32>
    %366 = arith.mulf %317, %254 : vector<8x128xf32>
    %367 = arith.mulf %320, %250 : vector<8x128xf32>
    %368 = arith.addf %366, %367 : vector<8x128xf32>
    %369 = arith.mulf %323, %250 : vector<8x128xf32>
    %370 = arith.mulf %326, %254 : vector<8x128xf32>
    %371 = arith.subf %369, %370 : vector<8x128xf32>
    %372 = arith.mulf %323, %254 : vector<8x128xf32>
    %373 = arith.mulf %326, %250 : vector<8x128xf32>
    %374 = arith.addf %372, %373 : vector<8x128xf32>
    %375 = arith.mulf %281, %250 : vector<8x128xf32>
    %376 = arith.mulf %284, %252 : vector<8x128xf32>
    %377 = arith.subf %375, %376 : vector<8x128xf32>
    %378 = arith.mulf %281, %252 : vector<8x128xf32>
    %379 = arith.mulf %284, %250 : vector<8x128xf32>
    %380 = arith.addf %378, %379 : vector<8x128xf32>
    %381 = arith.mulf %287, %250 : vector<8x128xf32>
    %382 = arith.mulf %290, %252 : vector<8x128xf32>
    %383 = arith.subf %381, %382 : vector<8x128xf32>
    %384 = arith.mulf %287, %252 : vector<8x128xf32>
    %385 = arith.mulf %290, %250 : vector<8x128xf32>
    %386 = arith.addf %384, %385 : vector<8x128xf32>
    %387 = arith.mulf %293, %250 : vector<8x128xf32>
    %388 = arith.mulf %296, %252 : vector<8x128xf32>
    %389 = arith.subf %387, %388 : vector<8x128xf32>
    %390 = arith.mulf %293, %252 : vector<8x128xf32>
    %391 = arith.mulf %296, %250 : vector<8x128xf32>
    %392 = arith.addf %390, %391 : vector<8x128xf32>
    %393 = arith.mulf %299, %250 : vector<8x128xf32>
    %394 = arith.mulf %302, %252 : vector<8x128xf32>
    %395 = arith.subf %393, %394 : vector<8x128xf32>
    %396 = arith.mulf %299, %252 : vector<8x128xf32>
    %397 = arith.mulf %302, %250 : vector<8x128xf32>
    %398 = arith.addf %396, %397 : vector<8x128xf32>
    %399 = arith.mulf %305, %250 : vector<8x128xf32>
    %400 = arith.mulf %308, %252 : vector<8x128xf32>
    %401 = arith.subf %399, %400 : vector<8x128xf32>
    %402 = arith.mulf %305, %252 : vector<8x128xf32>
    %403 = arith.mulf %308, %250 : vector<8x128xf32>
    %404 = arith.addf %402, %403 : vector<8x128xf32>
    %405 = arith.mulf %311, %250 : vector<8x128xf32>
    %406 = arith.mulf %314, %252 : vector<8x128xf32>
    %407 = arith.subf %405, %406 : vector<8x128xf32>
    %408 = arith.mulf %311, %252 : vector<8x128xf32>
    %409 = arith.mulf %314, %250 : vector<8x128xf32>
    %410 = arith.addf %408, %409 : vector<8x128xf32>
    %411 = arith.mulf %317, %250 : vector<8x128xf32>
    %412 = arith.mulf %320, %252 : vector<8x128xf32>
    %413 = arith.subf %411, %412 : vector<8x128xf32>
    %414 = arith.mulf %317, %252 : vector<8x128xf32>
    %415 = arith.mulf %320, %250 : vector<8x128xf32>
    %416 = arith.addf %414, %415 : vector<8x128xf32>
    %417 = arith.mulf %323, %250 : vector<8x128xf32>
    %418 = arith.mulf %326, %252 : vector<8x128xf32>
    %419 = arith.subf %417, %418 : vector<8x128xf32>
    %420 = arith.mulf %323, %252 : vector<8x128xf32>
    %421 = arith.mulf %326, %250 : vector<8x128xf32>
    %422 = arith.addf %420, %421 : vector<8x128xf32>
    %423 = vector.broadcast %0 : f32 to vector<8x128xf32>
    %424 = arith.mulf %335, %423 : vector<8x128xf32>
    %425 = vector.broadcast %8 : f32 to vector<8x128xf32>
    %426 = arith.mulf %338, %425 : vector<8x128xf32>
    %427 = arith.addf %424, %426 : vector<8x128xf32>
    %428 = vector.broadcast %0 : f32 to vector<8x128xf32>
    %429 = arith.mulf %338, %428 : vector<8x128xf32>
    %430 = vector.broadcast %8 : f32 to vector<8x128xf32>
    %431 = arith.mulf %335, %430 : vector<8x128xf32>
    %432 = arith.subf %429, %431 : vector<8x128xf32>
    %433 = vector.broadcast %0 : f32 to vector<8x128xf32>
    %434 = arith.mulf %347, %433 : vector<8x128xf32>
    %435 = vector.broadcast %8 : f32 to vector<8x128xf32>
    %436 = arith.mulf %350, %435 : vector<8x128xf32>
    %437 = arith.subf %434, %436 : vector<8x128xf32>
    %438 = vector.broadcast %8 : f32 to vector<8x128xf32>
    %439 = arith.mulf %347, %438 : vector<8x128xf32>
    %440 = vector.broadcast %0 : f32 to vector<8x128xf32>
    %441 = arith.mulf %350, %440 : vector<8x128xf32>
    %442 = arith.addf %439, %441 : vector<8x128xf32>
    %443 = vector.broadcast %0 : f32 to vector<8x128xf32>
    %444 = arith.mulf %359, %443 : vector<8x128xf32>
    %445 = vector.broadcast %8 : f32 to vector<8x128xf32>
    %446 = arith.mulf %362, %445 : vector<8x128xf32>
    %447 = arith.addf %444, %446 : vector<8x128xf32>
    %448 = vector.broadcast %0 : f32 to vector<8x128xf32>
    %449 = arith.mulf %362, %448 : vector<8x128xf32>
    %450 = vector.broadcast %8 : f32 to vector<8x128xf32>
    %451 = arith.mulf %359, %450 : vector<8x128xf32>
    %452 = arith.subf %449, %451 : vector<8x128xf32>
    %453 = vector.broadcast %0 : f32 to vector<8x128xf32>
    %454 = arith.mulf %371, %453 : vector<8x128xf32>
    %455 = vector.broadcast %8 : f32 to vector<8x128xf32>
    %456 = arith.mulf %374, %455 : vector<8x128xf32>
    %457 = arith.subf %454, %456 : vector<8x128xf32>
    %458 = vector.broadcast %8 : f32 to vector<8x128xf32>
    %459 = arith.mulf %371, %458 : vector<8x128xf32>
    %460 = vector.broadcast %0 : f32 to vector<8x128xf32>
    %461 = arith.mulf %374, %460 : vector<8x128xf32>
    %462 = arith.addf %459, %461 : vector<8x128xf32>
    %463 = vector.broadcast %0 : f32 to vector<8x128xf32>
    %464 = arith.mulf %383, %463 : vector<8x128xf32>
    %465 = vector.broadcast %8 : f32 to vector<8x128xf32>
    %466 = arith.mulf %386, %465 : vector<8x128xf32>
    %467 = arith.addf %464, %466 : vector<8x128xf32>
    %468 = vector.broadcast %0 : f32 to vector<8x128xf32>
    %469 = arith.mulf %386, %468 : vector<8x128xf32>
    %470 = vector.broadcast %8 : f32 to vector<8x128xf32>
    %471 = arith.mulf %383, %470 : vector<8x128xf32>
    %472 = arith.subf %469, %471 : vector<8x128xf32>
    %473 = vector.broadcast %0 : f32 to vector<8x128xf32>
    %474 = arith.mulf %395, %473 : vector<8x128xf32>
    %475 = vector.broadcast %8 : f32 to vector<8x128xf32>
    %476 = arith.mulf %398, %475 : vector<8x128xf32>
    %477 = arith.subf %474, %476 : vector<8x128xf32>
    %478 = vector.broadcast %8 : f32 to vector<8x128xf32>
    %479 = arith.mulf %395, %478 : vector<8x128xf32>
    %480 = vector.broadcast %0 : f32 to vector<8x128xf32>
    %481 = arith.mulf %398, %480 : vector<8x128xf32>
    %482 = arith.addf %479, %481 : vector<8x128xf32>
    %483 = vector.broadcast %0 : f32 to vector<8x128xf32>
    %484 = arith.mulf %407, %483 : vector<8x128xf32>
    %485 = vector.broadcast %8 : f32 to vector<8x128xf32>
    %486 = arith.mulf %410, %485 : vector<8x128xf32>
    %487 = arith.addf %484, %486 : vector<8x128xf32>
    %488 = vector.broadcast %0 : f32 to vector<8x128xf32>
    %489 = arith.mulf %410, %488 : vector<8x128xf32>
    %490 = vector.broadcast %8 : f32 to vector<8x128xf32>
    %491 = arith.mulf %407, %490 : vector<8x128xf32>
    %492 = arith.subf %489, %491 : vector<8x128xf32>
    %493 = vector.broadcast %0 : f32 to vector<8x128xf32>
    %494 = arith.mulf %419, %493 : vector<8x128xf32>
    %495 = vector.broadcast %8 : f32 to vector<8x128xf32>
    %496 = arith.mulf %422, %495 : vector<8x128xf32>
    %497 = arith.subf %494, %496 : vector<8x128xf32>
    %498 = vector.broadcast %8 : f32 to vector<8x128xf32>
    %499 = arith.mulf %419, %498 : vector<8x128xf32>
    %500 = vector.broadcast %0 : f32 to vector<8x128xf32>
    %501 = arith.mulf %422, %500 : vector<8x128xf32>
    %502 = arith.addf %499, %501 : vector<8x128xf32>
    %503 = vector.broadcast %1 : f32 to vector<8x128xf32>
    %504 = arith.mulf %341, %503 : vector<8x128xf32>
    %505 = vector.broadcast %9 : f32 to vector<8x128xf32>
    %506 = arith.mulf %344, %505 : vector<8x128xf32>
    %507 = arith.addf %504, %506 : vector<8x128xf32>
    %508 = vector.broadcast %1 : f32 to vector<8x128xf32>
    %509 = arith.mulf %344, %508 : vector<8x128xf32>
    %510 = vector.broadcast %9 : f32 to vector<8x128xf32>
    %511 = arith.mulf %341, %510 : vector<8x128xf32>
    %512 = arith.subf %509, %511 : vector<8x128xf32>
    %513 = vector.broadcast %1 : f32 to vector<8x128xf32>
    %514 = arith.mulf %437, %513 : vector<8x128xf32>
    %515 = vector.broadcast %9 : f32 to vector<8x128xf32>
    %516 = arith.mulf %442, %515 : vector<8x128xf32>
    %517 = arith.addf %514, %516 : vector<8x128xf32>
    %518 = vector.broadcast %1 : f32 to vector<8x128xf32>
    %519 = arith.mulf %442, %518 : vector<8x128xf32>
    %520 = vector.broadcast %9 : f32 to vector<8x128xf32>
    %521 = arith.mulf %437, %520 : vector<8x128xf32>
    %522 = arith.subf %519, %521 : vector<8x128xf32>
    %523 = vector.broadcast %1 : f32 to vector<8x128xf32>
    %524 = arith.mulf %365, %523 : vector<8x128xf32>
    %525 = vector.broadcast %9 : f32 to vector<8x128xf32>
    %526 = arith.mulf %368, %525 : vector<8x128xf32>
    %527 = arith.subf %524, %526 : vector<8x128xf32>
    %528 = vector.broadcast %9 : f32 to vector<8x128xf32>
    %529 = arith.mulf %365, %528 : vector<8x128xf32>
    %530 = vector.broadcast %1 : f32 to vector<8x128xf32>
    %531 = arith.mulf %368, %530 : vector<8x128xf32>
    %532 = arith.addf %529, %531 : vector<8x128xf32>
    %533 = vector.broadcast %1 : f32 to vector<8x128xf32>
    %534 = arith.mulf %457, %533 : vector<8x128xf32>
    %535 = vector.broadcast %9 : f32 to vector<8x128xf32>
    %536 = arith.mulf %462, %535 : vector<8x128xf32>
    %537 = arith.subf %534, %536 : vector<8x128xf32>
    %538 = vector.broadcast %9 : f32 to vector<8x128xf32>
    %539 = arith.mulf %457, %538 : vector<8x128xf32>
    %540 = vector.broadcast %1 : f32 to vector<8x128xf32>
    %541 = arith.mulf %462, %540 : vector<8x128xf32>
    %542 = arith.addf %539, %541 : vector<8x128xf32>
    %543 = vector.broadcast %1 : f32 to vector<8x128xf32>
    %544 = arith.mulf %389, %543 : vector<8x128xf32>
    %545 = vector.broadcast %9 : f32 to vector<8x128xf32>
    %546 = arith.mulf %392, %545 : vector<8x128xf32>
    %547 = arith.addf %544, %546 : vector<8x128xf32>
    %548 = vector.broadcast %1 : f32 to vector<8x128xf32>
    %549 = arith.mulf %392, %548 : vector<8x128xf32>
    %550 = vector.broadcast %9 : f32 to vector<8x128xf32>
    %551 = arith.mulf %389, %550 : vector<8x128xf32>
    %552 = arith.subf %549, %551 : vector<8x128xf32>
    %553 = vector.broadcast %1 : f32 to vector<8x128xf32>
    %554 = arith.mulf %477, %553 : vector<8x128xf32>
    %555 = vector.broadcast %9 : f32 to vector<8x128xf32>
    %556 = arith.mulf %482, %555 : vector<8x128xf32>
    %557 = arith.addf %554, %556 : vector<8x128xf32>
    %558 = vector.broadcast %1 : f32 to vector<8x128xf32>
    %559 = arith.mulf %482, %558 : vector<8x128xf32>
    %560 = vector.broadcast %9 : f32 to vector<8x128xf32>
    %561 = arith.mulf %477, %560 : vector<8x128xf32>
    %562 = arith.subf %559, %561 : vector<8x128xf32>
    %563 = vector.broadcast %1 : f32 to vector<8x128xf32>
    %564 = arith.mulf %413, %563 : vector<8x128xf32>
    %565 = vector.broadcast %9 : f32 to vector<8x128xf32>
    %566 = arith.mulf %416, %565 : vector<8x128xf32>
    %567 = arith.subf %564, %566 : vector<8x128xf32>
    %568 = vector.broadcast %9 : f32 to vector<8x128xf32>
    %569 = arith.mulf %413, %568 : vector<8x128xf32>
    %570 = vector.broadcast %1 : f32 to vector<8x128xf32>
    %571 = arith.mulf %416, %570 : vector<8x128xf32>
    %572 = arith.addf %569, %571 : vector<8x128xf32>
    %573 = vector.broadcast %1 : f32 to vector<8x128xf32>
    %574 = arith.mulf %497, %573 : vector<8x128xf32>
    %575 = vector.broadcast %9 : f32 to vector<8x128xf32>
    %576 = arith.mulf %502, %575 : vector<8x128xf32>
    %577 = arith.subf %574, %576 : vector<8x128xf32>
    %578 = vector.broadcast %9 : f32 to vector<8x128xf32>
    %579 = arith.mulf %497, %578 : vector<8x128xf32>
    %580 = vector.broadcast %1 : f32 to vector<8x128xf32>
    %581 = arith.mulf %502, %580 : vector<8x128xf32>
    %582 = arith.addf %579, %581 : vector<8x128xf32>
    %583 = vector.broadcast %2 : f32 to vector<8x128xf32>
    %584 = arith.mulf %353, %583 : vector<8x128xf32>
    %585 = vector.broadcast %10 : f32 to vector<8x128xf32>
    %586 = arith.mulf %356, %585 : vector<8x128xf32>
    %587 = arith.addf %584, %586 : vector<8x128xf32>
    %588 = vector.broadcast %2 : f32 to vector<8x128xf32>
    %589 = arith.mulf %356, %588 : vector<8x128xf32>
    %590 = vector.broadcast %10 : f32 to vector<8x128xf32>
    %591 = arith.mulf %353, %590 : vector<8x128xf32>
    %592 = arith.subf %589, %591 : vector<8x128xf32>
    %593 = vector.broadcast %2 : f32 to vector<8x128xf32>
    %594 = arith.mulf %447, %593 : vector<8x128xf32>
    %595 = vector.broadcast %10 : f32 to vector<8x128xf32>
    %596 = arith.mulf %452, %595 : vector<8x128xf32>
    %597 = arith.addf %594, %596 : vector<8x128xf32>
    %598 = vector.broadcast %2 : f32 to vector<8x128xf32>
    %599 = arith.mulf %452, %598 : vector<8x128xf32>
    %600 = vector.broadcast %10 : f32 to vector<8x128xf32>
    %601 = arith.mulf %447, %600 : vector<8x128xf32>
    %602 = arith.subf %599, %601 : vector<8x128xf32>
    %603 = vector.broadcast %2 : f32 to vector<8x128xf32>
    %604 = arith.mulf %527, %603 : vector<8x128xf32>
    %605 = vector.broadcast %10 : f32 to vector<8x128xf32>
    %606 = arith.mulf %532, %605 : vector<8x128xf32>
    %607 = arith.addf %604, %606 : vector<8x128xf32>
    %608 = vector.broadcast %2 : f32 to vector<8x128xf32>
    %609 = arith.mulf %532, %608 : vector<8x128xf32>
    %610 = vector.broadcast %10 : f32 to vector<8x128xf32>
    %611 = arith.mulf %527, %610 : vector<8x128xf32>
    %612 = arith.subf %609, %611 : vector<8x128xf32>
    %613 = vector.broadcast %2 : f32 to vector<8x128xf32>
    %614 = arith.mulf %537, %613 : vector<8x128xf32>
    %615 = vector.broadcast %10 : f32 to vector<8x128xf32>
    %616 = arith.mulf %542, %615 : vector<8x128xf32>
    %617 = arith.addf %614, %616 : vector<8x128xf32>
    %618 = vector.broadcast %2 : f32 to vector<8x128xf32>
    %619 = arith.mulf %542, %618 : vector<8x128xf32>
    %620 = vector.broadcast %10 : f32 to vector<8x128xf32>
    %621 = arith.mulf %537, %620 : vector<8x128xf32>
    %622 = arith.subf %619, %621 : vector<8x128xf32>
    %623 = vector.broadcast %2 : f32 to vector<8x128xf32>
    %624 = arith.mulf %401, %623 : vector<8x128xf32>
    %625 = vector.broadcast %10 : f32 to vector<8x128xf32>
    %626 = arith.mulf %404, %625 : vector<8x128xf32>
    %627 = arith.subf %624, %626 : vector<8x128xf32>
    %628 = vector.broadcast %10 : f32 to vector<8x128xf32>
    %629 = arith.mulf %401, %628 : vector<8x128xf32>
    %630 = vector.broadcast %2 : f32 to vector<8x128xf32>
    %631 = arith.mulf %404, %630 : vector<8x128xf32>
    %632 = arith.addf %629, %631 : vector<8x128xf32>
    %633 = vector.broadcast %2 : f32 to vector<8x128xf32>
    %634 = arith.mulf %487, %633 : vector<8x128xf32>
    %635 = vector.broadcast %10 : f32 to vector<8x128xf32>
    %636 = arith.mulf %492, %635 : vector<8x128xf32>
    %637 = arith.subf %634, %636 : vector<8x128xf32>
    %638 = vector.broadcast %10 : f32 to vector<8x128xf32>
    %639 = arith.mulf %487, %638 : vector<8x128xf32>
    %640 = vector.broadcast %2 : f32 to vector<8x128xf32>
    %641 = arith.mulf %492, %640 : vector<8x128xf32>
    %642 = arith.addf %639, %641 : vector<8x128xf32>
    %643 = vector.broadcast %2 : f32 to vector<8x128xf32>
    %644 = arith.mulf %567, %643 : vector<8x128xf32>
    %645 = vector.broadcast %10 : f32 to vector<8x128xf32>
    %646 = arith.mulf %572, %645 : vector<8x128xf32>
    %647 = arith.subf %644, %646 : vector<8x128xf32>
    %648 = vector.broadcast %10 : f32 to vector<8x128xf32>
    %649 = arith.mulf %567, %648 : vector<8x128xf32>
    %650 = vector.broadcast %2 : f32 to vector<8x128xf32>
    %651 = arith.mulf %572, %650 : vector<8x128xf32>
    %652 = arith.addf %649, %651 : vector<8x128xf32>
    %653 = vector.broadcast %2 : f32 to vector<8x128xf32>
    %654 = arith.mulf %577, %653 : vector<8x128xf32>
    %655 = vector.broadcast %10 : f32 to vector<8x128xf32>
    %656 = arith.mulf %582, %655 : vector<8x128xf32>
    %657 = arith.subf %654, %656 : vector<8x128xf32>
    %658 = vector.broadcast %10 : f32 to vector<8x128xf32>
    %659 = arith.mulf %577, %658 : vector<8x128xf32>
    %660 = vector.broadcast %2 : f32 to vector<8x128xf32>
    %661 = arith.mulf %582, %660 : vector<8x128xf32>
    %662 = arith.addf %659, %661 : vector<8x128xf32>
    %663 = vector.broadcast %3 : f32 to vector<8x128xf32>
    %664 = arith.mulf %377, %663 : vector<8x128xf32>
    %665 = vector.broadcast %11 : f32 to vector<8x128xf32>
    %666 = arith.mulf %380, %665 : vector<8x128xf32>
    %667 = arith.addf %664, %666 : vector<8x128xf32>
    %668 = vector.broadcast %3 : f32 to vector<8x128xf32>
    %669 = arith.mulf %380, %668 : vector<8x128xf32>
    %670 = vector.broadcast %11 : f32 to vector<8x128xf32>
    %671 = arith.mulf %377, %670 : vector<8x128xf32>
    %672 = arith.subf %669, %671 : vector<8x128xf32>
    %673 = vector.broadcast %3 : f32 to vector<8x128xf32>
    %674 = arith.mulf %467, %673 : vector<8x128xf32>
    %675 = vector.broadcast %11 : f32 to vector<8x128xf32>
    %676 = arith.mulf %472, %675 : vector<8x128xf32>
    %677 = arith.subf %674, %676 : vector<8x128xf32>
    %678 = vector.broadcast %11 : f32 to vector<8x128xf32>
    %679 = arith.mulf %467, %678 : vector<8x128xf32>
    %680 = vector.broadcast %3 : f32 to vector<8x128xf32>
    %681 = arith.mulf %472, %680 : vector<8x128xf32>
    %682 = arith.addf %679, %681 : vector<8x128xf32>
    %683 = vector.broadcast %3 : f32 to vector<8x128xf32>
    %684 = arith.mulf %547, %683 : vector<8x128xf32>
    %685 = vector.broadcast %11 : f32 to vector<8x128xf32>
    %686 = arith.mulf %552, %685 : vector<8x128xf32>
    %687 = arith.addf %684, %686 : vector<8x128xf32>
    %688 = vector.broadcast %3 : f32 to vector<8x128xf32>
    %689 = arith.mulf %552, %688 : vector<8x128xf32>
    %690 = vector.broadcast %11 : f32 to vector<8x128xf32>
    %691 = arith.mulf %547, %690 : vector<8x128xf32>
    %692 = arith.subf %689, %691 : vector<8x128xf32>
    %693 = vector.broadcast %3 : f32 to vector<8x128xf32>
    %694 = arith.mulf %557, %693 : vector<8x128xf32>
    %695 = vector.broadcast %11 : f32 to vector<8x128xf32>
    %696 = arith.mulf %562, %695 : vector<8x128xf32>
    %697 = arith.subf %694, %696 : vector<8x128xf32>
    %698 = vector.broadcast %11 : f32 to vector<8x128xf32>
    %699 = arith.mulf %557, %698 : vector<8x128xf32>
    %700 = vector.broadcast %3 : f32 to vector<8x128xf32>
    %701 = arith.mulf %562, %700 : vector<8x128xf32>
    %702 = arith.addf %699, %701 : vector<8x128xf32>
    %703 = vector.broadcast %3 : f32 to vector<8x128xf32>
    %704 = arith.mulf %627, %703 : vector<8x128xf32>
    %705 = vector.broadcast %11 : f32 to vector<8x128xf32>
    %706 = arith.mulf %632, %705 : vector<8x128xf32>
    %707 = arith.addf %704, %706 : vector<8x128xf32>
    %708 = vector.broadcast %3 : f32 to vector<8x128xf32>
    %709 = arith.mulf %632, %708 : vector<8x128xf32>
    %710 = vector.broadcast %11 : f32 to vector<8x128xf32>
    %711 = arith.mulf %627, %710 : vector<8x128xf32>
    %712 = arith.subf %709, %711 : vector<8x128xf32>
    %713 = vector.broadcast %3 : f32 to vector<8x128xf32>
    %714 = arith.mulf %637, %713 : vector<8x128xf32>
    %715 = vector.broadcast %11 : f32 to vector<8x128xf32>
    %716 = arith.mulf %642, %715 : vector<8x128xf32>
    %717 = arith.subf %714, %716 : vector<8x128xf32>
    %718 = vector.broadcast %11 : f32 to vector<8x128xf32>
    %719 = arith.mulf %637, %718 : vector<8x128xf32>
    %720 = vector.broadcast %3 : f32 to vector<8x128xf32>
    %721 = arith.mulf %642, %720 : vector<8x128xf32>
    %722 = arith.addf %719, %721 : vector<8x128xf32>
    %723 = vector.broadcast %3 : f32 to vector<8x128xf32>
    %724 = arith.mulf %647, %723 : vector<8x128xf32>
    %725 = vector.broadcast %11 : f32 to vector<8x128xf32>
    %726 = arith.mulf %652, %725 : vector<8x128xf32>
    %727 = arith.addf %724, %726 : vector<8x128xf32>
    %728 = vector.broadcast %3 : f32 to vector<8x128xf32>
    %729 = arith.mulf %652, %728 : vector<8x128xf32>
    %730 = vector.broadcast %11 : f32 to vector<8x128xf32>
    %731 = arith.mulf %647, %730 : vector<8x128xf32>
    %732 = arith.subf %729, %731 : vector<8x128xf32>
    %733 = vector.broadcast %3 : f32 to vector<8x128xf32>
    %734 = arith.mulf %657, %733 : vector<8x128xf32>
    %735 = vector.broadcast %11 : f32 to vector<8x128xf32>
    %736 = arith.mulf %662, %735 : vector<8x128xf32>
    %737 = arith.subf %734, %736 : vector<8x128xf32>
    %738 = vector.broadcast %11 : f32 to vector<8x128xf32>
    %739 = arith.mulf %657, %738 : vector<8x128xf32>
    %740 = vector.broadcast %3 : f32 to vector<8x128xf32>
    %741 = arith.mulf %662, %740 : vector<8x128xf32>
    %742 = arith.addf %739, %741 : vector<8x128xf32>
    %743 = vector.broadcast %4 : f32 to vector<8x128xf32>
    %744 = arith.mulf %743, %329 : vector<8x128xf32>
    %745 = vector.broadcast %12 : f32 to vector<8x128xf32>
    %746 = arith.mulf %745, %427 : vector<8x128xf32>
    %747 = arith.subf %744, %746 : vector<8x128xf32>
    %748 = vector.broadcast %4 : f32 to vector<8x128xf32>
    %749 = arith.mulf %748, %332 : vector<8x128xf32>
    %750 = vector.broadcast %12 : f32 to vector<8x128xf32>
    %751 = arith.mulf %750, %432 : vector<8x128xf32>
    %752 = arith.subf %749, %751 : vector<8x128xf32>
    %753 = vector.broadcast %12 : f32 to vector<8x128xf32>
    %754 = arith.mulf %753, %329 : vector<8x128xf32>
    %755 = vector.broadcast %4 : f32 to vector<8x128xf32>
    %756 = arith.mulf %755, %427 : vector<8x128xf32>
    %757 = arith.addf %754, %756 : vector<8x128xf32>
    %758 = vector.broadcast %12 : f32 to vector<8x128xf32>
    %759 = arith.mulf %758, %332 : vector<8x128xf32>
    %760 = vector.broadcast %4 : f32 to vector<8x128xf32>
    %761 = arith.mulf %760, %432 : vector<8x128xf32>
    %762 = arith.addf %759, %761 : vector<8x128xf32>
    %763 = vector.broadcast %4 : f32 to vector<8x128xf32>
    %764 = arith.mulf %763, %507 : vector<8x128xf32>
    %765 = vector.broadcast %12 : f32 to vector<8x128xf32>
    %766 = arith.mulf %765, %517 : vector<8x128xf32>
    %767 = arith.subf %764, %766 : vector<8x128xf32>
    %768 = vector.broadcast %4 : f32 to vector<8x128xf32>
    %769 = arith.mulf %768, %512 : vector<8x128xf32>
    %770 = vector.broadcast %12 : f32 to vector<8x128xf32>
    %771 = arith.mulf %770, %522 : vector<8x128xf32>
    %772 = arith.subf %769, %771 : vector<8x128xf32>
    %773 = vector.broadcast %12 : f32 to vector<8x128xf32>
    %774 = arith.mulf %773, %507 : vector<8x128xf32>
    %775 = vector.broadcast %4 : f32 to vector<8x128xf32>
    %776 = arith.mulf %775, %517 : vector<8x128xf32>
    %777 = arith.addf %774, %776 : vector<8x128xf32>
    %778 = vector.broadcast %12 : f32 to vector<8x128xf32>
    %779 = arith.mulf %778, %512 : vector<8x128xf32>
    %780 = vector.broadcast %4 : f32 to vector<8x128xf32>
    %781 = arith.mulf %780, %522 : vector<8x128xf32>
    %782 = arith.addf %779, %781 : vector<8x128xf32>
    %783 = vector.broadcast %4 : f32 to vector<8x128xf32>
    %784 = arith.mulf %783, %587 : vector<8x128xf32>
    %785 = vector.broadcast %12 : f32 to vector<8x128xf32>
    %786 = arith.mulf %785, %597 : vector<8x128xf32>
    %787 = arith.subf %784, %786 : vector<8x128xf32>
    %788 = vector.broadcast %4 : f32 to vector<8x128xf32>
    %789 = arith.mulf %788, %592 : vector<8x128xf32>
    %790 = vector.broadcast %12 : f32 to vector<8x128xf32>
    %791 = arith.mulf %790, %602 : vector<8x128xf32>
    %792 = arith.subf %789, %791 : vector<8x128xf32>
    %793 = vector.broadcast %12 : f32 to vector<8x128xf32>
    %794 = arith.mulf %793, %587 : vector<8x128xf32>
    %795 = vector.broadcast %4 : f32 to vector<8x128xf32>
    %796 = arith.mulf %795, %597 : vector<8x128xf32>
    %797 = arith.addf %794, %796 : vector<8x128xf32>
    %798 = vector.broadcast %12 : f32 to vector<8x128xf32>
    %799 = arith.mulf %798, %592 : vector<8x128xf32>
    %800 = vector.broadcast %4 : f32 to vector<8x128xf32>
    %801 = arith.mulf %800, %602 : vector<8x128xf32>
    %802 = arith.addf %799, %801 : vector<8x128xf32>
    %803 = vector.broadcast %4 : f32 to vector<8x128xf32>
    %804 = arith.mulf %803, %607 : vector<8x128xf32>
    %805 = vector.broadcast %12 : f32 to vector<8x128xf32>
    %806 = arith.mulf %805, %617 : vector<8x128xf32>
    %807 = arith.subf %804, %806 : vector<8x128xf32>
    %808 = vector.broadcast %4 : f32 to vector<8x128xf32>
    %809 = arith.mulf %808, %612 : vector<8x128xf32>
    %810 = vector.broadcast %12 : f32 to vector<8x128xf32>
    %811 = arith.mulf %810, %622 : vector<8x128xf32>
    %812 = arith.subf %809, %811 : vector<8x128xf32>
    %813 = vector.broadcast %12 : f32 to vector<8x128xf32>
    %814 = arith.mulf %813, %607 : vector<8x128xf32>
    %815 = vector.broadcast %4 : f32 to vector<8x128xf32>
    %816 = arith.mulf %815, %617 : vector<8x128xf32>
    %817 = arith.addf %814, %816 : vector<8x128xf32>
    %818 = vector.broadcast %12 : f32 to vector<8x128xf32>
    %819 = arith.mulf %818, %612 : vector<8x128xf32>
    %820 = vector.broadcast %4 : f32 to vector<8x128xf32>
    %821 = arith.mulf %820, %622 : vector<8x128xf32>
    %822 = arith.addf %819, %821 : vector<8x128xf32>
    %823 = vector.broadcast %4 : f32 to vector<8x128xf32>
    %824 = arith.mulf %823, %667 : vector<8x128xf32>
    %825 = vector.broadcast %12 : f32 to vector<8x128xf32>
    %826 = arith.mulf %825, %677 : vector<8x128xf32>
    %827 = arith.subf %824, %826 : vector<8x128xf32>
    %828 = vector.broadcast %4 : f32 to vector<8x128xf32>
    %829 = arith.mulf %828, %672 : vector<8x128xf32>
    %830 = vector.broadcast %12 : f32 to vector<8x128xf32>
    %831 = arith.mulf %830, %682 : vector<8x128xf32>
    %832 = arith.subf %829, %831 : vector<8x128xf32>
    %833 = vector.broadcast %12 : f32 to vector<8x128xf32>
    %834 = arith.mulf %833, %667 : vector<8x128xf32>
    %835 = vector.broadcast %4 : f32 to vector<8x128xf32>
    %836 = arith.mulf %835, %677 : vector<8x128xf32>
    %837 = arith.addf %834, %836 : vector<8x128xf32>
    %838 = vector.broadcast %12 : f32 to vector<8x128xf32>
    %839 = arith.mulf %838, %672 : vector<8x128xf32>
    %840 = vector.broadcast %4 : f32 to vector<8x128xf32>
    %841 = arith.mulf %840, %682 : vector<8x128xf32>
    %842 = arith.addf %839, %841 : vector<8x128xf32>
    %843 = vector.broadcast %4 : f32 to vector<8x128xf32>
    %844 = arith.mulf %843, %687 : vector<8x128xf32>
    %845 = vector.broadcast %12 : f32 to vector<8x128xf32>
    %846 = arith.mulf %845, %697 : vector<8x128xf32>
    %847 = arith.subf %844, %846 : vector<8x128xf32>
    %848 = vector.broadcast %4 : f32 to vector<8x128xf32>
    %849 = arith.mulf %848, %692 : vector<8x128xf32>
    %850 = vector.broadcast %12 : f32 to vector<8x128xf32>
    %851 = arith.mulf %850, %702 : vector<8x128xf32>
    %852 = arith.subf %849, %851 : vector<8x128xf32>
    %853 = vector.broadcast %12 : f32 to vector<8x128xf32>
    %854 = arith.mulf %853, %687 : vector<8x128xf32>
    %855 = vector.broadcast %4 : f32 to vector<8x128xf32>
    %856 = arith.mulf %855, %697 : vector<8x128xf32>
    %857 = arith.addf %854, %856 : vector<8x128xf32>
    %858 = vector.broadcast %12 : f32 to vector<8x128xf32>
    %859 = arith.mulf %858, %692 : vector<8x128xf32>
    %860 = vector.broadcast %4 : f32 to vector<8x128xf32>
    %861 = arith.mulf %860, %702 : vector<8x128xf32>
    %862 = arith.addf %859, %861 : vector<8x128xf32>
    %863 = vector.broadcast %4 : f32 to vector<8x128xf32>
    %864 = arith.mulf %863, %707 : vector<8x128xf32>
    %865 = vector.broadcast %12 : f32 to vector<8x128xf32>
    %866 = arith.mulf %865, %717 : vector<8x128xf32>
    %867 = arith.subf %864, %866 : vector<8x128xf32>
    %868 = vector.broadcast %4 : f32 to vector<8x128xf32>
    %869 = arith.mulf %868, %712 : vector<8x128xf32>
    %870 = vector.broadcast %12 : f32 to vector<8x128xf32>
    %871 = arith.mulf %870, %722 : vector<8x128xf32>
    %872 = arith.subf %869, %871 : vector<8x128xf32>
    %873 = vector.broadcast %12 : f32 to vector<8x128xf32>
    %874 = arith.mulf %873, %707 : vector<8x128xf32>
    %875 = vector.broadcast %4 : f32 to vector<8x128xf32>
    %876 = arith.mulf %875, %717 : vector<8x128xf32>
    %877 = arith.addf %874, %876 : vector<8x128xf32>
    %878 = vector.broadcast %12 : f32 to vector<8x128xf32>
    %879 = arith.mulf %878, %712 : vector<8x128xf32>
    %880 = vector.broadcast %4 : f32 to vector<8x128xf32>
    %881 = arith.mulf %880, %722 : vector<8x128xf32>
    %882 = arith.addf %879, %881 : vector<8x128xf32>
    %883 = vector.broadcast %4 : f32 to vector<8x128xf32>
    %884 = arith.mulf %883, %727 : vector<8x128xf32>
    %885 = vector.broadcast %12 : f32 to vector<8x128xf32>
    %886 = arith.mulf %885, %737 : vector<8x128xf32>
    %887 = arith.subf %884, %886 : vector<8x128xf32>
    %888 = vector.broadcast %4 : f32 to vector<8x128xf32>
    %889 = arith.mulf %888, %732 : vector<8x128xf32>
    %890 = vector.broadcast %12 : f32 to vector<8x128xf32>
    %891 = arith.mulf %890, %742 : vector<8x128xf32>
    %892 = arith.subf %889, %891 : vector<8x128xf32>
    %893 = vector.broadcast %12 : f32 to vector<8x128xf32>
    %894 = arith.mulf %893, %727 : vector<8x128xf32>
    %895 = vector.broadcast %4 : f32 to vector<8x128xf32>
    %896 = arith.mulf %895, %737 : vector<8x128xf32>
    %897 = arith.addf %894, %896 : vector<8x128xf32>
    %898 = vector.broadcast %12 : f32 to vector<8x128xf32>
    %899 = arith.mulf %898, %732 : vector<8x128xf32>
    %900 = vector.broadcast %4 : f32 to vector<8x128xf32>
    %901 = arith.mulf %900, %742 : vector<8x128xf32>
    %902 = arith.addf %899, %901 : vector<8x128xf32>
    %903 = vector.broadcast %5 : f32 to vector<8x128xf32>
    %904 = arith.mulf %903, %747 : vector<8x128xf32>
    %905 = vector.broadcast %13 : f32 to vector<8x128xf32>
    %906 = arith.mulf %905, %767 : vector<8x128xf32>
    %907 = arith.subf %904, %906 : vector<8x128xf32>
    %908 = vector.broadcast %5 : f32 to vector<8x128xf32>
    %909 = arith.mulf %908, %752 : vector<8x128xf32>
    %910 = vector.broadcast %13 : f32 to vector<8x128xf32>
    %911 = arith.mulf %910, %772 : vector<8x128xf32>
    %912 = arith.subf %909, %911 : vector<8x128xf32>
    %913 = vector.broadcast %13 : f32 to vector<8x128xf32>
    %914 = arith.mulf %913, %747 : vector<8x128xf32>
    %915 = vector.broadcast %5 : f32 to vector<8x128xf32>
    %916 = arith.mulf %915, %767 : vector<8x128xf32>
    %917 = arith.addf %914, %916 : vector<8x128xf32>
    %918 = vector.broadcast %13 : f32 to vector<8x128xf32>
    %919 = arith.mulf %918, %752 : vector<8x128xf32>
    %920 = vector.broadcast %5 : f32 to vector<8x128xf32>
    %921 = arith.mulf %920, %772 : vector<8x128xf32>
    %922 = arith.addf %919, %921 : vector<8x128xf32>
    %923 = vector.broadcast %5 : f32 to vector<8x128xf32>
    %924 = arith.mulf %923, %757 : vector<8x128xf32>
    %925 = vector.broadcast %13 : f32 to vector<8x128xf32>
    %926 = arith.mulf %925, %777 : vector<8x128xf32>
    %927 = arith.subf %924, %926 : vector<8x128xf32>
    %928 = vector.broadcast %5 : f32 to vector<8x128xf32>
    %929 = arith.mulf %928, %762 : vector<8x128xf32>
    %930 = vector.broadcast %13 : f32 to vector<8x128xf32>
    %931 = arith.mulf %930, %782 : vector<8x128xf32>
    %932 = arith.subf %929, %931 : vector<8x128xf32>
    %933 = vector.broadcast %13 : f32 to vector<8x128xf32>
    %934 = arith.mulf %933, %757 : vector<8x128xf32>
    %935 = vector.broadcast %5 : f32 to vector<8x128xf32>
    %936 = arith.mulf %935, %777 : vector<8x128xf32>
    %937 = arith.addf %934, %936 : vector<8x128xf32>
    %938 = vector.broadcast %13 : f32 to vector<8x128xf32>
    %939 = arith.mulf %938, %762 : vector<8x128xf32>
    %940 = vector.broadcast %5 : f32 to vector<8x128xf32>
    %941 = arith.mulf %940, %782 : vector<8x128xf32>
    %942 = arith.addf %939, %941 : vector<8x128xf32>
    %943 = vector.broadcast %5 : f32 to vector<8x128xf32>
    %944 = arith.mulf %943, %787 : vector<8x128xf32>
    %945 = vector.broadcast %13 : f32 to vector<8x128xf32>
    %946 = arith.mulf %945, %807 : vector<8x128xf32>
    %947 = arith.subf %944, %946 : vector<8x128xf32>
    %948 = vector.broadcast %5 : f32 to vector<8x128xf32>
    %949 = arith.mulf %948, %792 : vector<8x128xf32>
    %950 = vector.broadcast %13 : f32 to vector<8x128xf32>
    %951 = arith.mulf %950, %812 : vector<8x128xf32>
    %952 = arith.subf %949, %951 : vector<8x128xf32>
    %953 = vector.broadcast %13 : f32 to vector<8x128xf32>
    %954 = arith.mulf %953, %787 : vector<8x128xf32>
    %955 = vector.broadcast %5 : f32 to vector<8x128xf32>
    %956 = arith.mulf %955, %807 : vector<8x128xf32>
    %957 = arith.addf %954, %956 : vector<8x128xf32>
    %958 = vector.broadcast %13 : f32 to vector<8x128xf32>
    %959 = arith.mulf %958, %792 : vector<8x128xf32>
    %960 = vector.broadcast %5 : f32 to vector<8x128xf32>
    %961 = arith.mulf %960, %812 : vector<8x128xf32>
    %962 = arith.addf %959, %961 : vector<8x128xf32>
    %963 = vector.broadcast %5 : f32 to vector<8x128xf32>
    %964 = arith.mulf %963, %797 : vector<8x128xf32>
    %965 = vector.broadcast %13 : f32 to vector<8x128xf32>
    %966 = arith.mulf %965, %817 : vector<8x128xf32>
    %967 = arith.subf %964, %966 : vector<8x128xf32>
    %968 = vector.broadcast %5 : f32 to vector<8x128xf32>
    %969 = arith.mulf %968, %802 : vector<8x128xf32>
    %970 = vector.broadcast %13 : f32 to vector<8x128xf32>
    %971 = arith.mulf %970, %822 : vector<8x128xf32>
    %972 = arith.subf %969, %971 : vector<8x128xf32>
    %973 = vector.broadcast %13 : f32 to vector<8x128xf32>
    %974 = arith.mulf %973, %797 : vector<8x128xf32>
    %975 = vector.broadcast %5 : f32 to vector<8x128xf32>
    %976 = arith.mulf %975, %817 : vector<8x128xf32>
    %977 = arith.addf %974, %976 : vector<8x128xf32>
    %978 = vector.broadcast %13 : f32 to vector<8x128xf32>
    %979 = arith.mulf %978, %802 : vector<8x128xf32>
    %980 = vector.broadcast %5 : f32 to vector<8x128xf32>
    %981 = arith.mulf %980, %822 : vector<8x128xf32>
    %982 = arith.addf %979, %981 : vector<8x128xf32>
    %983 = vector.broadcast %5 : f32 to vector<8x128xf32>
    %984 = arith.mulf %983, %827 : vector<8x128xf32>
    %985 = vector.broadcast %13 : f32 to vector<8x128xf32>
    %986 = arith.mulf %985, %847 : vector<8x128xf32>
    %987 = arith.subf %984, %986 : vector<8x128xf32>
    %988 = vector.broadcast %5 : f32 to vector<8x128xf32>
    %989 = arith.mulf %988, %832 : vector<8x128xf32>
    %990 = vector.broadcast %13 : f32 to vector<8x128xf32>
    %991 = arith.mulf %990, %852 : vector<8x128xf32>
    %992 = arith.subf %989, %991 : vector<8x128xf32>
    %993 = vector.broadcast %13 : f32 to vector<8x128xf32>
    %994 = arith.mulf %993, %827 : vector<8x128xf32>
    %995 = vector.broadcast %5 : f32 to vector<8x128xf32>
    %996 = arith.mulf %995, %847 : vector<8x128xf32>
    %997 = arith.addf %994, %996 : vector<8x128xf32>
    %998 = vector.broadcast %13 : f32 to vector<8x128xf32>
    %999 = arith.mulf %998, %832 : vector<8x128xf32>
    %1000 = vector.broadcast %5 : f32 to vector<8x128xf32>
    %1001 = arith.mulf %1000, %852 : vector<8x128xf32>
    %1002 = arith.addf %999, %1001 : vector<8x128xf32>
    %1003 = vector.broadcast %5 : f32 to vector<8x128xf32>
    %1004 = arith.mulf %1003, %837 : vector<8x128xf32>
    %1005 = vector.broadcast %13 : f32 to vector<8x128xf32>
    %1006 = arith.mulf %1005, %857 : vector<8x128xf32>
    %1007 = arith.subf %1004, %1006 : vector<8x128xf32>
    %1008 = vector.broadcast %5 : f32 to vector<8x128xf32>
    %1009 = arith.mulf %1008, %842 : vector<8x128xf32>
    %1010 = vector.broadcast %13 : f32 to vector<8x128xf32>
    %1011 = arith.mulf %1010, %862 : vector<8x128xf32>
    %1012 = arith.subf %1009, %1011 : vector<8x128xf32>
    %1013 = vector.broadcast %13 : f32 to vector<8x128xf32>
    %1014 = arith.mulf %1013, %837 : vector<8x128xf32>
    %1015 = vector.broadcast %5 : f32 to vector<8x128xf32>
    %1016 = arith.mulf %1015, %857 : vector<8x128xf32>
    %1017 = arith.addf %1014, %1016 : vector<8x128xf32>
    %1018 = vector.broadcast %13 : f32 to vector<8x128xf32>
    %1019 = arith.mulf %1018, %842 : vector<8x128xf32>
    %1020 = vector.broadcast %5 : f32 to vector<8x128xf32>
    %1021 = arith.mulf %1020, %862 : vector<8x128xf32>
    %1022 = arith.addf %1019, %1021 : vector<8x128xf32>
    %1023 = vector.broadcast %5 : f32 to vector<8x128xf32>
    %1024 = arith.mulf %1023, %867 : vector<8x128xf32>
    %1025 = vector.broadcast %13 : f32 to vector<8x128xf32>
    %1026 = arith.mulf %1025, %887 : vector<8x128xf32>
    %1027 = arith.subf %1024, %1026 : vector<8x128xf32>
    %1028 = vector.broadcast %5 : f32 to vector<8x128xf32>
    %1029 = arith.mulf %1028, %872 : vector<8x128xf32>
    %1030 = vector.broadcast %13 : f32 to vector<8x128xf32>
    %1031 = arith.mulf %1030, %892 : vector<8x128xf32>
    %1032 = arith.subf %1029, %1031 : vector<8x128xf32>
    %1033 = vector.broadcast %13 : f32 to vector<8x128xf32>
    %1034 = arith.mulf %1033, %867 : vector<8x128xf32>
    %1035 = vector.broadcast %5 : f32 to vector<8x128xf32>
    %1036 = arith.mulf %1035, %887 : vector<8x128xf32>
    %1037 = arith.addf %1034, %1036 : vector<8x128xf32>
    %1038 = vector.broadcast %13 : f32 to vector<8x128xf32>
    %1039 = arith.mulf %1038, %872 : vector<8x128xf32>
    %1040 = vector.broadcast %5 : f32 to vector<8x128xf32>
    %1041 = arith.mulf %1040, %892 : vector<8x128xf32>
    %1042 = arith.addf %1039, %1041 : vector<8x128xf32>
    %1043 = vector.broadcast %5 : f32 to vector<8x128xf32>
    %1044 = arith.mulf %1043, %877 : vector<8x128xf32>
    %1045 = vector.broadcast %13 : f32 to vector<8x128xf32>
    %1046 = arith.mulf %1045, %897 : vector<8x128xf32>
    %1047 = arith.subf %1044, %1046 : vector<8x128xf32>
    %1048 = vector.broadcast %5 : f32 to vector<8x128xf32>
    %1049 = arith.mulf %1048, %882 : vector<8x128xf32>
    %1050 = vector.broadcast %13 : f32 to vector<8x128xf32>
    %1051 = arith.mulf %1050, %902 : vector<8x128xf32>
    %1052 = arith.subf %1049, %1051 : vector<8x128xf32>
    %1053 = vector.broadcast %13 : f32 to vector<8x128xf32>
    %1054 = arith.mulf %1053, %877 : vector<8x128xf32>
    %1055 = vector.broadcast %5 : f32 to vector<8x128xf32>
    %1056 = arith.mulf %1055, %897 : vector<8x128xf32>
    %1057 = arith.addf %1054, %1056 : vector<8x128xf32>
    %1058 = vector.broadcast %13 : f32 to vector<8x128xf32>
    %1059 = arith.mulf %1058, %882 : vector<8x128xf32>
    %1060 = vector.broadcast %5 : f32 to vector<8x128xf32>
    %1061 = arith.mulf %1060, %902 : vector<8x128xf32>
    %1062 = arith.addf %1059, %1061 : vector<8x128xf32>
    %1063 = vector.broadcast %6 : f32 to vector<8x128xf32>
    %1064 = arith.mulf %1063, %907 : vector<8x128xf32>
    %1065 = vector.broadcast %14 : f32 to vector<8x128xf32>
    %1066 = arith.mulf %1065, %947 : vector<8x128xf32>
    %1067 = arith.subf %1064, %1066 : vector<8x128xf32>
    %1068 = vector.broadcast %6 : f32 to vector<8x128xf32>
    %1069 = arith.mulf %1068, %912 : vector<8x128xf32>
    %1070 = vector.broadcast %14 : f32 to vector<8x128xf32>
    %1071 = arith.mulf %1070, %952 : vector<8x128xf32>
    %1072 = arith.subf %1069, %1071 : vector<8x128xf32>
    %1073 = vector.broadcast %14 : f32 to vector<8x128xf32>
    %1074 = arith.mulf %1073, %907 : vector<8x128xf32>
    %1075 = vector.broadcast %6 : f32 to vector<8x128xf32>
    %1076 = arith.mulf %1075, %947 : vector<8x128xf32>
    %1077 = arith.addf %1074, %1076 : vector<8x128xf32>
    %1078 = vector.broadcast %14 : f32 to vector<8x128xf32>
    %1079 = arith.mulf %1078, %912 : vector<8x128xf32>
    %1080 = vector.broadcast %6 : f32 to vector<8x128xf32>
    %1081 = arith.mulf %1080, %952 : vector<8x128xf32>
    %1082 = arith.addf %1079, %1081 : vector<8x128xf32>
    %1083 = vector.broadcast %6 : f32 to vector<8x128xf32>
    %1084 = arith.mulf %1083, %927 : vector<8x128xf32>
    %1085 = vector.broadcast %14 : f32 to vector<8x128xf32>
    %1086 = arith.mulf %1085, %967 : vector<8x128xf32>
    %1087 = arith.subf %1084, %1086 : vector<8x128xf32>
    %1088 = vector.broadcast %6 : f32 to vector<8x128xf32>
    %1089 = arith.mulf %1088, %932 : vector<8x128xf32>
    %1090 = vector.broadcast %14 : f32 to vector<8x128xf32>
    %1091 = arith.mulf %1090, %972 : vector<8x128xf32>
    %1092 = arith.subf %1089, %1091 : vector<8x128xf32>
    %1093 = vector.broadcast %14 : f32 to vector<8x128xf32>
    %1094 = arith.mulf %1093, %927 : vector<8x128xf32>
    %1095 = vector.broadcast %6 : f32 to vector<8x128xf32>
    %1096 = arith.mulf %1095, %967 : vector<8x128xf32>
    %1097 = arith.addf %1094, %1096 : vector<8x128xf32>
    %1098 = vector.broadcast %14 : f32 to vector<8x128xf32>
    %1099 = arith.mulf %1098, %932 : vector<8x128xf32>
    %1100 = vector.broadcast %6 : f32 to vector<8x128xf32>
    %1101 = arith.mulf %1100, %972 : vector<8x128xf32>
    %1102 = arith.addf %1099, %1101 : vector<8x128xf32>
    %1103 = vector.broadcast %6 : f32 to vector<8x128xf32>
    %1104 = arith.mulf %1103, %917 : vector<8x128xf32>
    %1105 = vector.broadcast %14 : f32 to vector<8x128xf32>
    %1106 = arith.mulf %1105, %957 : vector<8x128xf32>
    %1107 = arith.subf %1104, %1106 : vector<8x128xf32>
    %1108 = vector.broadcast %6 : f32 to vector<8x128xf32>
    %1109 = arith.mulf %1108, %922 : vector<8x128xf32>
    %1110 = vector.broadcast %14 : f32 to vector<8x128xf32>
    %1111 = arith.mulf %1110, %962 : vector<8x128xf32>
    %1112 = arith.subf %1109, %1111 : vector<8x128xf32>
    %1113 = vector.broadcast %14 : f32 to vector<8x128xf32>
    %1114 = arith.mulf %1113, %917 : vector<8x128xf32>
    %1115 = vector.broadcast %6 : f32 to vector<8x128xf32>
    %1116 = arith.mulf %1115, %957 : vector<8x128xf32>
    %1117 = arith.addf %1114, %1116 : vector<8x128xf32>
    %1118 = vector.broadcast %14 : f32 to vector<8x128xf32>
    %1119 = arith.mulf %1118, %922 : vector<8x128xf32>
    %1120 = vector.broadcast %6 : f32 to vector<8x128xf32>
    %1121 = arith.mulf %1120, %962 : vector<8x128xf32>
    %1122 = arith.addf %1119, %1121 : vector<8x128xf32>
    %1123 = vector.broadcast %6 : f32 to vector<8x128xf32>
    %1124 = arith.mulf %1123, %937 : vector<8x128xf32>
    %1125 = vector.broadcast %14 : f32 to vector<8x128xf32>
    %1126 = arith.mulf %1125, %977 : vector<8x128xf32>
    %1127 = arith.subf %1124, %1126 : vector<8x128xf32>
    %1128 = vector.broadcast %6 : f32 to vector<8x128xf32>
    %1129 = arith.mulf %1128, %942 : vector<8x128xf32>
    %1130 = vector.broadcast %14 : f32 to vector<8x128xf32>
    %1131 = arith.mulf %1130, %982 : vector<8x128xf32>
    %1132 = arith.subf %1129, %1131 : vector<8x128xf32>
    %1133 = vector.broadcast %14 : f32 to vector<8x128xf32>
    %1134 = arith.mulf %1133, %937 : vector<8x128xf32>
    %1135 = vector.broadcast %6 : f32 to vector<8x128xf32>
    %1136 = arith.mulf %1135, %977 : vector<8x128xf32>
    %1137 = arith.addf %1134, %1136 : vector<8x128xf32>
    %1138 = vector.broadcast %14 : f32 to vector<8x128xf32>
    %1139 = arith.mulf %1138, %942 : vector<8x128xf32>
    %1140 = vector.broadcast %6 : f32 to vector<8x128xf32>
    %1141 = arith.mulf %1140, %982 : vector<8x128xf32>
    %1142 = arith.addf %1139, %1141 : vector<8x128xf32>
    %1143 = vector.broadcast %6 : f32 to vector<8x128xf32>
    %1144 = arith.mulf %1143, %987 : vector<8x128xf32>
    %1145 = vector.broadcast %14 : f32 to vector<8x128xf32>
    %1146 = arith.mulf %1145, %1027 : vector<8x128xf32>
    %1147 = arith.subf %1144, %1146 : vector<8x128xf32>
    %1148 = vector.broadcast %6 : f32 to vector<8x128xf32>
    %1149 = arith.mulf %1148, %992 : vector<8x128xf32>
    %1150 = vector.broadcast %14 : f32 to vector<8x128xf32>
    %1151 = arith.mulf %1150, %1032 : vector<8x128xf32>
    %1152 = arith.subf %1149, %1151 : vector<8x128xf32>
    %1153 = vector.broadcast %14 : f32 to vector<8x128xf32>
    %1154 = arith.mulf %1153, %987 : vector<8x128xf32>
    %1155 = vector.broadcast %6 : f32 to vector<8x128xf32>
    %1156 = arith.mulf %1155, %1027 : vector<8x128xf32>
    %1157 = arith.addf %1154, %1156 : vector<8x128xf32>
    %1158 = vector.broadcast %14 : f32 to vector<8x128xf32>
    %1159 = arith.mulf %1158, %992 : vector<8x128xf32>
    %1160 = vector.broadcast %6 : f32 to vector<8x128xf32>
    %1161 = arith.mulf %1160, %1032 : vector<8x128xf32>
    %1162 = arith.addf %1159, %1161 : vector<8x128xf32>
    %1163 = vector.broadcast %6 : f32 to vector<8x128xf32>
    %1164 = arith.mulf %1163, %1007 : vector<8x128xf32>
    %1165 = vector.broadcast %14 : f32 to vector<8x128xf32>
    %1166 = arith.mulf %1165, %1047 : vector<8x128xf32>
    %1167 = arith.subf %1164, %1166 : vector<8x128xf32>
    %1168 = vector.broadcast %6 : f32 to vector<8x128xf32>
    %1169 = arith.mulf %1168, %1012 : vector<8x128xf32>
    %1170 = vector.broadcast %14 : f32 to vector<8x128xf32>
    %1171 = arith.mulf %1170, %1052 : vector<8x128xf32>
    %1172 = arith.subf %1169, %1171 : vector<8x128xf32>
    %1173 = vector.broadcast %14 : f32 to vector<8x128xf32>
    %1174 = arith.mulf %1173, %1007 : vector<8x128xf32>
    %1175 = vector.broadcast %6 : f32 to vector<8x128xf32>
    %1176 = arith.mulf %1175, %1047 : vector<8x128xf32>
    %1177 = arith.addf %1174, %1176 : vector<8x128xf32>
    %1178 = vector.broadcast %14 : f32 to vector<8x128xf32>
    %1179 = arith.mulf %1178, %1012 : vector<8x128xf32>
    %1180 = vector.broadcast %6 : f32 to vector<8x128xf32>
    %1181 = arith.mulf %1180, %1052 : vector<8x128xf32>
    %1182 = arith.addf %1179, %1181 : vector<8x128xf32>
    %1183 = vector.broadcast %6 : f32 to vector<8x128xf32>
    %1184 = arith.mulf %1183, %997 : vector<8x128xf32>
    %1185 = vector.broadcast %14 : f32 to vector<8x128xf32>
    %1186 = arith.mulf %1185, %1037 : vector<8x128xf32>
    %1187 = arith.subf %1184, %1186 : vector<8x128xf32>
    %1188 = vector.broadcast %6 : f32 to vector<8x128xf32>
    %1189 = arith.mulf %1188, %1002 : vector<8x128xf32>
    %1190 = vector.broadcast %14 : f32 to vector<8x128xf32>
    %1191 = arith.mulf %1190, %1042 : vector<8x128xf32>
    %1192 = arith.subf %1189, %1191 : vector<8x128xf32>
    %1193 = vector.broadcast %14 : f32 to vector<8x128xf32>
    %1194 = arith.mulf %1193, %997 : vector<8x128xf32>
    %1195 = vector.broadcast %6 : f32 to vector<8x128xf32>
    %1196 = arith.mulf %1195, %1037 : vector<8x128xf32>
    %1197 = arith.addf %1194, %1196 : vector<8x128xf32>
    %1198 = vector.broadcast %14 : f32 to vector<8x128xf32>
    %1199 = arith.mulf %1198, %1002 : vector<8x128xf32>
    %1200 = vector.broadcast %6 : f32 to vector<8x128xf32>
    %1201 = arith.mulf %1200, %1042 : vector<8x128xf32>
    %1202 = arith.addf %1199, %1201 : vector<8x128xf32>
    %1203 = vector.broadcast %6 : f32 to vector<8x128xf32>
    %1204 = arith.mulf %1203, %1017 : vector<8x128xf32>
    %1205 = vector.broadcast %14 : f32 to vector<8x128xf32>
    %1206 = arith.mulf %1205, %1057 : vector<8x128xf32>
    %1207 = arith.subf %1204, %1206 : vector<8x128xf32>
    %1208 = vector.broadcast %6 : f32 to vector<8x128xf32>
    %1209 = arith.mulf %1208, %1022 : vector<8x128xf32>
    %1210 = vector.broadcast %14 : f32 to vector<8x128xf32>
    %1211 = arith.mulf %1210, %1062 : vector<8x128xf32>
    %1212 = arith.subf %1209, %1211 : vector<8x128xf32>
    %1213 = vector.broadcast %14 : f32 to vector<8x128xf32>
    %1214 = arith.mulf %1213, %1017 : vector<8x128xf32>
    %1215 = vector.broadcast %6 : f32 to vector<8x128xf32>
    %1216 = arith.mulf %1215, %1057 : vector<8x128xf32>
    %1217 = arith.addf %1214, %1216 : vector<8x128xf32>
    %1218 = vector.broadcast %14 : f32 to vector<8x128xf32>
    %1219 = arith.mulf %1218, %1022 : vector<8x128xf32>
    %1220 = vector.broadcast %6 : f32 to vector<8x128xf32>
    %1221 = arith.mulf %1220, %1062 : vector<8x128xf32>
    %1222 = arith.addf %1219, %1221 : vector<8x128xf32>
    %1223 = vector.broadcast %7 : f32 to vector<8x128xf32>
    %1224 = arith.mulf %1223, %1067 : vector<8x128xf32>
    %1225 = vector.broadcast %15 : f32 to vector<8x128xf32>
    %1226 = arith.mulf %1225, %1147 : vector<8x128xf32>
    %1227 = arith.subf %1224, %1226 : vector<8x128xf32>
    %1228 = vector.broadcast %7 : f32 to vector<8x128xf32>
    %1229 = arith.mulf %1228, %1072 : vector<8x128xf32>
    %1230 = vector.broadcast %15 : f32 to vector<8x128xf32>
    %1231 = arith.mulf %1230, %1152 : vector<8x128xf32>
    %1232 = arith.subf %1229, %1231 : vector<8x128xf32>
    %1233 = vector.broadcast %15 : f32 to vector<8x128xf32>
    %1234 = arith.mulf %1233, %1067 : vector<8x128xf32>
    %1235 = vector.broadcast %7 : f32 to vector<8x128xf32>
    %1236 = arith.mulf %1235, %1147 : vector<8x128xf32>
    %1237 = arith.addf %1234, %1236 : vector<8x128xf32>
    %1238 = vector.broadcast %15 : f32 to vector<8x128xf32>
    %1239 = arith.mulf %1238, %1072 : vector<8x128xf32>
    %1240 = vector.broadcast %7 : f32 to vector<8x128xf32>
    %1241 = arith.mulf %1240, %1152 : vector<8x128xf32>
    %1242 = arith.addf %1239, %1241 : vector<8x128xf32>
    %1243 = vector.broadcast %7 : f32 to vector<8x128xf32>
    %1244 = arith.mulf %1243, %1087 : vector<8x128xf32>
    %1245 = vector.broadcast %15 : f32 to vector<8x128xf32>
    %1246 = arith.mulf %1245, %1167 : vector<8x128xf32>
    %1247 = arith.subf %1244, %1246 : vector<8x128xf32>
    %1248 = vector.broadcast %7 : f32 to vector<8x128xf32>
    %1249 = arith.mulf %1248, %1092 : vector<8x128xf32>
    %1250 = vector.broadcast %15 : f32 to vector<8x128xf32>
    %1251 = arith.mulf %1250, %1172 : vector<8x128xf32>
    %1252 = arith.subf %1249, %1251 : vector<8x128xf32>
    %1253 = vector.broadcast %15 : f32 to vector<8x128xf32>
    %1254 = arith.mulf %1253, %1087 : vector<8x128xf32>
    %1255 = vector.broadcast %7 : f32 to vector<8x128xf32>
    %1256 = arith.mulf %1255, %1167 : vector<8x128xf32>
    %1257 = arith.addf %1254, %1256 : vector<8x128xf32>
    %1258 = vector.broadcast %15 : f32 to vector<8x128xf32>
    %1259 = arith.mulf %1258, %1092 : vector<8x128xf32>
    %1260 = vector.broadcast %7 : f32 to vector<8x128xf32>
    %1261 = arith.mulf %1260, %1172 : vector<8x128xf32>
    %1262 = arith.addf %1259, %1261 : vector<8x128xf32>
    %1263 = vector.broadcast %7 : f32 to vector<8x128xf32>
    %1264 = arith.mulf %1263, %1107 : vector<8x128xf32>
    %1265 = vector.broadcast %15 : f32 to vector<8x128xf32>
    %1266 = arith.mulf %1265, %1187 : vector<8x128xf32>
    %1267 = arith.subf %1264, %1266 : vector<8x128xf32>
    %1268 = vector.broadcast %7 : f32 to vector<8x128xf32>
    %1269 = arith.mulf %1268, %1112 : vector<8x128xf32>
    %1270 = vector.broadcast %15 : f32 to vector<8x128xf32>
    %1271 = arith.mulf %1270, %1192 : vector<8x128xf32>
    %1272 = arith.subf %1269, %1271 : vector<8x128xf32>
    %1273 = vector.broadcast %15 : f32 to vector<8x128xf32>
    %1274 = arith.mulf %1273, %1107 : vector<8x128xf32>
    %1275 = vector.broadcast %7 : f32 to vector<8x128xf32>
    %1276 = arith.mulf %1275, %1187 : vector<8x128xf32>
    %1277 = arith.addf %1274, %1276 : vector<8x128xf32>
    %1278 = vector.broadcast %15 : f32 to vector<8x128xf32>
    %1279 = arith.mulf %1278, %1112 : vector<8x128xf32>
    %1280 = vector.broadcast %7 : f32 to vector<8x128xf32>
    %1281 = arith.mulf %1280, %1192 : vector<8x128xf32>
    %1282 = arith.addf %1279, %1281 : vector<8x128xf32>
    %1283 = vector.broadcast %7 : f32 to vector<8x128xf32>
    %1284 = arith.mulf %1283, %1127 : vector<8x128xf32>
    %1285 = vector.broadcast %15 : f32 to vector<8x128xf32>
    %1286 = arith.mulf %1285, %1207 : vector<8x128xf32>
    %1287 = arith.subf %1284, %1286 : vector<8x128xf32>
    %1288 = vector.broadcast %7 : f32 to vector<8x128xf32>
    %1289 = arith.mulf %1288, %1132 : vector<8x128xf32>
    %1290 = vector.broadcast %15 : f32 to vector<8x128xf32>
    %1291 = arith.mulf %1290, %1212 : vector<8x128xf32>
    %1292 = arith.subf %1289, %1291 : vector<8x128xf32>
    %1293 = vector.broadcast %15 : f32 to vector<8x128xf32>
    %1294 = arith.mulf %1293, %1127 : vector<8x128xf32>
    %1295 = vector.broadcast %7 : f32 to vector<8x128xf32>
    %1296 = arith.mulf %1295, %1207 : vector<8x128xf32>
    %1297 = arith.addf %1294, %1296 : vector<8x128xf32>
    %1298 = vector.broadcast %15 : f32 to vector<8x128xf32>
    %1299 = arith.mulf %1298, %1132 : vector<8x128xf32>
    %1300 = vector.broadcast %7 : f32 to vector<8x128xf32>
    %1301 = arith.mulf %1300, %1212 : vector<8x128xf32>
    %1302 = arith.addf %1299, %1301 : vector<8x128xf32>
    %1303 = vector.broadcast %7 : f32 to vector<8x128xf32>
    %1304 = arith.mulf %1303, %1077 : vector<8x128xf32>
    %1305 = vector.broadcast %15 : f32 to vector<8x128xf32>
    %1306 = arith.mulf %1305, %1157 : vector<8x128xf32>
    %1307 = arith.subf %1304, %1306 : vector<8x128xf32>
    %1308 = vector.broadcast %7 : f32 to vector<8x128xf32>
    %1309 = arith.mulf %1308, %1082 : vector<8x128xf32>
    %1310 = vector.broadcast %15 : f32 to vector<8x128xf32>
    %1311 = arith.mulf %1310, %1162 : vector<8x128xf32>
    %1312 = arith.subf %1309, %1311 : vector<8x128xf32>
    %1313 = vector.broadcast %15 : f32 to vector<8x128xf32>
    %1314 = arith.mulf %1313, %1077 : vector<8x128xf32>
    %1315 = vector.broadcast %7 : f32 to vector<8x128xf32>
    %1316 = arith.mulf %1315, %1157 : vector<8x128xf32>
    %1317 = arith.addf %1314, %1316 : vector<8x128xf32>
    %1318 = vector.broadcast %15 : f32 to vector<8x128xf32>
    %1319 = arith.mulf %1318, %1082 : vector<8x128xf32>
    %1320 = vector.broadcast %7 : f32 to vector<8x128xf32>
    %1321 = arith.mulf %1320, %1162 : vector<8x128xf32>
    %1322 = arith.addf %1319, %1321 : vector<8x128xf32>
    %1323 = vector.broadcast %7 : f32 to vector<8x128xf32>
    %1324 = arith.mulf %1323, %1097 : vector<8x128xf32>
    %1325 = vector.broadcast %15 : f32 to vector<8x128xf32>
    %1326 = arith.mulf %1325, %1177 : vector<8x128xf32>
    %1327 = arith.subf %1324, %1326 : vector<8x128xf32>
    %1328 = vector.broadcast %7 : f32 to vector<8x128xf32>
    %1329 = arith.mulf %1328, %1102 : vector<8x128xf32>
    %1330 = vector.broadcast %15 : f32 to vector<8x128xf32>
    %1331 = arith.mulf %1330, %1182 : vector<8x128xf32>
    %1332 = arith.subf %1329, %1331 : vector<8x128xf32>
    %1333 = vector.broadcast %15 : f32 to vector<8x128xf32>
    %1334 = arith.mulf %1333, %1097 : vector<8x128xf32>
    %1335 = vector.broadcast %7 : f32 to vector<8x128xf32>
    %1336 = arith.mulf %1335, %1177 : vector<8x128xf32>
    %1337 = arith.addf %1334, %1336 : vector<8x128xf32>
    %1338 = vector.broadcast %15 : f32 to vector<8x128xf32>
    %1339 = arith.mulf %1338, %1102 : vector<8x128xf32>
    %1340 = vector.broadcast %7 : f32 to vector<8x128xf32>
    %1341 = arith.mulf %1340, %1182 : vector<8x128xf32>
    %1342 = arith.addf %1339, %1341 : vector<8x128xf32>
    %1343 = vector.broadcast %7 : f32 to vector<8x128xf32>
    %1344 = arith.mulf %1343, %1117 : vector<8x128xf32>
    %1345 = vector.broadcast %15 : f32 to vector<8x128xf32>
    %1346 = arith.mulf %1345, %1197 : vector<8x128xf32>
    %1347 = arith.subf %1344, %1346 : vector<8x128xf32>
    %1348 = vector.broadcast %7 : f32 to vector<8x128xf32>
    %1349 = arith.mulf %1348, %1122 : vector<8x128xf32>
    %1350 = vector.broadcast %15 : f32 to vector<8x128xf32>
    %1351 = arith.mulf %1350, %1202 : vector<8x128xf32>
    %1352 = arith.subf %1349, %1351 : vector<8x128xf32>
    %1353 = vector.broadcast %15 : f32 to vector<8x128xf32>
    %1354 = arith.mulf %1353, %1117 : vector<8x128xf32>
    %1355 = vector.broadcast %7 : f32 to vector<8x128xf32>
    %1356 = arith.mulf %1355, %1197 : vector<8x128xf32>
    %1357 = arith.addf %1354, %1356 : vector<8x128xf32>
    %1358 = vector.broadcast %15 : f32 to vector<8x128xf32>
    %1359 = arith.mulf %1358, %1122 : vector<8x128xf32>
    %1360 = vector.broadcast %7 : f32 to vector<8x128xf32>
    %1361 = arith.mulf %1360, %1202 : vector<8x128xf32>
    %1362 = arith.addf %1359, %1361 : vector<8x128xf32>
    %1363 = vector.broadcast %7 : f32 to vector<8x128xf32>
    %1364 = arith.mulf %1363, %1137 : vector<8x128xf32>
    %1365 = vector.broadcast %15 : f32 to vector<8x128xf32>
    %1366 = arith.mulf %1365, %1217 : vector<8x128xf32>
    %1367 = arith.subf %1364, %1366 : vector<8x128xf32>
    %1368 = vector.broadcast %7 : f32 to vector<8x128xf32>
    %1369 = arith.mulf %1368, %1142 : vector<8x128xf32>
    %1370 = vector.broadcast %15 : f32 to vector<8x128xf32>
    %1371 = arith.mulf %1370, %1222 : vector<8x128xf32>
    %1372 = arith.subf %1369, %1371 : vector<8x128xf32>
    %1373 = vector.broadcast %15 : f32 to vector<8x128xf32>
    %1374 = arith.mulf %1373, %1137 : vector<8x128xf32>
    %1375 = vector.broadcast %7 : f32 to vector<8x128xf32>
    %1376 = arith.mulf %1375, %1217 : vector<8x128xf32>
    %1377 = arith.addf %1374, %1376 : vector<8x128xf32>
    %1378 = vector.broadcast %15 : f32 to vector<8x128xf32>
    %1379 = arith.mulf %1378, %1142 : vector<8x128xf32>
    %1380 = vector.broadcast %7 : f32 to vector<8x128xf32>
    %1381 = arith.mulf %1380, %1222 : vector<8x128xf32>
    %1382 = arith.addf %1379, %1381 : vector<8x128xf32>
    %1383 = arith.mulf %1227, %1227 : vector<8x128xf32>
    %1384 = arith.mulf %1232, %1232 : vector<8x128xf32>
    %1385 = arith.addf %1383, %1384 : vector<8x128xf32>
    %1386 = arith.mulf %1247, %1247 : vector<8x128xf32>
    %1387 = arith.mulf %1252, %1252 : vector<8x128xf32>
    %1388 = arith.addf %1386, %1387 : vector<8x128xf32>
    %1389 = arith.mulf %1267, %1267 : vector<8x128xf32>
    %1390 = arith.mulf %1272, %1272 : vector<8x128xf32>
    %1391 = arith.addf %1389, %1390 : vector<8x128xf32>
    %1392 = arith.mulf %1287, %1287 : vector<8x128xf32>
    %1393 = arith.mulf %1292, %1292 : vector<8x128xf32>
    %1394 = arith.addf %1392, %1393 : vector<8x128xf32>
    %1395 = arith.mulf %1307, %1307 : vector<8x128xf32>
    %1396 = arith.mulf %1312, %1312 : vector<8x128xf32>
    %1397 = arith.addf %1395, %1396 : vector<8x128xf32>
    %1398 = arith.mulf %1327, %1327 : vector<8x128xf32>
    %1399 = arith.mulf %1332, %1332 : vector<8x128xf32>
    %1400 = arith.addf %1398, %1399 : vector<8x128xf32>
    %1401 = arith.mulf %1347, %1347 : vector<8x128xf32>
    %1402 = arith.mulf %1352, %1352 : vector<8x128xf32>
    %1403 = arith.addf %1401, %1402 : vector<8x128xf32>
    %1404 = arith.mulf %1367, %1367 : vector<8x128xf32>
    %1405 = arith.mulf %1372, %1372 : vector<8x128xf32>
    %1406 = arith.addf %1404, %1405 : vector<8x128xf32>
    %1407 = arith.mulf %1237, %1237 : vector<8x128xf32>
    %1408 = arith.mulf %1242, %1242 : vector<8x128xf32>
    %1409 = arith.addf %1407, %1408 : vector<8x128xf32>
    %1410 = arith.mulf %1257, %1257 : vector<8x128xf32>
    %1411 = arith.mulf %1262, %1262 : vector<8x128xf32>
    %1412 = arith.addf %1410, %1411 : vector<8x128xf32>
    %1413 = arith.mulf %1277, %1277 : vector<8x128xf32>
    %1414 = arith.mulf %1282, %1282 : vector<8x128xf32>
    %1415 = arith.addf %1413, %1414 : vector<8x128xf32>
    %1416 = arith.mulf %1297, %1297 : vector<8x128xf32>
    %1417 = arith.mulf %1302, %1302 : vector<8x128xf32>
    %1418 = arith.addf %1416, %1417 : vector<8x128xf32>
    %1419 = arith.mulf %1317, %1317 : vector<8x128xf32>
    %1420 = arith.mulf %1322, %1322 : vector<8x128xf32>
    %1421 = arith.addf %1419, %1420 : vector<8x128xf32>
    %1422 = arith.mulf %1337, %1337 : vector<8x128xf32>
    %1423 = arith.mulf %1342, %1342 : vector<8x128xf32>
    %1424 = arith.addf %1422, %1423 : vector<8x128xf32>
    %1425 = arith.mulf %1357, %1357 : vector<8x128xf32>
    %1426 = arith.mulf %1362, %1362 : vector<8x128xf32>
    %1427 = arith.addf %1425, %1426 : vector<8x128xf32>
    %1428 = arith.mulf %1377, %1377 : vector<8x128xf32>
    %1429 = arith.mulf %1382, %1382 : vector<8x128xf32>
    %1430 = arith.addf %1428, %1429 : vector<8x128xf32>
    %1431 = arith.addf %1385, %1391 : vector<8x128xf32>
    %1432 = arith.addf %1388, %1394 : vector<8x128xf32>
    %1433 = arith.addf %1431, %1397 : vector<8x128xf32>
    %1434 = arith.addf %1432, %1400 : vector<8x128xf32>
    %1435 = arith.addf %1433, %1403 : vector<8x128xf32>
    %1436 = arith.addf %1434, %1406 : vector<8x128xf32>
    %1437 = arith.addf %1435, %1409 : vector<8x128xf32>
    %1438 = arith.addf %1436, %1412 : vector<8x128xf32>
    %1439 = arith.addf %1437, %1415 : vector<8x128xf32>
    %1440 = arith.addf %1438, %1418 : vector<8x128xf32>
    %1441 = arith.addf %1439, %1421 : vector<8x128xf32>
    %1442 = arith.addf %1440, %1424 : vector<8x128xf32>
    %1443 = arith.addf %1441, %1427 : vector<8x128xf32>
    %1444 = arith.addf %1442, %1430 : vector<8x128xf32>
    %1445 = arith.subf %1443, %1444 : vector<8x128xf32>
    %c0_40 = arith.constant 0 : index
    %c0_41 = arith.constant 0 : index
    %c0_42 = arith.constant 0 : index
    %1446 = vector.load %arg4[%c0_40, %c0_41, %c0_42] : memref<4x8x128xf32, #tpu.memory_space<vmem>>, vector<1x8x128xf32>
    %1447 = vector.shape_cast %1446 : vector<1x8x128xf32> to vector<8x128xf32>
    %1448 = vector.shape_cast %1445 : vector<8x128xf32> to vector<1x8x128xf32>
    tpu.vector_store %arg4[%c0_40, %c0_41, %c0_42], %1448 {strides = array<i32>} : memref<4x8x128xf32, #tpu.memory_space<vmem>>, vector<1x8x128xf32>,
    %1449 = arith.addf %1385, %1388 : vector<8x128xf32>
    %1450 = arith.addf %1391, %1394 : vector<8x128xf32>
    %1451 = arith.addf %1449, %1397 : vector<8x128xf32>
    %1452 = arith.addf %1451, %1400 : vector<8x128xf32>
    %1453 = arith.addf %1450, %1403 : vector<8x128xf32>
    %1454 = arith.addf %1453, %1406 : vector<8x128xf32>
    %1455 = arith.addf %1452, %1409 : vector<8x128xf32>
    %1456 = arith.addf %1455, %1412 : vector<8x128xf32>
    %1457 = arith.addf %1454, %1415 : vector<8x128xf32>
    %1458 = arith.addf %1457, %1418 : vector<8x128xf32>
    %1459 = arith.addf %1456, %1421 : vector<8x128xf32>
    %1460 = arith.addf %1459, %1424 : vector<8x128xf32>
    %1461 = arith.addf %1458, %1427 : vector<8x128xf32>
    %1462 = arith.addf %1461, %1430 : vector<8x128xf32>
    %1463 = arith.subf %1460, %1462 : vector<8x128xf32>
    %c1_43 = arith.constant 1 : index
    %c0_44 = arith.constant 0 : index
    %c0_45 = arith.constant 0 : index
    %1464 = vector.load %arg4[%c1_43, %c0_44, %c0_45] : memref<4x8x128xf32, #tpu.memory_space<vmem>>, vector<1x8x128xf32>
    %1465 = vector.shape_cast %1464 : vector<1x8x128xf32> to vector<8x128xf32>
    %1466 = vector.shape_cast %1463 : vector<8x128xf32> to vector<1x8x128xf32>
    tpu.vector_store %arg4[%c1_43, %c0_44, %c0_45], %1466 {strides = array<i32>} : memref<4x8x128xf32, #tpu.memory_space<vmem>>, vector<1x8x128xf32>,
    %1467 = arith.addf %1385, %1388 : vector<8x128xf32>
    %1468 = arith.addf %1467, %1391 : vector<8x128xf32>
    %1469 = arith.addf %1468, %1394 : vector<8x128xf32>
    %1470 = arith.addf %1397, %1400 : vector<8x128xf32>
    %1471 = arith.addf %1470, %1403 : vector<8x128xf32>
    %1472 = arith.addf %1471, %1406 : vector<8x128xf32>
    %1473 = arith.addf %1469, %1409 : vector<8x128xf32>
    %1474 = arith.addf %1473, %1412 : vector<8x128xf32>
    %1475 = arith.addf %1474, %1415 : vector<8x128xf32>
    %1476 = arith.addf %1475, %1418 : vector<8x128xf32>
    %1477 = arith.addf %1472, %1421 : vector<8x128xf32>
    %1478 = arith.addf %1477, %1424 : vector<8x128xf32>
    %1479 = arith.addf %1478, %1427 : vector<8x128xf32>
    %1480 = arith.addf %1479, %1430 : vector<8x128xf32>
    %1481 = arith.subf %1476, %1480 : vector<8x128xf32>
    %c2_46 = arith.constant 2 : index
    %c0_47 = arith.constant 0 : index
    %c0_48 = arith.constant 0 : index
    %1482 = vector.load %arg4[%c2_46, %c0_47, %c0_48] : memref<4x8x128xf32, #tpu.memory_space<vmem>>, vector<1x8x128xf32>
    %1483 = vector.shape_cast %1482 : vector<1x8x128xf32> to vector<8x128xf32>
    %1484 = vector.shape_cast %1481 : vector<8x128xf32> to vector<1x8x128xf32>
    tpu.vector_store %arg4[%c2_46, %c0_47, %c0_48], %1484 {strides = array<i32>} : memref<4x8x128xf32, #tpu.memory_space<vmem>>, vector<1x8x128xf32>,
    %1485 = arith.addf %1385, %1388 : vector<8x128xf32>
    %1486 = arith.addf %1485, %1391 : vector<8x128xf32>
    %1487 = arith.addf %1486, %1394 : vector<8x128xf32>
    %1488 = arith.addf %1487, %1397 : vector<8x128xf32>
    %1489 = arith.addf %1488, %1400 : vector<8x128xf32>
    %1490 = arith.addf %1489, %1403 : vector<8x128xf32>
    %1491 = arith.addf %1490, %1406 : vector<8x128xf32>
    %1492 = arith.addf %1409, %1412 : vector<8x128xf32>
    %1493 = arith.addf %1492, %1415 : vector<8x128xf32>
    %1494 = arith.addf %1493, %1418 : vector<8x128xf32>
    %1495 = arith.addf %1494, %1421 : vector<8x128xf32>
    %1496 = arith.addf %1495, %1424 : vector<8x128xf32>
    %1497 = arith.addf %1496, %1427 : vector<8x128xf32>
    %1498 = arith.addf %1497, %1430 : vector<8x128xf32>
    %1499 = arith.subf %1491, %1498 : vector<8x128xf32>
    %c3_49 = arith.constant 3 : index
    %c0_50 = arith.constant 0 : index
    %c0_51 = arith.constant 0 : index
    %1500 = vector.load %arg4[%c3_49, %c0_50, %c0_51] : memref<4x8x128xf32, #tpu.memory_space<vmem>>, vector<1x8x128xf32>
    %1501 = vector.shape_cast %1500 : vector<1x8x128xf32> to vector<8x128xf32>
    %1502 = vector.shape_cast %1499 : vector<8x128xf32> to vector<1x8x128xf32>
    tpu.vector_store %arg4[%c3_49, %c0_50, %c0_51], %1502 {strides = array<i32>} : memref<4x8x128xf32, #tpu.memory_space<vmem>>, vector<1x8x128xf32>,
    return
  }
  func.func @transform_0(%arg0: i32) -> (i32, i32, i32) {
    %c0_i32 = arith.constant 0 : i32
    %c0_i32_0 = arith.constant 0 : i32
    %c0_i32_1 = arith.constant 0 : i32
    return %c0_i32, %arg0, %c0_i32_0 : i32, i32, i32
  }
  func.func @transform_1(%arg0: i32) -> (i32, i32) {
    %c0_i32 = arith.constant 0 : i32
    %c0_i32_0 = arith.constant 0 : i32
    %c0_i32_1 = arith.constant 0 : i32
    return %c0_i32, %c0_i32_0 : i32, i32
  }
  func.func @transform_2(%arg0: i32) -> (i32, i32) {
    %c0_i32 = arith.constant 0 : i32
    %c0_i32_0 = arith.constant 0 : i32
    %c0_i32_1 = arith.constant 0 : i32
    return %c0_i32, %c0_i32_0 : i32, i32
  }
  func.func @transform_3(%arg0: i32) -> (i32, i32, i32) {
    %c0_i32 = arith.constant 0 : i32
    %c0_i32_0 = arith.constant 0 : i32
    %c0_i32_1 = arith.constant 0 : i32
    return %c0_i32, %arg0, %c0_i32_0 : i32, i32, i32
  }
}

</mosaic_0001>

<bundles_post_ra>
// kernel: quanv2d_forward.1
= control target key start
LH: loop header
LB: loop body
LE: loop exit
PB: predicated region body
PF: predicated region fallthrough
CT: control target
= control target key end

     0   :  { %8 = vsyncpa [#allocation3], 0  ;;  %s10153_s0 = inlined_call_operand.vmem [shape: f32[16,8,128], index: 0, kind: input, shape index: {}]   ;;  %s10154_s1 = inlined_call_operand.vmem [shape: f32[1,8], index: 1, kind: input, shape index: {}]   ;;  %s10155_s2 = inlined_call_operand.vmem [shape: f32[1,8], index: 2, kind: input, shape index: {}]   ;;  %s10156_s3 = inlined_call_operand.vmem [shape: f32[4,8,128], index: 3, kind: output, shape index: {}]  }
   0x1   :  { %s17_s14 = sshll.u32 %s10154_s1, 4  ;;  %s18_s14 = int_to_ptr.vmem [resolvable:$true] %s17_s14 }
   0x2   :  { %9 = vsyncpa [#allocation5], 0  ;;  %s26_s17 = sshll.u32 %s10155_s2, 4  ;;  %s6192_s18 = smov [#allocation2]   ;;  %s27_s17 = int_to_ptr.vmem [resolvable:$true] %s26_s17 }
   0x3   :  { %20 = dma.vmem_to_smem %s18_s14, 16, %s6192_s18, [#allocation3]  }
   0x4   :  { %s6193_s19 = smov [#allocation4]  }
   0x5   :  { %29 = dma.vmem_to_smem %s27_s17, 16, %s6193_s19, [#allocation5]  }
   0x6   :  { %6188 = dma.done.wait [#allocation3], 16  }
   0x7   :  { %6189 = vsyncadd [#allocation3], 4294967280 }
   0x8   :  { %6190 = dma.done.wait [#allocation5], 16  }
   0x9   :  { %6191 = vsyncadd [#allocation5], 4294967280 }
   0xa   :  { %38 = sfence }
   0xb   :  { %v55_v0 = vld [vmem:[%s10153_s0] sm:$0xff]  ;;  %v56_v1 = vld [vmem:[%s10153_s0 + $0x8] sm:$0xff]  ;;  %v57_v5 = vld [vmem:[%s10153_s0 + $0x10] sm:$0xff]  ;;  %v10170_v27 = vmov 683565275   ;;  %s9133_s22 = sld [smem:[#allocation4]] }
   0xc   :  { %v6233_v2 = vmul.f32 0.5, %v55_v0  ;;  %v6235_v3 = vmul.f32 0.5, %v56_v1  ;;  %v6245_v10 = vmul.f32 0.5, %v57_v5  ;;  %v10167_v29 = vmov 2475754826   ;;  %s9195_s2 = sld [smem:[#allocation2 + $0x1]] }
   0xd   :  { %v10165_v31 = vmov 2131351028   ;;  %v10163_v33 = vmov 2102212464   ;;  %v10161_v35 = vmov 920167782  }
   0xe   :  { %10289 = vst [vmem:[#allocation8_spill] sm:$0xff] %v6233_v2  ;;  %v87_v4 = vand.u32 2147483647, %v6233_v2  ;;  %v90_v6 = vand.u32 2139095040, %v6233_v2  ;;  %v244_v9 = vand.u32 2139095040, %v6235_v3  ;;  %v398_v18 = vand.u32 2139095040, %v6245_v10 }
   0xf   :  { %10290 = vst [vmem:[#allocation9_spill] sm:$0xff] %v6235_v3  ;;  %v241_v16 = vand.u32 2147483647, %v6235_v3  ;;  %v10159_v42 = vmov 1326507024   ;;  %s9200_s23 = sld [smem:[#allocation4 + $0x1]] }
  0x10   :  { %v94_v7 = vand.u32 8388607, %v87_v4  ;;  %v91_v8 = vshrl.u32 %v90_v6, 23  ;;  %10291 = vst [vmem:[#allocation10_spill] sm:$0xff] %v6245_v10  ;;  %v245_v13 = vshrl.u32 %v244_v9, 23  ;;  %v6258_v25 = vshrl.u32 %v398_v18, 23 }
  0x11   :  { %v6256_v24 = vand.u32 8388607, %v241_v16  ;;  %s9207_s24 = sld [smem:[#allocation2 + $0x2]] }
  0x12   :  { %v95_v11 = vor.u32 8388608, %v94_v7  ;;  %v6056_v12 = vadd.s32 4294967169, %v91_v8  ;;  %v6059_v17 = vadd.s32 4294967169, %v245_v13  ;;  %s9234_s25 = sld [smem:[#allocation4 + $0x2]] }
  0x13   :  { %v249_v62 = vor.u32 8388608, %v6256_v24  ;;  %s9270_s26 = sld [smem:[#allocation2 + $0x3]] }
  0x14   :  { %v97_v14 = vadd.s32 1, %v6056_v12  ;;  %v6247_v15 = vshll.u32 %v95_v11, 8  ;;  %v251_v20 = vadd.s32 1, %v6059_v17  ;;  %s9276_s27 = sld [smem:[#allocation4 + $0x3]] }
  0x15   :  { %s9291_s28 = sld [smem:[#allocation2 + $0x4]] }
  0x16   :  { %vm98_vm0 = vcmp.gt.s32.totalorder %v97_v14, 0  ;;  %v6252_v23 = vand.u32 65535, %v6247_v15  ;;  %vm252_vm2 = vcmp.gt.s32.totalorder %v251_v20, 0  ;;  %v137_v61 = vshrl.u32 %v6247_v15, 16  ;;  %s9332_s29 = sld [smem:[#allocation4 + $0x4]] }
  0x17   :  { %v99_v19 = vsel %vm98_vm0, %v97_v14, 0  ;;  %v253_v47 = vsel %vm252_vm2, %v251_v20, 0  ;;  %s9481_s30 = sld [smem:[#allocation2 + $0x5]] }
  0x18   :  { %v100_v21 = vshrl.u32 %v99_v19, 5  ;;  %v101_v22 = vand.u32 31, %v99_v19  ;;  %v6271_v50 = vand.u32 31, %v253_v47  ;;  %v6286_v5 = vshrl.u32 %v253_v47, 5  ;;  %s9491_s4 = sld [smem:[#allocation4 + $0x5]] }
  0x19   :  { %s9509_s5 = sld [smem:[#allocation2 + $0x6]] }
  0x1a   :  { %v102_v26 = vsub.s32 32, %v101_v22  ;;  %v104_v28 = vshll.u32 %v10170_v27, %v101_v22  ;;  %v107_v30 = vshll.u32 %v10167_v29, %v101_v22  ;;  %v110_v32 = vshll.u32 %v10165_v31, %v101_v22  ;;  %s9698_s6 = sld [smem:[#allocation4 + $0x6]] }
  0x1b   :  { %v113_v34 = vshll.u32 %v10163_v33, %v101_v22  ;;  %v116_v36 = vshll.u32 %v10161_v35, %v101_v22  ;;  %vm119_vm1 = vcmp.lt.s32.totalorder %v100_v21, 1  ;;  %vm120_vm3 = vcmp.lt.s32.totalorder %v100_v21, 2  ;;  %s9885_s7 = sld [smem:[#allocation2 + $0x7]] }
  0x1c   :  { %v103_v37 = vshrl.u32 %v10170_v27, %v102_v26  ;;  %v105_v38 = vshrl.u32 %v10167_v29, %v102_v26  ;;  %v108_v39 = vshrl.u32 %v10165_v31, %v102_v26  ;;  %v111_v40 = vshrl.u32 %v10163_v33, %v102_v26  ;;  %s9895_s8 = sld [smem:[#allocation4 + $0x7]] }
  0x1d   :  { %v114_v41 = vshrl.u32 %v10161_v35, %v102_v26  ;;  %v117_v43 = vshrl.u32 %v10159_v42, %v102_v26  ;;  %vm122_vm4 = vcmp.lt.s32.totalorder %v100_v21, 4  ;;  %vm121_vm5 = vcmp.lt.s32.totalorder %v100_v21, 3 }
  0x1e   :  { %v106_v44 = vor.u32 %v105_v38, %v104_v28  ;;  %v109_v45 = vor.u32 %v108_v39, %v107_v30  ;;  %v112_v46 = vor.u32 %v111_v40, %v110_v32  ;;  %v6277_v58 = vsub.s32 32, %v6271_v50 }
  0x1f   :  { %v115_v48 = vor.u32 %v114_v41, %v113_v34  ;;  %v118_v49 = vor.u32 %v117_v43, %v116_v36  ;;  %v258_v11 = vshll.u32 %v10170_v27, %v6271_v50  ;;  %v261_v13 = vshll.u32 %v10167_v29, %v6271_v50 }
  0x20   :  { %v123_v51 = vsel %vm119_vm1, %v103_v37, %v106_v44  ;;  %v124_v52 = vsel %vm122_vm4, %v112_v46, 2102212464  ;;  %v127_v53 = vsel %vm119_vm1, %v106_v44, %v109_v45  ;;  %v131_v54 = vsel %vm119_vm1, %v109_v45, %v112_v46 }
  0x21   :  { %v125_v55 = vsel %vm121_vm5, %v109_v45, %v124_v52  ;;  %v128_v56 = vsel %vm122_vm4, %v115_v48, 920167782  ;;  %v132_v57 = vsel %vm122_vm4, %v118_v49, 1326507024  ;;  %v259_v12 = vshrl.u32 %v10167_v29, %v6277_v58 }
  0x22   :  { %v129_v59 = vsel %vm121_vm5, %v112_v46, %v128_v56  ;;  %v133_v60 = vsel %vm121_vm5, %v115_v48, %v132_v57  ;;  %v6282_v63 = vsel %vm120_vm3, %v123_v51, %v125_v55  ;;  %v262_v14 = vshrl.u32 %v10165_v31, %v6277_v58 }
  0x23   :  { %v130_v0 = vsel %vm120_vm3, %v127_v53, %v129_v59  ;;  %v134_v1 = vsel %vm120_vm3, %v131_v54, %v133_v60  ;;  %v264_v20 = vshll.u32 %v10165_v31, %v6271_v50  ;;  %v6302_v44 = vor.u32 %v259_v12, %v258_v11 }
  0x24   :  { %v138_v6 = vand.u32 65535, %v134_v1  ;;  %v139_v7 = vshrl.u32 %v134_v1, 16  ;;  %v160_v8 = vand.u32 65535, %v130_v0  ;;  %v161_v9 = vshrl.u32 %v130_v0, 16 }
  0x25   :  { %v10172_v45 = vmov 0   ;;  %v267_v51 = vshll.u32 %v10163_v33, %v6271_v50  ;;  %v6311_v54 = vor.u32 %v262_v14, %v261_v13  ;;  %v268_v59 = vshrl.u32 %v10161_v35, %v6277_v58 }
  0x26   :  { %v140_v17 = vmul.u32 %v138_v6, %v6252_v23  ;;  %v141_v18 = vmul.u32 %v139_v7, %v6252_v23  ;;  %v142_v19 = vmul.u32 %v138_v6, %v137_v61  ;;  %v143_v21 = vmul.u32 %v139_v7, %v137_v61 }
  0x27   :  { %v162_v22 = vmul.u32 %v160_v8, %v6252_v23  ;;  %v163_v26 = vmul.u32 %v161_v9, %v6252_v23  ;;  %v164_v28 = vmul.u32 %v160_v8, %v137_v61  ;;  %v165_v36 = vmul.u32 %v161_v9, %v137_v61 }
  0x28   :  { %v144_v30 = vshll.u32 %v141_v18, 16  ;;  %v145_v32 = vshrl.u32 %v141_v18, 16  ;;  %v146_v34 = vshll.u32 %v142_v19, 16  ;;  %v147_v37 = vshrl.u32 %v142_v19, 16 }
  0x29   :  { %v166_v38 = vshll.u32 %v163_v26, 16  ;;  %v167_v39 = vshrl.u32 %v163_v26, 16  ;;  %v168_v40 = vshll.u32 %v164_v28, 16  ;;  %v169_v43 = vshrl.u32 %v164_v28, 16 }
  0x2a   :  { %vm148_vm6 = vc.u32 %v140_v17, %v144_v30  ;;  %v150_v41 = vadd.s32 %v144_v30, %v140_v17  ;;  %v265_v23 = vshrl.u32 %v10163_v33, %v6277_v58  ;;  %v270_v61 = vshll.u32 %v10161_v35, %v6271_v50 }
  0x2b   :  { %v149_v46 = vsel %vm148_vm6, 1, %v10172_v45  ;;  %vm170_vm7 = vc.u32 %v162_v22, %v166_v38  ;;  %v172_v47 = vadd.s32 %v166_v38, %v162_v22  ;;  %v271_v0 = vshrl.u32 %v10159_v42, %v6277_v58 }
  0x2c   :  { %v151_v48 = vadd.s32 %v149_v46, %v143_v21  ;;  %vm152_vm8 = vc.u32 %v150_v41, %v146_v34  ;;  %v171_v49 = vsel %vm170_vm7, 1, %v10172_v45  ;;  %v6314_v57 = vor.u32 %v265_v23, %v264_v20 }
  0x2d   :  { %v153_v52 = vsel %vm152_vm8, 1, %v10172_v45  ;;  %v173_v53 = vadd.s32 %v171_v49, %v165_v36  ;;  %vm174_vm9 = vc.u32 %v172_v47, %v168_v40  ;;  %vm273_vm10 = vcmp.lt.s32.totalorder %v6286_v5, 1 }
  0x2e   :  { %v155_v55 = vadd.s32 %v153_v52, %v151_v48  ;;  %v175_v56 = vsel %vm174_vm9, 1, %v10172_v45  ;;  %v6323_v6 = vadd.s32 %v172_v47, %v168_v40  ;;  %v269_v7 = vor.u32 %v268_v59, %v267_v51 }
  0x2f   :  { %v177_v60 = vadd.s32 %v175_v56, %v173_v53  ;;  %vm275_vm11 = vcmp.lt.s32.totalorder %v6286_v5, 3  ;;  %v272_v9 = vor.u32 %v271_v0, %v270_v61  ;;  %vm274_vm12 = vcmp.lt.s32.totalorder %v6286_v5, 2 }
  0x30   :  { %v156_v1 = vadd.s32 %v155_v55, %v145_v32  ;;  %vm276_vm13 = vcmp.lt.s32.totalorder %v6286_v5, 4  ;;  %v281_v50 = vsel %vm273_vm10, %v6302_v44, %v6311_v54  ;;  %v6062_v17 = vadd.s32 4294967169, %v6258_v25 }
  0x31   :  { %v178_v8 = vadd.s32 %v177_v60, %v167_v39  ;;  %v282_v12 = vsel %vm276_vm13, %v269_v7, 920167782  ;;  %v180_v18 = vmul.u32 %v6247_v15, %v6282_v63  ;;  %v285_v20 = vsel %vm273_vm10, %v6311_v54, %v6314_v57 }
  0x32   :  { %v6328_v11 = vadd.s32 %v156_v1, %v147_v37  ;;  %v283_v14 = vsel %vm275_vm11, %v6314_v57, %v282_v12  ;;  %v286_v22 = vsel %vm276_vm13, %v272_v9, 1326507024  ;;  %v6354_v25 = vshll.u32 %v249_v62, 8 }
  0x33   :  { %v179_v13 = vadd.s32 %v178_v8, %v169_v43  ;;  %v284_v19 = vsel %vm274_vm12, %v281_v50, %v283_v14  ;;  %v287_v63 = vsel %vm275_vm11, %v269_v7, %v286_v22  ;;  %v405_v62 = vadd.s32 1, %v6062_v17 }
  0x34   :  { %vm182_vm14 = vc.u32 %v6328_v11, %v6323_v6  ;;  %v314_v15 = vand.u32 65535, %v284_v19  ;;  %v315_v26 = vshrl.u32 %v284_v19, 16  ;;  %v288_v30 = vsel %vm274_vm12, %v285_v20, %v287_v63 }
  0x35   :  { %v183_v21 = vadd.s32 1, %v179_v13  ;;  %v290_v32 = vand.u32 65535, %v6354_v25  ;;  %v291_v34 = vshrl.u32 %v6354_v25, 16  ;;  %v292_v37 = vand.u32 65535, %v288_v30 }
  0x36   :  { %v293_v38 = vshrl.u32 %v288_v30, 16  ;;  %vm406_vm15 = vcmp.gt.s32.totalorder %v405_v62, 0  ;;  %v257_v9 = vshrl.u32 %v10170_v27, %v6277_v58 }
  0x37   :  { %v184_v28 = vsel %vm182_vm14, %v183_v21, %v179_v13  ;;  %v317_v39 = vmul.u32 %v315_v26, %v290_v32  ;;  %v318_v24 = vmul.u32 %v314_v15, %v291_v34  ;;  %v294_v41 = vmul.u32 %v292_v37, %v290_v32 }
  0x38   :  { %v185_v36 = vadd.s32 %v184_v28, %v180_v18  ;;  %v295_v43 = vmul.u32 %v293_v38, %v290_v32  ;;  %v296_v46 = vmul.u32 %v292_v37, %v291_v34  ;;  %v316_v47 = vmul.u32 %v314_v15, %v290_v32 }
  0x39   :  { %v320_v23 = vshll.u32 %v317_v39, 16  ;;  %v297_v49 = vmul.u32 %v293_v38, %v291_v34  ;;  %v322_v53 = vshll.u32 %v318_v24, 16  ;;  %v319_v59 = vmul.u32 %v315_v26, %v291_v34 }
  0x3a   :  { %v186_v40 = vadd.s32 536870912, %v185_v36  ;;  %v298_v51 = vshll.u32 %v295_v43, 16  ;;  %v300_v52 = vshll.u32 %v296_v46, 16  ;;  %v299_v60 = vshrl.u32 %v295_v43, 16 }
  0x3b   :  { %vm324_vm1 = vc.u32 %v316_v47, %v320_v23  ;;  %v326_v0 = vadd.s32 %v320_v23, %v316_v47  ;;  %v407_v8 = vsel %vm406_vm15, %v405_v62, 0  ;;  %v278_v13 = vsel %vm276_vm13, %v6314_v57, 2102212464 }
  0x3c   :  { %v6362_v48 = vshrl.u32 %v186_v40, 30  ;;  %vm302_vm0 = vc.u32 %v294_v41, %v298_v51  ;;  %v304_v56 = vadd.s32 %v298_v51, %v294_v41  ;;  %v325_v12 = vsel %vm324_vm1, 1, %v10172_v45 }
  0x3d   :  { %v303_v61 = vsel %vm302_vm0, 1, %v10172_v45  ;;  %vm328_vm3 = vc.u32 %v326_v0, %v322_v53  ;;  %v321_v17 = vshrl.u32 %v317_v39, 16  ;;  %v327_v18 = vadd.s32 %v325_v12, %v319_v59 }
  0x3e   :  { %v188_v55 = vshll.u32 %v6362_v48, 30  ;;  %v305_v7 = vadd.s32 %v303_v61, %v297_v49  ;;  %vm306_vm2 = vc.u32 %v304_v56, %v300_v52  ;;  %v301_v20 = vshrl.u32 %v296_v46, 16 }
  0x3f   :  { %v307_v50 = vsel %vm306_vm2, 1, %v10172_v45  ;;  %v329_v21 = vsel %vm328_vm3, 1, %v10172_v45  ;;  %v409_v22 = vand.u32 31, %v407_v8  ;;  %v323_v15 = vshrl.u32 %v318_v24, 16 }
  0x40   :  { %v6366_v1 = vsub.s32 %v185_v36, %v188_v55  ;;  %v309_v14 = vadd.s32 %v307_v50, %v305_v7  ;;  %v331_v63 = vadd.s32 %v329_v21, %v327_v18  ;;  %v10158_v26 = vand.u32 2147483647, %v6245_v10 }
  0x41   :  { %v277_v57 = vsel %vm273_vm10, %v257_v9, %v6302_v44  ;;  %v279_v32 = vsel %vm275_vm11, %v6311_v54, %v278_v13  ;;  %v6386_v34 = vsub.s32 32, %v409_v22  ;;  %v6390_v37 = vadd.s32 %v326_v0, %v322_v53 }
  0x42   :  { %v191_v19 = vsub.s32 0, %v6366_v1  ;;  %vm190_vm4 = vcmp.lt.s32.totalorder %v6366_v1, 0  ;;  %v310_v58 = vadd.s32 %v309_v14, %v299_v60  ;;  %v332_v28 = vadd.s32 %v331_v63, %v321_v17 }
  0x43   :  { %v402_v39 = vand.u32 8388607, %v10158_v26  ;;  %v280_v62 = vsel %vm274_vm12, %v277_v57, %v279_v32  ;;  %v6396_v40 = vshrl.u32 %v407_v8, 5  ;;  %v421_v44 = vshll.u32 %v10163_v33, %v409_v22 }
  0x44   :  { %v192_v30 = vsel %vm190_vm4, %v191_v19, %v6366_v1  ;;  %v6388_v36 = vadd.s32 %v310_v58, %v301_v20  ;;  %v333_v38 = vadd.s32 %v332_v28, %v323_v15  ;;  %v415_v54 = vshll.u32 %v10167_v29, %v409_v22 }
  0x45   :  { %v193_v24 = vclz %v192_v30  ;;  %v416_v43 = vshrl.u32 %v10165_v31, %v6386_v34  ;;  %v418_v46 = vshll.u32 %v10165_v31, %v409_v22  ;;  %v419_v47 = vshrl.u32 %v10163_v33, %v6386_v34 }
  0x46   :  { %v337_v41 = vadd.s32 1, %v333_v38  ;;  %vm336_vm5 = vc.u32 %v6388_v36, %v6390_v37  ;;  %v422_v5 = vshrl.u32 %v10161_v35, %v6386_v34  ;;  %v424_v23 = vshll.u32 %v10161_v35, %v409_v22 }
  0x47   :  { %v412_v49 = vshll.u32 %v10170_v27, %v409_v22  ;;  %v413_v51 = vshrl.u32 %v10167_v29, %v6386_v34  ;;  %v334_v52 = vmul.u32 %v6354_v25, %v280_v62  ;;  %v403_v53 = vor.u32 8388608, %v402_v39 }
  0x48   :  { %v423_v55 = vor.u32 %v422_v5, %v421_v44  ;;  %v425_v56 = vshrl.u32 %v10159_v42, %v6386_v34  ;;  %v6057_v59 = vadd.s32 4294967294, %v193_v24  ;;  %v338_v60 = vsel %vm336_vm5, %v337_v41, %v333_v38 }
  0x49   :  { %v6416_v61 = vor.u32 %v416_v43, %v415_v54  ;;  %v6418_v0 = vor.u32 %v419_v47, %v418_v46  ;;  %vm430_vm6 = vcmp.lt.s32.totalorder %v6396_v40, 4  ;;  %v6421_v8 = vor.u32 %v413_v51, %v412_v49  ;;  %v58_v51 = vld [vmem:[%s10153_s0 + $0x18] sm:$0xff] }
  0x4a   :  { %v426_v7 = vor.u32 %v425_v56, %v424_v23  ;;  %vm427_vm7 = vcmp.lt.s32.totalorder %v6396_v40, 1  ;;  %v339_v9 = vadd.s32 %v338_v60, %v334_v52  ;;  %vm429_vm8 = vcmp.lt.s32.totalorder %v6396_v40, 3 }
  0x4b   :  { %v436_v25 = vsel %vm430_vm6, %v423_v55, 920167782  ;;  %v6427_v50 = vshll.u32 %v403_v53, 8  ;;  %vm6058_vm9 = vcmp.lt.s32.totalorder %v6057_v59, 0  ;;  %vm428_vm10 = vcmp.lt.s32.totalorder %v6396_v40, 2  ;;  %v60_v40 = vld [vmem:[%s10153_s0 + $0x28] sm:$0xff] }
  0x4c   :  { %v439_v12 = vsel %vm427_vm7, %v6416_v61, %v6418_v0  ;;  %v440_v13 = vsel %vm430_vm6, %v426_v7, 1326507024  ;;  %v435_v14 = vsel %vm427_vm7, %v6421_v8, %v6416_v61  ;;  %v437_v17 = vsel %vm429_vm8, %v6418_v0, %v436_v25 }
  0x4d   :  { %v196_v18 = vsel %vm6058_vm9, 0, %v6057_v59  ;;  %v340_v19 = vadd.s32 536870912, %v339_v9  ;;  %v441_v20 = vsel %vm429_vm8, %v423_v55, %v440_v13  ;;  %v444_v21 = vand.u32 65535, %v6427_v50 }
  0x4e   :  { %v442_v22 = vsel %vm428_vm10, %v439_v12, %v441_v20  ;;  %v438_v58 = vsel %vm428_vm10, %v435_v14, %v437_v17  ;;  %v445_v15 = vshrl.u32 %v6427_v50, 16  ;;  %v201_v30 = vsub.s32 4294967266, %v196_v18 }
  0x4f   :  { %v446_v63 = vand.u32 65535, %v442_v22  ;;  %v447_v28 = vshrl.u32 %v442_v22, 16  ;;  %v6451_v57 = vshrl.u32 %v340_v19, 30  ;;  %v469_v39 = vshrl.u32 %v438_v58, 16 }
  0x50   :  { %v181_v44 = vadd.s32 %v6323_v6, %v6328_v11  ;;  %v197_v41 = vsub.s32 32, %v196_v18  ;;  %v202_v54 = vadd.s32 127, %v201_v30  ;;  %v468_v43 = vand.u32 65535, %v438_v58 }
  0x51   :  { %v448_v32 = vmul.u32 %v446_v63, %v444_v21  ;;  %v449_v38 = vmul.u32 %v447_v28, %v444_v21  ;;  %v450_v24 = vmul.u32 %v446_v63, %v445_v15  ;;  %v342_v46 = vshll.u32 %v6451_v57, 30 }
  0x52   :  { %v451_v47 = vmul.u32 %v447_v28, %v445_v15  ;;  %v471_v23 = vmul.u32 %v469_v39, %v444_v21  ;;  %v198_v52 = vshll.u32 %v6366_v1, %v196_v18  ;;  %v199_v53 = vshrl.u32 %v181_v44, %v197_v41 }
  0x53   :  { %v452_v62 = vshll.u32 %v449_v38, 16  ;;  %v454_v49 = vshll.u32 %v450_v24, 16  ;;  %v203_v55 = vshll.u32 %v202_v54, 23  ;;  %v472_v6 = vmul.u32 %v468_v43, %v445_v15 }
  0x54   :  { %v6461_v11 = vsub.s32 %v339_v9, %v342_v46  ;;  %v470_v60 = vmul.u32 %v468_v43, %v444_v21  ;;  %v474_v7 = vshll.u32 %v471_v23, 16  ;;  %v6463_v25 = vmul.f32 0.5, %v58_v51 }
  0x55   :  { %vm456_vm11 = vc.u32 %v448_v32, %v452_v62  ;;  %v458_v56 = vadd.s32 %v452_v62, %v448_v32  ;;  %v453_v12 = vshrl.u32 %v449_v38, 16  ;;  %v473_v13 = vmul.u32 %v469_v39, %v445_v15 }
  0x56   :  { %v457_v5 = vsel %vm456_vm11, 1, %v10172_v45  ;;  %10292 = vst [vmem:[#allocation11_spill] sm:$0xff] %v6463_v25  ;;  %v200_v14 = vor.u32 %v199_v53, %v198_v52  ;;  %v411_v17 = vshrl.u32 %v10170_v27, %v6386_v34  ;;  %v476_v18 = vshll.u32 %v472_v6, 16 }
  0x57   :  { %v459_v59 = vadd.s32 %v457_v5, %v451_v47  ;;  %vm460_vm12 = vc.u32 %v458_v56, %v454_v49  ;;  %v204_v19 = vor.u32 4788187, %v203_v55  ;;  %v345_v9 = vsub.s32 0, %v6461_v11  ;;  %v61_v56 = vld [vmem:[%s10153_s0 + $0x30] sm:$0xff] }
  0x58   :  { %v461_v1 = vsel %vm460_vm12, 1, %v10172_v45  ;;  %vm478_vm13 = vc.u32 %v470_v60, %v474_v7  ;;  %vm344_vm14 = vcmp.lt.s32.totalorder %v6461_v11, 0  ;;  %v432_v21 = vsel %vm430_vm6, %v6418_v0, 2102212464 }
  0x59   :  { %v463_v20 = vadd.s32 %v461_v1, %v459_v59  ;;  %v479_v22 = vsel %vm478_vm13, 1, %v10172_v45  ;;  %v480_v58 = vadd.s32 %v474_v7, %v470_v60  ;;  %v455_v15 = vshrl.u32 %v450_v24, 16  ;;  %v63_v59 = vld [vmem:[%s10153_s0 + $0x40] sm:$0xff] }
  0x5a   :  { %v481_v34 = vadd.s32 %v479_v22, %v473_v13  ;;  %v431_v28 = vsel %vm427_vm7, %v411_v17, %v6421_v8  ;;  %v475_v30 = vshrl.u32 %v471_v23, 16  ;;  %v346_v32 = vsel %vm344_vm14, %v345_v9, %v6461_v11  ;;  %v64_v13 = vld [vmem:[%s10153_s0 + $0x48] sm:$0xff] }
  0x5b   :  { %v464_v63 = vadd.s32 %v463_v20, %v453_v12  ;;  %vm482_vm15 = vc.u32 %v480_v58, %v476_v18  ;;  %v433_v38 = vsel %vm429_vm8, %v6416_v61, %v432_v21  ;;  %v552_v39 = vand.u32 2139095040, %v6463_v25 }
  0x5c   :  { %v483_v0 = vsel %vm482_vm15, 1, %v10172_v45  ;;  %v205_v62 = vand.u32 2147483647, %v204_v19  ;;  %v207_v24 = vcvt.s32.f32 %v200_v14  ;;  %v477_v44 = vshrl.u32 %v472_v6, 16  ;;  %v59_v6 = vld [vmem:[%s10153_s0 + $0x20] sm:$0xff] }
  0x5d   :  { %v485_v41 = vadd.s32 %v483_v0, %v481_v34  ;;  %v6483_v54 = vadd.s32 %v464_v63, %v455_v15  ;;  %v6485_v43 = vadd.s32 %v480_v58, %v476_v18  ;;  %v553_v8 = vshrl.u32 %v552_v39, 23  ;;  %v65_v58 = vld [vmem:[%s10153_s0 + $0x50] sm:$0xff] }
  0x5e   :  { %v347_v46 = vclz %v346_v32  ;;  %v434_v47 = vsel %vm428_vm10, %v431_v28, %v433_v38  ;;  %v208_v61 = vmul.f32 %v207_v24, %v205_v62  ;;  %vm89_vm2 = vcmp.lt.s32.totalorder %v6233_v2, 0  ;;  %v67_v32 = vld [vmem:[%s10153_s0 + $0x60] sm:$0xff] }
  0x5f   :  { %v486_v5 = vadd.s32 %v485_v41, %v475_v30  ;;  %v6065_v23 = vadd.s32 4294967169, %v553_v8  ;;  %v488_v51 = vmul.u32 %v6427_v50, %v434_v47  ;;  %vm490_vm0 = vc.u32 %v6483_v54, %v6485_v43  ;;  %v62_v50 = vld [vmem:[%s10153_s0 + $0x38] sm:$0xff] }
  0x60   :  { %v6060_v53 = vadd.s32 4294967294, %v347_v46  ;;  %v209_v60 = vxor.u32 2147483648, %v208_v61  ;;  %v10157_v17 = vand.u32 2147483647, %v6463_v25  ;;  %v6512_v1 = vmul.f32 0.5, %v59_v6  ;;  %v66_v30 = vld [vmem:[%s10153_s0 + $0x58] sm:$0xff] }
  0x61   :  { %v487_v49 = vadd.s32 %v486_v5, %v477_v44  ;;  %v559_v52 = vadd.s32 1, %v6065_v23  ;;  %v6514_v18 = vmul.f32 0.5, %v60_v40  ;;  %v6516_v9 = vmul.f32 0.5, %v61_v56 }
  0x62   :  { %10293 = vst [vmem:[#allocation12_spill] sm:$0xff] %v6512_v1  ;;  %vm6061_vm3 = vcmp.lt.s32.totalorder %v6060_v53, 0  ;;  %v6518_v20 = vmul.f32 0.5, %v62_v50  ;;  %v6520_v21 = vmul.f32 0.5, %v63_v59  ;;  %v6525_v15 = vmul.f32 0.5, %v64_v13 }
  0x63   :  { %v491_v55 = vadd.s32 1, %v487_v49  ;;  %vm560_vm1 = vcmp.gt.s32.totalorder %v559_v52, 0  ;;  %10294 = vst [vmem:[#allocation13_spill] sm:$0xff] %v6516_v9  ;;  %vm6529_vm4 = vcmp.le.f32.partialorder %v87_v4, 0.7853982  ;;  %v210_v34 = vsel %vm89_vm2, %v209_v60, %v208_v61 }
  0x64   :  { %v561_v12 = vsel %vm560_vm1, %v559_v52, 0  ;;  %10295 = vst [vmem:[#allocation14_spill] sm:$0xff] %v6518_v20  ;;  %v350_v38 = vsel %vm6061_vm3, 0, %v6060_v53  ;;  %v556_v4 = vand.u32 8388607, %v10157_v17  ;;  %v6554_v8 = vmul.f32 0.5, %v65_v58 }
  0x65   :  { %v492_v7 = vsel %vm490_vm0, %v491_v55, %v487_v49  ;;  %v563_v19 = vand.u32 31, %v561_v12  ;;  %10296 = vst [vmem:[#allocation15_spill] sm:$0xff] %v6520_v21  ;;  %v6556_v46 = vshrl.u32 %v561_v12, 5  ;;  %v6561_v23 = vmul.f32 0.5, %v66_v30  ;;  %v68_v52 = vld [vmem:[%s10153_s0 + $0x68] sm:$0xff] }
  0x66   :  { %v493_v14 = vadd.s32 %v492_v7, %v488_v51  ;;  %10297 = vst [vmem:[#allocation16_spill] sm:$0xff] %v6525_v15  ;;  %v6563_v61 = vmul.f32 0.5, %v67_v32  ;;  %v6568_v49 = vsel %vm6529_vm4, %v6233_v2, %v210_v34  ;;  %v355_v53 = vsub.s32 4294967266, %v350_v38 }
  0x67   :  { %v6535_v28 = vsub.s32 32, %v563_v19  ;;  %v566_v39 = vshll.u32 %v10170_v27, %v563_v19  ;;  %v569_v24 = vshll.u32 %v10167_v29, %v563_v19  ;;  %v575_v41 = vshll.u32 %v10163_v33, %v563_v19  ;;  %10300 = vst [vmem:[#allocation17_spill] sm:$0xff] %v6554_v8 }
  0x68   :  { %v494_v22 = vadd.s32 536870912, %v493_v14  ;;  %v572_v47 = vshll.u32 %v10165_v31, %v563_v19  ;;  %10301 = vst [vmem:[#allocation18_spill] sm:$0xff] %v6561_v23  ;;  %v557_v6 = vor.u32 8388608, %v556_v4  ;;  %v578_v59 = vshll.u32 %v10161_v35, %v563_v19 }
  0x69   :  { %v567_v62 = vshrl.u32 %v10167_v29, %v6535_v28  ;;  %v570_v44 = vshrl.u32 %v10165_v31, %v6535_v28  ;;  %v573_v5 = vshrl.u32 %v10163_v33, %v6535_v28  ;;  %10302 = vst [vmem:[#allocation19_spill] sm:$0xff] %v6563_v61  ;;  %v576_v51 = vshrl.u32 %v10161_v35, %v6535_v28 }
  0x6a   :  { %v6543_v0 = vshrl.u32 %v494_v22, 30  ;;  %v579_v60 = vshrl.u32 %v10159_v42, %v6535_v28  ;;  %v335_v7 = vadd.s32 %v6390_v37, %v6388_v36  ;;  %v351_v12 = vsub.s32 32, %v350_v38  ;;  %v69_v22 = vld [vmem:[%s10153_s0 + $0x70] sm:$0xff] }
  0x6b   :  { %v6576_v40 = vor.u32 %v567_v62, %v566_v39  ;;  %v6578_v56 = vor.u32 %v570_v44, %v569_v24  ;;  %v577_v50 = vor.u32 %v576_v51, %v575_v41  ;;  %v574_v13 = vor.u32 %v573_v5, %v572_v47 }
  0x6c   :  { %v496_v55 = vshll.u32 %v6543_v0, 30  ;;  %vm581_vm5 = vcmp.lt.s32.totalorder %v6556_v46, 1  ;;  %v6589_v58 = vmul.f32 0.5, %v68_v52  ;;  %v6593_v34 = vmul.f32 %v6568_v49, %v6568_v49  ;;  %v70_v52 = vld [vmem:[%s10153_s0 + $0x78] sm:$0xff]  ;;  %s9125_s0 = sld [smem:[#allocation2]] }
  0x6d   :  { %vm583_vm6 = vcmp.lt.s32.totalorder %v6556_v46, 3  ;;  %vm584_vm7 = vcmp.lt.s32.totalorder %v6556_v46, 4  ;;  %v356_v19 = vadd.s32 127, %v355_v53  ;;  %v580_v37 = vor.u32 %v579_v60, %v578_v59 }
  0x6e   :  { %10303 = vst [vmem:[#allocation20_spill] sm:$0xff] %v6589_v58  ;;  %v6597_v36 = vsub.s32 %v493_v14, %v496_v55  ;;  %v706_v30 = vand.u32 2139095040, %v6512_v1  ;;  %vm582_vm8 = vcmp.lt.s32.totalorder %v6556_v46, 2  ;;  %v589_v32 = vsel %vm581_vm5, %v6576_v40, %v6578_v56 }
  0x6f   :  { %v590_v4 = vsel %vm584_vm7, %v577_v50, 920167782  ;;  %v6607_v39 = vshll.u32 %v557_v6, 8  ;;  %v6609_v62 = vmul.f32 0.5, %v69_v22  ;;  %v352_v14 = vshll.u32 %v6461_v11, %v350_v38 }
  0x70   :  { %v353_v24 = vshrl.u32 %v335_v7, %v351_v12  ;;  %v591_v44 = vsel %vm583_vm6, %v574_v13, %v590_v4  ;;  %v211_v41 = vsub.s32 4, %v6362_v48  ;;  %v216_v47 = vmul.f32 -0.001358992, %v6593_v34 }
  0x71   :  { %10304 = vst [vmem:[#allocation21_spill] sm:$0xff] %v6609_v62  ;;  %v223_v5 = vmul.f32 -0.00019511016, %v6593_v34  ;;  %v593_v51 = vsel %vm581_vm5, %v6578_v56, %v574_v13  ;;  %v357_v53 = vshll.u32 %v356_v19, 23  ;;  %v499_v11 = vsub.s32 0, %v6597_v36 }
  0x72   :  { %v592_v38 = vsel %vm582_vm8, %v589_v32, %v591_v44  ;;  %v594_v55 = vsel %vm584_vm7, %v580_v37, 1326507024  ;;  %vm498_vm9 = vcmp.lt.s32.totalorder %v6597_v36, 0  ;;  %v598_v59 = vand.u32 65535, %v6607_v39 }
  0x73   :  { %v595_v6 = vsel %vm583_vm6, %v577_v50, %v594_v55  ;;  %v707_v60 = vshrl.u32 %v706_v30, 23  ;;  %v354_v7 = vor.u32 %v353_v24, %v352_v14  ;;  %v599_v22 = vshrl.u32 %v6607_v39, 16 }
  0x74   :  { %v596_v12 = vsel %vm582_vm8, %v593_v51, %v595_v6  ;;  %v623_v19 = vshrl.u32 %v592_v38, 16  ;;  %v6635_v4 = vmul.f32 0.5, %v70_v52  ;;  %v212_v37 = vsel %vm89_vm2, %v211_v41, %v6362_v48 }
  0x75   :  { %v6640_v32 = vadd.f32 0.041655596, %v216_v47  ;;  %v622_v44 = vand.u32 65535, %v592_v38  ;;  %v358_v50 = vor.u32 4788187, %v357_v53  ;;  %v500_v55 = vsel %vm498_vm9, %v499_v11, %v6597_v36 }
  0x76   :  { %10305 = vst [vmem:[#allocation22_spill] sm:$0xff] %v6635_v4  ;;  %v600_v30 = vand.u32 65535, %v596_v12  ;;  %v601_v14 = vshrl.u32 %v596_v12, 16  ;;  %v224_v24 = vadd.f32 0.008332121, %v223_v5  ;;  %v565_v51 = vshrl.u32 %v10170_v27, %v6535_v28 }
  0x77   :  { %v625_v6 = vmul.u32 %v623_v19, %v598_v59  ;;  %v6068_v17 = vadd.s32 4294967169, %v707_v60  ;;  %v361_v52 = vcvt.s32.f32 %v354_v7  ;;  %v501_v33 = vclz %v500_v55 }
  0x78   :  { %v602_v26 = vmul.u32 %v600_v30, %v598_v59  ;;  %v603_v42 = vmul.u32 %v601_v14, %v598_v59  ;;  %v604_v35 = vmul.u32 %v600_v30, %v599_v22  ;;  %v586_v48 = vsel %vm584_vm7, %v574_v13, 2102212464 }
  0x79   :  { %v624_v41 = vmul.u32 %v622_v44, %v598_v59  ;;  %v626_v47 = vmul.u32 %v622_v44, %v599_v22  ;;  %v359_v53 = vand.u32 2147483647, %v358_v50  ;;  %v605_v11 = vmul.u32 %v601_v14, %v599_v22 }
  0x7a   :  { %v606_v38 = vshll.u32 %v603_v42, 16  ;;  %v608_v12 = vshll.u32 %v604_v35, 16  ;;  %v585_v28 = vsel %vm581_vm5, %v565_v51, %v6576_v40  ;;  %v627_v5 = vmul.u32 %v623_v19, %v599_v22 }
  0x7b   :  { %v628_v60 = vshll.u32 %v625_v6, 16  ;;  %v713_v7 = vadd.s32 1, %v6068_v17  ;;  %v587_v55 = vsel %vm583_vm6, %v6578_v56, %v586_v48  ;;  %v630_v13 = vshll.u32 %v626_v47, 16 }
  0x7c   :  { %vm610_vm10 = vc.u32 %v602_v26, %v606_v38  ;;  %v612_v30 = vadd.s32 %v606_v38, %v602_v26  ;;  %v6063_v59 = vadd.s32 4294967294, %v501_v33  ;;  %v607_v14 = vshrl.u32 %v603_v42, 16 }
  0x7d   :  { %v611_v44 = vsel %vm610_vm10, 1, %v10172_v45  ;;  %vm632_vm11 = vc.u32 %v624_v41, %v628_v60  ;;  %v634_v50 = vadd.s32 %v628_v60, %v624_v41  ;;  %v629_v17 = vshrl.u32 %v625_v6, 16 }
  0x7e   :  { %v613_v31 = vadd.s32 %v611_v44, %v605_v11  ;;  %vm614_vm12 = vc.u32 %v612_v30, %v608_v12  ;;  %v633_v40 = vsel %vm632_vm11, 1, %v10172_v45  ;;  %v609_v51 = vshrl.u32 %v604_v35, 16 }
  0x7f   :  { %v615_v22 = vsel %vm614_vm12, 1, %v10172_v45  ;;  %v635_v19 = vadd.s32 %v633_v40, %v627_v5  ;;  %vm636_vm13 = vc.u32 %v634_v50, %v630_v13  ;;  %vm714_vm14 = vcmp.gt.s32.totalorder %v713_v7, 0 }
  0x80   :  { %v617_v56 = vadd.s32 %v615_v22, %v613_v31  ;;  %v637_v26 = vsel %vm636_vm13, 1, %v10172_v45  ;;  %v362_v33 = vmul.f32 %v361_v52, %v359_v53  ;;  %v631_v48 = vshrl.u32 %v626_v47, 16 }
  0x81   :  { %v639_v38 = vadd.s32 %v637_v26, %v635_v19  ;;  %v715_v29 = vsel %vm714_vm14, %v713_v7, 0  ;;  %v6657_v42 = vadd.s32 %v634_v50, %v630_v13  ;;  %v10169_v11 = vand.u32 2147483647, %v6512_v1 }
  0x82   :  { %v618_v41 = vadd.s32 %v617_v56, %v607_v14  ;;  %v717_v12 = vand.u32 31, %v715_v29  ;;  %v6662_v6 = vsel %vm6529_vm4, 0, %v212_v37  ;;  %vm243_vm15 = vcmp.lt.s32.totalorder %v6235_v3, 0 }
  0x83   :  { %10306 = vst [vmem:[#allocation23_spill] sm:$0xff] %v6662_v6  ;;  %v588_v31 = vsel %vm582_vm8, %v585_v28, %v587_v55  ;;  %v640_v35 = vadd.s32 %v639_v38, %v629_v17  ;;  %v6668_v52 = vand.u32 3, %v6662_v6  ;;  %vm6672_vm0 = vcmp.le.f32.partialorder %v241_v16, 0.7853982 }
  0x84   :  { %vm6064_vm1 = vcmp.lt.s32.totalorder %v6063_v59, 0  ;;  %v6676_v53 = vadd.s32 %v618_v41, %v609_v51  ;;  %v6678_v63 = vsub.s32 32, %v717_v12  ;;  %v218_v37 = vmul.f32 %v6640_v32, %v6593_v34 }
  0x85   :  { %v225_v46 = vmul.f32 %v224_v24, %v6593_v34  ;;  %v365_v28 = vsub.s32 4, %v6451_v57  ;;  %v641_v5 = vadd.s32 %v640_v35, %v631_v48  ;;  %v363_v60 = vxor.u32 2147483648, %v362_v33 }
  0x86   :  { %v642_v7 = vmul.u32 %v6607_v39, %v588_v31  ;;  %vm644_vm2 = vc.u32 %v6676_v53, %v6657_v42  ;;  %v710_v16 = vand.u32 8388607, %v10169_v11  ;;  %v504_v55 = vsel %vm6064_vm1, 0, %v6063_v59 }
  0x87   :  { %v645_v30 = vadd.s32 1, %v641_v5  ;;  %v720_v13 = vshll.u32 %v10170_v27, %v717_v12  ;;  %v10309_v44 = vmov 2475754826   ;;  %v10310_v50 = vmov 2131351028  }
  0x88   :  { %v723_v32 = vshll.u32 %v10309_v44, %v717_v12  ;;  %v721_v24 = vshrl.u32 %v10309_v44, %v6678_v63  ;;  %v724_v14 = vshrl.u32 %v10310_v50, %v6678_v63  ;;  %v10311_v40 = vmov 2102212464  }
  0x89   :  { %v729_v39 = vshll.u32 %v10311_v40, %v717_v12  ;;  %v10312_v22 = vmov 920167782   ;;  %v646_v19 = vsel %vm644_vm2, %v645_v30, %v641_v5  ;;  %v6698_v51 = vshrl.u32 %v715_v29, 5 }
  0x8a   :  { %v730_v17 = vshrl.u32 %v10312_v22, %v6678_v63  ;;  %v726_v59 = vshll.u32 %v10310_v50, %v717_v12  ;;  %v727_v56 = vshrl.u32 %v10311_v40, %v6678_v63  ;;  %v226_v26 = vadd.f32 -0.16666654, %v225_v46 }
  0x8b   :  { %v509_v48 = vsub.s32 4294967266, %v504_v55  ;;  %v647_v38 = vadd.s32 %v646_v19, %v642_v7  ;;  %v732_v41 = vshll.u32 %v10312_v22, %v717_v12  ;;  %v364_v31 = vsel %vm243_vm15, %v363_v60, %v362_v33 }
  0x8c   :  { %v489_v35 = vadd.s32 %v6485_v43, %v6483_v54  ;;  %v711_v11 = vor.u32 8388608, %v710_v16  ;;  %v10313_v29 = vmov 1326507024   ;;  %v6710_v27 = vor.u32 %v721_v24, %v720_v13 }
  0x8d   :  { %v733_v5 = vshrl.u32 %v10313_v29, %v6678_v63  ;;  %v648_v30 = vadd.s32 536870912, %v647_v38  ;;  %v6712_v45 = vor.u32 %v724_v14, %v723_v32  ;;  %v731_v46 = vor.u32 %v730_v17, %v729_v39 }
  0x8e   :  { %v505_v6 = vsub.s32 32, %v504_v55  ;;  %v6714_v7 = vor.u32 %v727_v56, %v726_v59  ;;  %vm735_vm3 = vcmp.lt.s32.totalorder %v6698_v51, 1  ;;  %vm738_vm4 = vcmp.lt.s32.totalorder %v6698_v51, 4 }
  0x8f   :  { %v510_v33 = vadd.s32 127, %v509_v48  ;;  %v6718_v12 = vshrl.u32 %v648_v30, 30  ;;  %v734_v54 = vor.u32 %v733_v5, %v732_v41  ;;  %vm737_vm5 = vcmp.lt.s32.totalorder %v6698_v51, 3 }
  0x90   :  { %v219_v43 = vadd.f32 -0.4999988, %v218_v37  ;;  %v227_v60 = vmul.f32 %v226_v26, %v6593_v34  ;;  %v6725_v16 = vsel %vm6672_vm0, %v6235_v3, %v364_v31  ;;  %v6727_v13 = vshll.u32 %v711_v11, 8 }
  0x91   :  { %v650_v32 = vshll.u32 %v6718_v12, 30  ;;  %vm736_vm6 = vcmp.lt.s32.totalorder %v6698_v51, 2  ;;  %v743_v24 = vsel %vm735_vm3, %v6710_v27, %v6712_v45  ;;  %v744_v37 = vsel %vm738_vm4, %v731_v46, 920167782 }
  0x92   :  { %v366_v14 = vsel %vm243_vm15, %v365_v28, %v6451_v57  ;;  %v506_v39 = vshll.u32 %v6597_v36, %v504_v55  ;;  %v745_v11 = vsel %vm737_vm5, %v6714_v7, %v744_v37  ;;  %v747_v17 = vsel %vm735_vm3, %v6712_v45, %v6714_v7 }
  0x93   :  { %v507_v19 = vshrl.u32 %v489_v35, %v505_v6  ;;  %v511_v59 = vshll.u32 %v510_v33, 23  ;;  %v6748_v56 = vsub.s32 %v647_v38, %v650_v32  ;;  %v748_v26 = vsel %vm738_vm4, %v734_v54, 1326507024 }
  0x94   :  { %v6754_v57 = vmul.f32 %v6725_v16, %v6725_v16  ;;  %v746_v36 = vsel %vm736_vm6, %v743_v24, %v745_v11  ;;  %v749_v28 = vsel %vm737_vm5, %v731_v46, %v748_v26  ;;  %v752_v55 = vand.u32 65535, %v6727_v13 }
  0x95   :  { %v220_v6 = vmul.f32 %v219_v43, %v6593_v34  ;;  %v228_v48 = vadd.f32 1.0, %v227_v60  ;;  %v750_v38 = vsel %vm736_vm6, %v747_v17, %v749_v28  ;;  %v753_v41 = vshrl.u32 %v6727_v13, 16 }
  0x96   :  { %v370_v31 = vmul.f32 -0.001358992, %v6754_v57  ;;  %v754_v35 = vand.u32 65535, %v750_v38  ;;  %v755_v5 = vshrl.u32 %v750_v38, 16  ;;  %v860_v30 = vand.u32 2139095040, %v6514_v18 }
  0x97   :  { %v508_v33 = vor.u32 %v507_v19, %v506_v39  ;;  %v512_v54 = vor.u32 4788187, %v511_v59  ;;  %v653_v46 = vsub.s32 0, %v6748_v56  ;;  %v777_v32 = vshrl.u32 %v746_v36, 16 }
  0x98   :  { %vm652_vm7 = vcmp.lt.s32.totalorder %v6748_v56, 0  ;;  %v756_v34 = vmul.u32 %v754_v35, %v752_v55  ;;  %v757_v43 = vmul.u32 %v755_v5, %v752_v55  ;;  %v776_v60 = vand.u32 65535, %v746_v36 }
  0x99   :  { %v6769_v24 = vadd.f32 1.0, %v220_v6  ;;  %v6773_v37 = vsel %vm6672_vm0, 0, %v366_v14  ;;  %v758_v11 = vmul.u32 %v754_v35, %v753_v41  ;;  %v779_v17 = vmul.u32 %v777_v32, %v752_v55 }
  0x9a   :  { %10315 = vst [vmem:[#allocation25_spill] sm:$0xff] %v6773_v37  ;;  %v371_v26 = vadd.f32 0.041655596, %v370_v31  ;;  %v377_v39 = vmul.f32 -0.00019511016, %v6754_v57  ;;  %v760_v19 = vshll.u32 %v757_v43, 16  ;;  %v6777_v28 = vmul.f32 %v228_v48, %v6568_v49 }
  0x9b   :  { %10314 = vst [vmem:[#allocation24_spill] sm:$0xff] %v6769_v24  ;;  %v861_v59 = vshrl.u32 %v860_v30, 23  ;;  %v654_v38 = vsel %vm652_vm7, %v653_v46, %v6748_v56  ;;  %v759_v4 = vmul.u32 %v755_v5, %v753_v41  ;;  %v762_v36 = vshll.u32 %v758_v11, 16 }
  0x9c   :  { %10316 = vst [vmem:[#allocation26_spill] sm:$0xff] %v6777_v28  ;;  %v513_v6 = vand.u32 2147483647, %v512_v54  ;;  %v515_v62 = vcvt.s32.f32 %v508_v33  ;;  %vm764_vm8 = vc.u32 %v756_v34, %v760_v19  ;;  %v780_v47 = vmul.u32 %v776_v60, %v753_v41 }
  0x9d   :  { %vm233_vm9 = vcmp.eq.s32.totalorder %v6668_v52, 0  ;;  %vm236_vm10 = vcmp.eq.s32.totalorder %v6668_v52, 2  ;;  %v10317_v14 = vmov 0   ;;  %v766_v35 = vadd.s32 %v760_v19, %v756_v34 }
  0x9e   :  { %v765_v31 = vsel %vm764_vm8, 1, %v10317_v14  ;;  %v778_v58 = vmul.u32 %v776_v60, %v752_v55  ;;  %v782_v30 = vshll.u32 %v779_v17, 16  ;;  %v372_v49 = vmul.f32 %v371_v26, %v6754_v57 }
  0x9f   :  { %v378_v48 = vadd.f32 0.008332121, %v377_v39  ;;  %vm397_vm11 = vcmp.lt.s32.totalorder %v6245_v10, 0  ;;  %v655_v5 = vclz %v654_v38  ;;  %v6071_v46 = vadd.s32 4294967169, %v861_v59 }
  0xa0   :  { %v761_v54 = vshrl.u32 %v757_v43, 16  ;;  %v767_v33 = vadd.s32 %v765_v31, %v759_v4  ;;  %vm768_vm12 = vc.u32 %v766_v35, %v762_v36  ;;  %v781_v61 = vmul.u32 %v777_v32, %v753_v41 }
  0xa1   :  { %vm232_vm13 = vcmp.lt.s32.totalorder %v6668_v52, 2  ;;  %v516_v23 = vmul.f32 %v515_v62, %v513_v6  ;;  %v10318_v8 = vmov 683565275   ;;  %v769_v55 = vsel %vm768_vm12, 1, %v10317_v14 }
  0xa2   :  { %v719_v15 = vshrl.u32 %v10318_v8, %v6678_v63  ;;  %v784_v34 = vshll.u32 %v780_v47, 16  ;;  %v10319_v60 = vand.u32 2147483647, %v6245_v10  ;;  %v740_v4 = vsel %vm738_vm4, %v6714_v7, 2102212464 }
  0xa3   :  { %v771_v41 = vadd.s32 %v769_v55, %v767_v33  ;;  %vm786_vm15 = vc.u32 %v778_v58, %v782_v30  ;;  %v788_v32 = vadd.s32 %v782_v30, %v778_v58  ;;  %v379_v62 = vmul.f32 %v378_v48, %v6754_v57 }
  0xa4   :  { %vm6791_vm14 = vcmp.le.f32.partialorder %v10319_v60, 0.7853982  ;;  %v6066_v43 = vadd.s32 4294967294, %v655_v5  ;;  %v763_v63 = vshrl.u32 %v758_v11, 16  ;;  %v787_v39 = vsel %vm786_vm15, 1, %v10317_v14 }
  0xa5   :  { %v772_v19 = vadd.s32 %v771_v41, %v761_v54  ;;  %v783_v59 = vshrl.u32 %v779_v17, 16  ;;  %v789_v38 = vadd.s32 %v787_v39, %v781_v61  ;;  %vm790_vm0 = vc.u32 %v788_v32, %v784_v34 }
  0xa6   :  { %v10182_v36 = vxor.u32 2147483648, %v6769_v24  ;;  %v739_v6 = vsel %vm735_vm3, %v719_v15, %v6710_v27  ;;  %v741_v58 = vsel %vm737_vm5, %v6712_v45, %v740_v4  ;;  %v791_v7 = vsel %vm790_vm0, 1, %v10317_v14 }
  0xa7   :  { %v10183_v11 = vxor.u32 2147483648, %v6777_v28  ;;  %v517_v31 = vxor.u32 2147483648, %v516_v23  ;;  %v785_v35 = vshrl.u32 %v780_v47, 16  ;;  %v793_v30 = vadd.s32 %v791_v7, %v789_v38 }
  0xa8   :  { %v373_v17 = vadd.f32 -0.4999988, %v372_v49  ;;  %v6809_v61 = vadd.s32 %v772_v19, %v763_v63  ;;  %v6811_v48 = vadd.s32 %v788_v32, %v784_v34  ;;  %v867_v5 = vadd.s32 1, %v6071_v46 }
  0xa9   :  { %v380_v54 = vadd.f32 -0.16666654, %v379_v62  ;;  %vm6067_vm1 = vcmp.lt.s32.totalorder %v6066_v43, 0  ;;  %v742_v27 = vsel %vm736_vm6, %v739_v6, %v741_v58  ;;  %v794_v15 = vadd.s32 %v793_v30, %v783_v59 }
  0xaa   :  { %v235_v45 = vsel %vm233_vm9, %v6769_v24, %v10183_v11  ;;  %v238_v47 = vsel %vm236_vm10, %v10182_v36, %v6777_v28  ;;  %v10185_v49 = vand.u32 2147483647, %v6514_v18  ;;  %vm868_vm2 = vcmp.gt.s32.totalorder %v867_v5, 0 }
  0xab   :  { %v6827_v46 = vand.u32 3, %v6773_v37  ;;  %v518_v51 = vsel %vm397_vm11, %v517_v31, %v516_v23  ;;  %v795_v33 = vadd.s32 %v794_v15, %v785_v35  ;;  %v869_v55 = vsel %vm868_vm2, %v867_v5, 0 }
  0xac   :  { %v6831_v34 = vsel %vm6067_vm1, 0, %v6066_v43  ;;  %v796_v60 = vmul.u32 %v6727_v13, %v742_v27  ;;  %vm798_vm3 = vc.u32 %v6809_v61, %v6811_v48  ;;  %v871_v4 = vand.u32 31, %v869_v55 }
  0xad   :  { %v6838_v41 = vsel %vm232_vm13, %v235_v45, %v238_v47  ;;  %v374_v32 = vmul.f32 %v373_v17, %v6754_v57  ;;  %v381_v62 = vmul.f32 %v380_v54, %v6754_v57  ;;  %v799_v63 = vadd.s32 1, %v795_v33 }
  0xae   :  { %v519_v23 = vsub.s32 4, %v6543_v0  ;;  %v6846_v43 = vsel %vm6791_vm14, %v6245_v10, %v518_v51  ;;  %v864_v13 = vand.u32 8388607, %v10185_v49  ;;  %v6850_v39 = vsub.s32 32, %v871_v4 }
  0xaf   :  { %v663_v52 = vsub.s32 4294967266, %v6831_v34  ;;  %v800_v19 = vsel %vm798_vm3, %v799_v63, %v795_v33  ;;  %v6853_v59 = vshrl.u32 %v869_v55, 5  ;;  %v883_v57 = vshll.u32 %v10311_v40, %v871_v4 }
  0xb0   :  { %v801_v38 = vadd.s32 %v800_v19, %v796_v60  ;;  %v874_v6 = vshll.u32 %v10318_v8, %v871_v4  ;;  %v877_v58 = vshll.u32 %v10309_v44, %v871_v4  ;;  %v880_v7 = vshll.u32 %v10310_v50, %v871_v4 }
  0xb1   :  { %v875_v31 = vshrl.u32 %v10309_v44, %v6850_v39  ;;  %v878_v35 = vshrl.u32 %v10310_v50, %v6850_v39  ;;  %v881_v30 = vshrl.u32 %v10311_v40, %v6850_v39  ;;  %v884_v17 = vshrl.u32 %v10312_v22, %v6850_v39 }
  0xb2   :  { %v6867_v5 = vadd.f32 1.0, %v374_v32  ;;  %v382_v54 = vadd.f32 1.0, %v381_v62  ;;  %v6871_v27 = vmul.f32 %v6846_v43, %v6846_v43  ;;  %v802_v15 = vadd.s32 536870912, %v801_v38 }
  0xb3   :  { %vm390_vm4 = vcmp.eq.s32.totalorder %v6827_v46, 2  ;;  %v643_v45 = vadd.s32 %v6657_v42, %v6676_v53  ;;  %v885_v47 = vor.u32 %v884_v17, %v883_v57  ;;  %v886_v51 = vshll.u32 %v10312_v22, %v871_v4 }
  0xb4   :  { %10322 = vst [vmem:[#allocation27_spill] sm:$0xff] %v6867_v5  ;;  %v887_v33 = vshrl.u32 %v10313_v29, %v6850_v39  ;;  %vm387_vm5 = vcmp.eq.s32.totalorder %v6827_v46, 0  ;;  %v659_v55 = vsub.s32 32, %v6831_v34  ;;  %v664_v60 = vadd.s32 127, %v663_v52 }
  0xb5   :  { %v6881_v32 = vshrl.u32 %v802_v15, 30  ;;  %v865_v62 = vor.u32 8388608, %v864_v13  ;;  %v6883_v63 = vor.u32 %v875_v31, %v874_v6  ;;  %v6885_v19 = vor.u32 %v878_v35, %v877_v58 }
  0xb6   :  { %v882_v36 = vor.u32 %v881_v30, %v880_v7  ;;  %vm892_vm6 = vcmp.lt.s32.totalorder %v6853_v59, 4  ;;  %v6889_v42 = vmul.f32 %v382_v54, %v6725_v16  ;;  %vm889_vm7 = vcmp.lt.s32.totalorder %v6853_v59, 1 }
  0xb7   :  { %v804_v53 = vshll.u32 %v6881_v32, 30  ;;  %vm891_vm8 = vcmp.lt.s32.totalorder %v6853_v59, 3  ;;  %v10184_v4 = vxor.u32 2147483648, %v6867_v5  ;;  %v524_v13 = vmul.f32 -0.001358992, %v6871_v27 }
  0xb8   :  { %10323 = vst [vmem:[#allocation28_spill] sm:$0xff] %v6889_v42  ;;  %v888_v52 = vor.u32 %v887_v33, %v886_v51  ;;  %v898_v57 = vsel %vm892_vm6, %v885_v47, 920167782  ;;  %vm386_vm9 = vcmp.lt.s32.totalorder %v6827_v46, 2  ;;  %v660_v16 = vshll.u32 %v6748_v56, %v6831_v34 }
  0xb9   :  { %v661_v6 = vshrl.u32 %v643_v45, %v659_v55  ;;  %v6901_v58 = vsub.s32 %v801_v38, %v804_v53  ;;  %v6903_v7 = vshll.u32 %v865_v62, 8  ;;  %vm230_vm10 = vweird.f32 %v6233_v2 }
  0xba   :  { %v665_v31 = vshll.u32 %v664_v60, 23  ;;  %vm890_vm12 = vcmp.lt.s32.totalorder %v6853_v59, 2  ;;  %v897_v35 = vsel %vm889_vm7, %v6883_v63, %v6885_v19  ;;  %v899_v30 = vsel %vm891_vm8, %v882_v36, %v898_v57 }
  0xbb   :  { %v10186_v56 = vxor.u32 2147483648, %v6889_v42  ;;  %v531_v34 = vmul.f32 -0.00019511016, %v6871_v27  ;;  %v807_v38 = vsub.s32 0, %v6901_v58  ;;  %v901_v17 = vsel %vm889_vm7, %v6885_v19, %v882_v36 }
  0xbc   :  { %v525_v54 = vadd.f32 0.041655596, %v524_v13  ;;  %vm806_vm13 = vcmp.lt.s32.totalorder %v6901_v58, 0  ;;  %v902_v15 = vsel %vm892_vm6, %v888_v52, 1326507024  ;;  %v1014_v45 = vand.u32 2139095040, %v6516_v9 }
  0xbd   :  { %v662_v51 = vor.u32 %v661_v6, %v660_v16  ;;  %v900_v33 = vsel %vm890_vm12, %v897_v35, %v899_v30  ;;  %v903_v55 = vsel %vm891_vm8, %v885_v47, %v902_v15  ;;  %v906_v60 = vand.u32 65535, %v6903_v7 }
  0xbe   :  { %v520_v62 = vsel %vm397_vm11, %v519_v23, %v6543_v0  ;;  %v666_v53 = vor.u32 4788187, %v665_v31  ;;  %v904_v13 = vsel %vm890_vm12, %v901_v17, %v903_v55  ;;  %v907_v52 = vshrl.u32 %v6903_v7, 16 }
  0xbf   :  { %v392_v47 = vsel %vm390_vm4, %v10184_v4, %v6889_v42  ;;  %v808_v57 = vsel %vm806_vm13, %v807_v38, %v6901_v58  ;;  %v908_v16 = vand.u32 65535, %v904_v13  ;;  %v909_v6 = vshrl.u32 %v904_v13, 16 }
  0xc0   :  { %v389_v0 = vsel %vm387_vm5, %v6867_v5, %v10186_v56  ;;  %v532_v23 = vadd.f32 0.008332121, %v531_v34  ;;  %v931_v31 = vshrl.u32 %v900_v33, 16  ;;  %v1015_v35 = vshrl.u32 %v1014_v45, 23 }
  0xc1   :  { %v526_v30 = vmul.f32 %v525_v54, %v6871_v27  ;;  %v669_v17 = vcvt.s32.f32 %v662_v51  ;;  %v911_v15 = vmul.u32 %v909_v6, %v906_v60  ;;  %v930_v55 = vand.u32 65535, %v900_v33 }
  0xc2   :  { %v667_v11 = vand.u32 2147483647, %v666_v53  ;;  %v809_v4 = vclz %v808_v57  ;;  %v873_v38 = vshrl.u32 %v10318_v8, %v6850_v39  ;;  %v912_v13 = vmul.u32 %v908_v16, %v907_v52 }
  0xc3   :  { %v6953_v49 = vsel %vm230_vm10, nan, %v6838_v41  ;;  %v6957_v34 = vsel %vm6791_vm14, 0, %v520_v62  ;;  %v910_v45 = vmul.u32 %v908_v16, %v906_v60  ;;  %v914_v54 = vshll.u32 %v911_v15, 16 }
  0xc4   :  { %10324 = vst [vmem:[#allocation29_spill] sm:$0xff] %v6953_v49  ;;  %v393_v51 = vsel %vm386_vm9, %v389_v0, %v392_v47  ;;  %v894_v33 = vsel %vm892_vm6, %v882_v36, 2102212464  ;;  %v933_v53 = vmul.u32 %v931_v31, %v906_v60  ;;  %v6074_v39 = vadd.s32 4294967169, %v1015_v35 }
  0xc5   :  { %10325 = vst [vmem:[#allocation30_spill] sm:$0xff] %v6957_v34  ;;  %vm384_vm11 = vweird.f32 %v6235_v3  ;;  %v527_v57 = vadd.f32 -0.4999988, %v526_v30  ;;  %v533_v41 = vmul.f32 %v532_v23, %v6871_v27  ;;  %v913_v56 = vmul.u32 %v909_v6, %v907_v52 }
  0xc6   :  { %v934_v49 = vmul.u32 %v930_v55, %v907_v52  ;;  %v670_v26 = vmul.f32 %v669_v17, %v667_v11  ;;  %v6069_v62 = vadd.s32 4294967294, %v809_v4  ;;  %v893_v16 = vsel %vm889_vm7, %v873_v38, %v6883_v63 }
  0xc7   :  { %v916_v46 = vshll.u32 %v912_v13, 16  ;;  %vm551_vm14 = vcmp.lt.s32.totalorder %v6463_v25, 0  ;;  %v895_v36 = vsel %vm891_vm8, %v6885_v19, %v894_v33  ;;  %vm918_vm15 = vc.u32 %v910_v45, %v914_v54 }
  0xc8   :  { %v920_v47 = vadd.s32 %v914_v54, %v910_v45  ;;  %v932_v0 = vmul.u32 %v930_v55, %v906_v60  ;;  %v915_v35 = vshrl.u32 %v911_v15, 16  ;;  %v919_v6 = vsel %vm918_vm15, 1, %v10317_v14 }
  0xc9   :  { %v936_v23 = vshll.u32 %v933_v53, 16  ;;  %v1021_v11 = vadd.s32 1, %v6074_v39  ;;  %v921_v4 = vadd.s32 %v919_v6, %v913_v56  ;;  %v935_v30 = vmul.u32 %v931_v31, %v907_v52 }
  0xca   :  { %vm922_vm0 = vc.u32 %v920_v47, %v916_v46  ;;  %v938_v17 = vshll.u32 %v934_v49, 16  ;;  %v534_v63 = vadd.f32 -0.16666654, %v533_v41  ;;  %vm6070_vm1 = vcmp.lt.s32.totalorder %v6069_v62, 0 }
  0xcb   :  { %v923_v38 = vsel %vm922_vm0, 1, %v10317_v14  ;;  %v10190_v2 = vand.u32 2147483647, %v6516_v9  ;;  %v917_v5 = vshrl.u32 %v912_v13, 16  ;;  %vm940_vm2 = vc.u32 %v932_v0, %v936_v23 }
  0xcc   :  { %v925_v19 = vadd.s32 %v923_v38, %v921_v4  ;;  %v942_v45 = vadd.s32 %v936_v23, %v932_v0  ;;  %v671_v60 = vxor.u32 2147483648, %v670_v26  ;;  %v896_v15 = vsel %vm890_vm12, %v893_v16, %v895_v36 }
  0xcd   :  { %v941_v55 = vsel %vm940_vm2, 1, %v10317_v14  ;;  %vm1022_vm3 = vcmp.gt.s32.totalorder %v1021_v11, 0  ;;  %v937_v52 = vshrl.u32 %v933_v53, 16  ;;  %v6978_v54 = vsel %vm6070_vm1, 0, %v6069_v62 }
  0xce   :  { %v926_v56 = vadd.s32 %v925_v19, %v915_v35  ;;  %v943_v31 = vadd.s32 %v941_v55, %v935_v30  ;;  %vm944_vm4 = vc.u32 %v942_v45, %v938_v17  ;;  %v939_v33 = vshrl.u32 %v934_v49, 16 }
  0xcf   :  { %v945_v39 = vsel %vm944_vm4, 1, %v10317_v14  ;;  %v1023_v13 = vsel %vm1022_vm3, %v1021_v11, 0  ;;  %v6983_v46 = vadd.s32 %v942_v45, %v938_v17  ;;  %v6987_v16 = vsel %vm384_vm11, nan, %v393_v51 }
  0xd0   :  { %v6981_v41 = vadd.s32 %v926_v56, %v917_v5  ;;  %v947_v47 = vadd.s32 %v945_v39, %v943_v31  ;;  %v1025_v59 = vand.u32 31, %v1023_v13  ;;  %10326 = vst [vmem:[#allocation31_spill] sm:$0xff] %v6987_v16  ;;  %v528_v53 = vmul.f32 %v527_v57, %v6871_v27 }
  0xd1   :  { %v6991_v36 = vand.u32 3, %v6957_v34  ;;  %v10327_v49 = vand.u32 2147483647, %v6463_v25  ;;  %v535_v5 = vmul.f32 %v534_v63, %v6871_v27  ;;  %v1018_v35 = vand.u32 8388607, %v10190_v2 }
  0xd2   :  { %v948_v0 = vadd.s32 %v947_v47, %v937_v52  ;;  %v7002_v6 = vsub.s32 32, %v1025_v59  ;;  %v672_v51 = vsel %vm551_vm14, %v671_v60, %v670_v26  ;;  %v817_v57 = vsub.s32 4294967266, %v6978_v54 }
  0xd3   :  { %vm6995_vm5 = vcmp.le.f32.partialorder %v10327_v49, 0.7853982  ;;  %v950_v23 = vmul.u32 %v6903_v7, %v896_v15  ;;  %v7008_v11 = vshrl.u32 %v1023_v13, 5  ;;  %vm952_vm6 = vc.u32 %v6981_v41, %v6983_v46 }
  0xd4   :  { %v949_v4 = vadd.s32 %v948_v0, %v939_v33  ;;  %v1028_v27 = vshll.u32 %v10318_v8, %v1025_v59  ;;  %v1031_v30 = vshll.u32 %v10309_v44, %v1025_v59  ;;  %v1029_v17 = vshrl.u32 %v10309_v44, %v7002_v6 }
  0xd5   :  { %v1032_v26 = vshrl.u32 %v10310_v50, %v7002_v6  ;;  %v1034_v63 = vshll.u32 %v10310_v50, %v1025_v59  ;;  %v1037_v7 = vshll.u32 %v10311_v40, %v1025_v59  ;;  %v1035_v19 = vshrl.u32 %v10311_v40, %v7002_v6 }
  0xd6   :  { %v953_v38 = vadd.s32 1, %v949_v4  ;;  %v1038_v45 = vshrl.u32 %v10312_v22, %v7002_v6  ;;  %v1040_v60 = vshll.u32 %v10312_v22, %v1025_v59  ;;  %v536_v15 = vadd.f32 1.0, %v535_v5 }
  0xd7   :  { %v7028_v55 = vsel %vm6995_vm5, %v6463_v25, %v672_v51  ;;  %v797_v56 = vadd.s32 %v6811_v48, %v6809_v61  ;;  %v1019_v52 = vor.u32 8388608, %v1018_v35  ;;  %v813_v31 = vsub.s32 32, %v6978_v54 }
  0xd8   :  { %v954_v33 = vsel %vm952_vm6, %v953_v38, %v949_v4  ;;  %v1039_v39 = vor.u32 %v1038_v45, %v1037_v7  ;;  %v1041_v13 = vshrl.u32 %v10313_v29, %v7002_v6  ;;  %v818_v47 = vadd.s32 127, %v817_v57 }
  0xd9   :  { %v955_v59 = vadd.s32 %v954_v33, %v950_v23  ;;  %v7038_v49 = vor.u32 %v1029_v17, %v1028_v27  ;;  %v7040_v5 = vor.u32 %v1032_v26, %v1031_v30  ;;  %v7042_v0 = vor.u32 %v1035_v19, %v1034_v63 }
  0xda   :  { %v1042_v61 = vor.u32 %v1041_v13, %v1040_v60  ;;  %vm1043_vm7 = vcmp.lt.s32.totalorder %v7008_v11, 1  ;;  %vm1046_vm8 = vcmp.lt.s32.totalorder %v7008_v11, 4  ;;  %v7046_v48 = vadd.f32 1.0, %v528_v53 }
  0xdb   :  { %v673_v35 = vsub.s32 4, %v6718_v12  ;;  %v956_v51 = vadd.s32 536870912, %v955_v59  ;;  %vm1045_vm9 = vcmp.lt.s32.totalorder %v7008_v11, 3  ;;  %v7052_v57 = vmul.f32 %v7028_v55, %v7028_v55 }
  0xdc   :  { %10330 = vst [vmem:[#allocation32_spill] sm:$0xff] %v7046_v48  ;;  %v814_v23 = vshll.u32 %v6901_v58, %v6978_v54  ;;  %v815_v4 = vshrl.u32 %v797_v56, %v813_v31  ;;  %v1052_v27 = vsel %vm1046_vm8, %v1039_v39, 920167782  ;;  %vm541_vm12 = vcmp.eq.s32.totalorder %v6991_v36, 0 }
  0xdd   :  { %v819_v53 = vshll.u32 %v818_v47, 23  ;;  %v7059_v30 = vshrl.u32 %v956_v51, 30  ;;  %vm1044_vm13 = vcmp.lt.s32.totalorder %v7008_v11, 2  ;;  %v1051_v17 = vsel %vm1043_vm7, %v7038_v49, %v7040_v5 }
  0xde   :  { %v7067_v26 = vmul.f32 %v536_v15, %v6846_v43  ;;  %v1053_v58 = vsel %vm1045_vm9, %v7042_v0, %v1052_v27  ;;  %v1056_v54 = vsel %vm1046_vm8, %v1042_v61, 1326507024  ;;  %v7074_v63 = vshll.u32 %v1019_v52, 8 }
  0xdf   :  { %vm544_vm15 = vcmp.eq.s32.totalorder %v6991_v36, 2  ;;  %v678_v7 = vmul.f32 -0.001358992, %v7052_v57  ;;  %v958_v38 = vshll.u32 %v7059_v30, 30  ;;  %v1055_v43 = vsel %vm1043_vm7, %v7040_v5, %v7042_v0 }
  0xe0   :  { %10331 = vst [vmem:[#allocation33_spill] sm:$0xff] %v7067_v26  ;;  %v685_v19 = vmul.f32 -0.00019511016, %v7052_v57  ;;  %v816_v45 = vor.u32 %v815_v4, %v814_v23  ;;  %v1054_v60 = vsel %vm1044_vm13, %v1051_v17, %v1053_v58  ;;  %v1057_v15 = vsel %vm1045_vm9, %v1039_v39, %v1056_v54 }
  0xe1   :  { %v10191_v56 = vxor.u32 2147483648, %v7046_v48  ;;  %v674_v52 = vsel %vm551_vm14, %v673_v35, %v6718_v12  ;;  %v820_v31 = vor.u32 4788187, %v819_v53  ;;  %v7092_v33 = vsub.s32 %v955_v59, %v958_v38 }
  0xe2   :  { %v10195_v13 = vxor.u32 2147483648, %v7067_v26  ;;  %v1058_v47 = vsel %vm1044_vm13, %v1055_v43, %v1057_v15  ;;  %v1060_v61 = vand.u32 65535, %v7074_v63  ;;  %v1061_v51 = vshrl.u32 %v7074_v63, 16 }
  0xe3   :  { %v679_v23 = vadd.f32 0.041655596, %v678_v7  ;;  %vm960_vm0 = vcmp.lt.s32.totalorder %v7092_v33, 0  ;;  %v961_v39 = vsub.s32 0, %v7092_v33  ;;  %v1085_v4 = vshrl.u32 %v1054_v60, 16 }
  0xe4   :  { %v686_v27 = vadd.f32 0.008332121, %v685_v19  ;;  %v823_v12 = vcvt.s32.f32 %v816_v45  ;;  %v1062_v35 = vand.u32 65535, %v1058_v47  ;;  %v1063_v59 = vshrl.u32 %v1058_v47, 16 }
  0xe5   :  { %v821_v53 = vand.u32 2147483647, %v820_v31  ;;  %v962_v17 = vsel %vm960_vm0, %v961_v39, %v7092_v33  ;;  %v1084_v58 = vand.u32 65535, %v1054_v60  ;;  %v1168_v54 = vand.u32 2139095040, %v6518_v20 }
  0xe6   :  { %v963_v38 = vclz %v962_v17  ;;  %v1064_v43 = vmul.u32 %v1062_v35, %v1060_v61  ;;  %v1065_v15 = vmul.u32 %v1063_v59, %v1060_v61  ;;  %v1066_v2 = vmul.u32 %v1062_v35, %v1061_v51 }
  0xe7   :  { %v7108_v7 = vsel %vm544_vm15, %v10191_v56, %v7067_v26  ;;  %v7112_v19 = vsel %vm6995_vm5, 0, %v674_v52  ;;  %vm705_vm14 = vcmp.lt.s32.totalorder %v6512_v1, 0  ;;  %v1087_v45 = vmul.u32 %v1085_v4, %v1060_v61 }
  0xe8   :  { %10332 = vst [vmem:[#allocation34_spill] sm:$0xff] %v7112_v19  ;;  %v7120_v60 = vsel %vm541_vm12, %v7046_v48, %v10195_v13  ;;  %v680_v31 = vmul.f32 %v679_v23, %v7052_v57  ;;  %v687_v47 = vmul.f32 %v686_v27, %v7052_v57  ;;  %v1068_v39 = vshll.u32 %v1065_v15, 16 }
  0xe9   :  { %v6072_v35 = vadd.s32 4294967294, %v963_v38  ;;  %v1067_v17 = vmul.u32 %v1063_v59, %v1061_v51  ;;  %v1070_v62 = vshll.u32 %v1066_v2, 16  ;;  %v1088_v52 = vmul.u32 %v1084_v58, %v1061_v51 }
  0xea   :  { %v7125_v56 = vand.u32 3, %v7112_v19  ;;  %v10333_v16 = vand.u32 2147483647, %v6512_v1  ;;  %v824_v13 = vmul.f32 %v823_v12, %v821_v53  ;;  %vm1072_vm2 = vc.u32 %v1064_v43, %v1068_v39 }
  0xeb   :  { %v1169_v48 = vshrl.u32 %v1168_v54, 23  ;;  %v1073_v23 = vsel %vm1072_vm2, 1, %v10317_v14  ;;  %v1074_v27 = vadd.s32 %v1068_v39, %v1064_v43  ;;  %v1086_v3 = vmul.u32 %v1084_v58, %v1060_v61 }
  0xec   :  { %vm7129_vm1 = vcmp.le.f32.partialorder %v10333_v16, 0.7853982  ;;  %v1090_v38 = vshll.u32 %v1087_v45, 16  ;;  %v681_v59 = vadd.f32 -0.4999988, %v680_v31  ;;  %v1069_v42 = vshrl.u32 %v1065_v15, 16 }
  0xed   :  { %v688_v34 = vadd.f32 -0.16666654, %v687_v47  ;;  %v1089_v24 = vmul.u32 %v1085_v4, %v1061_v51  ;;  %vm6073_vm3 = vcmp.lt.s32.totalorder %v6072_v35, 0  ;;  %v1075_v19 = vadd.s32 %v1073_v23, %v1067_v17 }
  0xee   :  { %vm1076_vm4 = vc.u32 %v1074_v27, %v1070_v62  ;;  %v1092_v28 = vshll.u32 %v1088_v52, 16  ;;  %v825_v16 = vxor.u32 2147483648, %v824_v13  ;;  %v1027_v37 = vshrl.u32 %v10318_v8, %v7002_v6 }
  0xef   :  { %v1048_v12 = vsel %vm1046_vm8, %v7042_v0, 2102212464  ;;  %v1077_v53 = vsel %vm1076_vm4, 1, %v10317_v14  ;;  %vm1094_vm5 = vc.u32 %v1086_v3, %v1090_v38  ;;  %v1096_v58 = vadd.s32 %v1090_v38, %v1086_v3 }
  0xf0   :  { %v1079_v61 = vadd.s32 %v1077_v53, %v1075_v19  ;;  %v6077_v54 = vadd.s32 4294967169, %v1169_v48  ;;  %v689_v51 = vmul.f32 %v688_v34, %v7052_v57  ;;  %v7141_v4 = vsel %vm6073_vm3, 0, %v6072_v35 }
  0xf1   :  { %v1071_v43 = vshrl.u32 %v1066_v2, 16  ;;  %v1095_v15 = vsel %vm1094_vm5, 1, %v10317_v14  ;;  %v1091_v47 = vshrl.u32 %v1087_v45, 16  ;;  %vm1098_vm6 = vc.u32 %v1096_v58, %v1092_v28 }
  0xf2   :  { %v1080_v31 = vadd.s32 %v1079_v61, %v1069_v42  ;;  %v1097_v6 = vadd.s32 %v1095_v15, %v1089_v24  ;;  %v826_v0 = vsel %vm705_vm14, %v825_v16, %v824_v13  ;;  %v1047_v19 = vsel %vm1043_vm7, %v1027_v37, %v7038_v49 }
  0xf3   :  { %v1049_v3 = vsel %vm1045_vm9, %v7040_v5, %v1048_v12  ;;  %v1099_v34 = vsel %vm1098_vm6, 1, %v10317_v14  ;;  %v971_v2 = vsub.s32 4294967266, %v7141_v4  ;;  %v1093_v48 = vshrl.u32 %v1088_v52, 16 }
  0xf4   :  { %v1101_v42 = vadd.s32 %v1099_v34, %v1097_v6  ;;  %v1175_v45 = vadd.s32 1, %v6077_v54  ;;  %v682_v24 = vmul.f32 %v681_v59, %v7052_v57  ;;  %v827_v39 = vsub.s32 4, %v6881_v32 }
  0xf5   :  { %v7156_v13 = vadd.s32 %v1080_v31, %v1071_v43  ;;  %v7158_v35 = vadd.s32 %v1096_v58, %v1092_v28  ;;  %v7163_v37 = vsel %vm7129_vm1, %v6512_v1, %v826_v0  ;;  %v1050_v49 = vsel %vm1044_vm13, %v1047_v19, %v1049_v3 }
  0xf6   :  { %v1102_v5 = vadd.s32 %v1101_v42, %v1091_v47  ;;  %vm1176_vm7 = vcmp.gt.s32.totalorder %v1175_v45, 0  ;;  %v690_v17 = vadd.f32 1.0, %v689_v51  ;;  %v951_v57 = vadd.s32 %v6983_v46, %v6981_v41 }
  0xf7   :  { %v967_v62 = vsub.s32 32, %v7141_v4  ;;  %v1177_v52 = vsel %vm1176_vm7, %v1175_v45, 0  ;;  %v972_v23 = vadd.s32 127, %v971_v2  ;;  %v10213_v27 = vand.u32 2147483647, %v6518_v20 }
  0xf8   :  { %v1103_v28 = vadd.s32 %v1102_v5, %v1093_v48  ;;  %v1179_v38 = vand.u32 31, %v1177_v52  ;;  %vm698_vm8 = vcmp.eq.s32.totalorder %v7125_v56, 2  ;;  %v7174_v11 = vmul.f32 %v7163_v37, %v7163_v37 }
  0xf9   :  { %v1104_v59 = vmul.u32 %v7074_v63, %v1050_v49  ;;  %vm1106_vm9 = vc.u32 %v7156_v13, %v7158_v35  ;;  %v7179_v41 = vadd.f32 1.0, %v682_v24  ;;  %vm695_vm12 = vcmp.eq.s32.totalorder %v7125_v56, 0 }
  0xfa   :  { %v7185_v46 = vsel %vm705_vm14, %v827_v39, %v6881_v32  ;;  %v1107_v16 = vadd.s32 1, %v1103_v28  ;;  %v7187_v12 = vsub.s32 32, %v1179_v38  ;;  %v7190_v53 = vmul.f32 %v690_v17, %v7028_v55 }
  0xfb   :  { %10336 = vst [vmem:[#allocation35_spill] sm:$0xff] %v7179_v41  ;;  %v832_v63 = vmul.f32 -0.001358992, %v7174_v11  ;;  %v968_v61 = vshll.u32 %v7092_v33, %v7141_v4  ;;  %v969_v58 = vshrl.u32 %v951_v57, %v967_v62  ;;  %v973_v54 = vshll.u32 %v972_v23, 23 }
  0xfc   :  { %10337 = vst [vmem:[#allocation36_spill] sm:$0xff] %v7190_v53  ;;  %v1108_v51 = vsel %vm1106_vm9, %v1107_v16, %v1103_v28  ;;  %v1172_v43 = vand.u32 8388607, %v10213_v27  ;;  %v1185_v32 = vshll.u32 %v10309_v44, %v1179_v38  ;;  %v1188_v31 = vshll.u32 %v10310_v50, %v1179_v38 }
  0xfd   :  { %v1109_v15 = vadd.s32 %v1108_v51, %v1104_v59  ;;  %v1191_v47 = vshll.u32 %v10311_v40, %v1179_v38  ;;  %v1194_v55 = vshll.u32 %v10312_v22, %v1179_v38  ;;  %v1186_v6 = vshrl.u32 %v10310_v50, %v7187_v12 }
  0xfe   :  { %v1189_v33 = vshrl.u32 %v10311_v40, %v7187_v12  ;;  %v1192_v4 = vshrl.u32 %v10312_v22, %v7187_v12  ;;  %v1195_v0 = vshrl.u32 %v10313_v29, %v7187_v12  ;;  %vm540_vm13 = vcmp.lt.s32.totalorder %v6991_v36, 2 }
  0xff   :  { %v10208_v19 = vxor.u32 2147483648, %v7179_v41  ;;  %v839_v3 = vmul.f32 -0.00019511016, %v7174_v11  ;;  %v1110_v34 = vadd.s32 536870912, %v1109_v15  ;;  %v7212_v2 = vshrl.u32 %v1177_v52, 5 }
 0x100   :  { %vm694_vm15 = vcmp.lt.s32.totalorder %v7125_v56, 2  ;;  %v10209_v48 = vxor.u32 2147483648, %v7190_v53  ;;  %v970_v42 = vor.u32 %v969_v58, %v968_v61  ;;  %v974_v45 = vor.u32 4788187, %v973_v54 }
 0x101   :  { %v1173_v24 = vor.u32 8388608, %v1172_v43  ;;  %v833_v39 = vadd.f32 0.041655596, %v832_v63  ;;  %v7216_v49 = vshrl.u32 %v1110_v34, 30  ;;  %v1182_v5 = vshll.u32 %v10318_v8, %v1179_v38 }
 0x102   :  { %v1183_v17 = vshrl.u32 %v10309_v44, %v7187_v12  ;;  %v7221_v57 = vor.u32 %v1186_v6, %v1185_v32  ;;  %v7223_v62 = vor.u32 %v1189_v33, %v1188_v31  ;;  %v1193_v52 = vor.u32 %v1192_v4, %v1191_v47 }
 0x103   :  { %v1196_v23 = vor.u32 %v1195_v0, %v1194_v55  ;;  %v840_v28 = vadd.f32 0.008332121, %v839_v3  ;;  %v1112_v59 = vshll.u32 %v7216_v49, 30  ;;  %vm1197_vm0 = vcmp.lt.s32.totalorder %v7212_v2, 1 }
 0x104   :  { %vm1200_vm14 = vcmp.lt.s32.totalorder %v7212_v2, 4  ;;  %vm538_vm2 = vweird.f32 %v6245_v10  ;;  %v700_v38 = vsel %vm698_vm8, %v10208_v19, %v7190_v53  ;;  %v975_v16 = vand.u32 2147483647, %v974_v45 }
 0x105   :  { %v977_v63 = vcvt.s32.f32 %v970_v42  ;;  %v7234_v61 = vshll.u32 %v1173_v24, 8  ;;  %v697_v58 = vsel %vm695_vm12, %v7179_v41, %v10209_v48  ;;  %v7241_v54 = vsub.s32 %v1109_v15, %v1112_v59 }
 0x106   :  { %v1184_v51 = vor.u32 %v1183_v17, %v1182_v5  ;;  %vm1199_vm3 = vcmp.lt.s32.totalorder %v7212_v2, 3  ;;  %vm1198_vm4 = vcmp.lt.s32.totalorder %v7212_v2, 2  ;;  %v1206_v43 = vsel %vm1200_vm14, %v1193_v52, 920167782 }
 0x107   :  { %v1209_v32 = vsel %vm1197_vm0, %v7221_v57, %v7223_v62  ;;  %v1210_v31 = vsel %vm1200_vm14, %v1196_v23, 1326507024  ;;  %v834_v47 = vmul.f32 %v833_v39, %v7174_v11  ;;  %v841_v15 = vmul.f32 %v840_v28, %v7174_v11 }
 0x108   :  { %vm1114_vm5 = vcmp.lt.s32.totalorder %v7241_v54, 0  ;;  %v1115_v55 = vsub.s32 0, %v7241_v54  ;;  %v978_v6 = vmul.f32 %v977_v63, %v975_v16  ;;  %v1211_v33 = vsel %vm1199_vm3, %v1193_v52, %v1210_v31 }
 0x109   :  { %v1214_v4 = vand.u32 65535, %v7234_v61  ;;  %v1215_v0 = vshrl.u32 %v7234_v61, 16  ;;  %v1205_v34 = vsel %vm1197_vm0, %v1184_v51, %v7221_v57  ;;  %v1207_v42 = vsel %vm1199_vm3, %v7223_v62, %v1206_v43 }
 0x10a   :  { %v1116_v3 = vsel %vm1114_vm5, %v1115_v55, %v7241_v54  ;;  %v1212_v45 = vsel %vm1198_vm4, %v1209_v32, %v1211_v33  ;;  %v547_v24 = vsel %vm540_vm13, %v7120_v60, %v7108_v7  ;;  %vm692_vm6 = vweird.f32 %v6463_v25 }
 0x10b   :  { %v1117_v39 = vclz %v1116_v3  ;;  %v1216_v5 = vand.u32 65535, %v1212_v45  ;;  %v1217_v17 = vshrl.u32 %v1212_v45, 16  ;;  %v701_v52 = vsel %vm694_vm15, %v697_v58, %v700_v38 }
 0x10c   :  { %v7280_v23 = vsel %vm7129_vm1, 0, %v7185_v46  ;;  %vm859_vm7 = vcmp.lt.s32.totalorder %v6514_v18, 0  ;;  %v835_v28 = vadd.f32 -0.4999988, %v834_v47  ;;  %v1208_v36 = vsel %vm1198_vm4, %v1205_v34, %v1207_v42 }
 0x10d   :  { %10338 = vst [vmem:[#allocation37_spill] sm:$0xff] %v7280_v23  ;;  %v1219_v7 = vmul.u32 %v1217_v17, %v1214_v4  ;;  %v1322_v60 = vand.u32 2139095040, %v6520_v21  ;;  %v842_v59 = vadd.f32 -0.16666654, %v841_v15  ;;  %v979_v16 = vxor.u32 2147483648, %v978_v6 }
 0x10e   :  { %v1181_v56 = vshrl.u32 %v10318_v8, %v7187_v12  ;;  %v1220_v38 = vmul.u32 %v1216_v5, %v1215_v0  ;;  %v6075_v63 = vadd.s32 4294967294, %v1117_v39  ;;  %v1218_v58 = vmul.u32 %v1216_v5, %v1214_v4 }
 0x10f   :  { %v1222_v26 = vshll.u32 %v1219_v7, 16  ;;  %v1238_v46 = vand.u32 65535, %v1208_v36  ;;  %v7290_v43 = vsel %vm538_vm2, nan, %v547_v24  ;;  %v7293_v32 = vand.u32 3, %v7280_v23 }
 0x110   :  { %10339 = vst [vmem:[#allocation38_spill] sm:$0xff] %v7290_v43  ;;  %v10340_v31 = vand.u32 2147483647, %v6514_v18  ;;  %v1239_v15 = vshrl.u32 %v1208_v36, 16  ;;  %v7303_v12 = vsel %vm692_vm6, nan, %v701_v52  ;;  %v836_v55 = vmul.f32 %v835_v28, %v7174_v11 }
 0x111   :  { %10343 = vst [vmem:[#allocation39_spill] sm:$0xff] %v7303_v12  ;;  %v1221_v33 = vmul.u32 %v1217_v17, %v1215_v0  ;;  %v1323_v3 = vshrl.u32 %v1322_v60, 23  ;;  %v843_v34 = vmul.f32 %v842_v59, %v7174_v11  ;;  %v980_v42 = vsel %vm859_vm7, %v979_v16, %v978_v6 }
 0x112   :  { %vm7297_vm1 = vcmp.le.f32.partialorder %v10340_v31, 0.7853982  ;;  %v1202_v45 = vsel %vm1200_vm14, %v7223_v62, 2102212464  ;;  %v1224_v24 = vshll.u32 %v1220_v38, 16  ;;  %vm6076_vm8 = vcmp.lt.s32.totalorder %v6075_v63, 0 }
 0x113   :  { %v1201_v39 = vsel %vm1197_vm0, %v1181_v56, %v1184_v51  ;;  %vm1226_vm9 = vc.u32 %v1218_v58, %v1222_v26  ;;  %v1240_v5 = vmul.u32 %v1238_v46, %v1214_v4  ;;  %v1228_v17 = vadd.s32 %v1222_v26, %v1218_v58 }
 0x114   :  { %v1227_v52 = vsel %vm1226_vm9, 1, %v10317_v14  ;;  %v1241_v28 = vmul.u32 %v1239_v15, %v1214_v4  ;;  %v1242_v36 = vmul.u32 %v1238_v46, %v1215_v0  ;;  %v1203_v11 = vsel %vm1199_vm3, %v7221_v57, %v1202_v45 }
 0x115   :  { %v1223_v6 = vshrl.u32 %v1219_v7, 16  ;;  %v1229_v60 = vadd.s32 %v1227_v52, %v1221_v33  ;;  %v6080_v59 = vadd.s32 4294967169, %v1323_v3  ;;  %vm1230_vm12 = vc.u32 %v1228_v17, %v1224_v24 }
 0x116   :  { %v1243_v62 = vmul.u32 %v1239_v15, %v1215_v0  ;;  %v1244_v16 = vshll.u32 %v1241_v28, 16  ;;  %v1246_v31 = vshll.u32 %v1242_v36, 16  ;;  %v981_v51 = vsub.s32 4, %v7059_v30 }
 0x117   :  { %v7320_v56 = vsel %vm6076_vm8, 0, %v6075_v63  ;;  %v1231_v58 = vsel %vm1230_vm12, 1, %v10317_v14  ;;  %v10212_v4 = vand.u32 2147483647, %v6520_v21  ;;  %v1225_v26 = vshrl.u32 %v1220_v38, 16 }
 0x118   :  { %v1233_v46 = vadd.s32 %v1231_v58, %v1229_v60  ;;  %vm1248_vm13 = vc.u32 %v1240_v5, %v1244_v16  ;;  %v1250_v57 = vadd.s32 %v1244_v16, %v1240_v5  ;;  %v7327_v7 = vsel %vm7297_vm1, %v6514_v18, %v980_v42 }
 0x119   :  { %v1204_v0 = vsel %vm1198_vm4, %v1201_v39, %v1203_v11  ;;  %v1249_v15 = vsel %vm1248_vm13, 1, %v10317_v14  ;;  %v1329_v63 = vadd.s32 1, %v6080_v59  ;;  %v1245_v3 = vshrl.u32 %v1241_v28, 16 }
 0x11a   :  { %v1234_v33 = vadd.s32 %v1233_v46, %v1223_v6  ;;  %v1251_v45 = vadd.s32 %v1249_v15, %v1243_v62  ;;  %vm1252_vm15 = vc.u32 %v1250_v57, %v1246_v31  ;;  %v1125_v38 = vsub.s32 4294967266, %v7320_v56 }
 0x11b   :  { %v1247_v24 = vshrl.u32 %v1242_v36, 16  ;;  %v1253_v5 = vsel %vm1252_vm15, 1, %v10317_v14  ;;  %vm1330_vm0 = vcmp.gt.s32.totalorder %v1329_v63, 0  ;;  %v7336_v42 = vadd.s32 %v1250_v57, %v1246_v31 }
 0x11c   :  { %v7334_v52 = vadd.s32 %v1234_v33, %v1225_v26  ;;  %v1255_v17 = vadd.s32 %v1253_v5, %v1251_v45  ;;  %v1331_v2 = vsel %vm1330_vm0, %v1329_v63, 0  ;;  %v7338_v39 = vadd.f32 1.0, %v836_v55 }
 0x11d   :  { %v844_v11 = vadd.f32 1.0, %v843_v34  ;;  %v1105_v28 = vadd.s32 %v7158_v35, %v7156_v13  ;;  %v1333_v6 = vand.u32 31, %v1331_v2  ;;  %v7344_v60 = vmul.f32 %v7327_v7, %v7327_v7 }
 0x11e   :  { %10344 = vst [vmem:[#allocation40_spill] sm:$0xff] %v7338_v39  ;;  %v1256_v36 = vadd.s32 %v1255_v17, %v1245_v3  ;;  %v1258_v59 = vmul.u32 %v7234_v61, %v1204_v0  ;;  %v1326_v62 = vand.u32 8388607, %v10212_v4  ;;  %v1121_v16 = vsub.s32 32, %v7320_v56 }
 0x11f   :  { %v1126_v31 = vadd.s32 127, %v1125_v38  ;;  %v7350_v55 = vshrl.u32 %v1331_v2, 5  ;;  %v7352_v34 = vsub.s32 32, %v1333_v6  ;;  %vm852_vm14 = vcmp.eq.s32.totalorder %v7293_v32, 2 }
 0x120   :  { %v1257_v13 = vadd.s32 %v1256_v36, %v1247_v24  ;;  %vm1260_vm3 = vc.u32 %v7334_v52, %v7336_v42  ;;  %v1336_v35 = vshll.u32 %v10318_v8, %v1333_v6  ;;  %v1345_v61 = vshll.u32 %v10311_v40, %v1333_v6 }
 0x121   :  { %v1337_v58 = vshrl.u32 %v10309_v44, %v7352_v34  ;;  %v1339_v26 = vshll.u32 %v10309_v44, %v1333_v6  ;;  %v1340_v46 = vshrl.u32 %v10310_v50, %v7352_v34  ;;  %v1342_v57 = vshll.u32 %v10310_v50, %v1333_v6 }
 0x122   :  { %v1261_v0 = vadd.s32 1, %v1257_v13  ;;  %v1343_v15 = vshrl.u32 %v10311_v40, %v7352_v34  ;;  %v1346_v63 = vshrl.u32 %v10312_v22, %v7352_v34  ;;  %v1348_v33 = vshll.u32 %v10312_v22, %v1333_v6 }
 0x123   :  { %v7371_v3 = vmul.f32 %v844_v11, %v7163_v37  ;;  %v993_v45 = vmul.f32 -0.00019511016, %v7344_v60  ;;  %v1122_v38 = vshll.u32 %v7241_v54, %v7320_v56  ;;  %v1123_v24 = vshrl.u32 %v1105_v28, %v1121_v16 }
 0x124   :  { %v1127_v5 = vshll.u32 %v1126_v31, 23  ;;  %v1262_v17 = vsel %vm1260_vm3, %v1261_v0, %v1257_v13  ;;  %v1347_v2 = vor.u32 %v1346_v63, %v1345_v61  ;;  %v1349_v36 = vshrl.u32 %v10313_v29, %v7352_v34 }
 0x125   :  { %10345 = vst [vmem:[#allocation41_spill] sm:$0xff] %v7371_v3  ;;  %vm848_vm4 = vcmp.lt.s32.totalorder %v7293_v32, 2  ;;  %v1263_v6 = vadd.s32 %v1262_v17, %v1258_v59  ;;  %v1327_v37 = vor.u32 8388608, %v1326_v62  ;;  %v7382_v11 = vor.u32 %v1337_v58, %v1336_v35 }
 0x126   :  { %v7384_v19 = vor.u32 %v1340_v46, %v1339_v26  ;;  %v7386_v48 = vor.u32 %v1343_v15, %v1342_v57  ;;  %v1350_v54 = vor.u32 %v1349_v36, %v1348_v33  ;;  %vm1351_vm5 = vcmp.lt.s32.totalorder %v7350_v55, 1 }
 0x127   :  { %vm1354_vm8 = vcmp.lt.s32.totalorder %v7350_v55, 4  ;;  %v10211_v56 = vxor.u32 2147483648, %v7371_v3  ;;  %v10210_v28 = vxor.u32 2147483648, %v7338_v39  ;;  %v1264_v16 = vadd.s32 536870912, %v1263_v6 }
 0x128   :  { %vm1353_vm9 = vcmp.lt.s32.totalorder %v7350_v55, 3  ;;  %vm10263_vm12 = vweird.f32 %v6512_v1  ;;  %v986_v59 = vmul.f32 -0.001358992, %v7344_v60  ;;  %v1124_v62 = vor.u32 %v1123_v24, %v1122_v38 }
 0x129   :  { %v1128_v31 = vor.u32 4788187, %v1127_v5  ;;  %v1360_v13 = vsel %vm1354_vm8, %v1347_v2, 920167782  ;;  %v994_v35 = vadd.f32 0.008332121, %v993_v45  ;;  %v1359_v58 = vsel %vm1351_vm5, %v7382_v11, %v7384_v19 }
 0x12a   :  { %v7397_v61 = vshrl.u32 %v1264_v16, 30  ;;  %vm1352_vm13 = vcmp.lt.s32.totalorder %v7350_v55, 2  ;;  %vm849_vm15 = vcmp.eq.s32.totalorder %v7293_v32, 0  ;;  %v1361_v26 = vsel %vm1353_vm9, %v7386_v48, %v1360_v13 }
 0x12b   :  { %v1364_v46 = vsel %vm1354_vm8, %v1350_v54, 1326507024  ;;  %v7410_v57 = vshll.u32 %v1327_v37, 8  ;;  %v854_v0 = vsel %vm852_vm14, %v10210_v28, %v7371_v3  ;;  %v982_v15 = vsel %vm859_vm7, %v981_v51, %v7059_v30 }
 0x12c   :  { %v1266_v63 = vshll.u32 %v7397_v61, 30  ;;  %v1363_v33 = vsel %vm1351_vm5, %v7384_v19, %v7386_v48  ;;  %v1129_v45 = vand.u32 2147483647, %v1128_v31  ;;  %v1131_v38 = vcvt.s32.f32 %v1124_v62 }
 0x12d   :  { %v1362_v24 = vsel %vm1352_vm13, %v1359_v58, %v1361_v26  ;;  %v1365_v5 = vsel %vm1353_vm9, %v1347_v2, %v1364_v46  ;;  %v851_v17 = vsel %vm849_vm15, %v7338_v39, %v10211_v56  ;;  %v987_v30 = vadd.f32 0.041655596, %v986_v59 }
 0x12e   :  { %v995_v51 = vmul.f32 %v994_v35, %v7344_v60  ;;  %v7435_v36 = vsub.s32 %v1263_v6, %v1266_v63  ;;  %vm1013_vm7 = vcmp.lt.s32.totalorder %v6516_v9, 0  ;;  %v1366_v37 = vsel %vm1352_vm13, %v1363_v33, %v1365_v5 }
 0x12f   :  { %v1368_v54 = vand.u32 65535, %v7410_v57  ;;  %v1369_v16 = vshrl.u32 %v7410_v57, 16  ;;  %v7444_v2 = vsel %vm7297_vm1, 0, %v982_v15  ;;  %v1393_v62 = vshrl.u32 %v1362_v24, 16 }
 0x130   :  { %vm1268_vm0 = vcmp.lt.s32.totalorder %v7435_v36, 0  ;;  %v1269_v59 = vsub.s32 0, %v7435_v36  ;;  %v855_v6 = vsel %vm848_vm4, %v851_v17, %v854_v0  ;;  %v1132_v31 = vmul.f32 %v1131_v38, %v1129_v45 }
 0x131   :  { %v1370_v13 = vand.u32 65535, %v1366_v37  ;;  %v1371_v35 = vshrl.u32 %v1366_v37, 16  ;;  %v988_v58 = vmul.f32 %v987_v30, %v7344_v60  ;;  %v996_v26 = vadd.f32 -0.16666654, %v995_v51  ;;  %v10350_v51 = vld [vmem:[#allocation16_spill] sm:$0xff] }
 0x132   :  { %v1270_v46 = vsel %vm1268_vm0, %v1269_v59, %v7435_v36  ;;  %v1392_v63 = vand.u32 65535, %v1362_v24  ;;  %v7454_v28 = vsel %vm10263_vm12, nan, %v855_v6  ;;  %v7457_v32 = vand.u32 3, %v7444_v2 }
 0x133   :  { %v1271_v47 = vclz %v1270_v46  ;;  %v1372_v15 = vmul.u32 %v1370_v13, %v1368_v54  ;;  %v1373_v33 = vmul.u32 %v1371_v35, %v1368_v54  ;;  %v1374_v5 = vmul.u32 %v1370_v13, %v1369_v16  ;;  %10346 = vst [vmem:[#allocation42_spill] sm:$0xff] %v7454_v28 }
 0x134   :  { %v10347_v0 = vand.u32 2147483647, %v6516_v9  ;;  %v1395_v38 = vmul.u32 %v1393_v62, %v1368_v54  ;;  %v1133_v17 = vxor.u32 2147483648, %v1132_v31  ;;  %v1476_v37 = vand.u32 2139095040, %v10350_v51 }
 0x135   :  { %v6078_v24 = vadd.s32 4294967294, %v1271_v47  ;;  %v1376_v30 = vshll.u32 %v1373_v33, 16  ;;  %v1375_v13 = vmul.u32 %v1371_v35, %v1369_v16  ;;  %v1378_v6 = vshll.u32 %v1374_v5, 16 }
 0x136   :  { %vm7461_vm1 = vcmp.le.f32.partialorder %v10347_v0, 0.7853982  ;;  %v1396_v46 = vmul.u32 %v1392_v63, %v1369_v16  ;;  %v989_v56 = vadd.f32 -0.4999988, %v988_v58  ;;  %v997_v4 = vmul.f32 %v996_v26, %v7344_v60 }
 0x137   :  { %vm6079_vm14 = vcmp.lt.s32.totalorder %v6078_v24, 0  ;;  %vm1380_vm3 = vc.u32 %v1372_v15, %v1376_v30  ;;  %v1382_v27 = vadd.s32 %v1376_v30, %v1372_v15  ;;  %v1394_v28 = vmul.u32 %v1392_v63, %v1368_v54 }
 0x138   :  { %v1381_v0 = vsel %vm1380_vm3, 1, %v10317_v14  ;;  %v1398_v12 = vshll.u32 %v1395_v38, 16  ;;  %v1134_v47 = vsel %vm1013_vm7, %v1133_v17, %v1132_v31  ;;  %v1274_v43 = vsel %vm6079_vm14, 0, %v6078_v24 }
 0x139   :  { %v1397_v1 = vmul.u32 %v1393_v62, %v1369_v16  ;;  %v1477_v25 = vshrl.u32 %v1476_v37, 23  ;;  %v1377_v59 = vshrl.u32 %v1373_v33, 16  ;;  %v1383_v35 = vadd.s32 %v1381_v0, %v1375_v13 }
 0x13a   :  { %vm1384_vm4 = vc.u32 %v1382_v27, %v1378_v6  ;;  %v1400_v10 = vshll.u32 %v1396_v46, 16  ;;  %v1259_v58 = vadd.s32 %v7336_v42, %v7334_v52  ;;  %v1335_v26 = vshrl.u32 %v10318_v8, %v7352_v34 }
 0x13b   :  { %v1356_v54 = vsel %vm1354_vm8, %v7386_v48, 2102212464  ;;  %v1385_v63 = vsel %vm1384_vm4, 1, %v10317_v14  ;;  %v1279_v31 = vsub.s32 4294967266, %v1274_v43  ;;  %vm1402_vm15 = vc.u32 %v1394_v28, %v1398_v12 }
 0x13c   :  { %v1387_v15 = vadd.s32 %v1385_v63, %v1383_v35  ;;  %v1404_v16 = vadd.s32 %v1398_v12, %v1394_v28  ;;  %v7482_v27 = vsel %vm7461_vm1, %v6516_v9, %v1134_v47  ;;  %v1379_v62 = vshrl.u32 %v1374_v5, 16 }
 0x13d   :  { %v1403_v52 = vsel %vm1402_vm15, 1, %v10317_v14  ;;  %v6083_v42 = vadd.s32 4294967169, %v1477_v25  ;;  %v1399_v33 = vshrl.u32 %v1395_v38, 16  ;;  %v1275_v48 = vsub.s32 32, %v1274_v43 }
 0x13e   :  { %v1388_v34 = vadd.s32 %v1387_v15, %v1377_v59  ;;  %v1405_v17 = vadd.s32 %v1403_v52, %v1397_v1  ;;  %vm1406_vm0 = vc.u32 %v1404_v16, %v1400_v10  ;;  %v1355_v24 = vsel %vm1351_vm5, %v1335_v26, %v7382_v11 }
 0x13f   :  { %v1357_v12 = vsel %vm1353_vm9, %v7384_v19, %v1356_v54  ;;  %v1407_v28 = vsel %vm1406_vm0, 1, %v10317_v14  ;;  %v1280_v30 = vadd.s32 127, %v1279_v31  ;;  %v1401_v5 = vshrl.u32 %v1396_v46, 16 }
 0x140   :  { %v1409_v37 = vadd.s32 %v1407_v28, %v1405_v17  ;;  %v1483_v13 = vadd.s32 1, %v6083_v42  ;;  %v990_v25 = vmul.f32 %v989_v56, %v7344_v60  ;;  %v7495_v1 = vmul.f32 %v7482_v27, %v7482_v27 }
 0x141   :  { %v7497_v38 = vadd.s32 %v1388_v34, %v1379_v62  ;;  %v7499_v59 = vadd.s32 %v1404_v16, %v1400_v10  ;;  %v998_v11 = vadd.f32 1.0, %v997_v4  ;;  %v1358_v19 = vsel %vm1352_vm13, %v1355_v24, %v1357_v12 }
 0x142   :  { %v1410_v6 = vadd.s32 %v1409_v37, %v1399_v33  ;;  %vm1484_vm5 = vcmp.gt.s32.totalorder %v1483_v13, 0  ;;  %v1140_v46 = vmul.f32 -0.001358992, %v7495_v1  ;;  %v1276_v0 = vshll.u32 %v7435_v36, %v1274_v43 }
 0x143   :  { %v1277_v47 = vshrl.u32 %v1259_v58, %v1275_v48  ;;  %v1485_v60 = vsel %vm1484_vm5, %v1483_v13, 0  ;;  %v1281_v56 = vshll.u32 %v1280_v30, 23  ;;  %v10222_v26 = vand.u32 2147483647, %v10350_v51 }
 0x144   :  { %v1411_v35 = vadd.s32 %v1410_v6, %v1401_v5  ;;  %v1487_v54 = vand.u32 31, %v1485_v60  ;;  %vm1003_vm8 = vcmp.eq.s32.totalorder %v7457_v32, 0  ;;  %vm1006_vm9 = vcmp.eq.s32.totalorder %v7457_v32, 2 }
 0x145   :  { %v1412_v10 = vmul.u32 %v7410_v57, %v1358_v19  ;;  %vm1414_vm13 = vc.u32 %v7497_v38, %v7499_v59  ;;  %v7511_v4 = vadd.f32 1.0, %v990_v25  ;;  %v10351_v43 = vsub.s32 4, %v7216_v49 }
 0x146   :  { %v1415_v36 = vadd.s32 1, %v1411_v35  ;;  %v7520_v58 = vsub.s32 32, %v1487_v54  ;;  %v7523_v63 = vmul.f32 %v998_v11, %v7327_v7  ;;  %v1141_v31 = vadd.f32 0.041655596, %v1140_v46 }
 0x147   :  { %v7518_v55 = vsel %vm1013_vm7, %v10351_v43, %v7216_v49  ;;  %v1147_v57 = vmul.f32 -0.00019511016, %v7495_v1  ;;  %v1278_v15 = vor.u32 %v1277_v47, %v1276_v0  ;;  %v1282_v16 = vor.u32 4788187, %v1281_v56 }
 0x148   :  { %v1416_v62 = vsel %vm1414_vm13, %v1415_v36, %v1411_v35  ;;  %v1480_v52 = vand.u32 8388607, %v10222_v26  ;;  %v1493_v42 = vshll.u32 %v10309_v44, %v1487_v54  ;;  %v1496_v49 = vshll.u32 %v10310_v50, %v1487_v54 }
 0x149   :  { %v1417_v34 = vadd.s32 %v1416_v62, %v1412_v10  ;;  %v1499_v33 = vshll.u32 %v10311_v40, %v1487_v54  ;;  %v1502_v17 = vshll.u32 %v10312_v22, %v1487_v54  ;;  %v1494_v7 = vshrl.u32 %v10310_v50, %v7520_v58 }
 0x14a   :  { %v1497_v48 = vshrl.u32 %v10311_v40, %v7520_v58  ;;  %v1500_v24 = vshrl.u32 %v10312_v22, %v7520_v58  ;;  %v1503_v12 = vshrl.u32 %v10313_v29, %v7520_v58  ;;  %v10220_v28 = vxor.u32 2147483648, %v7511_v4 }
 0x14b   :  { %v1148_v30 = vadd.f32 0.008332121, %v1147_v57  ;;  %v1418_v5 = vadd.s32 536870912, %v1417_v34  ;;  %v7541_v37 = vshrl.u32 %v1485_v60, 5  ;;  %vm1002_vm7 = vcmp.lt.s32.totalorder %v7457_v32, 2 }
 0x14c   :  { %v10221_v13 = vxor.u32 2147483648, %v7523_v63  ;;  %v1283_v25 = vand.u32 2147483647, %v1282_v16  ;;  %v1285_v11 = vcvt.s32.f32 %v1278_v15  ;;  %v1481_v19 = vor.u32 8388608, %v1480_v52 }
 0x14d   :  { %v1142_v6 = vmul.f32 %v1141_v31, %v7495_v1  ;;  %v7546_v46 = vshrl.u32 %v1418_v5, 30  ;;  %v1490_v0 = vshll.u32 %v10318_v8, %v1487_v54  ;;  %v1491_v47 = vshrl.u32 %v10309_v44, %v7520_v58 }
 0x14e   :  { %vm1167_vm14 = vcmp.lt.s32.totalorder %v6518_v20, 0  ;;  %v7552_v60 = vor.u32 %v1494_v7, %v1493_v42  ;;  %v1498_v56 = vor.u32 %v1497_v48, %v1496_v49  ;;  %v1501_v35 = vor.u32 %v1500_v24, %v1499_v33  ;;  %v10355_v24 = vld [vmem:[#allocation17_spill] sm:$0xff] }
 0x14f   :  { %v1504_v10 = vor.u32 %v1503_v12, %v1502_v17  ;;  %v1149_v43 = vmul.f32 %v1148_v30, %v7495_v1  ;;  %v1420_v36 = vshll.u32 %v7546_v46, 30  ;;  %vm1505_vm3 = vcmp.lt.s32.totalorder %v7541_v37, 1 }
 0x150   :  { %vm1508_vm4 = vcmp.lt.s32.totalorder %v7541_v37, 4  ;;  %v1005_v54 = vsel %vm1003_vm8, %v7511_v4, %v10221_v13  ;;  %v1008_v31 = vsel %vm1006_vm9, %v10220_v28, %v7523_v63  ;;  %v1286_v57 = vmul.f32 %v1285_v11, %v1283_v25 }
 0x151   :  { %v7568_v15 = vshll.u32 %v1481_v19, 8  ;;  %v1143_v16 = vadd.f32 -0.4999988, %v1142_v6  ;;  %v7570_v62 = vsub.s32 %v1417_v34, %v1420_v36  ;;  %v1492_v52 = vor.u32 %v1491_v47, %v1490_v0 }
 0x152   :  { %vm1507_vm15 = vcmp.lt.s32.totalorder %v7541_v37, 3  ;;  %v10352_v42 = vand.u32 2147483647, %v6518_v20  ;;  %vm1506_vm5 = vcmp.lt.s32.totalorder %v7541_v37, 2  ;;  %v1514_v33 = vsel %vm1508_vm4, %v1501_v35, 920167782 }
 0x153   :  { %v1517_v17 = vsel %vm1505_vm3, %v7552_v60, %v1498_v56  ;;  %v1518_v34 = vsel %vm1508_vm4, %v1504_v10, 1326507024  ;;  %v1150_v7 = vadd.f32 -0.16666654, %v1149_v43  ;;  %vm1422_vm8 = vcmp.lt.s32.totalorder %v7570_v62, 0 }
 0x154   :  { %vm7575_vm0 = vcmp.le.f32.partialorder %v10352_v42, 0.7853982  ;;  %v1423_v48 = vsub.s32 0, %v7570_v62  ;;  %v1630_v12 = vand.u32 2139095040, %v10355_v24  ;;  %v1287_v30 = vxor.u32 2147483648, %v1286_v57 }
 0x155   :  { %v1519_v5 = vsel %vm1507_vm15, %v1501_v35, %v1518_v34  ;;  %v1522_v25 = vand.u32 65535, %v7568_v15  ;;  %v1523_v11 = vshrl.u32 %v7568_v15, 16  ;;  %v1513_v6 = vsel %vm1505_vm3, %v1492_v52, %v7552_v60 }
 0x156   :  { %v1424_v19 = vsel %vm1422_vm8, %v1423_v48, %v7570_v62  ;;  %v1515_v0 = vsel %vm1507_vm15, %v1498_v56, %v1514_v33  ;;  %v1520_v47 = vsel %vm1506_vm5, %v1517_v17, %v1519_v5  ;;  %v7605_v35 = vsel %vm7461_vm1, 0, %v7518_v55 }
 0x157   :  { %10356 = vst [vmem:[#allocation43_spill] sm:$0xff] %v7605_v35  ;;  %v1425_v10 = vclz %v1424_v19  ;;  %v1524_v43 = vand.u32 65535, %v1520_v47  ;;  %v1525_v36 = vshrl.u32 %v1520_v47, 16  ;;  %v7609_v42 = vsel %vm1002_vm7, %v1005_v54, %v1008_v31 }
 0x158   :  { %v7612_v34 = vmul.f32 %v1143_v16, %v7495_v1  ;;  %v1151_v33 = vmul.f32 %v1150_v7, %v7495_v1  ;;  %v7616_v48 = vand.u32 3, %v7605_v35  ;;  %v1516_v55 = vsel %vm1506_vm5, %v1513_v6, %v1515_v0 }
 0x159   :  { %v6081_v45 = vadd.s32 4294967294, %v1425_v10  ;;  %v1527_v5 = vmul.u32 %v1525_v36, %v1522_v25  ;;  %v1288_v32 = vsel %vm1167_vm14, %v1287_v30, %v1286_v57  ;;  %v1489_v54 = vshrl.u32 %v10318_v8, %v7520_v58 }
 0x15a   :  { %v1528_v31 = vmul.u32 %v1524_v43, %v1523_v11  ;;  %v1631_v16 = vshrl.u32 %v1630_v12, 23  ;;  %v1526_v1 = vmul.u32 %v1524_v43, %v1522_v25  ;;  %v1546_v19 = vand.u32 65535, %v1516_v55 }
 0x15b   :  { %vm6082_vm1 = vcmp.lt.s32.totalorder %v6081_v45, 0  ;;  %v1530_v7 = vshll.u32 %v1527_v5, 16  ;;  %v1152_v47 = vadd.f32 1.0, %v1151_v33  ;;  %v1510_v10 = vsel %vm1508_vm4, %v1498_v56, 2102212464 }
 0x15c   :  { %v1428_v28 = vsel %vm6082_vm1, 0, %v6081_v45  ;;  %v1547_v13 = vshrl.u32 %v1516_v55, 16  ;;  %v1413_v6 = vadd.s32 %v7499_v59, %v7497_v38  ;;  %v1529_v30 = vmul.u32 %v1525_v36, %v1523_v11 }
 0x15d   :  { %v1429_v0 = vsub.s32 32, %v1428_v28  ;;  %v1433_v57 = vsub.s32 4294967266, %v1428_v28  ;;  %v7632_v58 = vsel %vm7575_vm0, %v6518_v20, %v1288_v32  ;;  %v1509_v12 = vsel %vm1505_vm3, %v1489_v54, %v1492_v52 }
 0x15e   :  { %v1532_v43 = vshll.u32 %v1528_v31, 16  ;;  %v6086_v33 = vadd.s32 4294967169, %v1631_v16  ;;  %v1511_v56 = vsel %vm1507_vm15, %v7552_v60, %v1510_v10  ;;  %vm1534_vm9 = vc.u32 %v1526_v1, %v1530_v7 }
 0x15f   :  { %v1434_v45 = vadd.s32 127, %v1433_v57  ;;  %v1548_v38 = vmul.u32 %v1546_v19, %v1522_v25  ;;  %v1535_v59 = vsel %vm1534_vm9, 1, %v10317_v14  ;;  %v1536_v36 = vadd.s32 %v1530_v7, %v1526_v1 }
 0x160   :  { %v1549_v55 = vmul.u32 %v1547_v13, %v1522_v25  ;;  %v1550_v26 = vmul.u32 %v1546_v19, %v1523_v11  ;;  %v1430_v32 = vshll.u32 %v7570_v62, %v1428_v28  ;;  %v1431_v17 = vshrl.u32 %v1413_v6, %v1429_v0 }
 0x161   :  { %v1531_v39 = vshrl.u32 %v1527_v5, 16  ;;  %v1537_v3 = vadd.s32 %v1535_v59, %v1529_v30  ;;  %vm1538_vm13 = vc.u32 %v1536_v36, %v1532_v43  ;;  %v1551_v52 = vmul.u32 %v1547_v13, %v1523_v11 }
 0x162   :  { %v1552_v54 = vshll.u32 %v1549_v55, 16  ;;  %v1554_v16 = vshll.u32 %v1550_v26, 16  ;;  %v1435_v57 = vshll.u32 %v1434_v45, 23  ;;  %v1533_v41 = vshrl.u32 %v1528_v31, 16 }
 0x163   :  { %v1539_v60 = vsel %vm1538_vm13, 1, %v10317_v14  ;;  %v10233_v10 = vand.u32 2147483647, %v10355_v24  ;;  %v1637_v25 = vadd.s32 1, %v6086_v33  ;;  %v7645_v28 = vmul.f32 %v7632_v58, %v7632_v58 }
 0x164   :  { %v1541_v53 = vadd.s32 %v1539_v60, %v1537_v3  ;;  %vm1556_vm7 = vc.u32 %v1548_v38, %v1552_v54  ;;  %v1558_v1 = vadd.s32 %v1552_v54, %v1548_v38  ;;  %v1432_v62 = vor.u32 %v1431_v17, %v1430_v32 }
 0x165   :  { %v1512_v13 = vsel %vm1506_vm5, %v1509_v12, %v1511_v56  ;;  %v1557_v11 = vsel %vm1556_vm7, 1, %v10317_v14  ;;  %v1553_v31 = vshrl.u32 %v1549_v55, 16  ;;  %v1436_v19 = vor.u32 4788187, %v1435_v57 }
 0x166   :  { %v1542_v5 = vadd.s32 %v1541_v53, %v1531_v39  ;;  %v1559_v7 = vadd.s32 %v1557_v11, %v1551_v52  ;;  %vm1560_vm3 = vc.u32 %v1558_v1, %v1554_v16  ;;  %v1555_v6 = vshrl.u32 %v1550_v26, 16 }
 0x167   :  { %v1561_v3 = vsel %vm1560_vm3, 1, %v10317_v14  ;;  %vm1638_vm4 = vcmp.gt.s32.totalorder %v1637_v25, 0  ;;  %v7653_v30 = vadd.s32 %v1558_v1, %v1554_v16  ;;  %v7656_v37 = vadd.f32 1.0, %v7612_v34 }
 0x168   :  { %v7651_v0 = vadd.s32 %v1542_v5, %v1533_v41  ;;  %v1563_v43 = vadd.s32 %v1561_v3, %v1559_v7  ;;  %v1639_v17 = vsel %vm1638_vm4, %v1637_v25, 0  ;;  %v7659_v12 = vmul.f32 %v1152_v47, %v7482_v27 }
 0x169   :  { %10357 = vst [vmem:[#allocation44_spill] sm:$0xff] %v7656_v37  ;;  %vm1160_vm15 = vcmp.eq.s32.totalorder %v7616_v48, 2  ;;  %v1634_v53 = vand.u32 8388607, %v10233_v10  ;;  %v1641_v39 = vand.u32 31, %v1639_v17  ;;  %v1566_v45 = vmul.u32 %v7568_v15, %v1512_v13 }
 0x16a   :  { %10358 = vst [vmem:[#allocation45_spill] sm:$0xff] %v7659_v12  ;;  %v1294_v26 = vmul.f32 -0.001358992, %v7645_v28  ;;  %v1301_v41 = vmul.f32 -0.00019511016, %v7645_v28  ;;  %v1564_v33 = vadd.s32 %v1563_v43, %v1553_v31  ;;  %vm1157_vm5 = vcmp.eq.s32.totalorder %v7616_v48, 0 }
 0x16b   :  { %v1437_v34 = vand.u32 2147483647, %v1436_v19  ;;  %v1439_v56 = vcvt.s32.f32 %v1432_v62  ;;  %v7668_v38 = vshrl.u32 %v1639_v17, 5  ;;  %v7670_v27 = vsub.s32 32, %v1641_v39 }
 0x16c   :  { %vm1321_vm8 = vcmp.lt.s32.totalorder %v6520_v21, 0  ;;  %v1565_v47 = vadd.s32 %v1564_v33, %v1555_v6  ;;  %vm1568_vm1 = vc.u32 %v7651_v0, %v7653_v30  ;;  %v1644_v59 = vshll.u32 %v10318_v8, %v1641_v39 }
 0x16d   :  { %v1653_v36 = vshll.u32 %v10311_v40, %v1641_v39  ;;  %v1645_v15 = vshrl.u32 %v10309_v44, %v7670_v27  ;;  %v1647_v55 = vshll.u32 %v10309_v44, %v1641_v39  ;;  %v1648_v32 = vshrl.u32 %v10310_v50, %v7670_v27 }
 0x16e   :  { %v1650_v52 = vshll.u32 %v10310_v50, %v1641_v39  ;;  %vm1156_vm9 = vcmp.lt.s32.totalorder %v7616_v48, 2  ;;  %v1569_v54 = vadd.s32 1, %v1565_v47  ;;  %v1651_v16 = vshrl.u32 %v10311_v40, %v7670_v27 }
 0x16f   :  { %v1654_v57 = vshrl.u32 %v10312_v22, %v7670_v27  ;;  %v1656_v60 = vshll.u32 %v10312_v22, %v1641_v39  ;;  %vm1000_vm13 = vweird.f32 %v6514_v18  ;;  %v10232_v1 = vxor.u32 2147483648, %v7659_v12 }
 0x170   :  { %v10231_v25 = vxor.u32 2147483648, %v7656_v37  ;;  %v1302_v62 = vadd.f32 0.008332121, %v1301_v41  ;;  %v1440_v13 = vmul.f32 %v1439_v56, %v1437_v34  ;;  %v1295_v11 = vadd.f32 0.041655596, %v1294_v26 }
 0x171   :  { %v1570_v5 = vsel %vm1568_vm1, %v1569_v54, %v1565_v47  ;;  %v1655_v31 = vor.u32 %v1654_v57, %v1653_v36  ;;  %v1657_v7 = vshrl.u32 %v10313_v29, %v7670_v27  ;;  %v1635_v6 = vor.u32 8388608, %v1634_v53 }
 0x172   :  { %v1571_v19 = vadd.s32 %v1570_v5, %v1566_v45  ;;  %v7697_v3 = vor.u32 %v1645_v15, %v1644_v59  ;;  %v7699_v43 = vor.u32 %v1648_v32, %v1647_v55  ;;  %v7701_v17 = vor.u32 %v1651_v16, %v1650_v52 }
 0x173   :  { %v1658_v39 = vor.u32 %v1657_v7, %v1656_v60  ;;  %vm1659_vm7 = vcmp.lt.s32.totalorder %v7668_v38, 1  ;;  %vm1662_vm3 = vcmp.lt.s32.totalorder %v7668_v38, 4  ;;  %v1303_v26 = vmul.f32 %v1302_v62, %v7645_v28 }
 0x174   :  { %v1441_v41 = vxor.u32 2147483648, %v1440_v13  ;;  %v1572_v33 = vadd.s32 536870912, %v1571_v19  ;;  %vm1661_vm4 = vcmp.lt.s32.totalorder %v7668_v38, 3  ;;  %v1162_v53 = vsel %vm1160_vm15, %v10231_v25, %v7659_v12 }
 0x175   :  { %v10359_v45 = vsub.s32 4, %v7397_v61  ;;  %v10360_v56 = vand.u32 2147483647, %v6520_v21  ;;  %v1668_v59 = vsel %vm1662_vm3, %v1655_v31, 920167782  ;;  %v1296_v36 = vmul.f32 %v1295_v11, %v7645_v28 }
 0x176   :  { %v7726_v15 = vshrl.u32 %v1572_v33, 30  ;;  %vm1660_vm15 = vcmp.lt.s32.totalorder %v7668_v38, 2  ;;  %v1159_v55 = vsel %vm1157_vm5, %v7656_v37, %v10232_v1  ;;  %v1669_v32 = vsel %vm1661_vm4, %v7701_v17, %v1668_v59 }
 0x177   :  { %v1290_v34 = vsel %vm1167_vm14, %v10359_v45, %v7397_v61  ;;  %vm7719_vm1 = vcmp.le.f32.partialorder %v10360_v56, 0.7853982  ;;  %v1667_v61 = vsel %vm1659_vm7, %v7697_v3, %v7699_v43  ;;  %v1672_v52 = vsel %vm1662_vm3, %v1658_v39, 1326507024 }
 0x178   :  { %v7743_v54 = vshll.u32 %v1635_v6, 8  ;;  %v1304_v16 = vadd.f32 -0.16666654, %v1303_v26  ;;  %v1442_v57 = vsel %vm1321_vm8, %v1441_v41, %v1440_v13  ;;  %v1574_v60 = vshll.u32 %v7726_v15, 30 }
 0x179   :  { %v1671_v62 = vsel %vm1659_vm7, %v7699_v43, %v7701_v17  ;;  %v7755_v11 = vsel %vm1000_vm13, nan, %v7609_v42  ;;  %vm10248_vm14 = vweird.f32 %v6516_v9  ;;  %v1670_v5 = vsel %vm1660_vm15, %v1667_v61, %v1669_v32 }
 0x17a   :  { %10363 = vst [vmem:[#allocation46_spill] sm:$0xff] %v7755_v11  ;;  %v1673_v13 = vsel %vm1661_vm4, %v1655_v31, %v1672_v52  ;;  %v1163_v7 = vsel %vm1156_vm9, %v1159_v55, %v1162_v53  ;;  %v7766_v6 = vsel %vm7575_vm0, 0, %v1290_v34  ;;  %v1297_v39 = vadd.f32 -0.4999988, %v1296_v36  ;;  %v10366_v55 = vld [vmem:[#allocation18_spill] sm:$0xff] }
 0x17b   :  { %10364 = vst [vmem:[#allocation47_spill] sm:$0xff] %v7766_v6  ;;  %v1575_v26 = vsub.s32 %v1571_v19, %v1574_v60  ;;  %v7771_v42 = vsel %vm7719_vm1, %v6520_v21, %v1442_v57  ;;  %v1674_v41 = vsel %vm1660_vm15, %v1671_v62, %v1673_v13  ;;  %v1676_v33 = vand.u32 65535, %v7743_v54 }
 0x17c   :  { %v1677_v31 = vshrl.u32 %v7743_v54, 16  ;;  %v1305_v48 = vmul.f32 %v1304_v16, %v7645_v28  ;;  %v1701_v53 = vshrl.u32 %v1670_v5, 16  ;;  %v7780_v19 = vsel %vm10248_vm14, nan, %v1163_v7 }
 0x17d   :  { %vm1576_vm5 = vcmp.lt.s32.totalorder %v1575_v26, 0  ;;  %v1577_v49 = vsub.s32 0, %v1575_v26  ;;  %10365 = vst [vmem:[#allocation48_spill] sm:$0xff] %v7780_v19  ;;  %v7783_v45 = vand.u32 3, %v7766_v6  ;;  %v1678_v34 = vand.u32 65535, %v1674_v41 }
 0x17e   :  { %v1679_v56 = vshrl.u32 %v1674_v41, 16  ;;  %v7787_v59 = vmul.f32 %v7771_v42, %v7771_v42  ;;  %v1700_v61 = vand.u32 65535, %v1670_v5  ;;  %v1784_v32 = vand.u32 2139095040, %v10366_v55 }
 0x17f   :  { %v1578_v36 = vsel %vm1576_vm5, %v1577_v49, %v1575_v26  ;;  %v1680_v16 = vmul.u32 %v1678_v34, %v1676_v33  ;;  %v1682_v60 = vmul.u32 %v1678_v34, %v1677_v31  ;;  %v1298_v62 = vmul.f32 %v1297_v39, %v7645_v28 }
 0x180   :  { %v1579_v52 = vclz %v1578_v36  ;;  %v1681_v57 = vmul.u32 %v1679_v56, %v1676_v33  ;;  %v1306_v13 = vadd.f32 1.0, %v1305_v48  ;;  %v1567_v7 = vadd.s32 %v7653_v30, %v7651_v0 }
 0x181   :  { %v1703_v25 = vmul.u32 %v1701_v53, %v1676_v33  ;;  %v1448_v41 = vmul.f32 -0.001358992, %v7787_v59  ;;  %v1643_v49 = vshrl.u32 %v10318_v8, %v7670_v27  ;;  %v1455_v10 = vmul.f32 -0.00019511016, %v7787_v59 }
 0x182   :  { %v6084_v1 = vadd.s32 4294967294, %v1579_v52  ;;  %v1684_v5 = vshll.u32 %v1681_v57, 16  ;;  %v1683_v36 = vmul.u32 %v1679_v56, %v1677_v31  ;;  %v1686_v19 = vshll.u32 %v1682_v60, 16 }
 0x183   :  { %v1704_v11 = vmul.u32 %v1700_v61, %v1677_v31  ;;  %v1702_v28 = vmul.u32 %v1700_v61, %v1676_v33  ;;  %v1785_v39 = vshrl.u32 %v1784_v32, 23  ;;  %v1706_v34 = vshll.u32 %v1703_v25, 16 }
 0x184   :  { %vm6085_vm0 = vcmp.lt.s32.totalorder %v6084_v1, 0  ;;  %vm1688_vm9 = vc.u32 %v1680_v16, %v1684_v5  ;;  %v1690_v30 = vadd.s32 %v1684_v5, %v1680_v16  ;;  %v1705_v12 = vmul.u32 %v1701_v53, %v1677_v31 }
 0x185   :  { %v1582_v48 = vsel %vm6085_vm0, 0, %v6084_v1  ;;  %v1689_v0 = vsel %vm1688_vm9, 1, %v10317_v14  ;;  %v1685_v27 = vshrl.u32 %v1681_v57, 16  ;;  %v1708_v23 = vshll.u32 %v1704_v11, 16 }
 0x186   :  { %v1583_v9 = vsub.s32 32, %v1582_v48  ;;  %v1584_v52 = vshll.u32 %v1575_v26, %v1582_v48  ;;  %v1587_v37 = vsub.s32 4294967266, %v1582_v48  ;;  %v1691_v6 = vadd.s32 %v1689_v0, %v1683_v36 }
 0x187   :  { %vm1692_vm5 = vc.u32 %v1690_v30, %v1686_v19  ;;  %v1664_v33 = vsel %vm1662_vm3, %v7701_v17, 2102212464  ;;  %vm1710_vm0 = vc.u32 %v1702_v28, %v1706_v34  ;;  %v1712_v32 = vadd.s32 %v1706_v34, %v1702_v28 }
 0x188   :  { %v1585_v56 = vshrl.u32 %v1567_v7, %v1583_v9  ;;  %v1588_v35 = vadd.s32 127, %v1587_v37  ;;  %v1693_v1 = vsel %vm1692_vm5, 1, %v10317_v14  ;;  %v6089_v16 = vadd.s32 4294967169, %v1785_v39 }
 0x189   :  { %v1695_v61 = vadd.s32 %v1693_v1, %v1691_v6  ;;  %v1687_v48 = vshrl.u32 %v1682_v60, 16  ;;  %v1711_v31 = vsel %vm1710_vm0, 1, %v10317_v14  ;;  %v1707_v19 = vshrl.u32 %v1703_v25, 16 }
 0x18a   :  { %v1586_v5 = vor.u32 %v1585_v56, %v1584_v52  ;;  %v1589_v26 = vshll.u32 %v1588_v35, 23  ;;  %v1713_v57 = vadd.s32 %v1711_v31, %v1705_v12  ;;  %vm1714_vm9 = vc.u32 %v1712_v32, %v1708_v23 }
 0x18b   :  { %v1696_v53 = vadd.s32 %v1695_v61, %v1685_v27  ;;  %v1663_v37 = vsel %vm1659_vm7, %v1643_v49, %v7697_v3  ;;  %v1665_v17 = vsel %vm1661_vm4, %v7699_v43, %v1664_v33  ;;  %v1715_v6 = vsel %vm1714_vm9, 1, %v10317_v14 }
 0x18c   :  { %v1590_v9 = vor.u32 4788187, %v1589_v26  ;;  %v1593_v7 = vcvt.s32.f32 %v1586_v5  ;;  %v1709_v35 = vshrl.u32 %v1704_v11, 16  ;;  %v1717_v60 = vadd.s32 %v1715_v6, %v1713_v57 }
 0x18d   :  { %v1791_v36 = vadd.s32 1, %v6089_v16  ;;  %vm1311_vm3 = vcmp.eq.s32.totalorder %v7783_v45, 0  ;;  %v1443_v12 = vsub.s32 4, %v7546_v46  ;;  %v7812_v28 = vadd.s32 %v1696_v53, %v1687_v48 }
 0x18e   :  { %v1591_v25 = vand.u32 2147483647, %v1590_v9  ;;  %v7814_v39 = vadd.s32 %v1712_v32, %v1708_v23  ;;  %v7816_v3 = vadd.f32 1.0, %v1298_v62  ;;  %v1666_v43 = vsel %vm1660_vm15, %v1663_v37, %v1665_v17 }
 0x18f   :  { %v1718_v49 = vadd.s32 %v1717_v60, %v1707_v19  ;;  %vm1792_vm7 = vcmp.gt.s32.totalorder %v1791_v36, 0  ;;  %v7821_v11 = vmul.f32 %v1306_v13, %v7632_v58  ;;  %v1449_v0 = vadd.f32 0.041655596, %v1448_v41 }
 0x190   :  { %10367 = vst [vmem:[#allocation18_spill] sm:$0xff] %v7816_v3  ;;  %v1456_v30 = vadd.f32 0.008332121, %v1455_v10  ;;  %v1793_v34 = vsel %vm1792_vm7, %v1791_v36, 0  ;;  %v1594_v52 = vmul.f32 %v1593_v7, %v1591_v25  ;;  %v10245_v56 = vand.u32 2147483647, %v10366_v55 }
 0x191   :  { %10368 = vst [vmem:[#allocation49_spill] sm:$0xff] %v7821_v11  ;;  %v1719_v27 = vadd.s32 %v1718_v49, %v1709_v35  ;;  %v1795_v33 = vand.u32 31, %v1793_v34  ;;  %vm1310_vm4 = vcmp.lt.s32.totalorder %v7783_v45, 2  ;;  %vm1314_vm5 = vcmp.eq.s32.totalorder %v7783_v45, 2 }
 0x192   :  { %vm1475_vm0 = vcmp.lt.s32.totalorder %v10350_v51, 0  ;;  %v1720_v23 = vmul.u32 %v7743_v54, %v1666_v43  ;;  %vm1722_vm15 = vc.u32 %v7812_v28, %v7814_v39  ;;  %v1444_v58 = vsel %vm1321_vm8, %v1443_v12, %v7546_v46 }
 0x193   :  { %v10369_v10 = vand.u32 2147483647, %v10350_v51  ;;  %v1723_v62 = vadd.s32 1, %v1719_v27  ;;  %v7839_v13 = vsub.s32 32, %v1795_v33  ;;  %v10244_v41 = vxor.u32 2147483648, %v7821_v11 }
 0x194   :  { %v10243_v54 = vxor.u32 2147483648, %v7816_v3  ;;  %v1450_v1 = vmul.f32 %v1449_v0, %v7787_v59  ;;  %v1457_v61 = vmul.f32 %v1456_v30, %v7787_v59  ;;  %v1595_v32 = vxor.u32 2147483648, %v1594_v52 }
 0x195   :  { %vm7835_vm9 = vcmp.le.f32.partialorder %v10369_v10, 0.7853982  ;;  %v1724_v16 = vsel %vm1722_vm15, %v1723_v62, %v1719_v27  ;;  %v1788_v46 = vand.u32 8388607, %v10245_v56  ;;  %v1801_v5 = vshll.u32 %v10309_v44, %v1795_v33 }
 0x196   :  { %v1725_v26 = vadd.s32 %v1724_v16, %v1720_v23  ;;  %v1804_v48 = vshll.u32 %v10310_v50, %v1795_v33  ;;  %v1807_v31 = vshll.u32 %v10311_v40, %v1795_v33  ;;  %v1810_v53 = vshll.u32 %v10312_v22, %v1795_v33 }
 0x197   :  { %v1802_v19 = vshrl.u32 %v10310_v50, %v7839_v13  ;;  %v1805_v57 = vshrl.u32 %v10311_v40, %v7839_v13  ;;  %v1808_v9 = vshrl.u32 %v10312_v22, %v7839_v13  ;;  %v1811_v37 = vshrl.u32 %v10313_v29, %v7839_v13 }
 0x198   :  { %v7861_v17 = vsel %vm7719_vm1, 0, %v1444_v58  ;;  %v1458_v6 = vadd.f32 -0.16666654, %v1457_v61  ;;  %v1726_v7 = vadd.s32 536870912, %v1725_v26  ;;  %v7863_v35 = vshrl.u32 %v1793_v34, 5 }
 0x199   :  { %v1313_v60 = vsel %vm1311_vm3, %v7816_v3, %v10244_v41  ;;  %v1316_v36 = vsel %vm1314_vm5, %v10243_v54, %v7821_v11  ;;  %v1451_v12 = vadd.f32 -0.4999988, %v1450_v1  ;;  %v1789_v47 = vor.u32 8388608, %v1788_v46 }
 0x19a   :  { %v1596_v25 = vsel %vm1475_vm0, %v1595_v32, %v1594_v52  ;;  %v7877_v43 = vshrl.u32 %v1726_v7, 30  ;;  %v1798_v49 = vshll.u32 %v10318_v8, %v1795_v33  ;;  %v1799_v0 = vshrl.u32 %v10309_v44, %v7839_v13 }
 0x19b   :  { %v1803_v30 = vor.u32 %v1802_v19, %v1801_v5  ;;  %v1806_v34 = vor.u32 %v1805_v57, %v1804_v48  ;;  %v1809_v27 = vor.u32 %v1808_v9, %v1807_v31  ;;  %v1812_v23 = vor.u32 %v1811_v37, %v1810_v53  ;;  %v10372_v31 = vld [vmem:[#allocation19_spill] sm:$0xff] }
 0x19c   :  { %v1459_v58 = vmul.f32 %v1458_v6, %v7787_v59  ;;  %v1728_v10 = vshll.u32 %v7877_v43, 30  ;;  %vm1813_vm8 = vcmp.lt.s32.totalorder %v7863_v35, 1  ;;  %vm1816_vm1 = vcmp.lt.s32.totalorder %v7863_v35, 4 }
 0x19d   :  { %v7888_v52 = vsel %vm1310_vm4, %v1313_v60, %v1316_v36  ;;  %v1452_v33 = vmul.f32 %v1451_v12, %v7787_v59  ;;  %v7892_v62 = vand.u32 3, %v7861_v17  ;;  %v7894_v1 = vshll.u32 %v1789_v47, 8 }
 0x19e   :  { %v7899_v61 = vsel %vm7835_vm9, %v10350_v51, %v1596_v25  ;;  %v1729_v32 = vsub.s32 %v1725_v26, %v1728_v10  ;;  %v1800_v16 = vor.u32 %v1799_v0, %v1798_v49  ;;  %vm1815_vm3 = vcmp.lt.s32.totalorder %v7863_v35, 3 }
 0x19f   :  { %vm1814_vm7 = vcmp.lt.s32.totalorder %v7863_v35, 2  ;;  %v1822_v45 = vsel %vm1816_vm1, %v1809_v27, 920167782  ;;  %v1825_v59 = vsel %vm1813_vm8, %v1803_v30, %v1806_v34  ;;  %v1826_v46 = vsel %vm1816_vm1, %v1812_v23, 1326507024 }
 0x1a0   :  { %v1460_v5 = vadd.f32 1.0, %v1459_v58  ;;  %vm1730_vm4 = vcmp.lt.s32.totalorder %v1729_v32, 0  ;;  %v1731_v48 = vsub.s32 0, %v1729_v32  ;;  %v1938_v53 = vand.u32 2139095040, %v10372_v31 }
 0x1a1   :  { %v7912_v26 = vmul.f32 %v7899_v61, %v7899_v61  ;;  %v1827_v19 = vsel %vm1815_vm3, %v1809_v27, %v1826_v46  ;;  %v1830_v57 = vand.u32 65535, %v7894_v1  ;;  %v1831_v9 = vshrl.u32 %v7894_v1, 16 }
 0x1a2   :  { %v1732_v37 = vsel %vm1730_vm4, %v1731_v48, %v1729_v32  ;;  %v1821_v6 = vsel %vm1813_vm8, %v1800_v16, %v1803_v30  ;;  %v1823_v7 = vsel %vm1815_vm3, %v1806_v34, %v1822_v45  ;;  %v1828_v60 = vsel %vm1814_vm7, %v1825_v59, %v1827_v19 }
 0x1a3   :  { %v1733_v12 = vclz %v1732_v37  ;;  %v1832_v47 = vand.u32 65535, %v1828_v60  ;;  %v1833_v25 = vshrl.u32 %v1828_v60, 16  ;;  %v7925_v49 = vadd.f32 1.0, %v1452_v33 }
 0x1a4   :  { %v7928_v0 = vmul.f32 %v1460_v5, %v7771_v42  ;;  %v1602_v27 = vmul.f32 -0.001358992, %v7912_v26  ;;  %v1721_v58 = vadd.s32 %v7814_v39, %v7812_v28  ;;  %v1824_v45 = vsel %vm1814_vm7, %v1821_v6, %v1823_v7 }
 0x1a5   :  { %10373 = vst [vmem:[#allocation19_spill] sm:$0xff] %v7925_v49  ;;  %v6087_v10 = vadd.s32 4294967294, %v1733_v12  ;;  %v1835_v59 = vmul.u32 %v1833_v25, %v1830_v57  ;;  %v1797_v46 = vshrl.u32 %v10318_v8, %v7839_v13  ;;  %v1818_v33 = vsel %vm1816_vm1, %v1806_v34, 2102212464 }
 0x1a6   :  { %10374 = vst [vmem:[#allocation50_spill] sm:$0xff] %v7928_v0  ;;  %v1836_v42 = vmul.u32 %v1832_v47, %v1831_v9  ;;  %v1939_v5 = vshrl.u32 %v1938_v53, 23  ;;  %v1834_v48 = vmul.u32 %v1832_v47, %v1830_v57  ;;  %v1854_v37 = vand.u32 65535, %v1824_v45 }
 0x1a7   :  { %vm6088_vm5 = vcmp.lt.s32.totalorder %v6087_v10, 0  ;;  %v1838_v19 = vshll.u32 %v1835_v59, 16  ;;  %v1603_v60 = vadd.f32 0.041655596, %v1602_v27  ;;  %v1609_v28 = vmul.f32 -0.00019511016, %v7912_v26 }
 0x1a8   :  { %v1736_v39 = vsel %vm6088_vm5, 0, %v6087_v10  ;;  %v1855_v12 = vshrl.u32 %v1824_v45, 16  ;;  %v1837_v41 = vmul.u32 %v1833_v25, %v1831_v9  ;;  %v1817_v13 = vsel %vm1813_vm8, %v1797_v46, %v1800_v16 }
 0x1a9   :  { %v1737_v54 = vsub.s32 32, %v1736_v39  ;;  %v1738_v6 = vshll.u32 %v1729_v32, %v1736_v39  ;;  %v1741_v7 = vsub.s32 4294967266, %v1736_v39  ;;  %v1819_v34 = vsel %vm1815_vm3, %v1803_v30, %v1818_v33 }
 0x1aa   :  { %v1840_v53 = vshll.u32 %v1836_v42, 16  ;;  %v6092_v56 = vadd.s32 4294967169, %v1939_v5  ;;  %vm1842_vm15 = vc.u32 %v1834_v48, %v1838_v19  ;;  %v1856_v27 = vmul.u32 %v1854_v37, %v1830_v57 }
 0x1ab   :  { %v1739_v47 = vshrl.u32 %v1721_v58, %v1737_v54  ;;  %v1742_v36 = vadd.s32 127, %v1741_v7  ;;  %v1843_v23 = vsel %vm1842_vm15, 1, %v10317_v14  ;;  %v1844_v10 = vadd.s32 %v1838_v19, %v1834_v48 }
 0x1ac   :  { %v1857_v45 = vmul.u32 %v1855_v12, %v1830_v57  ;;  %v1858_v3 = vmul.u32 %v1854_v37, %v1831_v9  ;;  %vm1629_vm1 = vcmp.lt.s32.totalorder %v10355_v24, 0  ;;  %v1839_v39 = vshrl.u32 %v1835_v59, 16 }
 0x1ad   :  { %v1740_v32 = vor.u32 %v1739_v47, %v1738_v6  ;;  %v1743_v25 = vshll.u32 %v1742_v36, 23  ;;  %v1845_v16 = vadd.s32 %v1843_v23, %v1837_v41  ;;  %vm1846_vm8 = vc.u32 %v1844_v10, %v1840_v53 }
 0x1ae   :  { %v1859_v46 = vmul.u32 %v1855_v12, %v1831_v9  ;;  %v1860_v30 = vshll.u32 %v1857_v45, 16  ;;  %v1862_v33 = vshll.u32 %v1858_v3, 16  ;;  %v1610_v5 = vadd.f32 0.008332121, %v1609_v28 }
 0x1af   :  { %v1744_v54 = vor.u32 4788187, %v1743_v25  ;;  %v1747_v58 = vcvt.s32.f32 %v1740_v32  ;;  %v1847_v7 = vsel %vm1846_vm8, 1, %v10317_v14  ;;  %vm1465_vm3 = vcmp.eq.s32.totalorder %v7892_v62, 0 }
 0x1b0   :  { %vm1468_vm4 = vcmp.eq.s32.totalorder %v7892_v62, 2  ;;  %v1841_v57 = vshrl.u32 %v1836_v42, 16  ;;  %v1849_v48 = vadd.s32 %v1847_v7, %v1845_v16  ;;  %vm1864_vm5 = vc.u32 %v1856_v27, %v1860_v30 }
 0x1b1   :  { %v1866_v19 = vadd.s32 %v1860_v30, %v1856_v27  ;;  %v1745_v36 = vand.u32 2147483647, %v1744_v54  ;;  %v1820_v41 = vsel %vm1814_vm7, %v1817_v13, %v1819_v34  ;;  %v1865_v9 = vsel %vm1864_vm5, 1, %v10317_v14 }
 0x1b2   :  { %v1945_v23 = vadd.s32 1, %v6092_v56  ;;  %v10375_v59 = vand.u32 2147483647, %v10355_v24  ;;  %v1850_v28 = vadd.s32 %v1849_v48, %v1839_v39  ;;  %v1861_v12 = vshrl.u32 %v1857_v45, 16 }
 0x1b3   :  { %v1867_v6 = vadd.s32 %v1865_v9, %v1859_v46  ;;  %vm1868_vm8 = vc.u32 %v1866_v19, %v1862_v33  ;;  %v1748_v42 = vmul.f32 %v1747_v58, %v1745_v36  ;;  %v7960_v47 = vadd.s32 %v1866_v19, %v1862_v33 }
 0x1b4   :  { %vm7955_vm15 = vcmp.le.f32.partialorder %v10375_v59, 0.7853982  ;;  %v1869_v53 = vsel %vm1868_vm8, 1, %v10317_v14  ;;  %vm1946_vm14 = vcmp.gt.s32.totalorder %v1945_v23, 0  ;;  %vm10249_vm7 = vweird.f32 %v6518_v20 }
 0x1b5   :  { %v7963_v35 = vadd.s32 %v1850_v28, %v1841_v57  ;;  %v1863_v56 = vshrl.u32 %v1858_v3, 16  ;;  %v1871_v13 = vadd.s32 %v1869_v53, %v1867_v6  ;;  %v1947_v34 = vsel %vm1946_vm14, %v1945_v23, 0 }
 0x1b6   :  { %vm1464_vm5 = vcmp.lt.s32.totalorder %v7892_v62, 2  ;;  %v10251_v27 = vxor.u32 2147483648, %v7928_v0  ;;  %v10250_v10 = vxor.u32 2147483648, %v7925_v49  ;;  %v1749_v45 = vxor.u32 2147483648, %v1748_v42 }
 0x1b7   :  { %v1949_v32 = vand.u32 31, %v1947_v34  ;;  %v1604_v25 = vmul.f32 %v1603_v60, %v7912_v26  ;;  %v1611_v39 = vmul.f32 %v1610_v5, %v7912_v26  ;;  %v1872_v16 = vadd.s32 %v1871_v13, %v1861_v12 }
 0x1b8   :  { %v10378_v46 = vand.u32 2147483647, %v10372_v31  ;;  %v1874_v3 = vmul.u32 %v7894_v1, %v1820_v41  ;;  %vm1876_vm14 = vc.u32 %v7963_v35, %v7960_v47  ;;  %v7975_v33 = vshrl.u32 %v1947_v34, 5 }
 0x1b9   :  { %v7977_v54 = vsub.s32 32, %v1949_v32  ;;  %v1750_v58 = vsel %vm1629_vm1, %v1749_v45, %v1748_v42  ;;  %v1873_v7 = vadd.s32 %v1872_v16, %v1863_v56  ;;  %v1952_v60 = vshll.u32 %v10318_v8, %v1949_v32 }
 0x1ba   :  { %v1942_v30 = vand.u32 8388607, %v10378_v46  ;;  %v1961_v5 = vshll.u32 %v10311_v40, %v1949_v32  ;;  %v1955_v1 = vshll.u32 %v10309_v44, %v1949_v32  ;;  %v1958_v19 = vshll.u32 %v10310_v50, %v1949_v32 }
 0x1bb   :  { %v1953_v57 = vshrl.u32 %v10309_v44, %v7977_v54  ;;  %v1956_v48 = vshrl.u32 %v10310_v50, %v7977_v54  ;;  %vm10260_vm8 = vweird.f32 %v6520_v21  ;;  %v1877_v36 = vadd.s32 1, %v1873_v7 }
 0x1bc   :  { %v1959_v41 = vshrl.u32 %v10311_v40, %v7977_v54  ;;  %v1962_v9 = vshrl.u32 %v10312_v22, %v7977_v54  ;;  %v1964_v23 = vshll.u32 %v10312_v22, %v1949_v32  ;;  %v1467_v59 = vsel %vm1465_vm3, %v7925_v49, %v10251_v27 }
 0x1bd   :  { %v1470_v28 = vsel %vm1468_vm4, %v10250_v10, %v7928_v0  ;;  %v1605_v12 = vadd.f32 -0.4999988, %v1604_v25  ;;  %v1612_v6 = vadd.f32 -0.16666654, %v1611_v39  ;;  %v1878_v42 = vsel %vm1876_vm14, %v1877_v36, %v1873_v7 }
 0x1be   :  { %v1943_v53 = vor.u32 8388608, %v1942_v30  ;;  %v1963_v56 = vor.u32 %v1962_v9, %v1961_v5  ;;  %v1965_v13 = vshrl.u32 %v10313_v29, %v7977_v54  ;;  %v8013_v34 = vsel %vm7955_vm15, %v10355_v24, %v1750_v58 }
 0x1bf   :  { %v1879_v45 = vadd.s32 %v1878_v42, %v1874_v3  ;;  %v8015_v32 = vor.u32 %v1953_v57, %v1952_v60  ;;  %v8017_v16 = vor.u32 %v1956_v48, %v1955_v1  ;;  %v8019_v25 = vor.u32 %v1959_v41, %v1958_v19 }
 0x1c0   :  { %v1966_v39 = vor.u32 %v1965_v13, %v1964_v23  ;;  %vm1967_vm3 = vcmp.lt.s32.totalorder %v7975_v33, 1  ;;  %vm1970_vm4 = vcmp.lt.s32.totalorder %v7975_v33, 4  ;;  %v8026_v46 = vsel %vm10249_vm7, nan, %v7888_v52 }
 0x1c1   :  { %10379 = vst [vmem:[#allocation51_spill] sm:$0xff] %v8026_v46  ;;  %v1613_v30 = vmul.f32 %v1612_v6, %v7912_v26  ;;  %v1880_v58 = vadd.s32 536870912, %v1879_v45  ;;  %vm1969_vm14 = vcmp.lt.s32.totalorder %v7975_v33, 3  ;;  %v1471_v3 = vsel %vm1464_vm5, %v1467_v59, %v1470_v28 }
 0x1c2   :  { %v10380_v7 = vsub.s32 4, %v7726_v15  ;;  %v8039_v5 = vmul.f32 %v8013_v34, %v8013_v34  ;;  %v1976_v52 = vsel %vm1970_vm4, %v1963_v56, 920167782  ;;  %v1751_v57 = vsub.s32 4, %v7877_v43 }
 0x1c3   :  { %v8044_v1 = vshrl.u32 %v1880_v58, 30  ;;  %vm1968_vm7 = vcmp.lt.s32.totalorder %v7975_v33, 2  ;;  %v1975_v62 = vsel %vm1967_vm3, %v8015_v32, %v8017_v16  ;;  %v1977_v48 = vsel %vm1969_vm14, %v8019_v25, %v1976_v52 }
 0x1c4   :  { %v1598_v60 = vsel %vm1475_vm0, %v10380_v7, %v7726_v15  ;;  %v1606_v15 = vmul.f32 %v1605_v12, %v7912_v26  ;;  %v1980_v19 = vsel %vm1970_vm4, %v1966_v39, 1326507024  ;;  %v8057_v36 = vshll.u32 %v1943_v53, 8 }
 0x1c5   :  { %v8061_v41 = vsel %vm7835_vm9, 0, %v1598_v60  ;;  %v1614_v9 = vadd.f32 1.0, %v1613_v30  ;;  %v1882_v23 = vshll.u32 %v8044_v1, 30  ;;  %v1979_v26 = vsel %vm1967_vm3, %v8017_v16, %v8019_v25 }
 0x1c6   :  { %v1756_v59 = vmul.f32 -0.001358992, %v8039_v5  ;;  %v1763_v28 = vmul.f32 -0.00019511016, %v8039_v5  ;;  %v1978_v12 = vsel %vm1968_vm7, %v1975_v62, %v1977_v48  ;;  %v1981_v38 = vsel %vm1969_vm14, %v1963_v56, %v1980_v19  ;;  %v10384_v19 = vld [vmem:[#allocation20_spill] sm:$0xff] }
 0x1c7   :  { %v8076_v6 = vsel %vm10260_vm8, nan, %v1471_v3  ;;  %v8079_v42 = vand.u32 3, %v8061_v41  ;;  %v8084_v53 = vsel %vm1629_vm1, %v1751_v57, %v7877_v43  ;;  %v1883_v13 = vsub.s32 %v1879_v45, %v1882_v23 }
 0x1c8   :  { %10381 = vst [vmem:[#allocation52_spill] sm:$0xff] %v8076_v6  ;;  %v8086_v39 = vadd.f32 1.0, %v1606_v15  ;;  %v1982_v30 = vsel %vm1968_vm7, %v1979_v26, %v1981_v38  ;;  %v1984_v56 = vand.u32 65535, %v8057_v36  ;;  %v1985_v58 = vshrl.u32 %v8057_v36, 16 }
 0x1c9   :  { %v8093_v3 = vmul.f32 %v1614_v9, %v7899_v61  ;;  %vm1884_vm0 = vcmp.lt.s32.totalorder %v1883_v13, 0  ;;  %v1885_v7 = vsub.s32 0, %v1883_v13  ;;  %v2009_v60 = vshrl.u32 %v1978_v12, 16 }
 0x1ca   :  { %10382 = vst [vmem:[#allocation53_spill] sm:$0xff] %v8086_v39  ;;  %v1757_v52 = vadd.f32 0.041655596, %v1756_v59  ;;  %v1764_v62 = vadd.f32 0.008332121, %v1763_v28  ;;  %v1986_v43 = vand.u32 65535, %v1982_v30  ;;  %v1951_v15 = vshrl.u32 %v10318_v8, %v7977_v54 }
 0x1cb   :  { %10383 = vst [vmem:[#allocation54_spill] sm:$0xff] %v8093_v3  ;;  %v1987_v57 = vshrl.u32 %v1982_v30, 16  ;;  %v1886_v45 = vsel %vm1884_vm0, %v1885_v7, %v1883_v13  ;;  %v2008_v48 = vand.u32 65535, %v1978_v12  ;;  %v2092_v23 = vand.u32 2139095040, %v10384_v19 }
 0x1cc   :  { %v1887_v26 = vclz %v1886_v45  ;;  %v1988_v38 = vmul.u32 %v1986_v43, %v1984_v56  ;;  %v1990_v27 = vmul.u32 %v1986_v43, %v1985_v58  ;;  %v1875_v59 = vadd.s32 %v7960_v47, %v7963_v35 }
 0x1cd   :  { %v1989_v10 = vmul.u32 %v1987_v57, %v1984_v56  ;;  %v2011_v28 = vmul.u32 %v2009_v60, %v1984_v56  ;;  %v1758_v30 = vmul.f32 %v1757_v52, %v8039_v5  ;;  %v1765_v7 = vmul.f32 %v1764_v62, %v8039_v5 }
 0x1ce   :  { %v6090_v54 = vadd.s32 4294967294, %v1887_v26  ;;  %vm1622_vm9 = vcmp.eq.s32.totalorder %v8079_v42, 2  ;;  %v1971_v43 = vsel %vm1967_vm3, %v1951_v15, %v8015_v32  ;;  %v1991_v45 = vmul.u32 %v1987_v57, %v1985_v58 }
 0x1cf   :  { %v1992_v12 = vshll.u32 %v1989_v10, 16  ;;  %v1994_v61 = vshll.u32 %v1990_v27, 16  ;;  %v2012_v6 = vmul.u32 %v2008_v48, %v1985_v58  ;;  %vm1619_vm1 = vcmp.eq.s32.totalorder %v8079_v42, 0 }
 0x1d0   :  { %vm6091_vm5 = vcmp.lt.s32.totalorder %v6090_v54, 0  ;;  %v2010_v47 = vmul.u32 %v2008_v48, %v1984_v56  ;;  %v2093_v35 = vshrl.u32 %v2092_v23, 23  ;;  %v2014_v9 = vshll.u32 %v2011_v28, 16 }
 0x1d1   :  { %vm1996_vm0 = vc.u32 %v1988_v38, %v1992_v12  ;;  %v1890_v52 = vsel %vm6091_vm5, 0, %v6090_v54  ;;  %v1998_v26 = vadd.s32 %v1992_v12, %v1988_v38  ;;  %v2013_v49 = vmul.u32 %v2009_v60, %v1985_v58 }
 0x1d2   :  { %v1997_v62 = vsel %vm1996_vm0, 1, %v10317_v14  ;;  %v1891_v46 = vsub.s32 32, %v1890_v52  ;;  %v1892_v21 = vshll.u32 %v1883_v13, %v1890_v52  ;;  %v1895_v20 = vsub.s32 4294967266, %v1890_v52 }
 0x1d3   :  { %v1993_v0 = vshrl.u32 %v1989_v10, 16  ;;  %v1999_v32 = vadd.s32 %v1997_v62, %v1991_v45  ;;  %vm2000_vm3 = vc.u32 %v1998_v26, %v1994_v61  ;;  %v2016_v57 = vshll.u32 %v2012_v6, 16 }
 0x1d4   :  { %vm1618_vm8 = vcmp.lt.s32.totalorder %v8079_v42, 2  ;;  %v1893_v15 = vshrl.u32 %v1875_v59, %v1891_v46  ;;  %v1896_v11 = vadd.s32 127, %v1895_v20  ;;  %v1972_v56 = vsel %vm1970_vm4, %v8019_v25, 2102212464 }
 0x1d5   :  { %v2001_v48 = vsel %vm2000_vm3, 1, %v10317_v14  ;;  %vm1783_vm5 = vcmp.lt.s32.totalorder %v10366_v55, 0  ;;  %v1995_v23 = vshrl.u32 %v1990_v27, 16  ;;  %vm2018_vm0 = vc.u32 %v2010_v47, %v2014_v9 }
 0x1d6   :  { %v2003_v13 = vadd.s32 %v2001_v48, %v1999_v32  ;;  %v2020_v58 = vadd.s32 %v2014_v9, %v2010_v47  ;;  %v1894_v10 = vor.u32 %v1893_v15, %v1892_v21  ;;  %v1897_v60 = vshll.u32 %v1896_v11, 23 }
 0x1d7   :  { %v2019_v38 = vsel %vm2018_vm0, 1, %v10317_v14  ;;  %v6095_v61 = vadd.s32 4294967169, %v2093_v35  ;;  %v2015_v46 = vshrl.u32 %v2011_v28, 16  ;;  %v1973_v25 = vsel %vm1969_vm14, %v8017_v16, %v1972_v56 }
 0x1d8   :  { %v2004_v54 = vadd.s32 %v2003_v13, %v1993_v0  ;;  %v2021_v20 = vadd.s32 %v2019_v38, %v2013_v49  ;;  %vm2022_vm12 = vc.u32 %v2020_v58, %v2016_v57  ;;  %v1898_v59 = vor.u32 4788187, %v1897_v60 }
 0x1d9   :  { %v1901_v12 = vcvt.s32.f32 %v1894_v10  ;;  %v2023_v27 = vsel %vm2022_vm12, 1, %v10317_v14  ;;  %vm10287_vm4 = vweird.f32 %v10350_v51  ;;  %v1766_v9 = vadd.f32 -0.16666654, %v1765_v7 }
 0x1da   :  { %v2017_v21 = vshrl.u32 %v2012_v6, 16  ;;  %v2025_v11 = vadd.s32 %v2023_v27, %v2021_v20  ;;  %v2099_v45 = vadd.s32 1, %v6095_v61  ;;  %v10385_v0 = vxor.u32 2147483648, %v8086_v39 }
 0x1db   :  { %v1899_v28 = vand.u32 2147483647, %v1898_v59  ;;  %v8127_v47 = vadd.s32 %v2004_v54, %v1995_v23  ;;  %v8129_v35 = vadd.s32 %v2020_v58, %v2016_v57  ;;  %v10386_v16 = vxor.u32 2147483648, %v8093_v3 }
 0x1dc   :  { %v1624_v49 = vsel %vm1622_vm9, %v10385_v0, %v8093_v3  ;;  %v1974_v6 = vsel %vm1968_vm7, %v1971_v43, %v1973_v25  ;;  %v2026_v52 = vadd.s32 %v2025_v11, %v2015_v46  ;;  %vm2100_vm12 = vcmp.gt.s32.totalorder %v2099_v45, 0 }
 0x1dd   :  { %v1621_v7 = vsel %vm1619_vm1, %v8086_v39, %v10386_v16  ;;  %v1759_v62 = vadd.f32 -0.4999988, %v1758_v30  ;;  %v1902_v26 = vmul.f32 %v1901_v12, %v1899_v28  ;;  %v10266_v32 = vand.u32 2147483647, %v10384_v19 }
 0x1de   :  { %v2101_v15 = vsel %vm2100_vm12, %v2099_v45, 0  ;;  %v1767_v56 = vmul.f32 %v1766_v9, %v8039_v5  ;;  %v10387_v57 = vand.u32 2147483647, %v10366_v55  ;;  %v2027_v23 = vadd.s32 %v2026_v52, %v2017_v21 }
 0x1df   :  { %v2103_v13 = vand.u32 31, %v2101_v15  ;;  %v8149_v33 = vsel %vm7955_vm15, 0, %v8084_v53  ;;  %v1903_v30 = vxor.u32 2147483648, %v1902_v26  ;;  %v2028_v43 = vmul.u32 %v8057_v36, %v1974_v6 }
 0x1e0   :  { %vm8142_vm14 = vcmp.le.f32.partialorder %v10387_v57, 0.7853982  ;;  %vm2030_vm7 = vc.u32 %v8127_v47, %v8129_v35  ;;  %v1625_v58 = vsel %vm1618_vm8, %v1621_v7, %v1624_v49  ;;  %v8157_v10 = vand.u32 3, %v8149_v33 }
 0x1e1   :  { %v2031_v60 = vadd.s32 1, %v2027_v23  ;;  %v8159_v38 = vsub.s32 32, %v2103_v13  ;;  %v1760_v61 = vmul.f32 %v1759_v62, %v8039_v5  ;;  %v1904_v37 = vsel %vm1783_vm5, %v1903_v30, %v1902_v26 }
 0x1e2   :  { %v1905_v53 = vsub.s32 4, %v8044_v1  ;;  %v2096_v36 = vand.u32 8388607, %v10266_v32  ;;  %v1768_v54 = vadd.f32 1.0, %v1767_v56  ;;  %v2109_v42 = vshll.u32 %v10309_v44, %v2103_v13 }
 0x1e3   :  { %v2032_v46 = vsel %vm2030_vm7, %v2031_v60, %v2027_v23  ;;  %v2112_v20 = vshll.u32 %v10310_v50, %v2103_v13  ;;  %v8172_v59 = vsel %vm8142_vm14, %v10366_v55, %v1904_v37  ;;  %v2115_v12 = vshll.u32 %v10311_v40, %v2103_v13 }
 0x1e4   :  { %v2033_v5 = vadd.s32 %v2032_v46, %v2028_v43  ;;  %v2118_v25 = vshll.u32 %v10312_v22, %v2103_v13  ;;  %v2110_v27 = vshrl.u32 %v10310_v50, %v8159_v38  ;;  %v2113_v9 = vshrl.u32 %v10311_v40, %v8159_v38 }
 0x1e5   :  { %v2116_v21 = vshrl.u32 %v10312_v22, %v8159_v38  ;;  %v2119_v11 = vshrl.u32 %v10313_v29, %v8159_v38  ;;  %v8186_v45 = vsel %vm10287_vm4, nan, %v1625_v58  ;;  %v2097_v49 = vor.u32 8388608, %v2096_v36 }
 0x1e6   :  { %10390 = vst [vmem:[#allocation20_spill] sm:$0xff] %v8186_v45  ;;  %v2034_v0 = vadd.s32 536870912, %v2033_v5  ;;  %v8188_v28 = vshrl.u32 %v2101_v15, 5  ;;  %v8190_v16 = vadd.f32 1.0, %v1760_v61  ;;  %v8193_v7 = vmul.f32 %v1768_v54, %v8013_v34 }
 0x1e7   :  { %vm1773_vm15 = vcmp.eq.s32.totalorder %v8157_v10, 0  ;;  %v1906_v6 = vsel %vm1783_vm5, %v1905_v53, %v8044_v1  ;;  %v8201_v52 = vmul.f32 %v8172_v59, %v8172_v59  ;;  %v2106_v26 = vshll.u32 %v10318_v8, %v2103_v13 }
 0x1e8   :  { %10391 = vst [vmem:[#allocation55_spill] sm:$0xff] %v8190_v16  ;;  %v8203_v62 = vshrl.u32 %v2034_v0, 30  ;;  %v2107_v15 = vshrl.u32 %v10309_v44, %v8159_v38  ;;  %v8208_v56 = vor.u32 %v2110_v27, %v2109_v42  ;;  %v2114_v34 = vor.u32 %v2113_v9, %v2112_v20  ;;  %v10393_v42 = vld [vmem:[#allocation21_spill] sm:$0xff] }
 0x1e9   :  { %10392 = vst [vmem:[#allocation56_spill] sm:$0xff] %v8193_v7  ;;  %v2117_v57 = vor.u32 %v2116_v21, %v2115_v12  ;;  %v2120_v23 = vor.u32 %v2119_v11, %v2118_v25  ;;  %vm2121_vm8 = vcmp.lt.s32.totalorder %v8188_v28, 1  ;;  %vm2124_vm9 = vcmp.lt.s32.totalorder %v8188_v28, 4 }
 0x1ea   :  { %v2036_v30 = vshll.u32 %v8203_v62, 30  ;;  %v8213_v1 = vshll.u32 %v2097_v49, 8  ;;  %vm1776_vm1 = vcmp.eq.s32.totalorder %v8157_v10, 2  ;;  %v10264_v13 = vxor.u32 2147483648, %v8190_v16 }
 0x1eb   :  { %v8219_v43 = vsel %vm8142_vm14, 0, %v1906_v6  ;;  %v1910_v58 = vmul.f32 -0.001358992, %v8201_v52  ;;  %v10265_v60 = vxor.u32 2147483648, %v8193_v7  ;;  %v2108_v37 = vor.u32 %v2107_v15, %v2106_v26 }
 0x1ec   :  { %v2037_v61 = vsub.s32 %v2033_v5, %v2036_v30  ;;  %vm2123_vm3 = vcmp.lt.s32.totalorder %v8188_v28, 3  ;;  %vm2122_vm5 = vcmp.lt.s32.totalorder %v8188_v28, 2  ;;  %v2130_v53 = vsel %vm2124_vm9, %v2117_v57, 920167782 }
 0x1ed   :  { %v2133_v36 = vsel %vm2121_vm8, %v8208_v56, %v2114_v34  ;;  %v2134_v48 = vsel %vm2124_vm9, %v2120_v23, 1326507024  ;;  %v2138_v46 = vand.u32 65535, %v8213_v1  ;;  %v2246_v20 = vand.u32 2139095040, %v10393_v42 }
 0x1ee   :  { %vm2038_vm0 = vcmp.lt.s32.totalorder %v2037_v61, 0  ;;  %v2039_v54 = vsub.s32 0, %v2037_v61  ;;  %v1911_v5 = vadd.f32 0.041655596, %v1910_v58  ;;  %v1917_v12 = vmul.f32 -0.00019511016, %v8201_v52 }
 0x1ef   :  { %v2135_v25 = vsel %vm2123_vm3, %v2117_v57, %v2134_v48  ;;  %v2139_v27 = vshrl.u32 %v8213_v1, 16  ;;  %v2129_v21 = vsel %vm2121_vm8, %v2108_v37, %v8208_v56  ;;  %v2131_v11 = vsel %vm2123_vm3, %v2114_v34, %v2130_v53 }
 0x1f0   :  { %v2040_v9 = vsel %vm2038_vm0, %v2039_v54, %v2037_v61  ;;  %v2136_v0 = vsel %vm2122_vm5, %v2133_v36, %v2135_v25  ;;  %v8250_v49 = vsel %vm1776_vm1, %v10264_v13, %v8193_v7  ;;  %v8257_v57 = vsel %vm1773_vm15, %v8190_v16, %v10265_v60 }
 0x1f1   :  { %v2041_v6 = vclz %v2040_v9  ;;  %v2140_v26 = vand.u32 65535, %v2136_v0  ;;  %v2141_v15 = vshrl.u32 %v2136_v0, 16  ;;  %v2105_v23 = vshrl.u32 %v10318_v8, %v8159_v38 }
 0x1f2   :  { %v2247_v58 = vshrl.u32 %v2246_v20, 23  ;;  %v2029_v53 = vadd.s32 %v8129_v35, %v8127_v47  ;;  %v2132_v48 = vsel %vm2122_vm5, %v2129_v21, %v2131_v11  ;;  %v1912_v25 = vmul.f32 %v1911_v5, %v8201_v52 }
 0x1f3   :  { %v6093_v36 = vadd.s32 4294967294, %v2041_v6  ;;  %v2143_v54 = vmul.u32 %v2141_v15, %v2138_v46  ;;  %v1918_v9 = vadd.f32 0.008332121, %v1917_v12  ;;  %v2126_v0 = vsel %vm2124_vm9, %v2114_v34, 2102212464 }
 0x1f4   :  { %v2144_v13 = vmul.u32 %v2140_v26, %v2139_v27  ;;  %v2142_v38 = vmul.u32 %v2140_v26, %v2138_v46  ;;  %v2162_v32 = vand.u32 65535, %v2132_v48  ;;  %v2125_v47 = vsel %vm2121_vm8, %v2105_v23, %v2108_v37 }
 0x1f5   :  { %vm6094_vm12 = vcmp.lt.s32.totalorder %v6093_v36, 0  ;;  %v2146_v60 = vshll.u32 %v2143_v54, 16  ;;  %v2163_v35 = vshrl.u32 %v2132_v48, 16  ;;  %v6098_v6 = vadd.s32 4294967169, %v2247_v58 }
 0x1f6   :  { %v2044_v20 = vsel %vm6094_vm12, 0, %v6093_v36  ;;  %v2145_v45 = vmul.u32 %v2141_v15, %v2139_v27  ;;  %vm1772_vm14 = vcmp.lt.s32.totalorder %v8157_v10, 2  ;;  %v1913_v5 = vadd.f32 -0.4999988, %v1912_v25 }
 0x1f7   :  { %v2045_v30 = vsub.s32 32, %v2044_v20  ;;  %v2046_v21 = vshll.u32 %v2037_v61, %v2044_v20  ;;  %v2049_v11 = vsub.s32 4294967266, %v2044_v20  ;;  %v1919_v34 = vmul.f32 %v1918_v9, %v8201_v52 }
 0x1f8   :  { %v2127_v12 = vsel %vm2123_vm3, %v8208_v56, %v2126_v0  ;;  %v2148_v26 = vshll.u32 %v2144_v13, 16  ;;  %vm2150_vm7 = vc.u32 %v2142_v38, %v2146_v60  ;;  %v2164_v37 = vmul.u32 %v2162_v32, %v2138_v46 }
 0x1f9   :  { %v2047_v36 = vshrl.u32 %v2029_v53, %v2045_v30  ;;  %v2050_v51 = vadd.s32 127, %v2049_v11  ;;  %vm1937_vm15 = vcmp.lt.s32.totalorder %v10372_v31, 0  ;;  %v2151_v61 = vsel %vm2150_vm7, 1, %v10317_v14 }
 0x1fa   :  { %v2152_v23 = vadd.s32 %v2146_v60, %v2142_v38  ;;  %v2165_v15 = vmul.u32 %v2163_v35, %v2138_v46  ;;  %v2166_v58 = vmul.u32 %v2162_v32, %v2139_v27  ;;  %v2147_v20 = vshrl.u32 %v2143_v54, 16 }
 0x1fb   :  { %v2048_v48 = vor.u32 %v2047_v36, %v2046_v21  ;;  %v2051_v25 = vshll.u32 %v2050_v51, 23  ;;  %v2153_v9 = vadd.s32 %v2151_v61, %v2145_v45  ;;  %v10394_v16 = vand.u32 2147483647, %v10372_v31 }
 0x1fc   :  { %vm2154_vm9 = vc.u32 %v2152_v23, %v2148_v26  ;;  %v2167_v30 = vmul.u32 %v2163_v35, %v2139_v27  ;;  %v2168_v53 = vshll.u32 %v2165_v15, 16  ;;  %v2170_v0 = vshll.u32 %v2166_v58, 16 }
 0x1fd   :  { %vm8280_vm8 = vcmp.le.f32.partialorder %v10394_v16, 0.7853982  ;;  %v2052_v11 = vor.u32 4788187, %v2051_v25  ;;  %v2055_v7 = vcvt.s32.f32 %v2048_v48  ;;  %v2149_v39 = vshrl.u32 %v2144_v13, 16 }
 0x1fe   :  { %v2155_v60 = vsel %vm2154_vm9, 1, %v10317_v14  ;;  %vm2172_vm1 = vc.u32 %v2164_v37, %v2168_v53  ;;  %v2174_v51 = vadd.s32 %v2168_v53, %v2164_v37  ;;  %v2253_v46 = vadd.s32 1, %v6098_v6 }
 0x1ff   :  { %v2157_v32 = vadd.s32 %v2155_v60, %v2153_v9  ;;  %v1920_v45 = vadd.f32 -0.16666654, %v1919_v34  ;;  %v2053_v54 = vand.u32 2147483647, %v2052_v11  ;;  %v2128_v16 = vsel %vm2122_vm5, %v2125_v47, %v2127_v12 }
 0x200   :  { %v2173_v38 = vsel %vm2172_vm1, 1, %v10317_v14  ;;  %v2169_v27 = vshrl.u32 %v2165_v15, 16  ;;  %vm2176_vm3 = vc.u32 %v2174_v51, %v2170_v0  ;;  %v8289_v36 = vadd.s32 %v2174_v51, %v2170_v0 }
 0x201   :  { %v2158_v21 = vadd.s32 %v2157_v32, %v2147_v20  ;;  %v2175_v35 = vadd.s32 %v2173_v38, %v2167_v30  ;;  %v2056_v26 = vmul.f32 %v2055_v7, %v2053_v54  ;;  %v2177_v13 = vsel %vm2176_vm3, 1, %v10317_v14 }
 0x202   :  { %vm2254_vm0 = vcmp.gt.s32.totalorder %v2253_v46, 0  ;;  %v2171_v6 = vshrl.u32 %v2166_v58, 16  ;;  %v1779_v28 = vsel %vm1772_vm14, %v8257_v57, %v8250_v49  ;;  %v10397_v12 = vand.u32 2147483647, %v10393_v42 }
 0x203   :  { %v8291_v61 = vadd.s32 %v2158_v21, %v2149_v39  ;;  %v2179_v34 = vadd.s32 %v2177_v13, %v2175_v35  ;;  %v2255_v37 = vsel %vm2254_vm0, %v2253_v46, 0  ;;  %v2057_v47 = vxor.u32 2147483648, %v2056_v26 }
 0x204   :  { %v2250_v23 = vand.u32 8388607, %v10397_v12  ;;  %v2257_v7 = vand.u32 31, %v2255_v37  ;;  %vm10286_vm5 = vweird.f32 %v10355_v24  ;;  %v1914_v15 = vmul.f32 %v1913_v5, %v8201_v52 }
 0x205   :  { %v1921_v39 = vmul.f32 %v1920_v45, %v8201_v52  ;;  %v2180_v48 = vadd.s32 %v2179_v34, %v2169_v27  ;;  %v2182_v58 = vmul.u32 %v8213_v1, %v2128_v16  ;;  %v2058_v25 = vsel %vm1937_vm15, %v2057_v47, %v2056_v26 }
 0x206   :  { %vm2184_vm12 = vc.u32 %v8291_v61, %v8289_v36  ;;  %v8307_v10 = vshrl.u32 %v2255_v37, 5  ;;  %v8309_v49 = vsub.s32 32, %v2257_v7  ;;  %v2260_v20 = vshll.u32 %v10318_v8, %v2257_v7 }
 0x207   :  { %v2181_v57 = vadd.s32 %v2180_v48, %v2171_v6  ;;  %v2263_v5 = vshll.u32 %v10309_v44, %v2257_v7  ;;  %v2269_v52 = vshll.u32 %v10311_v40, %v2257_v7  ;;  %v8317_v1 = vsel %vm8280_vm8, %v10372_v31, %v2058_v25 }
 0x208   :  { %v2261_v9 = vshrl.u32 %v10309_v44, %v8309_v49  ;;  %v2264_v30 = vshrl.u32 %v10310_v50, %v8309_v49  ;;  %v2266_v53 = vshll.u32 %v10310_v50, %v2257_v7  ;;  %v2267_v11 = vshrl.u32 %v10311_v40, %v8309_v49 }
 0x209   :  { %v2185_v0 = vadd.s32 1, %v2181_v57  ;;  %v2270_v60 = vshrl.u32 %v10312_v22, %v8309_v49  ;;  %v2272_v32 = vshll.u32 %v10312_v22, %v2257_v7  ;;  %v8329_v51 = vadd.f32 1.0, %v1914_v15 }
 0x20a   :  { %v8332_v46 = vand.u32 3, %v8219_v43  ;;  %v2059_v45 = vsub.s32 4, %v8203_v62  ;;  %v2251_v54 = vor.u32 8388608, %v2250_v23  ;;  %v1922_v16 = vadd.f32 1.0, %v1921_v39 }
 0x20b   :  { %10398 = vst [vmem:[#allocation21_spill] sm:$0xff] %v8329_v51  ;;  %v2186_v38 = vsel %vm2184_vm12, %v2185_v0, %v2181_v57  ;;  %v2271_v21 = vor.u32 %v2270_v60, %v2269_v52  ;;  %v2273_v27 = vshrl.u32 %v10313_v29, %v8309_v49  ;;  %v8342_v35 = vmul.f32 %v8317_v1, %v8317_v1 }
 0x20c   :  { %v2187_v26 = vadd.s32 %v2186_v38, %v2182_v58  ;;  %v2262_v13 = vor.u32 %v2261_v9, %v2260_v20  ;;  %v8344_v6 = vor.u32 %v2264_v30, %v2263_v5  ;;  %v2268_v34 = vor.u32 %v2267_v11, %v2266_v53 }
 0x20d   :  { %v2274_v37 = vor.u32 %v2273_v27, %v2272_v32  ;;  %vm2275_vm14 = vcmp.lt.s32.totalorder %v8307_v10, 1  ;;  %vm2278_vm7 = vcmp.lt.s32.totalorder %v8307_v10, 4  ;;  %v8350_v47 = vsel %vm10286_vm5, nan, %v1779_v28 }
 0x20e   :  { %10399 = vst [vmem:[#allocation57_spill] sm:$0xff] %v8350_v47  ;;  %vm1930_vm9 = vcmp.eq.s32.totalorder %v8332_v46, 2  ;;  %v2188_v12 = vadd.s32 536870912, %v2187_v26  ;;  %vm2277_vm1 = vcmp.lt.s32.totalorder %v8307_v10, 3  ;;  %v8355_v23 = vmul.f32 %v1922_v16, %v8172_v59 }
 0x20f   :  { %v10275_v7 = vxor.u32 2147483648, %v8329_v51  ;;  %v2064_v15 = vmul.f32 -0.001358992, %v8342_v35  ;;  %v2284_v39 = vsel %vm2278_vm7, %v2271_v21, 920167782  ;;  %vm2276_vm3 = vcmp.lt.s32.totalorder %v8307_v10, 2 }
 0x210   :  { %10400 = vst [vmem:[#allocation58_spill] sm:$0xff] %v8355_v23  ;;  %v2071_v48 = vmul.f32 -0.00019511016, %v8342_v35  ;;  %v8362_v58 = vshrl.u32 %v2188_v12, 30  ;;  %v2283_v28 = vsel %vm2275_vm14, %v2262_v13, %v8344_v6  ;;  %v2060_v59 = vsel %vm1937_vm15, %v2059_v45, %v8203_v62 }
 0x211   :  { %v2285_v25 = vsel %vm2277_vm1, %v2268_v34, %v2284_v39  ;;  %v2288_v57 = vsel %vm2278_vm7, %v2274_v37, 1326507024  ;;  %v8375_v20 = vshll.u32 %v2251_v54, 8  ;;  %vm1926_vm0 = vcmp.lt.s32.totalorder %v8332_v46, 2 }
 0x212   :  { %vm1927_vm12 = vcmp.eq.s32.totalorder %v8332_v46, 0  ;;  %v2190_v5 = vshll.u32 %v8362_v58, 30  ;;  %v2287_v52 = vsel %vm2275_vm14, %v8344_v6, %v2268_v34  ;;  %v10276_v62 = vxor.u32 2147483648, %v8355_v23 }
 0x213   :  { %v2065_v9 = vadd.f32 0.041655596, %v2064_v15  ;;  %v2286_v30 = vsel %vm2276_vm3, %v2283_v28, %v2285_v25  ;;  %v2289_v53 = vsel %vm2277_vm1, %v2271_v21, %v2288_v57  ;;  %v1932_v0 = vsel %vm1930_vm9, %v10275_v7, %v8355_v23 }
 0x214   :  { %v8395_v11 = vsel %vm8280_vm8, 0, %v2060_v59  ;;  %v2072_v60 = vadd.f32 0.008332121, %v2071_v48  ;;  %v2191_v32 = vsub.s32 %v2187_v26, %v2190_v5  ;;  %v2290_v54 = vsel %vm2276_vm3, %v2287_v52, %v2289_v53  ;;  %v10402_v59 = vld [vmem:[#allocation22_spill] sm:$0xff] }
 0x215   :  { %10401 = vst [vmem:[#allocation59_spill] sm:$0xff] %v8395_v11  ;;  %v8398_v45 = vand.u32 3, %v8395_v11  ;;  %v2292_v16 = vand.u32 65535, %v8375_v20  ;;  %v2293_v38 = vshrl.u32 %v8375_v20, 16  ;;  %v2259_v27 = vshrl.u32 %v10318_v8, %v8309_v49 }
 0x216   :  { %vm2192_vm15 = vcmp.lt.s32.totalorder %v2191_v32, 0  ;;  %v2193_v21 = vsub.s32 0, %v2191_v32  ;;  %v2317_v56 = vshrl.u32 %v2286_v30, 16  ;;  %v1929_v26 = vsel %vm1927_vm12, %v8329_v51, %v10276_v62 }
 0x217   :  { %v2066_v37 = vmul.f32 %v2065_v9, %v8342_v35  ;;  %v2294_v12 = vand.u32 65535, %v2290_v54  ;;  %v2295_v15 = vshrl.u32 %v2290_v54, 16  ;;  %v2073_v39 = vmul.f32 %v2072_v60, %v8342_v35 }
 0x218   :  { %v2194_v48 = vsel %vm2192_vm15, %v2193_v21, %v2191_v32  ;;  %v2316_v28 = vand.u32 65535, %v2286_v30  ;;  %v2400_v25 = vand.u32 2139095040, %v10402_v59  ;;  %v8416_v53 = vsel %vm1926_vm0, %v1929_v26, %v1932_v0 }
 0x219   :  { %v2195_v57 = vclz %v2194_v48  ;;  %v2296_v5 = vmul.u32 %v2294_v12, %v2292_v16  ;;  %v2297_v49 = vmul.u32 %v2295_v15, %v2292_v16  ;;  %v2298_v52 = vmul.u32 %v2294_v12, %v2293_v38 }
 0x21a   :  { %v2183_v7 = vadd.s32 %v8289_v36, %v8291_v61  ;;  %v2279_v9 = vsel %vm2275_vm14, %v2259_v27, %v2262_v13  ;;  %v2319_v54 = vmul.u32 %v2317_v56, %v2292_v16  ;;  %v2067_v60 = vadd.f32 -0.4999988, %v2066_v37 }
 0x21b   :  { %v6096_v21 = vadd.s32 4294967294, %v2195_v57  ;;  %v2280_v30 = vsel %vm2278_vm7, %v2268_v34, 2102212464  ;;  %v2300_v48 = vshll.u32 %v2297_v49, 16  ;;  %v2074_v62 = vadd.f32 -0.16666654, %v2073_v39 }
 0x21c   :  { %v2299_v47 = vmul.u32 %v2295_v15, %v2293_v38  ;;  %v2302_v12 = vshll.u32 %v2298_v52, 16  ;;  %v2320_v24 = vmul.u32 %v2316_v28, %v2293_v38  ;;  %v2318_v46 = vmul.u32 %v2316_v28, %v2292_v16 }
 0x21d   :  { %vm6097_vm8 = vcmp.lt.s32.totalorder %v6096_v21, 0  ;;  %vm2304_vm9 = vc.u32 %v2296_v5, %v2300_v48  ;;  %v2401_v0 = vshrl.u32 %v2400_v25, 23  ;;  %v2306_v61 = vadd.s32 %v2300_v48, %v2296_v5 }
 0x21e   :  { %v2198_v26 = vsel %vm6097_vm8, 0, %v6096_v21  ;;  %v2305_v36 = vsel %vm2304_vm9, 1, %v10317_v14  ;;  %v2322_v13 = vshll.u32 %v2319_v54, 16  ;;  %vm10285_vm14 = vweird.f32 %v10366_v55 }
 0x21f   :  { %v2199_v27 = vsub.s32 32, %v2198_v26  ;;  %v2200_v37 = vshll.u32 %v2191_v32, %v2198_v26  ;;  %v2203_v57 = vsub.s32 4294967266, %v2198_v26  ;;  %v2321_v34 = vmul.u32 %v2317_v56, %v2293_v38 }
 0x220   :  { %v2301_v11 = vshrl.u32 %v2297_v49, 16  ;;  %v2307_v39 = vadd.s32 %v2305_v36, %v2299_v47  ;;  %vm2308_vm7 = vc.u32 %v2306_v61, %v2302_v12  ;;  %v2324_v15 = vshll.u32 %v2320_v24, 16 }
 0x221   :  { %v2075_v51 = vmul.f32 %v2074_v62, %v8342_v35  ;;  %v2201_v23 = vshrl.u32 %v2183_v7, %v2199_v27  ;;  %v2204_v16 = vadd.s32 127, %v2203_v57  ;;  %v2309_v28 = vsel %vm2308_vm7, 1, %v10317_v14 }
 0x222   :  { %v2303_v25 = vshrl.u32 %v2298_v52, 16  ;;  %v2311_v21 = vadd.s32 %v2309_v28, %v2307_v39  ;;  %vm2326_vm0 = vc.u32 %v2318_v46, %v2322_v13  ;;  %v2328_v5 = vadd.s32 %v2322_v13, %v2318_v46 }
 0x223   :  { %v2202_v48 = vor.u32 %v2201_v23, %v2200_v37  ;;  %v2205_v3 = vshll.u32 %v2204_v16, 23  ;;  %v2327_v32 = vsel %vm2326_vm0, 1, %v10317_v14  ;;  %v6101_v26 = vadd.s32 4294967169, %v2401_v0 }
 0x224   :  { %v2312_v38 = vadd.s32 %v2311_v21, %v2301_v11  ;;  %v2323_v56 = vshrl.u32 %v2319_v54, 16  ;;  %v2329_v47 = vadd.s32 %v2327_v32, %v2321_v34  ;;  %vm2330_vm12 = vc.u32 %v2328_v5, %v2324_v15 }
 0x225   :  { %v2206_v49 = vor.u32 4788187, %v2205_v3  ;;  %v2209_v12 = vcvt.s32.f32 %v2202_v48  ;;  %v2281_v7 = vsel %vm2277_vm1, %v8344_v6, %v2280_v30  ;;  %v2331_v62 = vsel %vm2330_vm12, 1, %v10317_v14 }
 0x226   :  { %v2325_v52 = vshrl.u32 %v2320_v24, 16  ;;  %v2333_v36 = vadd.s32 %v2331_v62, %v2329_v47  ;;  %v2397_v23 = vand.u32 2147483647, %v10402_v59  ;;  %v2407_v46 = vadd.s32 1, %v6101_v26 }
 0x227   :  { %v2068_v61 = vmul.f32 %v2067_v60, %v8342_v35  ;;  %v2207_v0 = vand.u32 2147483647, %v2206_v49  ;;  %v8435_v11 = vadd.s32 %v2312_v38, %v2303_v25  ;;  %v8437_v54 = vadd.s32 %v2328_v5, %v2324_v15 }
 0x228   :  { %v2076_v3 = vadd.f32 1.0, %v2075_v51  ;;  %v2282_v13 = vsel %vm2276_vm3, %v2279_v9, %v2281_v7  ;;  %v2334_v27 = vadd.s32 %v2333_v36, %v2323_v56  ;;  %vm2408_vm1 = vcmp.gt.s32.totalorder %v2407_v46, 0 }
 0x229   :  { %v10403_v6 = vand.u32 2147483647, %v10384_v19  ;;  %vm2091_vm8 = vcmp.lt.s32.totalorder %v10384_v19, 0  ;;  %v2210_v35 = vmul.f32 %v2209_v12, %v2207_v0  ;;  %v2409_v60 = vsel %vm2408_vm1, %v2407_v46, 0 }
 0x22a   :  { %v8451_v30 = vsel %vm10285_vm14, nan, %v8416_v53  ;;  %v2213_v10 = vsub.s32 4, %v8362_v58  ;;  %v2335_v51 = vadd.s32 %v2334_v27, %v2325_v52  ;;  %v2411_v9 = vand.u32 31, %v2409_v60 }
 0x22b   :  { %vm8443_vm15 = vcmp.le.f32.partialorder %v10403_v6, 0.7853982  ;;  %v8454_v37 = vadd.f32 1.0, %v2068_v61  ;;  %vm2081_vm3 = vcmp.eq.s32.totalorder %v8398_v45, 0  ;;  %vm2084_vm9 = vcmp.eq.s32.totalorder %v8398_v45, 2 }
 0x22c   :  { %v2211_v57 = vxor.u32 2147483648, %v2210_v35  ;;  %v2336_v34 = vmul.u32 %v8375_v20, %v2282_v13  ;;  %vm2338_vm7 = vc.u32 %v8435_v11, %v8437_v54  ;;  %v8462_v39 = vmul.f32 %v2076_v3, %v8317_v1 }
 0x22d   :  { %v2339_v53 = vadd.s32 1, %v2335_v51  ;;  %v2404_v15 = vand.u32 8388607, %v2397_v23  ;;  %v8466_v16 = vsub.s32 32, %v2411_v9  ;;  %v8470_v25 = vshrl.u32 %v2409_v60, 5 }
 0x22e   :  { %v2212_v28 = vsel %vm2091_vm8, %v2211_v57, %v2210_v35  ;;  %v2414_v21 = vshll.u32 %v10318_v8, %v2411_v9  ;;  %v2417_v20 = vshll.u32 %v10309_v44, %v2411_v9  ;;  %v2420_v32 = vshll.u32 %v10310_v50, %v2411_v9 }
 0x22f   :  { %v8477_v1 = vsel %vm8443_vm15, %v10384_v19, %v2212_v28  ;;  %v2340_v5 = vsel %vm2338_vm7, %v2339_v53, %v2335_v51  ;;  %v2415_v48 = vshrl.u32 %v10309_v44, %v8466_v16  ;;  %v2423_v56 = vshll.u32 %v10311_v40, %v2411_v9 }
 0x230   :  { %v2217_v26 = vmul.f32 %v8477_v1, %v8477_v1  ;;  %v2341_v38 = vadd.s32 %v2340_v5, %v2336_v34  ;;  %v2426_v47 = vshll.u32 %v10312_v22, %v2411_v9  ;;  %v2418_v49 = vshrl.u32 %v10310_v50, %v8466_v16 }
 0x231   :  { %v2421_v12 = vshrl.u32 %v10311_v40, %v8466_v16  ;;  %v2424_v7 = vshrl.u32 %v10312_v22, %v8466_v16  ;;  %v2427_v44 = vshrl.u32 %v10313_v29, %v8466_v16  ;;  %v2214_v62 = vsel %vm2091_vm8, %v2213_v10, %v8362_v58 }
 0x232   :  { %v2218_v52 = vmul.f32 -0.001358992, %v2217_v26  ;;  %v2225_v36 = vmul.f32 -0.00019511016, %v2217_v26  ;;  %v2342_v46 = vadd.s32 536870912, %v2341_v38  ;;  %vm2080_vm0 = vcmp.lt.s32.totalorder %v8398_v45, 2 }
 0x233   :  { %v2082_v50 = vxor.u32 2147483648, %v8462_v39  ;;  %v2085_v61 = vxor.u32 2147483648, %v8454_v37  ;;  %v2405_v40 = vor.u32 8388608, %v2404_v15  ;;  %v2416_v0 = vor.u32 %v2415_v48, %v2414_v21 }
 0x234   :  { %v2219_v3 = vadd.f32 0.041655596, %v2218_v52  ;;  %v2226_v22 = vadd.f32 0.008332121, %v2225_v36  ;;  %v2343_v13 = vshrl.u32 %v2342_v46, 30  ;;  %vm2429_vm12 = vcmp.lt.s32.totalorder %v8470_v25, 1 }
 0x235   :  { %v8501_v29 = vor.u32 %v2418_v49, %v2417_v20  ;;  %v2422_v27 = vor.u32 %v2421_v12, %v2420_v32  ;;  %v2425_v58 = vor.u32 %v2424_v7, %v2423_v56  ;;  %v2428_v6 = vor.u32 %v2427_v44, %v2426_v47 }
 0x236   :  { %v2220_v35 = vmul.f32 %v2219_v3, %v2217_v26  ;;  %v2227_v60 = vmul.f32 %v2226_v22, %v2217_v26  ;;  %v2344_v10 = vshll.u32 %v2343_v13, 30  ;;  %vm2432_vm1 = vcmp.lt.s32.totalorder %v8470_v25, 4 }
 0x237   :  { %v2083_v51 = vsel %vm2081_vm3, %v8454_v37, %v2082_v50  ;;  %v2086_v9 = vsel %vm2084_vm9, %v2085_v61, %v8462_v39  ;;  %v8516_v57 = vsel %vm8443_vm15, 0, %v2214_v62  ;;  %v8518_v34 = vshll.u32 %v2405_v40, 8 }
 0x238   :  { %v2221_v53 = vadd.f32 -0.4999988, %v2220_v35  ;;  %v2228_v15 = vadd.f32 -0.16666654, %v2227_v60  ;;  %vm2245_vm8 = vcmp.lt.s32.totalorder %v10393_v42, 0  ;;  %v8521_v28 = vsub.s32 %v2341_v38, %v2344_v10 }
 0x239   :  { %vm2431_vm3 = vcmp.lt.s32.totalorder %v8470_v25, 3  ;;  %vm2430_vm7 = vcmp.lt.s32.totalorder %v8470_v25, 2  ;;  %v2437_v21 = vsel %vm2429_vm12, %v2416_v0, %v8501_v29  ;;  %v2438_v24 = vsel %vm2432_vm1, %v2425_v58, 920167782 }
 0x23a   :  { %v2442_v20 = vsel %vm2432_vm1, %v2428_v6, 1326507024  ;;  %v2229_v5 = vmul.f32 %v2228_v15, %v2217_v26  ;;  %vm2346_vm15 = vcmp.lt.s32.totalorder %v8521_v28, 0  ;;  %v2347_v48 = vsub.s32 0, %v8521_v28 }
 0x23b   :  { %v2441_v32 = vsel %vm2429_vm12, %v8501_v29, %v2422_v27  ;;  %v8538_v38 = vand.u32 3, %v8516_v57  ;;  %v10406_v56 = vand.u32 2147483647, %v10393_v42  ;;  %v2439_v49 = vsel %vm2431_vm3, %v2422_v27, %v2438_v24 }
 0x23c   :  { %v2443_v12 = vsel %vm2431_vm3, %v2425_v58, %v2442_v20  ;;  %v2446_v7 = vand.u32 65535, %v8518_v34  ;;  %v2222_v44 = vmul.f32 %v2221_v53, %v2217_v26  ;;  %v2348_v62 = vsel %vm2346_vm15, %v2347_v48, %v8521_v28 }
 0x23d   :  { %vm8542_vm9 = vcmp.le.f32.partialorder %v10406_v56, 0.7853982  ;;  %v2413_v52 = vshrl.u32 %v10318_v8, %v8466_v16  ;;  %v2440_v36 = vsel %vm2430_vm7, %v2437_v21, %v2439_v49  ;;  %v2349_v46 = vclz %v2348_v62 }
 0x23e   :  { %v2367_v40 = vsub.s32 4, %v2343_v13  ;;  %v2444_v3 = vsel %vm2430_vm7, %v2441_v32, %v2443_v12  ;;  %v2447_v22 = vshrl.u32 %v8518_v34, 16  ;;  %v8561_v58 = vsel %vm2080_vm0, %v2083_v51, %v2086_v9 }
 0x23f   :  { %v2230_v26 = vadd.f32 1.0, %v2229_v5  ;;  %v2448_v6 = vand.u32 65535, %v2444_v3  ;;  %v2449_v35 = vshrl.u32 %v2444_v3, 16  ;;  %vm2238_vm15 = vcmp.eq.s32.totalorder %v8538_v38, 2 }
 0x240   :  { %v2337_v8 = vadd.s32 %v8437_v54, %v8435_v11  ;;  %v6099_v16 = vadd.s32 4294967294, %v2349_v46  ;;  %v2471_v60 = vshrl.u32 %v2440_v36, 16  ;;  %v8566_v10 = vadd.f32 1.0, %v2222_v44 }
 0x241   :  { %vm2235_vm14 = vcmp.eq.s32.totalorder %v8538_v38, 0  ;;  %v2433_v53 = vsel %vm2429_vm12, %v2413_v52, %v2416_v0  ;;  %v2451_v45 = vmul.u32 %v2449_v35, %v2446_v7  ;;  %v2470_v51 = vand.u32 65535, %v2440_v36 }
 0x242   :  { %vm6100_vm0 = vcmp.lt.s32.totalorder %v6099_v16, 0  ;;  %v2368_v9 = vsel %vm2245_vm8, %v2367_v40, %v2343_v13  ;;  %v2434_v15 = vsel %vm2432_vm1, %v2422_v27, 2102212464  ;;  %v2452_v21 = vmul.u32 %v2448_v6, %v2447_v22 }
 0x243   :  { %v8576_v11 = vmul.f32 %v2230_v26, %v8477_v1  ;;  %v2352_v54 = vsel %vm6100_vm0, 0, %v6099_v16  ;;  %v2450_v24 = vmul.u32 %v2448_v6, %v2446_v7  ;;  %v2454_v20 = vshll.u32 %v2451_v45, 16 }
 0x244   :  { %vm2234_vm5 = vcmp.lt.s32.totalorder %v8538_v38, 2  ;;  %v2353_v5 = vsub.s32 32, %v2352_v54  ;;  %v2354_v0 = vshll.u32 %v8521_v28, %v2352_v54  ;;  %v2357_v48 = vsub.s32 4294967266, %v2352_v54 }
 0x245   :  { %v2473_v32 = vmul.u32 %v2471_v60, %v2446_v7  ;;  %v2239_v56 = vxor.u32 2147483648, %v8566_v10  ;;  %v8583_v13 = vsel %vm8542_vm9, 0, %v2368_v9  ;;  %v2453_v27 = vmul.u32 %v2449_v35, %v2447_v22 }
 0x246   :  { %v2474_v49 = vmul.u32 %v2470_v51, %v2447_v22  ;;  %vm2078_vm12 = vweird.f32 %v10372_v31  ;;  %v2355_v1 = vshrl.u32 %v2337_v8, %v2353_v5  ;;  %v2358_v12 = vadd.s32 127, %v2357_v48  ;;  %v10484_v31 = vld [vmem:[#allocation31_spill] sm:$0xff] }
 0x247   :  { %v2456_v44 = vshll.u32 %v2452_v21, 16  ;;  %v2472_v62 = vmul.u32 %v2470_v51, %v2446_v7  ;;  %v2236_v52 = vxor.u32 2147483648, %v8576_v11  ;;  %v2455_v36 = vshrl.u32 %v2451_v45, 16 }
 0x248   :  { %vm2458_vm1 = vc.u32 %v2450_v24, %v2454_v20  ;;  %v2460_v28 = vadd.s32 %v2454_v20, %v2450_v24  ;;  %vm10288_vm0 = vweird.f32 %v10384_v19  ;;  %v2356_v46 = vor.u32 %v2355_v1, %v2354_v0  ;;  %v10409_v1 = vld [vmem:[#allocation23_spill] sm:$0xff] }
 0x249   :  { %v2359_v40 = vshll.u32 %v2358_v12, 23  ;;  %v2459_v3 = vsel %vm2458_vm1, 1, %v10317_v14  ;;  %v2476_v26 = vshll.u32 %v2473_v32, 16  ;;  %v2475_v35 = vmul.u32 %v2471_v60, %v2447_v22 }
 0x24a   :  { %v2461_v6 = vadd.s32 %v2459_v3, %v2453_v27  ;;  %vm2462_vm4 = vc.u32 %v2460_v28, %v2456_v44  ;;  %v2478_v16 = vshll.u32 %v2474_v49, 16  ;;  %v2363_v9 = vcvt.s32.f32 %v2356_v46 }
 0x24b   :  { %v2360_v8 = vor.u32 4788187, %v2359_v40  ;;  %v2435_v7 = vsel %vm2431_vm3, %v8501_v29, %v2434_v15  ;;  %v2463_v45 = vsel %vm2462_vm4, 1, %v10317_v14  ;;  %v2240_v51 = vsel %vm2238_vm15, %v2239_v56, %v8576_v11 }
 0x24c   :  { %v2465_v54 = vadd.s32 %v2463_v45, %v2461_v6  ;;  %vm2480_vm1 = vc.u32 %v2472_v62, %v2476_v26  ;;  %v2482_v24 = vadd.s32 %v2476_v26, %v2472_v62  ;;  %v2237_v22 = vsel %vm2235_vm14, %v8566_v10, %v2236_v52  ;;  %v10411_v45 = vld [vmem:[#allocation26_spill] sm:$0xff] }
 0x24d   :  { %v2361_v60 = vand.u32 2147483647, %v2360_v8  ;;  %v2457_v20 = vshrl.u32 %v2452_v21, 16  ;;  %v2481_v29 = vsel %vm2480_vm1, 1, %v10317_v14  ;;  %v2477_v5 = vshrl.u32 %v2473_v32, 16 }
 0x24e   :  { %v2466_v15 = vadd.s32 %v2465_v54, %v2455_v36  ;;  %v2483_v0 = vadd.s32 %v2481_v29, %v2475_v35  ;;  %vm2484_vm4 = vc.u32 %v2482_v24, %v2478_v16  ;;  %v2695_v12 = vadd.s32 3, %v10409_v1  ;;  %v10413_v54 = vld [vmem:[#allocation24_spill] sm:$0xff] }
 0x24f   :  { %v2364_v48 = vmul.f32 %v2363_v9, %v2361_v60  ;;  %v2485_v27 = vsel %vm2484_vm4, 1, %v10317_v14  ;;  %v3470_v44 = vadd.s32 3, %v7444_v2  ;;  %v2241_v62 = vsel %vm2234_vm5, %v2237_v22, %v2240_v51  ;;  %v10415_v29 = vld [vmem:[#allocation28_spill] sm:$0xff] }
 0x250   :  { %v2436_v28 = vsel %vm2430_vm7, %v2433_v53, %v2435_v7  ;;  %v2479_v21 = vshrl.u32 %v2474_v49, 16  ;;  %v2487_v46 = vadd.s32 %v2485_v27, %v2483_v0  ;;  %v2467_v36 = vadd.s32 %v2466_v15, %v2457_v20  ;;  %v10410_v53 = vld [vmem:[#allocation25_spill] sm:$0xff] }
 0x251   :  { %v2365_v40 = vxor.u32 2147483648, %v2364_v48  ;;  %v2486_v32 = vadd.s32 %v2482_v24, %v2478_v16  ;;  %v2696_v3 = vand.u32 3, %v2695_v12  ;;  %v8614_v14 = vsel %vm2078_vm12, nan, %v8561_v58 }
 0x252   :  { %v8617_v26 = vand.u32 3, %v8583_v13  ;;  %v2488_v2 = vadd.s32 %v2487_v46, %v2477_v5  ;;  %v3471_v38 = vand.u32 3, %v3470_v44  ;;  %v2850_v49 = vadd.s32 3, %v10410_v53  ;;  %v10417_v5 = vld [vmem:[#allocation27_spill] sm:$0xff] }
 0x253   :  { %v2366_v25 = vsel %vm2245_vm8, %v2365_v40, %v2364_v48  ;;  %vm2698_vm5 = vcmp.eq.s32.totalorder %v2696_v3, 0  ;;  %vm2701_vm14 = vcmp.eq.s32.totalorder %v2696_v3, 2  ;;  %v8624_v6 = vsel %vm10288_vm0, nan, %v2241_v62  ;;  %v10419_v62 = vld [vmem:[#allocation30_spill] sm:$0xff] }
 0x254   :  { %v8629_v58 = vsel %vm8542_vm9, %v10393_v42, %v2366_v25  ;;  %v2489_v35 = vadd.s32 %v2488_v2, %v2479_v21  ;;  %v2490_v16 = vmul.u32 %v8518_v34, %v2436_v28  ;;  %vm2492_vm8 = vc.u32 %v2467_v36, %v2486_v32 }
 0x255   :  { %v2371_v8 = vmul.f32 %v8629_v58, %v8629_v58  ;;  %vm2697_vm3 = vcmp.lt.s32.totalorder %v2696_v3, 2  ;;  %v2851_v9 = vand.u32 3, %v2850_v49  ;;  %v10412_v51 = vxor.u32 2147483648, %v10411_v45 }
 0x256   :  { %v2493_v7 = vadd.s32 1, %v2489_v35  ;;  %v10414_v22 = vxor.u32 2147483648, %v10413_v54  ;;  %vm3473_vm7 = vcmp.eq.s32.totalorder %v3471_v38, 0  ;;  %vm3476_vm15 = vcmp.eq.s32.totalorder %v3471_v38, 2 }
 0x257   :  { %v2700_v24 = vsel %vm2698_vm5, %v10413_v54, %v10412_v51  ;;  %v2372_v60 = vmul.f32 -0.001358992, %v2371_v8  ;;  %v2379_v20 = vmul.f32 -0.00019511016, %v2371_v8  ;;  %vm2853_vm9 = vcmp.eq.s32.totalorder %v2851_v9, 0 }
 0x258   :  { %v2703_v47 = vsel %vm2701_vm14, %v10414_v22, %v10411_v45  ;;  %v2494_v34 = vsel %vm2492_vm8, %v2493_v7, %v2489_v35  ;;  %vm2852_vm1 = vcmp.lt.s32.totalorder %v2851_v9, 2  ;;  %v10416_v15 = vxor.u32 2147483648, %v10415_v29  ;;  %v10422_v7 = vld [vmem:[#allocation34_spill] sm:$0xff] }
 0x259   :  { %vm2856_vm4 = vcmp.eq.s32.totalorder %v2851_v9, 2  ;;  %v2373_v48 = vadd.f32 0.041655596, %v2372_v60  ;;  %v2380_v27 = vadd.f32 0.008332121, %v2379_v20  ;;  %v2495_v1 = vadd.s32 %v2494_v34, %v2490_v16 }
 0x25a   :  { %v2855_v0 = vsel %vm2853_vm9, %v10417_v5, %v10416_v15  ;;  %v10418_v12 = vxor.u32 2147483648, %v10417_v5  ;;  %v3005_v28 = vadd.s32 3, %v10419_v62  ;;  %vm3472_vm5 = vcmp.lt.s32.totalorder %v3471_v38, 2 }
 0x25b   :  { %v10420_v21 = vxor.u32 2147483648, %v7523_v63  ;;  %v10421_v40 = vxor.u32 2147483648, %v7511_v4  ;;  %v2374_v25 = vmul.f32 %v2373_v48, %v2371_v8  ;;  %v2381_v53 = vmul.f32 %v2380_v27, %v2371_v8 }
 0x25c   :  { %v2858_v44 = vsel %vm2856_vm4, %v10418_v12, %v10415_v29  ;;  %vm2399_vm14 = vcmp.lt.s32.totalorder %v10402_v59, 0  ;;  %v2496_v49 = vadd.s32 536870912, %v2495_v1  ;;  %v2704_v35 = vsel %vm2697_vm3, %v2700_v24, %v2703_v47 }
 0x25d   :  { %v3475_v46 = vsel %vm3473_vm7, %v7511_v4, %v10420_v21  ;;  %v3478_v2 = vsel %vm3476_vm15, %v10421_v40, %v7523_v63  ;;  %vm2389_vm8 = vcmp.eq.s32.totalorder %v8617_v26, 0  ;;  %v2859_v16 = vsel %vm2852_vm1, %v2855_v0, %v2858_v44  ;;  %v10430_v44 = vld [vmem:[#allocation32_spill] sm:$0xff] }
 0x25e   :  { %v3006_v38 = vand.u32 3, %v3005_v28  ;;  %v3160_v45 = vadd.s32 3, %v10422_v7  ;;  %v2375_v51 = vadd.f32 -0.4999988, %v2374_v25  ;;  %v2382_v54 = vadd.f32 -0.16666654, %v2381_v53 }
 0x25f   :  { %v2497_v22 = vshrl.u32 %v2496_v49, 30  ;;  %v3479_v60 = vsel %vm3472_vm5, %v3475_v46, %v3478_v2  ;;  %vm2388_vm7 = vcmp.lt.s32.totalorder %v8617_v26, 2  ;;  %vm2392_vm9 = vcmp.eq.s32.totalorder %v8617_v26, 2  ;;  %v10432_v2 = vld [vmem:[#allocation37_spill] sm:$0xff]  ;;  %v10435_v7 = vld [vmem:[#allocation35_spill] sm:$0xff] }
 0x260   :  { %vm8662_vm15 = vcmp.le.f32.partialorder %v2397_v23, 0.7853982  ;;  %v8666_v63 = vadd.s32 %v2486_v32, %v2467_v36  ;;  %v8670_v9 = vsel %vm230_vm10, nan, %v2704_v35  ;;  %v3161_v24 = vand.u32 3, %v3160_v45  ;;  %v10427_v36 = vld [vmem:[#allocation43_spill] sm:$0xff] }
 0x261   :  { %v2376_v47 = vmul.f32 %v2375_v51, %v2371_v8  ;;  %v2383_v20 = vmul.f32 %v2382_v54, %v2371_v8  ;;  %v2498_v34 = vshll.u32 %v2497_v22, 30  ;;  %vm3008_vm3 = vcmp.eq.s32.totalorder %v3006_v38, 0  ;;  %v10428_v8 = vld [vmem:[#allocation33_spill] sm:$0xff] }
 0x262   :  { %v2521_v29 = vsub.s32 4, %v2497_v22  ;;  %v8674_v5 = vsel %vm384_vm11, nan, %v2859_v16  ;;  %v8678_v23 = vsel %vm1000_vm13, nan, %v3479_v60  ;;  %v3625_v32 = vadd.s32 3, %v10427_v36 }
 0x263   :  { %v8681_v0 = vadd.f32 1.0, %v2376_v47  ;;  %v2384_v48 = vadd.f32 1.0, %v2383_v20  ;;  %v2499_v27 = vsub.s32 %v2495_v1, %v2498_v34  ;;  %vm3011_vm10 = vcmp.eq.s32.totalorder %v3006_v38, 2  ;;  %v10437_v34 = vld [vmem:[#allocation47_spill] sm:$0xff] }
 0x264   :  { %vm2386_vm1 = vweird.f32 %v10393_v42  ;;  %vm3007_vm4 = vcmp.lt.s32.totalorder %v3006_v38, 2  ;;  %v10429_v12 = vxor.u32 2147483648, %v10428_v8  ;;  %vm3163_vm11 = vcmp.eq.s32.totalorder %v3161_v24, 0 }
 0x265   :  { %vm3166_vm5 = vcmp.eq.s32.totalorder %v3161_v24, 2  ;;  %v8688_v18 = vmul.f32 %v2384_v48, %v8629_v58  ;;  %v2393_v28 = vxor.u32 2147483648, %v8681_v0  ;;  %vm2500_vm13 = vcmp.lt.s32.totalorder %v2499_v27, 0  ;;  %v10433_v58 = vld [vmem:[#allocation36_spill] sm:$0xff]  ;;  %v10438_v48 = vld [vmem:[#allocation41_spill] sm:$0xff] }
 0x266   :  { %v3010_v62 = vsel %vm3008_vm3, %v10430_v44, %v10429_v12  ;;  %v2501_v21 = vsub.s32 0, %v2499_v27  ;;  %v2522_v1 = vsel %vm2399_vm14, %v2521_v29, %v2497_v22  ;;  %v10431_v46 = vxor.u32 2147483648, %v10430_v44  ;;  %v10440_v12 = vld [vmem:[#allocation40_spill] sm:$0xff] }
 0x267   :  { %v3315_v25 = vadd.s32 3, %v10432_v2  ;;  %v3626_v53 = vand.u32 3, %v3625_v32  ;;  %v2390_v49 = vxor.u32 2147483648, %v8688_v18  ;;  %vm3162_vm3 = vcmp.lt.s32.totalorder %v3161_v24, 2 }
 0x268   :  { %v3013_v40 = vsel %vm3011_vm10, %v10431_v46, %v10428_v8  ;;  %v2502_v35 = vsel %vm2500_vm13, %v2501_v21, %v2499_v27  ;;  %v10434_v16 = vxor.u32 2147483648, %v10433_v58  ;;  %v2394_v51 = vsel %vm2392_vm9, %v2393_v28, %v8688_v18 }
 0x269   :  { %v2503_v54 = vclz %v2502_v35  ;;  %v10436_v22 = vxor.u32 2147483648, %v10435_v7  ;;  %v3316_v3 = vand.u32 3, %v3315_v25  ;;  %v2391_v24 = vsel %vm2389_vm8, %v8681_v0, %v2390_v49 }
 0x26a   :  { %v3165_v45 = vsel %vm3163_vm11, %v10435_v7, %v10434_v16  ;;  %v8716_v47 = vsel %vm8662_vm15, 0, %v2522_v1  ;;  %v3014_v20 = vsel %vm3007_vm4, %v3010_v62, %v3013_v40  ;;  %v3780_v29 = vadd.s32 3, %v10437_v34  ;;  %v10442_v1 = vld [vmem:[#allocation45_spill] sm:$0xff]  ;;  %v10444_v40 = vld [vmem:[#allocation44_spill] sm:$0xff] }
 0x26b   :  { %v3168_v60 = vsel %vm3166_vm5, %v10436_v22, %v10433_v58  ;;  %v6102_v15 = vadd.s32 4294967294, %v2503_v54  ;;  %vm3318_vm9 = vcmp.eq.s32.totalorder %v3316_v3, 0  ;;  %vm3628_vm10 = vcmp.eq.s32.totalorder %v3626_v53, 0 }
 0x26c   :  { %vm3631_vm11 = vcmp.eq.s32.totalorder %v3626_v53, 2  ;;  %v2395_v36 = vsel %vm2388_vm7, %v2391_v24, %v2394_v51  ;;  %v3169_v32 = vsel %vm3162_vm3, %v3165_v45, %v3168_v60  ;;  %vm3321_vm5 = vcmp.eq.s32.totalorder %v3316_v3, 2  ;;  %v10458_v45 = vld [vmem:[#allocation19_spill] sm:$0xff] }
 0x26d   :  { %vm3627_vm13 = vcmp.lt.s32.totalorder %v3626_v53, 2  ;;  %vm6103_vm0 = vcmp.lt.s32.totalorder %v6102_v15, 0  ;;  %vm3317_vm8 = vcmp.lt.s32.totalorder %v3316_v3, 2  ;;  %v10439_v8 = vxor.u32 2147483648, %v10438_v48 }
 0x26e   :  { %v10441_v38 = vxor.u32 2147483648, %v10440_v12  ;;  %v2506_v21 = vsel %vm6103_vm0, 0, %v6102_v15  ;;  %v10443_v46 = vxor.u32 2147483648, %v10442_v1  ;;  %v10445_v26 = vxor.u32 2147483648, %v10444_v40 }
 0x26f   :  { %v3320_v44 = vsel %vm3318_vm9, %v10440_v12, %v10439_v8  ;;  %v3781_v35 = vand.u32 3, %v3780_v29  ;;  %v2507_v58 = vsub.s32 32, %v2506_v21  ;;  %v2508_v16 = vshll.u32 %v2499_v27, %v2506_v21  ;;  %v10448_v8 = vld [vmem:[#allocation49_spill] sm:$0xff] }
 0x270   :  { %v3323_v62 = vsel %vm3321_vm5, %v10441_v38, %v10438_v48  ;;  %v3630_v2 = vsel %vm3628_vm10, %v10444_v40, %v10443_v46  ;;  %v3633_v25 = vsel %vm3631_vm11, %v10445_v26, %v10442_v1  ;;  %v2511_v7 = vsub.s32 4294967266, %v2506_v21  ;;  %v10450_v38 = vld [vmem:[#allocation18_spill] sm:$0xff]  ;;  %v10454_v40 = vld [vmem:[#allocation13_spill] sm:$0xff] }
 0x271   :  { %v8736_v51 = vsel %vm538_vm2, nan, %v3014_v20  ;;  %v8740_v54 = vsel %vm2386_vm1, nan, %v2395_v36  ;;  %v8743_v22 = vand.u32 3, %v8716_v47  ;;  %v8747_v3 = vsel %vm692_vm6, nan, %v3169_v32 }
 0x272   :  { %v3324_v24 = vsel %vm3317_vm8, %v3320_v44, %v3323_v62  ;;  %v2509_v34 = vshrl.u32 %v8666_v63, %v2507_v58  ;;  %v2512_v27 = vadd.s32 127, %v2511_v7  ;;  %v3634_v29 = vsel %vm3627_vm13, %v3630_v2, %v3633_v25  ;;  %v10452_v62 = vld [vmem:[#allocation12_spill] sm:$0xff] }
 0x273   :  { %vm3782_vm0 = vcmp.lt.s32.totalorder %v3781_v35, 2  ;;  %vm3783_vm2 = vcmp.eq.s32.totalorder %v3781_v35, 0  ;;  %vm3786_vm7 = vcmp.eq.s32.totalorder %v3781_v35, 2  ;;  %v3935_v20 = vadd.s32 3, %v7861_v17 }
 0x274   :  { %v4090_v15 = vadd.s32 3, %v8061_v41  ;;  %v2510_v36 = vor.u32 %v2509_v34, %v2508_v16  ;;  %v2513_v48 = vshll.u32 %v2512_v27, 23  ;;  %v10449_v12 = vxor.u32 2147483648, %v10448_v8  ;;  %v10456_v16 = vld [vmem:[#allocation50_spill] sm:$0xff] }
 0x275   :  { %v10451_v44 = vxor.u32 2147483648, %v10450_v38  ;;  %vm10453_vm6 = vweird.f32 %v10452_v62  ;;  %v3936_v21 = vand.u32 3, %v3935_v20  ;;  %v4245_v17 = vadd.s32 3, %v8149_v33  ;;  %v10460_v34 = vld [vmem:[#allocation54_spill] sm:$0xff] }
 0x276   :  { %v3785_v32 = vsel %vm3783_vm2, %v10450_v38, %v10449_v12  ;;  %v8761_v53 = vsel %vm10453_vm6, nan, %v3324_v24  ;;  %v4091_v1 = vand.u32 3, %v4090_v15  ;;  %v2514_v46 = vor.u32 4788187, %v2513_v48  ;;  %v10463_v15 = vld [vmem:[#allocation14_spill] sm:$0xff] }
 0x277   :  { %v3788_v63 = vsel %vm3786_vm7, %v10451_v44, %v10448_v8  ;;  %v2517_v41 = vcvt.s32.f32 %v2510_v36  ;;  %vm10455_vm4 = vweird.f32 %v10454_v40  ;;  %v4400_v26 = vadd.s32 3, %v8219_v43 }
 0x278   :  { %v8766_v2 = vsel %vm10455_vm4, nan, %v3634_v29  ;;  %v3789_v25 = vsel %vm3782_vm0, %v3785_v32, %v3788_v63  ;;  %vm3937_vm3 = vcmp.lt.s32.totalorder %v3936_v21, 2  ;;  %vm3938_vm9 = vcmp.eq.s32.totalorder %v3936_v21, 0  ;;  %v10462_v29 = vld [vmem:[#allocation53_spill] sm:$0xff]  ;;  %v10466_v63 = vld [vmem:[#allocation56_spill] sm:$0xff] }
 0x279   :  { %vm3941_vm10 = vcmp.eq.s32.totalorder %v3936_v21, 2  ;;  %v2515_v58 = vand.u32 2147483647, %v2514_v46  ;;  %v10457_v7 = vxor.u32 2147483648, %v10456_v16  ;;  %v10459_v33 = vxor.u32 2147483648, %v10458_v45  ;;  %v10468_v21 = vld [vmem:[#allocation55_spill] sm:$0xff] }
 0x27a   :  { %vm4093_vm11 = vcmp.eq.s32.totalorder %v4091_v1, 0  ;;  %vm4092_vm5 = vcmp.lt.s32.totalorder %v4091_v1, 2  ;;  %v10461_v27 = vxor.u32 2147483648, %v10460_v34  ;;  %vm4096_vm13 = vcmp.eq.s32.totalorder %v4091_v1, 2 }
 0x27b   :  { %v3940_v60 = vsel %vm3938_vm9, %v10458_v45, %v10457_v7  ;;  %v3943_v24 = vsel %vm3941_vm10, %v10459_v33, %v10456_v16  ;;  %v4246_v35 = vand.u32 3, %v4245_v17  ;;  %v2518_v20 = vmul.f32 %v2517_v41, %v2515_v58  ;;  %v10472_v58 = vld [vmem:[#allocation58_spill] sm:$0xff]  ;;  %v10474_v7 = vld [vmem:[#allocation21_spill] sm:$0xff] }
 0x27c   :  { %v4095_v43 = vsel %vm4093_vm11, %v10462_v29, %v10461_v27  ;;  %vm10464_vm8 = vweird.f32 %v10463_v15  ;;  %v10465_v48 = vxor.u32 2147483648, %v10462_v29  ;;  %v4401_v12 = vand.u32 3, %v4400_v26  ;;  %v10470_v26 = vld [vmem:[#allocation15_spill] sm:$0xff] }
 0x27d   :  { %v8781_v36 = vsel %vm10464_vm8, nan, %v3789_v25  ;;  %v3944_v38 = vsel %vm3937_vm3, %v3940_v60, %v3943_v24  ;;  %vm4247_vm0 = vcmp.lt.s32.totalorder %v4246_v35, 2  ;;  %vm4248_vm2 = vcmp.eq.s32.totalorder %v4246_v35, 0  ;;  %v10476_v27 = vld [vmem:[#allocation59_spill] sm:$0xff] }
 0x27e   :  { %v4098_v8 = vsel %vm4096_vm13, %v10465_v48, %v10460_v34  ;;  %vm4251_vm7 = vcmp.eq.s32.totalorder %v4246_v35, 2  ;;  %v2519_v32 = vxor.u32 2147483648, %v2518_v20  ;;  %v10467_v62 = vxor.u32 2147483648, %v10466_v63  ;;  %v10479_v48 = vld [vmem:[#allocation17_spill] sm:$0xff] }
 0x27f   :  { %v4099_v44 = vsel %vm4092_vm5, %v4095_v43, %v4098_v8  ;;  %v10469_v17 = vxor.u32 2147483648, %v10468_v21  ;;  %vm4402_vm6 = vcmp.lt.s32.totalorder %v4401_v12, 2  ;;  %vm4403_vm4 = vcmp.eq.s32.totalorder %v4401_v12, 0 }
 0x280   :  { %v4250_v1 = vsel %vm4248_vm2, %v10468_v21, %v10467_v62  ;;  %vm4406_vm9 = vcmp.eq.s32.totalorder %v4401_v12, 2  ;;  %v2520_v40 = vsel %vm2399_vm14, %v2519_v32, %v2518_v20  ;;  %vm10471_vm3 = vweird.f32 %v10470_v26  ;;  %v10477_v20 = vld [vmem:[#allocation16_spill] sm:$0xff] }
 0x281   :  { %v4253_v46 = vsel %vm4251_vm7, %v10469_v17, %v10466_v63  ;;  %v8796_v25 = vsel %vm10471_vm3, nan, %v3944_v38  ;;  %v10473_v16 = vxor.u32 2147483648, %v10472_v58  ;;  %v10475_v60 = vxor.u32 2147483648, %v10474_v7 }
 0x282   :  { %v4254_v41 = vsel %vm4247_vm0, %v4250_v1, %v4253_v46  ;;  %v2523_v24 = vsel %vm8662_vm15, %v10402_v59, %v2520_v40  ;;  %v4555_v29 = vadd.s32 3, %v10476_v27  ;;  %v4710_v43 = vadd.s32 3, %v8516_v57 }
 0x283   :  { %v4405_v45 = vsel %vm4403_vm4, %v10474_v7, %v10473_v16  ;;  %v4408_v33 = vsel %vm4406_vm9, %v10475_v60, %v10472_v58  ;;  %v2525_v35 = vmul.f32 %v2523_v24, %v2523_v24  ;;  %vm10478_vm14 = vweird.f32 %v10477_v20 }
 0x284   :  { %v4409_v34 = vsel %vm4402_vm6, %v4405_v45, %v4408_v33  ;;  %v8811_v15 = vsel %vm10478_vm14, nan, %v4099_v44  ;;  %vm10480_vm10 = vweird.f32 %v10479_v48  ;;  %v4865_v12 = vadd.s32 3, %v8583_v13 }
 0x285   :  { %v8815_v8 = vsel %vm10480_vm10, nan, %v4254_v41  ;;  %vm10481_vm11 = vweird.f32 %v10366_v55  ;;  %v4556_v38 = vand.u32 3, %v4555_v29  ;;  %v4711_v32 = vand.u32 3, %v4710_v43 }
 0x286   :  { %v8820_v4 = vsel %vm10481_vm11, nan, %v4409_v34  ;;  %v5020_v63 = vadd.s32 3, %v8716_v47  ;;  %v2526_v57 = vmul.f32 -0.001358992, %v2525_v35  ;;  %v2533_v62 = vmul.f32 -0.00019511016, %v2525_v35 }
 0x287   :  { %v5032_v21 = vmul.f32 0.70710677, %v8670_v9  ;;  %vm4557_vm15 = vcmp.lt.s32.totalorder %v4556_v38, 2  ;;  %vm4558_vm5 = vcmp.eq.s32.totalorder %v4556_v38, 0  ;;  %vm4561_vm13 = vcmp.eq.s32.totalorder %v4556_v38, 2  ;;  %v10485_v38 = vld [vmem:[#allocation38_spill] sm:$0xff] }
 0x288   :  { %v8824_v44 = vand.u32 3, %v4865_v12  ;;  %v2527_v1 = vadd.f32 0.041655596, %v2526_v57  ;;  %v2534_v17 = vadd.f32 0.008332121, %v2533_v62  ;;  %v4560_v55 = vsel %vm4558_vm5, %v8454_v37, %v2082_v50 }
 0x289   :  { %v4563_v13 = vsel %vm4561_vm13, %v2085_v61, %v8462_v39  ;;  %vm2546_vm8 = vcmp.eq.s32.totalorder %v8743_v22, 2  ;;  %vm4712_vm0 = vcmp.lt.s32.totalorder %v4711_v32, 2  ;;  %vm4713_vm2 = vcmp.eq.s32.totalorder %v4711_v32, 0  ;;  %v10482_v39 = vld [vmem:[#allocation29_spill] sm:$0xff] }
 0x28a   :  { %vm4716_vm7 = vcmp.eq.s32.totalorder %v4711_v32, 2  ;;  %v8833_v9 = vand.u32 3, %v5020_v63  ;;  %v2528_v47 = vmul.f32 %v2527_v1, %v2525_v35  ;;  %v2535_v46 = vmul.f32 %v2534_v17, %v2525_v35 }
 0x28b   :  { %v4564_v41 = vsel %vm4557_vm15, %v4560_v55, %v4563_v13  ;;  %v4715_v40 = vsel %vm4713_vm2, %v8566_v10, %v2236_v52  ;;  %vm2543_vm6 = vcmp.eq.s32.totalorder %v8743_v22, 0  ;;  %v4718_v37 = vsel %vm4716_vm7, %v2239_v56, %v8576_v11 }
 0x28c   :  { %vm4868_vm4 = vcmp.eq.s32.totalorder %v8824_v44, 0  ;;  %vm4871_vm9 = vcmp.eq.s32.totalorder %v8824_v44, 2  ;;  %v5031_v50 = vmul.f32 0.70710677, %v10482_v39  ;;  %v2529_v61 = vadd.f32 -0.4999988, %v2528_v47 }
 0x28d   :  { %v2536_v26 = vadd.f32 -0.16666654, %v2535_v46  ;;  %v4719_v58 = vsel %vm4712_vm0, %v4715_v40, %v4718_v37  ;;  %vm4867_vm3 = vcmp.lt.s32.totalorder %v8824_v44, 2  ;;  %vm2542_vm14 = vcmp.lt.s32.totalorder %v8743_v22, 2 }
 0x28e   :  { %v8849_v52 = vsel %vm2078_vm12, nan, %v4564_v41  ;;  %vm10483_vm10 = vweird.f32 %v10384_v19  ;;  %v4870_v11 = vsel %vm4868_vm4, %v8681_v0, %v2390_v49  ;;  %vm5022_vm11 = vcmp.lt.s32.totalorder %v8833_v9, 2  ;;  %v10486_v41 = vld [vmem:[#allocation46_spill] sm:$0xff] }
 0x28f   :  { %v8853_v10 = vsel %vm10483_vm10, nan, %v4719_v58  ;;  %v2530_v56 = vmul.f32 %v2529_v61, %v2525_v35  ;;  %v2537_v16 = vmul.f32 %v2536_v26, %v2525_v35  ;;  %v4873_v7 = vsel %vm4871_vm9, %v2393_v28, %v8688_v18 }
 0x290   :  { %v5033_v45 = vsub.f32 0.0, %v5032_v21  ;;  %vm5023_vm12 = vcmp.eq.s32.totalorder %v8833_v9, 0  ;;  %v5034_v60 = vmul.f32 %v5031_v50, %v10484_v31  ;;  %v5035_v19 = vmul.f32 %v5031_v50, %v8674_v5 }
 0x291   :  { %v5039_v33 = vmul.f32 %v5032_v21, %v8674_v5  ;;  %v2531_v34 = vadd.f32 1.0, %v2530_v56  ;;  %v2538_v27 = vadd.f32 1.0, %v2537_v16  ;;  %vm5026_vm15 = vcmp.eq.s32.totalorder %v8833_v9, 2  ;;  %v10487_v56 = vld [vmem:[#allocation39_spill] sm:$0xff] }
 0x292   :  { %v5038_v49 = vmul.f32 %v5033_v45, %v10484_v31  ;;  %v5041_v29 = vmul.f32 %v5033_v45, %v8674_v5  ;;  %v5036_v43 = vsub.f32 %v5034_v60, %v5035_v19  ;;  %v5037_v0 = vadd.f32 %v5035_v19, %v5034_v60  ;;  %v10488_v19 = vld [vmem:[#allocation48_spill] sm:$0xff] }
 0x293   :  { %v5042_v18 = vmul.f32 %v5032_v21, %v10484_v31  ;;  %v2539_v28 = vmul.f32 %v2538_v27, %v2523_v24  ;;  %vm2540_vm5 = vweird.f32 %v10402_v59  ;;  %v2547_v35 = vxor.u32 2147483648, %v2531_v34 }
 0x294   :  { %v5040_v20 = vsub.f32 %v5038_v49, %v5039_v33  ;;  %v5081_v48 = vmul.f32 0.70710677, %v8678_v23  ;;  %v5044_v32 = vmul.f32 %v5036_v43, %v10485_v38  ;;  %v5047_v63 = vmul.f32 %v5037_v0, %v10485_v38 }
 0x295   :  { %v5043_v12 = vadd.f32 %v5042_v18, %v5041_v29  ;;  %v5051_v5 = vmul.f32 %v5036_v43, %v8736_v51  ;;  %v2544_v57 = vxor.u32 2147483648, %v2539_v28  ;;  %v2548_v62 = vsel %vm2546_vm8, %v2547_v35, %v2539_v28 }
 0x296   :  { %v5028_v1 = vsel %vm5026_vm15, %v2547_v35, %v2539_v28  ;;  %v5045_v24 = vmul.f32 %v5040_v20, %v8736_v51  ;;  %v5050_v17 = vmul.f32 %v5040_v20, %v10485_v38  ;;  %v5054_v55 = vmul.f32 %v5037_v0, %v8736_v51  ;;  %v10489_v35 = vld [vmem:[#allocation42_spill] sm:$0xff] }
 0x297   :  { %v5048_v21 = vmul.f32 %v5043_v12, %v8736_v51  ;;  %v5053_v23 = vmul.f32 %v5043_v12, %v10485_v38  ;;  %v2545_v13 = vsel %vm2543_vm6, %v2531_v34, %v2544_v57  ;;  %v5025_v47 = vsel %vm5023_vm12, %v2531_v34, %v2544_v57 }
 0x298   :  { %v5046_v46 = vadd.f32 %v5045_v24, %v5044_v32  ;;  %v5080_v40 = vmul.f32 0.70710677, %v10486_v41  ;;  %v4874_v37 = vsel %vm4867_vm3, %v4870_v11, %v4873_v7  ;;  %v5052_v50 = vsub.f32 %v5050_v17, %v5051_v5 }
 0x299   :  { %v5049_v39 = vsub.f32 %v5047_v63, %v5048_v21  ;;  %v5082_v61 = vsub.f32 0.0, %v5081_v48  ;;  %v2549_v26 = vsel %vm2542_vm14, %v2545_v13, %v2548_v62  ;;  %v5029_v51 = vsel %vm5022_vm11, %v5025_v47, %v5028_v1 }
 0x29a   :  { %v5055_v58 = vadd.f32 %v5054_v55, %v5053_v23  ;;  %v5056_v16 = vmul.f32 %v5046_v46, %v10487_v56  ;;  %v5059_v31 = vmul.f32 %v5046_v46, %v8747_v3  ;;  %v5062_v44 = vmul.f32 %v5052_v50, %v10487_v56  ;;  %v10490_v23 = vld [vmem:[#allocation51_spill] sm:$0xff] }
 0x29b   :  { %v5057_v45 = vmul.f32 %v5049_v39, %v8747_v3  ;;  %v5060_v60 = vmul.f32 %v5049_v39, %v10487_v56  ;;  %v5065_v7 = vmul.f32 %v5052_v50, %v8747_v3  ;;  %v5083_v9 = vmul.f32 %v5080_v40, %v10488_v19 }
 0x29c   :  { %v5063_v11 = vmul.f32 %v5055_v58, %v8747_v3  ;;  %v5066_v22 = vmul.f32 %v5055_v58, %v10487_v56  ;;  %v5084_v27 = vmul.f32 %v5080_v40, %v8766_v2  ;;  %v5087_v49 = vmul.f32 %v5082_v61, %v10488_v19  ;;  %v10491_v40 = vld [vmem:[#allocation57_spill] sm:$0xff] }
 0x29d   :  { %v5058_v33 = vsub.f32 %v5056_v16, %v5057_v45  ;;  %v5061_v34 = vadd.f32 %v5060_v60, %v5059_v31  ;;  %v8906_v29 = vsel %vm2386_vm1, nan, %v4874_v37  ;;  %v5088_v18 = vmul.f32 %v5081_v48, %v8766_v2  ;;  %v10492_v31 = vld [vmem:[#allocation52_spill] sm:$0xff] }
 0x29e   :  { %v5064_v43 = vsub.f32 %v5062_v44, %v5063_v11  ;;  %v5067_v0 = vadd.f32 %v5066_v22, %v5065_v7  ;;  %v2550_v3 = vsel %vm2540_vm5, nan, %v2549_v26  ;;  %v8913_v28 = vsel %vm2540_vm5, nan, %v5029_v51 }
 0x29f   :  { %v5068_v20 = vmul.f32 %v5058_v33, %v10489_v35  ;;  %v5090_v12 = vmul.f32 %v5082_v61, %v8766_v2  ;;  %v5071_v42 = vmul.f32 %v5061_v34, %v10489_v35  ;;  %v5075_v32 = vmul.f32 %v5058_v33, %v8761_v53 }
 0x2a0   :  { %v5069_v38 = vmul.f32 %v5064_v43, %v8761_v53  ;;  %v5078_v63 = vmul.f32 %v5061_v34, %v8761_v53  ;;  %v5085_v5 = vsub.f32 %v5083_v9, %v5084_v27  ;;  %v5086_v57 = vadd.f32 %v5084_v27, %v5083_v9 }
 0x2a1   :  { %v5089_v62 = vsub.f32 %v5087_v49, %v5088_v18  ;;  %v5091_v1 = vmul.f32 %v5081_v48, %v10488_v19  ;;  %v5072_v24 = vmul.f32 %v5067_v0, %v8761_v53  ;;  %v5074_v21 = vmul.f32 %v5064_v43, %v10489_v35 }
 0x2a2   :  { %v8922_v59 = vadd.f32 %v5069_v38, %v5068_v20  ;;  %v5077_v2 = vmul.f32 %v5067_v0, %v10489_v35  ;;  %v5093_v55 = vmul.f32 %v5085_v5, %v10490_v23  ;;  %v5096_v47 = vmul.f32 %v5086_v57, %v10490_v23 }
 0x2a3   :  { %v5092_v17 = vadd.f32 %v5091_v1, %v5090_v12  ;;  %v5094_v13 = vmul.f32 %v5089_v62, %v8781_v36  ;;  %v5099_v46 = vmul.f32 %v5089_v62, %v10490_v23  ;;  %v5100_v41 = vmul.f32 %v5085_v5, %v8781_v36  ;;  %v10493_v5 = vld [vmem:[#allocation20_spill] sm:$0xff] }
 0x2a4   :  { %v5103_v48 = vmul.f32 %v5086_v57, %v8781_v36  ;;  %v5129_v37 = vmul.f32 0.70710677, %v10491_v40  ;;  %v5130_v61 = vmul.f32 0.70710677, %v8815_v8  ;;  %v8937_v26 = vsub.f32 %v5071_v42, %v5072_v24 }
 0x2a5   :  { %v5095_v53 = vadd.f32 %v5094_v13, %v5093_v55  ;;  %v5097_v39 = vmul.f32 %v5092_v17, %v8781_v36  ;;  %v5102_v50 = vmul.f32 %v5092_v17, %v10490_v23  ;;  %v5101_v51 = vsub.f32 %v5099_v46, %v5100_v41 }
 0x2a6   :  { %v5132_v58 = vmul.f32 %v5129_v37, %v8451_v30  ;;  %v5133_v56 = vmul.f32 %v5129_v37, %v8820_v4  ;;  %v5131_v7 = vsub.f32 0.0, %v5130_v61  ;;  %v5137_v49 = vmul.f32 %v5130_v61, %v8820_v4 }
 0x2a7   :  { %v5098_v16 = vsub.f32 %v5096_v47, %v5097_v39  ;;  %v5104_v45 = vadd.f32 %v5103_v48, %v5102_v50  ;;  %v5105_v60 = vmul.f32 %v5095_v53, %v10492_v31  ;;  %v5108_v44 = vmul.f32 %v5095_v53, %v8796_v25 }
 0x2a8   :  { %v5111_v11 = vmul.f32 %v5101_v51, %v10492_v31  ;;  %v5114_v36 = vmul.f32 %v5101_v51, %v8796_v25  ;;  %v5134_v22 = vsub.f32 %v5132_v58, %v5133_v56  ;;  %v5135_v34 = vadd.f32 %v5133_v56, %v5132_v58 }
 0x2a9   :  { %v5106_v8 = vmul.f32 %v5098_v16, %v8796_v25  ;;  %v5109_v19 = vmul.f32 %v5098_v16, %v10492_v31  ;;  %v5112_v9 = vmul.f32 %v5104_v45, %v8796_v25  ;;  %v5115_v33 = vmul.f32 %v5104_v45, %v10492_v31 }
 0x2aa   :  { %v5136_v27 = vmul.f32 %v5131_v7, %v8451_v30  ;;  %v5139_v43 = vmul.f32 %v5131_v7, %v8820_v4  ;;  %v8952_v12 = vsub.f32 %v5074_v21, %v5075_v32  ;;  %v8954_v38 = vadd.f32 %v5078_v63, %v5077_v2 }
 0x2ab   :  { %v5107_v0 = vsub.f32 %v5105_v60, %v5106_v8  ;;  %v5110_v18 = vadd.f32 %v5109_v19, %v5108_v44  ;;  %v5113_v35 = vsub.f32 %v5111_v11, %v5112_v9  ;;  %v5116_v20 = vadd.f32 %v5115_v33, %v5114_v36 }
 0x2ac   :  { %v5138_v42 = vsub.f32 %v5136_v27, %v5137_v49  ;;  %v5140_v25 = vmul.f32 %v5130_v61, %v8451_v30  ;;  %v5142_v1 = vmul.f32 %v5134_v22, %v8614_v14  ;;  %v8960_v24 = vmul.f32 0.70710677, %v2550_v3 }
 0x2ad   :  { %v5117_v57 = vmul.f32 %v5107_v0, %v10493_v5  ;;  %v5118_v62 = vmul.f32 %v5113_v35, %v8811_v15  ;;  %v5120_v4 = vmul.f32 %v5110_v18, %v10493_v5  ;;  %v5121_v17 = vmul.f32 %v5116_v20, %v8811_v15 }
 0x2ae   :  { %v5123_v32 = vmul.f32 %v5113_v35, %v10493_v5  ;;  %v5124_v63 = vmul.f32 %v5107_v0, %v8811_v15  ;;  %v5126_v21 = vmul.f32 %v5116_v20, %v10493_v5  ;;  %v5141_v2 = vadd.f32 %v5140_v25, %v5139_v43 }
 0x2af   :  { %v5143_v30 = vmul.f32 %v5138_v42, %v8849_v52  ;;  %v5145_v23 = vmul.f32 %v5135_v34, %v8614_v14  ;;  %v5119_v55 = vadd.f32 %v5118_v62, %v5117_v57  ;;  %v5127_v13 = vmul.f32 %v5110_v18, %v8811_v15 }
 0x2b0   :  { %v5148_v3 = vmul.f32 %v5138_v42, %v8614_v14  ;;  %v5149_v47 = vmul.f32 %v5134_v22, %v8849_v52  ;;  %v5146_v41 = vmul.f32 %v5141_v2, %v8849_v52  ;;  %v5151_v48 = vmul.f32 %v5141_v2, %v8614_v14 }
 0x2b1   :  { %v5144_v46 = vadd.f32 %v5143_v30, %v5142_v1  ;;  %v5152_v40 = vmul.f32 %v5135_v34, %v8849_v52  ;;  %v5122_v37 = vsub.f32 %v5120_v4, %v5121_v17  ;;  %v5125_v53 = vsub.f32 %v5123_v32, %v5124_v63 }
 0x2b2   :  { %v5150_v39 = vsub.f32 %v5148_v3, %v5149_v47  ;;  %v8976_v50 = vmul.f32 0.70710677, %v8913_v28  ;;  %v5147_v61 = vsub.f32 %v5145_v23, %v5146_v41  ;;  %v5181_v14 = vmul.f32 %v5119_v55, %v8922_v59 }
 0x2b3   :  { %v5153_v51 = vadd.f32 %v5152_v40, %v5151_v48  ;;  %v5154_v15 = vmul.f32 %v5144_v46, %v8624_v6  ;;  %v5157_v58 = vmul.f32 %v5144_v46, %v8853_v10  ;;  %v5182_v52 = vmul.f32 %v5125_v53, %v8952_v12 }
 0x2b4   :  { %v5160_v56 = vmul.f32 %v5150_v39, %v8624_v6  ;;  %v5163_v16 = vmul.f32 %v5150_v39, %v8853_v10  ;;  %v5155_v45 = vmul.f32 %v5147_v61, %v8853_v10  ;;  %v5158_v31 = vmul.f32 %v5147_v61, %v8624_v6 }
 0x2b5   :  { %v5161_v28 = vmul.f32 %v5153_v51, %v8853_v10  ;;  %v5164_v60 = vmul.f32 %v5153_v51, %v8624_v6  ;;  %v5184_v44 = vmul.f32 %v5125_v53, %v8922_v59  ;;  %v5185_v11 = vmul.f32 %v5119_v55, %v8952_v12 }
 0x2b6   :  { %v5187_v36 = vmul.f32 %v5119_v55, %v8937_v26  ;;  %v5188_v7 = vmul.f32 %v5125_v53, %v8954_v38  ;;  %v5156_v22 = vsub.f32 %v5154_v15, %v5155_v45  ;;  %v5159_v8 = vadd.f32 %v5158_v31, %v5157_v58 }
 0x2b7   :  { %v5162_v19 = vsub.f32 %v5160_v56, %v5161_v28  ;;  %v5165_v9 = vadd.f32 %v5164_v60, %v5163_v16  ;;  %v5128_v33 = vadd.f32 %v5127_v13, %v5126_v21  ;;  %v8993_v34 = vsub.f32 0.0, %v8976_v50 }
 0x2b8   :  { %v5183_v27 = vsub.f32 %v5181_v14, %v5182_v52  ;;  %v5186_v10 = vadd.f32 %v5185_v11, %v5184_v44  ;;  %v5166_v6 = vmul.f32 %v5156_v22, %v8740_v54  ;;  %v5189_v43 = vsub.f32 %v5187_v36, %v5188_v7 }
 0x2b9   :  { %v5167_v49 = vmul.f32 %v5162_v19, %v8906_v29  ;;  %v5190_v0 = vmul.f32 %v5125_v53, %v8937_v26  ;;  %v5169_v18 = vmul.f32 %v5159_v8, %v8740_v54  ;;  %v5172_v35 = vmul.f32 %v5162_v19, %v8740_v54 }
 0x2ba   :  { %v5173_v20 = vmul.f32 %v5156_v22, %v8906_v29  ;;  %v5191_v42 = vmul.f32 %v5119_v55, %v8954_v38  ;;  %v5170_v25 = vmul.f32 %v5165_v9, %v8906_v29  ;;  %v5175_v5 = vmul.f32 %v5165_v9, %v8740_v54 }
 0x2bb   :  { %v5176_v57 = vmul.f32 %v5159_v8, %v8906_v29  ;;  %v5193_v62 = vmul.f32 %v5122_v37, %v8922_v59  ;;  %v5168_v1 = vadd.f32 %v5167_v49, %v5166_v6  ;;  %v5194_v17 = vmul.f32 %v5128_v33, %v8952_v12 }
 0x2bc   :  { %v5174_v4 = vsub.f32 %v5172_v35, %v5173_v20  ;;  %v5196_v32 = vmul.f32 %v5128_v33, %v8922_v59  ;;  %v5197_v63 = vmul.f32 %v5122_v37, %v8952_v12  ;;  %v5199_v21 = vmul.f32 %v5122_v37, %v8937_v26 }
 0x2bd   :  { %v5200_v2 = vmul.f32 %v5128_v33, %v8954_v38  ;;  %v5202_v30 = vmul.f32 %v5128_v33, %v8937_v26  ;;  %v5192_v23 = vadd.f32 %v5191_v42, %v5190_v0  ;;  %v5203_v54 = vmul.f32 %v5122_v37, %v8954_v38 }
 0x2be   :  { %v5205_v29 = vmul.f32 %v5183_v27, %v5168_v1  ;;  %v5206_v55 = vmul.f32 %v5186_v10, %v5174_v4  ;;  %v5171_v13 = vsub.f32 %v5169_v18, %v5170_v25  ;;  %v5195_v3 = vsub.f32 %v5193_v62, %v5194_v17 }
 0x2bf   :  { %v5208_v47 = vmul.f32 %v5183_v27, %v5174_v4  ;;  %v5209_v46 = vmul.f32 %v5186_v10, %v5168_v1  ;;  %v5198_v41 = vadd.f32 %v5197_v63, %v5196_v32  ;;  %v5201_v48 = vsub.f32 %v5199_v21, %v5200_v2 }
 0x2c0   :  { %v5211_v59 = vmul.f32 %v5189_v43, %v5168_v1  ;;  %v5212_v40 = vmul.f32 %v5192_v23, %v5174_v4  ;;  %v5204_v12 = vadd.f32 %v5203_v54, %v5202_v30  ;;  %v5214_v53 = vmul.f32 %v5189_v43, %v5174_v4 }
 0x2c1   :  { %v5215_v39 = vmul.f32 %v5192_v23, %v5168_v1  ;;  %v5217_v61 = vmul.f32 %v5195_v3, %v5168_v1  ;;  %v5177_v51 = vadd.f32 %v5176_v57, %v5175_v5  ;;  %v9013_v15 = vsub.f32 %v5205_v29, %v5206_v55 }
 0x2c2   :  { %v9015_v26 = vadd.f32 %v5209_v46, %v5208_v47  ;;  %v5218_v38 = vmul.f32 %v5198_v41, %v5174_v4  ;;  %v5220_v37 = vmul.f32 %v5195_v3, %v5174_v4  ;;  %v5221_v58 = vmul.f32 %v5198_v41, %v5168_v1 }
 0x2c3   :  { %v5223_v56 = vmul.f32 %v5201_v48, %v5168_v1  ;;  %v5224_v16 = vmul.f32 %v5204_v12, %v5174_v4  ;;  %v9017_v14 = vsub.f32 %v5211_v59, %v5212_v40  ;;  %v9019_v52 = vadd.f32 %v5215_v39, %v5214_v53 }
 0x2c4   :  { %v5226_v45 = vmul.f32 %v5201_v48, %v5174_v4  ;;  %v5227_v31 = vmul.f32 %v5204_v12, %v5168_v1  ;;  %v9021_v28 = vsub.f32 %v5217_v61, %v5218_v38  ;;  %v5229_v60 = vmul.f32 %v5183_v27, %v5171_v13 }
 0x2c5   :  { %v5230_v44 = vmul.f32 %v5186_v10, %v5177_v51  ;;  %v5232_v11 = vmul.f32 %v5183_v27, %v5177_v51  ;;  %v5233_v36 = vmul.f32 %v5186_v10, %v5171_v13  ;;  %v5235_v7 = vmul.f32 %v5189_v43, %v5171_v13 }
 0x2c6   :  { %v5236_v22 = vmul.f32 %v5192_v23, %v5177_v51  ;;  %v5238_v8 = vmul.f32 %v5189_v43, %v5177_v51  ;;  %v9023_v19 = vadd.f32 %v5221_v58, %v5220_v37  ;;  %v9025_v9 = vsub.f32 %v5223_v56, %v5224_v16 }
 0x2c7   :  { %v5239_v33 = vmul.f32 %v5192_v23, %v5171_v13  ;;  %v5241_v6 = vmul.f32 %v5195_v3, %v5171_v13  ;;  %v9027_v49 = vadd.f32 %v5227_v31, %v5226_v45  ;;  %v5242_v0 = vmul.f32 %v5198_v41, %v5177_v51 }
 0x2c8   :  { %v5244_v18 = vmul.f32 %v5195_v3, %v5177_v51  ;;  %v5245_v35 = vmul.f32 %v5198_v41, %v5171_v13  ;;  %v9029_v20 = vsub.f32 %v5229_v60, %v5230_v44  ;;  %v5247_v42 = vmul.f32 %v5201_v48, %v5171_v13 }
 0x2c9   :  { %v5248_v25 = vmul.f32 %v5204_v12, %v5177_v51  ;;  %v5250_v27 = vmul.f32 %v5201_v48, %v5177_v51  ;;  %v9031_v10 = vadd.f32 %v5233_v36, %v5232_v11  ;;  %v9033_v5 = vsub.f32 %v5235_v7, %v5236_v22 }
 0x2ca   :  { %v9035_v43 = vadd.f32 %v5239_v33, %v5238_v8  ;;  %v5251_v57 = vmul.f32 %v5204_v12, %v5171_v13  ;;  %v9037_v62 = vsub.f32 %v5241_v6, %v5242_v0  ;;  %v5253_v1 = vmul.f32 %v9013_v15, %v8960_v24 }
 0x2cb   :  { %v5254_v4 = vmul.f32 %v9015_v26, %v8993_v34  ;;  %v5256_v17 = vmul.f32 %v9013_v15, %v8993_v34  ;;  %v9045_v32 = vadd.f32 %v5245_v35, %v5244_v18  ;;  %v9047_v63 = vsub.f32 %v5247_v42, %v5248_v25 }
 0x2cc   :  { %v5260_v21 = vmul.f32 %v9019_v52, %v8993_v34  ;;  %v5262_v2 = vmul.f32 %v9017_v14, %v8993_v34  ;;  %v9053_v30 = vadd.f32 %v5251_v57, %v5250_v27  ;;  %v5257_v54 = vmul.f32 %v9015_v26, %v8960_v24 }
 0x2cd   :  { %v9055_v23 = vsub.f32 %v5253_v1, %v5254_v4  ;;  %v5259_v29 = vmul.f32 %v9017_v14, %v8960_v24  ;;  %v5263_v55 = vmul.f32 %v9019_v52, %v8960_v24  ;;  %v5265_v13 = vmul.f32 %v9021_v28, %v8960_v24 }
 0x2ce   :  { %v5266_v3 = vmul.f32 %v9023_v19, %v8993_v34  ;;  %v5268_v47 = vmul.f32 %v9021_v28, %v8993_v34  ;;  %v9069_v46 = vadd.f32 %v5257_v54, %v5256_v17  ;;  %v5272_v48 = vmul.f32 %v9027_v49, %v8993_v34 }
 0x2cf   :  { %v9071_v41 = vsub.f32 %v5259_v29, %v5260_v21  ;;  %v5274_v59 = vmul.f32 %v9025_v9, %v8993_v34  ;;  %v9077_v40 = vadd.f32 %v5263_v55, %v5262_v2  ;;  %v5269_v53 = vmul.f32 %v9023_v19, %v8960_v24 }
 0x2d0   :  { %v9079_v12 = vsub.f32 %v5265_v13, %v5266_v3  ;;  %v5271_v39 = vmul.f32 %v9025_v9, %v8960_v24  ;;  %v5275_v61 = vmul.f32 %v9027_v49, %v8960_v24  ;;  %v5277_v51 = vmul.f32 %v9029_v20, %v8960_v24 }
 0x2d1   :  { %v5278_v38 = vmul.f32 %v9031_v10, %v8993_v34  ;;  %v5280_v37 = vmul.f32 %v9029_v20, %v8993_v34  ;;  %v9093_v58 = vadd.f32 %v5269_v53, %v5268_v47  ;;  %v5281_v56 = vmul.f32 %v9031_v10, %v8960_v24 }
 0x2d2   :  { %v5284_v16 = vmul.f32 %v9035_v43, %v8993_v34  ;;  %v5286_v45 = vmul.f32 %v9033_v5, %v8993_v34  ;;  %v9101_v31 = vsub.f32 %v5271_v39, %v5272_v48  ;;  %v9103_v60 = vadd.f32 %v5275_v61, %v5274_v59 }
 0x2d3   :  { %v9105_v44 = vsub.f32 %v5277_v51, %v5278_v38  ;;  %v5283_v11 = vmul.f32 %v9033_v5, %v8960_v24  ;;  %v9109_v36 = vadd.f32 %v5281_v56, %v5280_v37  ;;  %v5287_v7 = vmul.f32 %v9035_v43, %v8960_v24 }
 0x2d4   :  { %v5290_v22 = vmul.f32 %v9045_v32, %v8993_v34  ;;  %v5292_v8 = vmul.f32 %v9037_v62, %v8993_v34  ;;  %v5289_v6 = vmul.f32 %v9037_v62, %v8960_v24  ;;  %v5296_v0 = vmul.f32 %v9053_v30, %v8993_v34 }
 0x2d5   :  { %v9117_v33 = vsub.f32 %v5283_v11, %v5284_v16  ;;  %v5298_v18 = vmul.f32 %v9047_v63, %v8993_v34  ;;  %v5288_v35 = vadd.f32 %v5287_v7, %v5286_v45  ;;  %v5293_v42 = vmul.f32 %v9045_v32, %v8960_v24 }
 0x2d6   :  { %v5295_v25 = vmul.f32 %v9047_v63, %v8960_v24  ;;  %v5301_v27 = vmul.f32 %v9015_v26, %v8976_v50  ;;  %v5299_v57 = vmul.f32 %v9053_v30, %v8960_v24  ;;  %v5303_v34 = vmul.f32 %v9013_v15, %v8976_v50 }
 0x2d7   :  { %v5305_v4 = vmul.f32 %v9019_v52, %v8976_v50  ;;  %v5307_v17 = vmul.f32 %v9017_v14, %v8976_v50  ;;  %v9143_v21 = vsub.f32 %v5289_v6, %v5290_v22  ;;  %v9145_v2 = vadd.f32 %v5293_v42, %v5292_v8 }
 0x2d8   :  { %v5309_v26 = vmul.f32 %v9023_v19, %v8976_v50  ;;  %v5311_v3 = vmul.f32 %v9021_v28, %v8976_v50  ;;  %v5297_v24 = vsub.f32 %v5295_v25, %v5296_v0  ;;  %v5300_v47 = vadd.f32 %v5299_v57, %v5298_v18 }
 0x2d9   :  { %v9151_v48 = vsub.f32 %v5253_v1, %v5301_v27  ;;  %v5313_v15 = vmul.f32 %v9027_v49, %v8976_v50  ;;  %v9155_v52 = vadd.f32 %v5303_v34, %v5257_v54  ;;  %v5306_v14 = vsub.f32 %v5259_v29, %v5305_v4 }
 0x2da   :  { %v5315_v59 = vmul.f32 %v9025_v9, %v8976_v50  ;;  %v5317_v38 = vmul.f32 %v9031_v10, %v8976_v50  ;;  %v5308_v19 = vadd.f32 %v5307_v17, %v5263_v55  ;;  %v5319_v28 = vmul.f32 %v9029_v20, %v8976_v50 }
 0x2db   :  { %v5321_v1 = vmul.f32 %v9035_v43, %v8976_v50  ;;  %v5323_v49 = vmul.f32 %v9033_v5, %v8976_v50  ;;  %v9167_v54 = vsub.f32 %v5265_v13, %v5309_v26  ;;  %v9169_v29 = vadd.f32 %v5311_v3, %v5269_v53 }
 0x2dc   :  { %v5314_v9 = vsub.f32 %v5271_v39, %v5313_v15  ;;  %v5325_v10 = vmul.f32 %v9045_v32, %v8976_v50  ;;  %v5316_v37 = vadd.f32 %v5315_v59, %v5275_v61  ;;  %v9173_v55 = vsub.f32 %v5277_v51, %v5317_v38 }
 0x2dd   :  { %v5327_v20 = vmul.f32 %v9037_v62, %v8976_v50  ;;  %v5329_v43 = vmul.f32 %v9053_v30, %v8976_v50  ;;  %v9179_v16 = vadd.f32 %v5319_v28, %v5281_v56  ;;  %v5322_v5 = vsub.f32 %v5283_v11, %v5321_v1 }
 0x2de   :  { %v5331_v13 = vmul.f32 %v9047_v63, %v8976_v50  ;;  %v5333_v53 = vstv %s9125_s0  ;;  %v5324_v39 = vadd.f32 %v5323_v49, %v5287_v7  ;;  %v5335_v32 = vstv %s9133_s22 }
 0x2df   :  { %v5334_v45 = vmul.f32 %v5333_v53, %v9071_v41  ;;  %v5338_v61 = vmul.f32 %v5333_v53, %v9077_v40  ;;  %v9187_v51 = vsub.f32 %v5289_v6, %v5325_v10  ;;  %v5336_v62 = vmul.f32 %v5335_v32, %v9077_v40 }
 0x2e0   :  { %v5339_v22 = vmul.f32 %v5335_v32, %v9071_v41  ;;  %v5341_v30 = vmul.f32 %v5333_v53, %v9101_v31  ;;  %v9192_v56 = vadd.f32 %v5327_v20, %v5293_v42  ;;  %v5330_v11 = vsub.f32 %v5295_v25, %v5329_v43 }
 0x2e1   :  { %v5332_v8 = vadd.f32 %v5331_v13, %v5299_v57  ;;  %v5342_v50 = vmul.f32 %v5335_v32, %v9103_v60  ;;  %v5344_v63 = vmul.f32 %v5335_v32, %v9101_v31  ;;  %v5345_v7 = vmul.f32 %v5333_v53, %v9103_v60 }
 0x2e2   :  { %v5347_v6 = vmul.f32 %v5333_v53, %v9117_v33  ;;  %v5348_v0 = vmul.f32 %v5335_v32, %v5288_v35  ;;  %v9202_v41 = vadd.f32 %v5336_v62, %v5334_v45  ;;  %v9204_v40 = vsub.f32 %v5338_v61, %v5339_v22 }
 0x2e3   :  { %v5350_v18 = vmul.f32 %v5333_v53, %v5288_v35  ;;  %v5351_v42 = vmul.f32 %v5335_v32, %v9117_v33  ;;  %v5343_v25 = vsub.f32 %v5341_v30, %v5342_v50  ;;  %v5353_v27 = vmul.f32 %v5333_v53, %v5297_v24 }
 0x2e4   :  { %v5354_v57 = vmul.f32 %v5335_v32, %v5300_v47  ;;  %v5356_v34 = vmul.f32 %v5335_v32, %v5297_v24  ;;  %v5357_v31 = vmul.f32 %v5333_v53, %v5300_v47  ;;  %v5359_v60 = vmul.f32 %v5333_v53, %v5306_v14 }
 0x2e5   :  { %v5360_v4 = vmul.f32 %v5335_v32, %v5308_v19  ;;  %v5362_v17 = vmul.f32 %v5333_v53, %v5308_v19  ;;  %v5346_v26 = vadd.f32 %v5345_v7, %v5344_v63  ;;  %v9209_v3 = vadd.f32 %v5348_v0, %v5347_v6 }
 0x2e6   :  { %v5363_v15 = vmul.f32 %v5335_v32, %v5306_v14  ;;  %v5365_v59 = vmul.f32 %v5333_v53, %v5314_v9  ;;  %v9211_v38 = vsub.f32 %v5350_v18, %v5351_v42  ;;  %v5366_v35 = vmul.f32 %v5335_v32, %v5316_v37 }
 0x2e7   :  { %v5368_v28 = vmul.f32 %v5335_v32, %v5314_v9  ;;  %v5369_v33 = vmul.f32 %v5333_v53, %v5316_v37  ;;  %v5355_v1 = vsub.f32 %v5353_v27, %v5354_v57  ;;  %v5371_v24 = vmul.f32 %v5333_v53, %v5322_v5 }
 0x2e8   :  { %v5372_v49 = vmul.f32 %v5335_v32, %v5324_v39  ;;  %v5374_v10 = vmul.f32 %v5333_v53, %v5324_v39  ;;  %v5358_v47 = vadd.f32 %v5357_v31, %v5356_v34  ;;  %v9213_v20 = vadd.f32 %v5360_v4, %v5359_v60 }
 0x2e9   :  { %v9215_v19 = vsub.f32 %v5362_v17, %v5363_v15  ;;  %v5375_v43 = vmul.f32 %v5335_v32, %v5322_v5  ;;  %v5367_v14 = vsub.f32 %v5365_v59, %v5366_v35  ;;  %v5370_v13 = vadd.f32 %v5369_v33, %v5368_v28 }
 0x2ea   :  { %v5377_v45 = vmul.f32 %v5333_v53, %v5330_v11  ;;  %v5378_v61 = vmul.f32 %v5335_v32, %v5332_v8  ;;  %v5380_v62 = vmul.f32 %v5335_v32, %v5330_v11  ;;  %v5381_v9 = vmul.f32 %v5333_v53, %v5332_v8 }
 0x2eb   :  { %v5383_v22 = vstv %s9195_s2  ;;  %v5385_v37 = vstv %s9200_s23  ;;  %v9219_v30 = vadd.f32 %v5372_v49, %v5371_v24  ;;  %v9221_v50 = vsub.f32 %v5374_v10, %v5375_v43 }
 0x2ec   :  { %v5384_v39 = vmul.f32 %v5383_v22, %v9079_v12  ;;  %v5386_v63 = vmul.f32 %v5385_v37, %v9093_v58  ;;  %v5388_v7 = vmul.f32 %v5383_v22, %v9093_v58  ;;  %v5389_v5 = vmul.f32 %v5385_v37, %v9079_v12 }
 0x2ed   :  { %v5391_v6 = vmul.f32 %v5383_v22, %v5343_v25  ;;  %v9228_v0 = vstv %s9207_s24  ;;  %v5392_v18 = vmul.f32 %v5385_v37, %v5346_v26  ;;  %v5394_v32 = vmul.f32 %v5383_v22, %v5346_v26 }
 0x2ee   :  { %v5395_v53 = vmul.f32 %v5385_v37, %v5343_v25  ;;  %v5397_v11 = vmul.f32 %v5383_v22, %v9143_v21  ;;  %v5379_v8 = vsub.f32 %v5377_v45, %v5378_v61  ;;  %v5382_v42 = vadd.f32 %v5381_v9, %v5380_v62 }
 0x2ef   :  { %v9231_v27 = vadd.f32 %v5386_v63, %v5384_v39  ;;  %v5398_v57 = vmul.f32 %v5385_v37, %v9145_v2  ;;  %v5400_v58 = vmul.f32 %v5385_v37, %v9143_v21  ;;  %v5401_v12 = vmul.f32 %v5383_v22, %v9145_v2 }
 0x2f0   :  { %v5403_v34 = vmul.f32 %v5383_v22, %v5355_v1  ;;  %v5404_v31 = vmul.f32 %v5385_v37, %v5358_v47  ;;  %v9238_v60 = vsub.f32 %v5388_v7, %v5389_v5  ;;  %v5406_v4 = vmul.f32 %v5385_v37, %v5355_v1 }
 0x2f1   :  { %v5407_v25 = vmul.f32 %v5383_v22, %v5358_v47  ;;  %v5409_v17 = vmul.f32 %v5383_v22, %v9167_v54  ;;  %v9241_v26 = vadd.f32 %v5392_v18, %v5391_v6  ;;  %v9243_v15 = vsub.f32 %v5394_v32, %v5395_v53 }
 0x2f2   :  { %v5399_v59 = vsub.f32 %v5397_v11, %v5398_v57  ;;  %v5410_v35 = vmul.f32 %v5385_v37, %v9169_v29  ;;  %v5412_v28 = vmul.f32 %v5383_v22, %v9169_v29  ;;  %v5413_v21 = vmul.f32 %v5385_v37, %v9167_v54 }
 0x2f3   :  { %v5415_v2 = vmul.f32 %v5383_v22, %v5367_v14  ;;  %v5416_v33 = vmul.f32 %v5385_v37, %v5370_v13  ;;  %v5402_v24 = vadd.f32 %v5401_v12, %v5400_v58  ;;  %v5405_v49 = vsub.f32 %v5403_v34, %v5404_v31 }
 0x2f4   :  { %v5418_v10 = vmul.f32 %v5383_v22, %v5370_v13  ;;  %v5419_v1 = vmul.f32 %v5385_v37, %v5367_v14  ;;  %v5408_v47 = vadd.f32 %v5407_v25, %v5406_v4  ;;  %v9248_v43 = vadd.f32 %v5410_v35, %v5409_v17 }
 0x2f5   :  { %v5421_v45 = vmul.f32 %v5383_v22, %v9187_v51  ;;  %v5422_v61 = vmul.f32 %v5385_v37, %v9192_v56  ;;  %v5424_v62 = vmul.f32 %v5385_v37, %v9187_v51  ;;  %v5425_v29 = vmul.f32 %v5383_v22, %v9192_v56 }
 0x2f6   :  { %v5427_v9 = vmul.f32 %v5383_v22, %v5379_v8  ;;  %v5428_v54 = vmul.f32 %v5385_v37, %v5382_v42  ;;  %v9254_v39 = vsub.f32 %v5412_v28, %v5413_v21  ;;  %v9256_v63 = vadd.f32 %v5416_v33, %v5415_v2 }
 0x2f7   :  { %v5430_v13 = vmul.f32 %v5385_v37, %v5379_v8  ;;  %v5431_v7 = vmul.f32 %v5383_v22, %v5382_v42  ;;  %v9258_v14 = vsub.f32 %v5418_v10, %v5419_v1  ;;  %v5434_v5 = vmul.f32 %v9228_v0, %v9105_v44 }
 0x2f8   :  { %v5435_v6 = vstv %s9234_s25  ;;  %v5438_v18 = vmul.f32 %v9228_v0, %v9109_v36  ;;  %v5423_v51 = vsub.f32 %v5421_v45, %v5422_v61  ;;  %v5441_v53 = vmul.f32 %v9228_v0, %v9209_v3 }
 0x2f9   :  { %v5436_v56 = vmul.f32 %v5435_v6, %v9109_v36  ;;  %v5439_v32 = vmul.f32 %v5435_v6, %v9105_v44  ;;  %v5426_v11 = vadd.f32 %v5425_v29, %v5424_v62  ;;  %v5429_v37 = vsub.f32 %v5427_v9, %v5428_v54 }
 0x2fa   :  { %v5432_v22 = vadd.f32 %v5431_v7, %v5430_v13  ;;  %v5442_v8 = vmul.f32 %v5435_v6, %v9211_v38  ;;  %v5444_v42 = vmul.f32 %v9228_v0, %v9211_v38  ;;  %v5445_v57 = vmul.f32 %v5435_v6, %v9209_v3 }
 0x2fb   :  { %v5447_v58 = vmul.f32 %v9228_v0, %v5399_v59  ;;  %v5448_v36 = vmul.f32 %v5435_v6, %v5402_v24  ;;  %v9278_v44 = vadd.f32 %v5436_v56, %v5434_v5  ;;  %v9280_v12 = vsub.f32 %v5438_v18, %v5439_v32 }
 0x2fc   :  { %v5450_v34 = vmul.f32 %v9228_v0, %v5402_v24  ;;  %v5451_v31 = vmul.f32 %v5435_v6, %v5399_v59  ;;  %v9283_v4 = vadd.f32 %v5442_v8, %v5441_v53  ;;  %v5453_v25 = vmul.f32 %v9228_v0, %v5405_v49 }
 0x2fd   :  { %v5454_v17 = vmul.f32 %v5435_v6, %v5408_v47  ;;  %v5456_v38 = vmul.f32 %v9228_v0, %v5408_v47  ;;  %v5457_v3 = vmul.f32 %v5435_v6, %v5405_v49  ;;  %v5459_v35 = vmul.f32 %v9228_v0, %v9173_v55 }
 0x2fe   :  { %v5460_v28 = vmul.f32 %v5435_v6, %v9179_v16  ;;  %v5462_v21 = vmul.f32 %v5435_v6, %v9173_v55  ;;  %v9293_v2 = vsub.f32 %v5444_v42, %v5445_v57  ;;  %v9295_v59 = vadd.f32 %v5448_v36, %v5447_v58 }
 0x2ff   :  { %v5463_v33 = vmul.f32 %v9228_v0, %v9179_v16  ;;  %v5465_v24 = vmul.f32 %v9228_v0, %v9219_v30  ;;  %v9301_v49 = vsub.f32 %v5450_v34, %v5451_v31  ;;  %v5466_v10 = vmul.f32 %v5435_v6, %v9221_v50 }
 0x300   :  { %v5468_v1 = vmul.f32 %v5435_v6, %v9219_v30  ;;  %v5469_v55 = vmul.f32 %v9228_v0, %v9221_v50  ;;  %v9307_v47 = vadd.f32 %v5454_v17, %v5453_v25  ;;  %v5471_v45 = vmul.f32 %v9228_v0, %v5423_v51 }
 0x301   :  { %v5472_v61 = vmul.f32 %v5435_v6, %v5426_v11  ;;  %v5474_v16 = vmul.f32 %v5435_v6, %v5423_v51  ;;  %v9310_v62 = vsub.f32 %v5456_v38, %v5457_v3  ;;  %v5461_v29 = vsub.f32 %v5459_v35, %v5460_v28 }
 0x302   :  { %v5464_v9 = vadd.f32 %v5463_v33, %v5462_v21  ;;  %v5475_v54 = vmul.f32 %v9228_v0, %v5426_v11  ;;  %v5467_v13 = vsub.f32 %v5465_v24, %v5466_v10  ;;  %v5470_v7 = vadd.f32 %v5469_v55, %v5468_v1 }
 0x303   :  { %v5477_v30 = vmul.f32 %v9228_v0, %v5429_v37  ;;  %v5478_v5 = vmul.f32 %v5435_v6, %v5432_v22  ;;  %v5480_v50 = vmul.f32 %v5435_v6, %v5429_v37  ;;  %v5481_v18 = vmul.f32 %v9228_v0, %v5432_v22 }
 0x304   :  { %v5483_v56 = vstv %s9270_s26  ;;  %v5485_v32 = vstv %s9276_s27  ;;  %v5473_v53 = vsub.f32 %v5471_v45, %v5472_v61  ;;  %v5476_v8 = vadd.f32 %v5475_v54, %v5474_v16 }
 0x305   :  { %v5484_v51 = vmul.f32 %v5483_v56, %v9151_v48  ;;  %v5486_v42 = vmul.f32 %v5485_v32, %v9155_v52  ;;  %v5488_v57 = vmul.f32 %v5483_v56, %v9155_v52  ;;  %v5489_v11 = vmul.f32 %v5485_v32, %v9151_v48 }
 0x306   :  { %v5491_v58 = vmul.f32 %v5483_v56, %v9213_v20  ;;  %v5492_v36 = vmul.f32 %v5485_v32, %v9215_v19  ;;  %v5479_v34 = vsub.f32 %v5477_v30, %v5478_v5  ;;  %v5494_v6 = vmul.f32 %v5485_v32, %v9213_v20 }
 0x307   :  { %v5495_v0 = vmul.f32 %v5483_v56, %v9215_v19  ;;  %v9326_v37 = vstv %s9291_s28  ;;  %v5482_v22 = vadd.f32 %v5481_v18, %v5480_v50  ;;  %v9328_v31 = vadd.f32 %v5486_v42, %v5484_v51 }
 0x308   :  { %v5497_v25 = vmul.f32 %v5483_v56, %v9248_v43  ;;  %v5498_v52 = vmul.f32 %v5485_v32, %v9254_v39  ;;  %v9334_v48 = vsub.f32 %v5488_v57, %v5489_v11  ;;  %v9336_v17 = vsub.f32 %v5491_v58, %v5492_v36 }
 0x309   :  { %v5500_v38 = vmul.f32 %v5483_v56, %v9254_v39  ;;  %v5501_v20 = vmul.f32 %v5485_v32, %v9248_v43  ;;  %v5503_v19 = vmul.f32 %v5483_v56, %v9256_v63  ;;  %v5504_v3 = vmul.f32 %v5485_v32, %v9258_v14 }
 0x30a   :  { %v5506_v35 = vmul.f32 %v5485_v32, %v9256_v63  ;;  %v5507_v28 = vmul.f32 %v5483_v56, %v9258_v14  ;;  %v9344_v21 = vadd.f32 %v5495_v0, %v5494_v6  ;;  %v5509_v33 = vmul.f32 %v5483_v56, %v5461_v29 }
 0x30b   :  { %v5510_v24 = vmul.f32 %v5485_v32, %v5464_v9  ;;  %v5512_v10 = vmul.f32 %v5483_v56, %v5464_v9  ;;  %v9346_v1 = vadd.f32 %v5498_v52, %v5497_v25  ;;  %v5513_v55 = vmul.f32 %v5485_v32, %v5461_v29 }
 0x30c   :  { %v5515_v45 = vmul.f32 %v5483_v56, %v5467_v13  ;;  %v5516_v39 = vmul.f32 %v5485_v32, %v5470_v7  ;;  %v9348_v61 = vsub.f32 %v5500_v38, %v5501_v20  ;;  %v5518_v43 = vmul.f32 %v5485_v32, %v5467_v13 }
 0x30d   :  { %v5519_v16 = vmul.f32 %v5483_v56, %v5470_v7  ;;  %v5521_v54 = vmul.f32 %v5483_v56, %v5473_v53  ;;  %v9350_v30 = vsub.f32 %v5503_v19, %v5504_v3  ;;  %v9352_v63 = vadd.f32 %v5507_v28, %v5506_v35 }
 0x30e   :  { %v5522_v14 = vmul.f32 %v5485_v32, %v5476_v8  ;;  %v5524_v5 = vmul.f32 %v5483_v56, %v5476_v8  ;;  %v9354_v50 = vadd.f32 %v5510_v24, %v5509_v33  ;;  %v9356_v9 = vsub.f32 %v5512_v10, %v5513_v55 }
 0x30f   :  { %v9358_v18 = vsub.f32 %v5515_v45, %v5516_v39  ;;  %v5525_v29 = vmul.f32 %v5485_v32, %v5473_v53  ;;  %v9360_v51 = vadd.f32 %v5519_v16, %v5518_v43  ;;  %v5527_v13 = vmul.f32 %v5483_v56, %v5479_v34 }
 0x310   :  { %v9362_v42 = vadd.f32 %v5522_v14, %v5521_v54  ;;  %v5528_v7 = vmul.f32 %v5485_v32, %v5482_v22  ;;  %v5530_v57 = vmul.f32 %v5485_v32, %v5479_v34  ;;  %v5531_v11 = vmul.f32 %v5483_v56, %v5482_v22 }
 0x311   :  { %v5534_v58 = vmul.f32 %v9326_v37, %v9055_v23  ;;  %v9367_v36 = vstv %s9332_s29  ;;  %v9369_v8 = vsub.f32 %v5524_v5, %v5525_v29  ;;  %v5538_v53 = vmul.f32 %v9326_v37, %v9069_v46 }
 0x312   :  { %v5536_v6 = vmul.f32 %v9367_v36, %v9202_v41  ;;  %v5539_v0 = vmul.f32 %v9367_v36, %v9204_v40  ;;  %v5541_v32 = vmul.f32 %v9367_v36, %v9055_v23  ;;  %v5542_v56 = vmul.f32 %v9326_v37, %v9202_v41 }
 0x313   :  { %v5544_v34 = vmul.f32 %v9367_v36, %v9069_v46  ;;  %v5545_v22 = vmul.f32 %v9326_v37, %v9204_v40  ;;  %v9385_v25 = vsub.f32 %v5527_v13, %v5528_v7  ;;  %v5547_v52 = vmul.f32 %v9326_v37, %v9231_v27 }
 0x314   :  { %v5548_v38 = vmul.f32 %v9367_v36, %v9241_v26  ;;  %v5550_v23 = vmul.f32 %v9326_v37, %v9238_v60  ;;  %v9393_v20 = vadd.f32 %v5531_v11, %v5530_v57  ;;  %v9395_v41 = vsub.f32 %v5534_v58, %v5536_v6 }
 0x315   :  { %v5551_v46 = vmul.f32 %v9367_v36, %v9243_v15  ;;  %v5553_v40 = vmul.f32 %v9367_v36, %v9231_v27  ;;  %v9401_v19 = vsub.f32 %v5538_v53, %v5539_v0  ;;  %v5554_v3 = vmul.f32 %v9326_v37, %v9241_v26 }
 0x316   :  { %v5556_v35 = vmul.f32 %v9367_v36, %v9238_v60  ;;  %v5557_v28 = vmul.f32 %v9326_v37, %v9243_v15  ;;  %v9409_v33 = vadd.f32 %v5542_v56, %v5541_v32  ;;  %v9411_v24 = vadd.f32 %v5545_v22, %v5544_v34 }
 0x317   :  { %v5559_v10 = vmul.f32 %v9326_v37, %v9278_v44  ;;  %v5560_v27 = vmul.f32 %v9367_v36, %v9283_v4  ;;  %v9417_v55 = vsub.f32 %v5547_v52, %v5548_v38  ;;  %v9419_v45 = vsub.f32 %v5550_v23, %v5551_v46 }
 0x318   :  { %v5562_v60 = vmul.f32 %v9326_v37, %v9280_v12  ;;  %v5563_v26 = vmul.f32 %v9367_v36, %v9293_v2  ;;  %v9425_v15 = vadd.f32 %v5554_v3, %v5553_v40  ;;  %v9427_v39 = vadd.f32 %v5557_v28, %v5556_v35 }
 0x319   :  { %v5565_v43 = vmul.f32 %v9367_v36, %v9278_v44  ;;  %v5566_v16 = vmul.f32 %v9326_v37, %v9283_v4  ;;  %v5568_v54 = vmul.f32 %v9367_v36, %v9280_v12  ;;  %v5569_v14 = vmul.f32 %v9326_v37, %v9293_v2 }
 0x31a   :  { %v5571_v5 = vmul.f32 %v9326_v37, %v9295_v59  ;;  %v5572_v29 = vmul.f32 %v9367_v36, %v9307_v47  ;;  %v9441_v13 = vsub.f32 %v5559_v10, %v5560_v27  ;;  %v5574_v44 = vmul.f32 %v9326_v37, %v9301_v49 }
 0x31b   :  { %v5575_v4 = vmul.f32 %v9367_v36, %v9310_v62  ;;  %v5577_v12 = vmul.f32 %v9367_v36, %v9295_v59  ;;  %v9449_v7 = vsub.f32 %v5562_v60, %v5563_v26  ;;  %v5578_v2 = vmul.f32 %v9326_v37, %v9307_v47 }
 0x31c   :  { %v5580_v57 = vmul.f32 %v9367_v36, %v9301_v49  ;;  %v5581_v11 = vmul.f32 %v9326_v37, %v9310_v62  ;;  %v9457_v58 = vadd.f32 %v5566_v16, %v5565_v43  ;;  %v5583_v6 = vmul.f32 %v9326_v37, %v9328_v31 }
 0x31d   :  { %v5584_v53 = vmul.f32 %v9367_v36, %v9336_v17  ;;  %v5586_v59 = vmul.f32 %v9326_v37, %v9334_v48  ;;  %v9465_v0 = vadd.f32 %v5569_v14, %v5568_v54  ;;  %v9467_v47 = vsub.f32 %v5571_v5, %v5572_v29 }
 0x31e   :  { %v5587_v49 = vmul.f32 %v9367_v36, %v9344_v21  ;;  %v5589_v62 = vmul.f32 %v9367_v36, %v9328_v31  ;;  %v9473_v32 = vsub.f32 %v5574_v44, %v5575_v4  ;;  %v9475_v56 = vadd.f32 %v5578_v2, %v5577_v12 }
 0x31f   :  { %v9477_v34 = vadd.f32 %v5581_v11, %v5580_v57  ;;  %v5590_v22 = vmul.f32 %v9326_v37, %v9336_v17  ;;  %v5592_v52 = vmul.f32 %v9367_v36, %v9334_v48  ;;  %v5593_v38 = vmul.f32 %v9326_v37, %v9344_v21 }
 0x320   :  { %v5595_v31 = vmul.f32 %v9326_v37, %v9346_v1  ;;  %v5596_v23 = vmul.f32 %v9367_v36, %v9350_v30  ;;  %v9493_v46 = vsub.f32 %v5583_v6, %v5584_v53  ;;  %v9495_v40 = vsub.f32 %v5586_v59, %v5587_v49 }
 0x321   :  { %v5598_v17 = vmul.f32 %v9326_v37, %v9348_v61  ;;  %v5599_v48 = vmul.f32 %v9367_v36, %v9352_v63  ;;  %v9501_v3 = vadd.f32 %v5590_v22, %v5589_v62  ;;  %v5601_v21 = vmul.f32 %v9367_v36, %v9346_v1 }
 0x322   :  { %v5602_v35 = vmul.f32 %v9326_v37, %v9350_v30  ;;  %v5604_v28 = vmul.f32 %v9367_v36, %v9348_v61  ;;  %v5605_v10 = vmul.f32 %v9326_v37, %v9352_v63  ;;  %v5607_v27 = vmul.f32 %v9326_v37, %v9354_v50 }
 0x323   :  { %v5608_v60 = vmul.f32 %v9367_v36, %v9358_v18  ;;  %v5610_v1 = vmul.f32 %v9326_v37, %v9356_v9  ;;  %v9519_v26 = vadd.f32 %v5593_v38, %v5592_v52  ;;  %v9521_v30 = vsub.f32 %v5595_v31, %v5596_v23 }
 0x324   :  { %v5611_v61 = vmul.f32 %v9367_v36, %v9360_v51  ;;  %v5613_v43 = vmul.f32 %v9367_v36, %v9354_v50  ;;  %v9527_v63 = vsub.f32 %v5598_v17, %v5599_v48  ;;  %v5614_v16 = vmul.f32 %v9326_v37, %v9358_v18 }
 0x325   :  { %v5616_v54 = vmul.f32 %v9367_v36, %v9356_v9  ;;  %v5617_v14 = vmul.f32 %v9326_v37, %v9360_v51  ;;  %v9535_v5 = vadd.f32 %v5602_v35, %v5601_v21  ;;  %v5619_v29 = vmul.f32 %v9326_v37, %v9362_v42 }
 0x326   :  { %v5620_v50 = vmul.f32 %v9367_v36, %v9385_v25  ;;  %v5622_v44 = vmul.f32 %v9326_v37, %v9369_v8  ;;  %v9543_v18 = vadd.f32 %v5605_v10, %v5604_v28  ;;  %v9545_v4 = vsub.f32 %v5607_v27, %v5608_v60 }
 0x327   :  { %v9547_v9 = vsub.f32 %v5610_v1, %v5611_v61  ;;  %v5623_v51 = vmul.f32 %v9367_v36, %v9393_v20  ;;  %v9551_v12 = vadd.f32 %v5614_v16, %v5613_v43  ;;  %v9553_v2 = vadd.f32 %v5617_v14, %v5616_v54 }
 0x328   :  { %v5625_v57 = vmul.f32 %v9367_v36, %v9362_v42  ;;  %v5626_v11 = vmul.f32 %v9326_v37, %v9385_v25  ;;  %v5628_v6 = vmul.f32 %v9367_v36, %v9369_v8  ;;  %v5629_v53 = vmul.f32 %v9326_v37, %v9393_v20 }
 0x329   :  { %v9564_v59 = vstv %s9481_s30  ;;  %v9567_v49 = vstv %s9491_s4  ;;  %v9569_v62 = vsub.f32 %v5619_v29, %v5620_v50  ;;  %v9571_v22 = vsub.f32 %v5622_v44, %v5623_v51 }
 0x32a   :  { %v5632_v42 = vmul.f32 %v9564_v59, %v9395_v41  ;;  %v5634_v25 = vmul.f32 %v9567_v49, %v9417_v55  ;;  %v5636_v36 = vmul.f32 %v9564_v59, %v9401_v19  ;;  %v5637_v37 = vmul.f32 %v9567_v49, %v9419_v45 }
 0x32b   :  { %v5639_v8 = vmul.f32 %v9567_v49, %v9395_v41  ;;  %v9584_v20 = vstv %s9509_s5  ;;  %v5640_v52 = vmul.f32 %v9564_v59, %v9417_v55  ;;  %v5642_v38 = vmul.f32 %v9567_v49, %v9401_v19 }
 0x32c   :  { %v5643_v31 = vmul.f32 %v9564_v59, %v9419_v45  ;;  %v5645_v23 = vmul.f32 %v9564_v59, %v9409_v33  ;;  %v9594_v17 = vadd.f32 %v5626_v11, %v5625_v57  ;;  %v9596_v48 = vadd.f32 %v5629_v53, %v5628_v6 }
 0x32d   :  { %v5646_v41 = vmul.f32 %v9567_v49, %v9425_v15  ;;  %v5648_v21 = vmul.f32 %v9564_v59, %v9411_v24  ;;  %v9602_v55 = vsub.f32 %v5632_v42, %v5634_v25  ;;  %v5649_v19 = vmul.f32 %v9567_v49, %v9427_v39 }
 0x32e   :  { %v5651_v45 = vmul.f32 %v9567_v49, %v9409_v33  ;;  %v5652_v35 = vmul.f32 %v9564_v59, %v9425_v15  ;;  %v9610_v28 = vsub.f32 %v5636_v36, %v5637_v37  ;;  %v5654_v10 = vmul.f32 %v9567_v49, %v9411_v24 }
 0x32f   :  { %v5655_v27 = vmul.f32 %v9564_v59, %v9427_v39  ;;  %v5657_v60 = vmul.f32 %v9564_v59, %v9441_v13  ;;  %v9618_v1 = vadd.f32 %v5640_v52, %v5639_v8  ;;  %v9620_v61 = vadd.f32 %v5643_v31, %v5642_v38 }
 0x330   :  { %v9622_v43 = vsub.f32 %v5645_v23, %v5646_v41  ;;  %v5658_v33 = vmul.f32 %v9567_v49, %v9467_v47  ;;  %v9626_v15 = vsub.f32 %v5648_v21, %v5649_v19  ;;  %v9628_v16 = vadd.f32 %v5652_v35, %v5651_v45 }
 0x331   :  { %v5660_v24 = vmul.f32 %v9564_v59, %v9449_v7  ;;  %v5661_v39 = vmul.f32 %v9567_v49, %v9473_v32  ;;  %v5663_v54 = vmul.f32 %v9567_v49, %v9441_v13  ;;  %v5664_v14 = vmul.f32 %v9564_v59, %v9467_v47 }
 0x332   :  { %v5666_v29 = vmul.f32 %v9567_v49, %v9449_v7  ;;  %v5667_v50 = vmul.f32 %v9564_v59, %v9473_v32  ;;  %v9642_v44 = vadd.f32 %v5655_v27, %v5654_v10  ;;  %v9644_v51 = vsub.f32 %v5657_v60, %v5658_v33 }
 0x333   :  { %v5669_v57 = vmul.f32 %v9564_v59, %v9457_v58  ;;  %v5670_v11 = vmul.f32 %v9567_v49, %v9475_v56  ;;  %v5672_v13 = vmul.f32 %v9564_v59, %v9465_v0  ;;  %v5673_v47 = vmul.f32 %v9567_v49, %v9477_v34 }
 0x334   :  { %v5675_v7 = vmul.f32 %v9567_v49, %v9457_v58  ;;  %v5676_v32 = vmul.f32 %v9564_v59, %v9475_v56  ;;  %v9658_v6 = vsub.f32 %v5660_v24, %v5661_v39  ;;  %v5678_v53 = vmul.f32 %v9567_v49, %v9465_v0 }
 0x335   :  { %v5679_v42 = vmul.f32 %v9564_v59, %v9477_v34  ;;  %v5681_v25 = vmul.f32 %v9564_v59, %v9493_v46  ;;  %v9666_v36 = vadd.f32 %v5664_v14, %v5663_v54  ;;  %v9668_v37 = vadd.f32 %v5667_v50, %v5666_v29 }
 0x336   :  { %v5682_v58 = vmul.f32 %v9567_v49, %v9521_v30  ;;  %v5684_v56 = vmul.f32 %v9564_v59, %v9495_v40  ;;  %v9674_v8 = vsub.f32 %v5669_v57, %v5670_v11  ;;  %v5685_v0 = vmul.f32 %v9567_v49, %v9527_v63 }
 0x337   :  { %v5687_v34 = vmul.f32 %v9567_v49, %v9493_v46  ;;  %v5688_v52 = vmul.f32 %v9564_v59, %v9521_v30  ;;  %v9682_v38 = vsub.f32 %v5672_v13, %v5673_v47  ;;  %v9684_v31 = vadd.f32 %v5676_v32, %v5675_v7 }
 0x338   :  { %v5690_v23 = vmul.f32 %v9567_v49, %v9495_v40  ;;  %v5691_v41 = vmul.f32 %v9564_v59, %v9527_v63  ;;  %v9690_v21 = vadd.f32 %v5679_v42, %v5678_v53  ;;  %v9692_v19 = vsub.f32 %v5681_v25, %v5682_v58 }
 0x339   :  { %v5693_v46 = vmul.f32 %v9564_v59, %v9501_v3  ;;  %v5694_v30 = vmul.f32 %v9567_v49, %v9535_v5  ;;  %v9700_v45 = vsub.f32 %v5684_v56, %v5685_v0  ;;  %v9702_v35 = vadd.f32 %v5688_v52, %v5687_v34 }
 0x33a   :  { %v5696_v40 = vmul.f32 %v9564_v59, %v9519_v26  ;;  %v5697_v63 = vmul.f32 %v9567_v49, %v9543_v18  ;;  %v5699_v10 = vmul.f32 %v9567_v49, %v9501_v3  ;;  %v5700_v27 = vmul.f32 %v9564_v59, %v9535_v5 }
 0x33b   :  { %v5702_v60 = vmul.f32 %v9567_v49, %v9519_v26  ;;  %v5703_v33 = vmul.f32 %v9564_v59, %v9543_v18  ;;  %v9716_v24 = vadd.f32 %v5691_v41, %v5690_v23  ;;  %v5705_v39 = vmul.f32 %v9564_v59, %v9545_v4 }
 0x33c   :  { %v5706_v54 = vmul.f32 %v9567_v49, %v9569_v62  ;;  %v5708_v3 = vmul.f32 %v9564_v59, %v9547_v9  ;;  %v9724_v14 = vsub.f32 %v5693_v46, %v5694_v30  ;;  %v5709_v5 = vmul.f32 %v9567_v49, %v9571_v22 }
 0x33d   :  { %v5711_v26 = vmul.f32 %v9567_v49, %v9545_v4  ;;  %v5712_v18 = vmul.f32 %v9564_v59, %v9569_v62  ;;  %v9732_v29 = vsub.f32 %v5696_v40, %v5697_v63  ;;  %v5714_v50 = vmul.f32 %v9567_v49, %v9547_v9 }
 0x33e   :  { %v5715_v57 = vmul.f32 %v9564_v59, %v9571_v22  ;;  %v5717_v11 = vmul.f32 %v9564_v59, %v9551_v12  ;;  %v9740_v13 = vadd.f32 %v5700_v27, %v5699_v10  ;;  %v9742_v47 = vadd.f32 %v5703_v33, %v5702_v60 }
 0x33f   :  { %v5718_v4 = vmul.f32 %v9567_v49, %v9594_v17  ;;  %v5720_v62 = vmul.f32 %v9564_v59, %v9553_v2  ;;  %v9748_v7 = vsub.f32 %v5705_v39, %v5706_v54  ;;  %v9750_v9 = vsub.f32 %v5708_v3, %v5709_v5 }
 0x340   :  { %v9752_v32 = vadd.f32 %v5712_v18, %v5711_v26  ;;  %v5721_v22 = vmul.f32 %v9567_v49, %v9596_v48  ;;  %v9756_v53 = vadd.f32 %v5715_v57, %v5714_v50  ;;  %v5723_v25 = vmul.f32 %v9567_v49, %v9551_v12 }
 0x341   :  { %v9758_v42 = vsub.f32 %v5717_v11, %v5718_v4  ;;  %v5724_v58 = vmul.f32 %v9564_v59, %v9594_v17  ;;  %v5726_v56 = vmul.f32 %v9567_v49, %v9553_v2  ;;  %v5727_v0 = vmul.f32 %v9564_v59, %v9596_v48 }
 0x342   :  { %v5730_v34 = vmul.f32 %v9584_v20, %v9602_v55  ;;  %v9771_v52 = vstv %s9698_s6  ;;  %v9773_v23 = vsub.f32 %v5720_v62, %v5721_v22  ;;  %v5734_v12 = vmul.f32 %v9584_v20, %v9610_v28 }
 0x343   :  { %v5732_v41 = vmul.f32 %v9771_v52, %v9644_v51  ;;  %v5735_v17 = vmul.f32 %v9771_v52, %v9658_v6  ;;  %v5737_v2 = vmul.f32 %v9771_v52, %v9602_v55  ;;  %v5738_v59 = vmul.f32 %v9584_v20, %v9644_v51 }
 0x344   :  { %v5740_v49 = vmul.f32 %v9771_v52, %v9610_v28  ;;  %v5741_v48 = vmul.f32 %v9584_v20, %v9658_v6  ;;  %v9789_v46 = vadd.f32 %v5724_v58, %v5723_v25  ;;  %v5743_v30 = vmul.f32 %v9584_v20, %v9622_v43 }
 0x345   :  { %v5744_v40 = vmul.f32 %v9771_v52, %v9674_v8  ;;  %v5746_v55 = vmul.f32 %v9584_v20, %v9626_v15  ;;  %v9797_v63 = vadd.f32 %v5727_v0, %v5726_v56  ;;  %v9799_v51 = vsub.f32 %v5730_v34, %v5732_v41 }
 0x346   :  { %v5747_v28 = vmul.f32 %v9771_v52, %v9682_v38  ;;  %v5749_v6 = vmul.f32 %v9771_v52, %v9622_v43  ;;  %v9805_v10 = vsub.f32 %v5734_v12, %v5735_v17  ;;  %v5750_v27 = vmul.f32 %v9584_v20, %v9674_v8 }
 0x347   :  { %v5752_v60 = vmul.f32 %v9771_v52, %v9626_v15  ;;  %v5753_v33 = vmul.f32 %v9584_v20, %v9682_v38  ;;  %v9813_v39 = vadd.f32 %v5738_v59, %v5737_v2  ;;  %v9815_v54 = vadd.f32 %v5741_v48, %v5740_v49 }
 0x348   :  { %v5755_v3 = vmul.f32 %v9584_v20, %v9618_v1  ;;  %v5756_v43 = vmul.f32 %v9771_v52, %v9666_v36  ;;  %v9821_v5 = vsub.f32 %v5743_v30, %v5744_v40  ;;  %v9823_v26 = vsub.f32 %v5746_v55, %v5747_v28 }
 0x349   :  { %v5758_v15 = vmul.f32 %v9584_v20, %v9620_v61  ;;  %v5759_v8 = vmul.f32 %v9771_v52, %v9668_v37  ;;  %v9829_v38 = vadd.f32 %v5750_v27, %v5749_v6  ;;  %v9831_v18 = vadd.f32 %v5753_v33, %v5752_v60 }
 0x34a   :  { %v5761_v50 = vmul.f32 %v9771_v52, %v9618_v1  ;;  %v5762_v57 = vmul.f32 %v9584_v20, %v9666_v36  ;;  %v5764_v11 = vmul.f32 %v9771_v52, %v9620_v61  ;;  %v5765_v4 = vmul.f32 %v9584_v20, %v9668_v37 }
 0x34b   :  { %v5767_v62 = vmul.f32 %v9584_v20, %v9628_v16  ;;  %v5768_v22 = vmul.f32 %v9771_v52, %v9684_v31  ;;  %v9845_v25 = vsub.f32 %v5755_v3, %v5756_v43  ;;  %v5770_v1 = vmul.f32 %v9584_v20, %v9642_v44 }
 0x34c   :  { %v5771_v36 = vmul.f32 %v9771_v52, %v9690_v21  ;;  %v5773_v61 = vmul.f32 %v9771_v52, %v9628_v16  ;;  %v9853_v58 = vsub.f32 %v5758_v15, %v5759_v8  ;;  %v5774_v37 = vmul.f32 %v9584_v20, %v9684_v31 }
 0x34d   :  { %v5776_v56 = vmul.f32 %v9771_v52, %v9642_v44  ;;  %v5777_v0 = vmul.f32 %v9584_v20, %v9690_v21  ;;  %v9861_v34 = vadd.f32 %v5762_v57, %v5761_v50  ;;  %v5779_v41 = vmul.f32 %v9584_v20, %v9692_v19 }
 0x34e   :  { %v5780_v12 = vmul.f32 %v9771_v52, %v9748_v7  ;;  %v5782_v16 = vmul.f32 %v9584_v20, %v9700_v45  ;;  %v9869_v17 = vadd.f32 %v5765_v4, %v5764_v11  ;;  %v9871_v31 = vsub.f32 %v5767_v62, %v5768_v22 }
 0x34f   :  { %v5783_v44 = vmul.f32 %v9771_v52, %v9750_v9  ;;  %v5785_v21 = vmul.f32 %v9771_v52, %v9692_v19  ;;  %v9877_v2 = vsub.f32 %v5770_v1, %v5771_v36  ;;  %v9879_v59 = vadd.f32 %v5774_v37, %v5773_v61 }
 0x350   :  { %v9881_v49 = vadd.f32 %v5777_v0, %v5776_v56  ;;  %v5786_v48 = vmul.f32 %v9584_v20, %v9748_v7  ;;  %v5788_v30 = vmul.f32 %v9771_v52, %v9700_v45  ;;  %v5789_v40 = vmul.f32 %v9584_v20, %v9750_v9 }
 0x351   :  { %v5791_v19 = vmul.f32 %v9584_v20, %v9724_v14  ;;  %v5792_v55 = vmul.f32 %v9771_v52, %v9758_v42  ;;  %v5781_v28 = vsub.f32 %v5779_v41, %v5780_v12  ;;  %v5784_v6 = vsub.f32 %v5782_v16, %v5783_v44 }
 0x352   :  { %v5794_v7 = vmul.f32 %v9584_v20, %v9732_v29  ;;  %v5795_v27 = vmul.f32 %v9771_v52, %v9773_v23  ;;  %v9901_v45 = vadd.f32 %v5786_v48, %v5785_v21  ;;  %v5797_v9 = vmul.f32 %v9771_v52, %v9724_v14 }
 0x353   :  { %v5798_v60 = vmul.f32 %v9584_v20, %v9758_v42  ;;  %v5800_v33 = vmul.f32 %v9771_v52, %v9732_v29  ;;  %v5801_v3 = vmul.f32 %v9584_v20, %v9773_v23  ;;  %v5803_v43 = vmul.f32 %v9584_v20, %v9702_v35 }
 0x354   :  { %v5804_v15 = vmul.f32 %v9771_v52, %v9752_v32  ;;  %v5806_v8 = vmul.f32 %v9584_v20, %v9716_v24  ;;  %v9917_v50 = vadd.f32 %v5789_v40, %v5788_v30  ;;  %v5793_v14 = vsub.f32 %v5791_v19, %v5792_v55 }
 0x355   :  { %v5807_v42 = vmul.f32 %v9771_v52, %v9756_v53  ;;  %v5809_v29 = vmul.f32 %v9771_v52, %v9702_v35  ;;  %v5796_v57 = vsub.f32 %v5794_v7, %v5795_v27  ;;  %v5810_v23 = vmul.f32 %v9584_v20, %v9752_v32 }
 0x356   :  { %v5812_v11 = vmul.f32 %v9771_v52, %v9716_v24  ;;  %v5813_v4 = vmul.f32 %v9584_v20, %v9756_v53  ;;  %v9929_v62 = vadd.f32 %v5798_v60, %v5797_v9  ;;  %v5815_v22 = vmul.f32 %v9584_v20, %v9740_v13 }
 0x357   :  { %v5816_v35 = vmul.f32 %v9771_v52, %v9789_v46  ;;  %v5818_v1 = vmul.f32 %v9584_v20, %v9742_v47  ;;  %v9937_v32 = vadd.f32 %v5801_v3, %v5800_v33  ;;  %v5805_v36 = vsub.f32 %v5803_v43, %v5804_v15 }
 0x358   :  { %v5808_v24 = vsub.f32 %v5806_v8, %v5807_v42  ;;  %v5819_v61 = vmul.f32 %v9771_v52, %v9797_v63  ;;  %v9941_v53 = vadd.f32 %v5810_v23, %v5809_v29  ;;  %v9943_v37 = vadd.f32 %v5813_v4, %v5812_v11 }
 0x359   :  { %v5821_v56 = vmul.f32 %v9771_v52, %v9740_v13  ;;  %v5822_v0 = vmul.f32 %v9584_v20, %v9789_v46  ;;  %v5824_v41 = vmul.f32 %v9771_v52, %v9742_v47  ;;  %v5825_v12 = vmul.f32 %v9584_v20, %v9797_v63 }
 0x35a   :  { %v9954_v16 = vstv %s9885_s7  ;;  %v9957_v44 = vstv %s9895_s8  ;;  %v5817_v21 = vsub.f32 %v5815_v22, %v5816_v35  ;;  %v5820_v48 = vsub.f32 %v5818_v1, %v5819_v61 }
 0x35b   :  { %v5828_v30 = vmul.f32 %v9954_v16, %v9799_v51  ;;  %v5830_v13 = vmul.f32 %v9957_v44, %v5781_v28  ;;  %v5832_v46 = vmul.f32 %v9954_v16, %v9805_v10  ;;  %v5833_v40 = vmul.f32 %v9957_v44, %v5784_v6 }
 0x35c   :  { %v5835_v47 = vmul.f32 %v9957_v44, %v9799_v51  ;;  %v5836_v20 = vmul.f32 %v9954_v16, %v5781_v28  ;;  %v9968_v52 = vadd.f32 %v5822_v0, %v5821_v56  ;;  %v5838_v63 = vmul.f32 %v9957_v44, %v9805_v10 }
 0x35d   :  { %v5839_v19 = vmul.f32 %v9954_v16, %v5784_v6  ;;  %v5841_v55 = vmul.f32 %v9954_v16, %v9821_v5  ;;  %v9975_v7 = vadd.f32 %v5825_v12, %v5824_v41  ;;  %v9977_v27 = vsub.f32 %v5828_v30, %v5830_v13 }
 0x35e   :  { %v5842_v9 = vmul.f32 %v9957_v44, %v5793_v14  ;;  %v5844_v51 = vmul.f32 %v9954_v16, %v9823_v26  ;;  %v9982_v28 = vsub.f32 %v5832_v46, %v5833_v40  ;;  %v5845_v60 = vmul.f32 %v9957_v44, %v5796_v57 }
 0x35f   :  { %v5847_v10 = vmul.f32 %v9957_v44, %v9821_v5  ;;  %v5848_v6 = vmul.f32 %v9954_v16, %v5793_v14  ;;  %v9988_v33 = vadd.f32 %v5836_v20, %v5835_v47  ;;  %v5850_v3 = vmul.f32 %v9957_v44, %v9823_v26 }
 0x360   :  { %v5851_v43 = vmul.f32 %v9954_v16, %v5796_v57  ;;  %v5853_v15 = vmul.f32 %v9954_v16, %v9845_v25  ;;  %v9995_v8 = vadd.f32 %v5839_v19, %v5838_v63  ;;  %v9997_v42 = vsub.f32 %v5841_v55, %v5842_v9 }
 0x361   :  { %v5854_v29 = vmul.f32 %v9957_v44, %v5805_v36  ;;  %v5856_v5 = vmul.f32 %v9954_v16, %v9853_v58  ;;  %v10002_v14 = vsub.f32 %v5844_v51, %v5845_v60  ;;  %v5857_v23 = vmul.f32 %v9957_v44, %v5808_v24 }
 0x362   :  { %v5859_v26 = vmul.f32 %v9957_v44, %v9845_v25  ;;  %v5860_v57 = vmul.f32 %v9954_v16, %v5805_v36  ;;  %v10008_v11 = vadd.f32 %v5848_v6, %v5847_v10  ;;  %v5862_v4 = vmul.f32 %v9957_v44, %v9853_v58 }
 0x363   :  { %v5863_v22 = vmul.f32 %v9954_v16, %v5808_v24  ;;  %v5865_v35 = vmul.f32 %v9954_v16, %v9871_v31  ;;  %v10015_v1 = vadd.f32 %v5851_v43, %v5850_v3  ;;  %v10017_v61 = vsub.f32 %v5853_v15, %v5854_v29 }
 0x364   :  { %v5866_v56 = vmul.f32 %v9957_v44, %v5817_v21  ;;  %v5868_v25 = vmul.f32 %v9954_v16, %v9877_v2  ;;  %v10022_v36 = vsub.f32 %v5856_v5, %v5857_v23  ;;  %v5869_v0 = vmul.f32 %v9957_v44, %v5820_v48 }
 0x365   :  { %v5871_v58 = vmul.f32 %v9957_v44, %v9871_v31  ;;  %v5872_v24 = vmul.f32 %v9954_v16, %v5817_v21  ;;  %v10028_v41 = vadd.f32 %v5860_v57, %v5859_v26  ;;  %v5874_v12 = vmul.f32 %v9957_v44, %v9877_v2 }
 0x366   :  { %v5875_v30 = vmul.f32 %v9954_v16, %v5820_v48  ;;  %v5877_v13 = vmul.f32 %v9954_v16, %v9813_v39  ;;  %v10035_v46 = vadd.f32 %v5863_v22, %v5862_v4  ;;  %v5867_v40 = vsub.f32 %v5865_v35, %v5866_v56 }
 0x367   :  { %v5878_v47 = vmul.f32 %v9957_v44, %v9901_v45  ;;  %v5880_v31 = vmul.f32 %v9954_v16, %v9815_v54  ;;  %v5870_v21 = vsub.f32 %v5868_v25, %v5869_v0  ;;  %v5881_v20 = vmul.f32 %v9957_v44, %v9917_v50 }
 0x368   :  { %v5883_v2 = vmul.f32 %v9957_v44, %v9813_v39  ;;  %v5884_v48 = vmul.f32 %v9954_v16, %v9901_v45  ;;  %v10047_v63 = vadd.f32 %v5872_v24, %v5871_v58  ;;  %v5886_v19 = vmul.f32 %v9957_v44, %v9815_v54 }
 0x369   :  { %v5887_v55 = vmul.f32 %v9954_v16, %v9917_v50  ;;  %v5889_v9 = vmul.f32 %v9954_v16, %v9829_v38  ;;  %v10055_v51 = vadd.f32 %v5875_v30, %v5874_v12  ;;  %v5879_v60 = vsub.f32 %v5877_v13, %v5878_v47 }
 0x36a   :  { %v5890_v39 = vmul.f32 %v9957_v44, %v9929_v62  ;;  %v5892_v45 = vmul.f32 %v9954_v16, %v9831_v18  ;;  %v5882_v10 = vsub.f32 %v5880_v31, %v5881_v20  ;;  %v5893_v6 = vmul.f32 %v9957_v44, %v9937_v32 }
 0x36b   :  { %v5895_v54 = vmul.f32 %v9957_v44, %v9829_v38  ;;  %v5896_v50 = vmul.f32 %v9954_v16, %v9929_v62  ;;  %v10067_v3 = vadd.f32 %v5884_v48, %v5883_v2  ;;  %v5898_v43 = vmul.f32 %v9957_v44, %v9831_v18 }
 0x36c   :  { %v5899_v15 = vmul.f32 %v9954_v16, %v9937_v32  ;;  %v5901_v29 = vmul.f32 %v9954_v16, %v9861_v34  ;;  %v5888_v5 = vadd.f32 %v5887_v55, %v5886_v19  ;;  %v5891_v23 = vsub.f32 %v5889_v9, %v5890_v39 }
 0x36d   :  { %v5902_v26 = vmul.f32 %v9957_v44, %v9941_v53  ;;  %v5904_v38 = vmul.f32 %v9954_v16, %v9869_v17  ;;  %v5894_v62 = vsub.f32 %v5892_v45, %v5893_v6  ;;  %v5905_v57 = vmul.f32 %v9957_v44, %v9943_v37 }
 0x36e   :  { %v5907_v18 = vmul.f32 %v9957_v44, %v9861_v34  ;;  %v5908_v32 = vmul.f32 %v9954_v16, %v9941_v53  ;;  %v5897_v4 = vadd.f32 %v5896_v50, %v5895_v54  ;;  %v5910_v22 = vmul.f32 %v9957_v44, %v9869_v17 }
 0x36f   :  { %v5911_v35 = vmul.f32 %v9954_v16, %v9943_v37  ;;  %v5913_v56 = vmul.f32 %v9954_v16, %v9879_v59  ;;  %v5900_v25 = vadd.f32 %v5899_v15, %v5898_v43  ;;  %v5903_v0 = vsub.f32 %v5901_v29, %v5902_v26 }
 0x370   :  { %v5914_v58 = vmul.f32 %v9957_v44, %v9968_v52  ;;  %v5916_v34 = vmul.f32 %v9954_v16, %v9881_v49  ;;  %v5906_v24 = vsub.f32 %v5904_v38, %v5905_v57  ;;  %v5917_v53 = vmul.f32 %v9957_v44, %v9975_v7 }
 0x371   :  { %v5919_v17 = vmul.f32 %v9957_v44, %v9879_v59  ;;  %v5920_v37 = vmul.f32 %v9954_v16, %v9968_v52  ;;  %v5909_v12 = vadd.f32 %v5908_v32, %v5907_v18  ;;  %v5922_v30 = vmul.f32 %v9957_v44, %v9881_v49 }
 0x372   :  { %v5923_v13 = vmul.f32 %v9954_v16, %v9975_v7  ;;  %v5925_v47 = vmul.f32 %v9977_v27, %v9977_v27  ;;  %v5912_v31 = vadd.f32 %v5911_v35, %v5910_v22  ;;  %v5915_v20 = vsub.f32 %v5913_v56, %v5914_v58 }
 0x373   :  { %v5926_v2 = vmul.f32 %v9982_v28, %v9982_v28  ;;  %v5928_v59 = vmul.f32 %v9997_v42, %v9997_v42  ;;  %v5918_v48 = vsub.f32 %v5916_v34, %v5917_v53  ;;  %v5929_v52 = vmul.f32 %v10002_v14, %v10002_v14 }
 0x374   :  { %v5931_v49 = vmul.f32 %v10017_v61, %v10017_v61  ;;  %v5932_v16 = vmul.f32 %v10022_v36, %v10022_v36  ;;  %v5921_v44 = vadd.f32 %v5920_v37, %v5919_v17  ;;  %v5934_v7 = vmul.f32 %v5867_v40, %v5867_v40 }
 0x375   :  { %v5935_v27 = vmul.f32 %v5870_v21, %v5870_v21  ;;  %v5937_v19 = vmul.f32 %v5879_v60, %v5879_v60  ;;  %v5924_v55 = vadd.f32 %v5923_v13, %v5922_v30  ;;  %v5927_v9 = vadd.f32 %v5926_v2, %v5925_v47 }
 0x376   :  { %v5938_v28 = vmul.f32 %v5882_v10, %v5882_v10  ;;  %v5940_v39 = vmul.f32 %v5891_v23, %v5891_v23  ;;  %v5930_v45 = vadd.f32 %v5929_v52, %v5928_v59  ;;  %v5941_v42 = vmul.f32 %v5894_v62, %v5894_v62 }
 0x377   :  { %v5943_v6 = vmul.f32 %v5903_v0, %v5903_v0  ;;  %v5944_v54 = vmul.f32 %v5906_v24, %v5906_v24  ;;  %v5933_v50 = vadd.f32 %v5932_v16, %v5931_v49  ;;  %v5946_v14 = vmul.f32 %v5915_v20, %v5915_v20 }
 0x378   :  { %v5947_v43 = vmul.f32 %v5918_v48, %v5918_v48  ;;  %v5949_v61 = vmul.f32 %v9988_v33, %v9988_v33  ;;  %v5936_v15 = vadd.f32 %v5935_v27, %v5934_v7  ;;  %v5939_v36 = vadd.f32 %v5938_v28, %v5937_v19 }
 0x379   :  { %v5950_v40 = vmul.f32 %v9995_v8, %v9995_v8  ;;  %v5952_v21 = vmul.f32 %v10008_v11, %v10008_v11  ;;  %v5942_v60 = vadd.f32 %v5941_v42, %v5940_v39  ;;  %v5953_v10 = vmul.f32 %v10015_v1, %v10015_v1 }
 0x37a   :  { %v5955_v29 = vmul.f32 %v10028_v41, %v10028_v41  ;;  %v5956_v23 = vmul.f32 %v10035_v46, %v10035_v46  ;;  %v5945_v26 = vadd.f32 %v5944_v54, %v5943_v6  ;;  %v5958_v33 = vmul.f32 %v10047_v63, %v10047_v63 }
 0x37b   :  { %v5959_v8 = vmul.f32 %v10055_v51, %v10055_v51  ;;  %v5961_v11 = vmul.f32 %v10067_v3, %v10067_v3  ;;  %v10135_v38 = vadd.f32 %v5947_v43, %v5946_v14  ;;  %v5951_v62 = vadd.f32 %v5950_v40, %v5949_v61 }
 0x37c   :  { %v5962_v1 = vmul.f32 %v5888_v5, %v5888_v5  ;;  %v5964_v57 = vmul.f32 %v5897_v4, %v5897_v4  ;;  %v5954_v18 = vadd.f32 %v5953_v10, %v5952_v21  ;;  %v5957_v41 = vadd.f32 %v5956_v23, %v5955_v29 }
 0x37d   :  { %v5960_v32 = vadd.f32 %v5959_v8, %v5958_v33  ;;  %v5965_v22 = vmul.f32 %v5900_v25, %v5900_v25  ;;  %v5967_v35 = vmul.f32 %v5909_v12, %v5909_v12  ;;  %v5968_v56 = vmul.f32 %v5912_v31, %v5912_v31 }
 0x37e   :  { %v5963_v46 = vadd.f32 %v5962_v1, %v5961_v11  ;;  %v5973_v0 = vadd.f32 %v5933_v50, %v5927_v9  ;;  %v5970_v63 = vmul.f32 %v5921_v44, %v5921_v44  ;;  %v5971_v58 = vmul.f32 %v5924_v55, %v5924_v55 }
 0x37f   :  { %v5974_v34 = vadd.f32 %v5936_v15, %v5930_v45  ;;  %v5989_v51 = vadd.f32 %v5930_v45, %v5927_v9  ;;  %v5966_v24 = vadd.f32 %v5965_v22, %v5964_v57  ;;  %v5990_v3 = vadd.f32 %v5936_v15, %v5933_v50 }
 0x380   :  { %v5975_v53 = vadd.f32 %v5973_v0, %v5939_v36  ;;  %v6008_v17 = vadd.f32 %v5942_v60, %v5939_v36  ;;  %v6026_v4 = vadd.f32 %v5954_v18, %v5951_v62  ;;  %v5969_v13 = vadd.f32 %v5968_v56, %v5967_v35 }
 0x381   :  { %v5976_v37 = vadd.f32 %v5974_v34, %v5942_v60  ;;  %v5991_v30 = vadd.f32 %v5989_v51, %v5939_v36  ;;  %v6006_v5 = vadd.f32 %v5989_v51, %v5933_v50  ;;  %v5993_v20 = vadd.f32 %v5990_v3, %v5945_v26 }
 0x382   :  { %v5977_v47 = vadd.f32 %v5975_v53, %v5945_v26  ;;  %v6009_v25 = vadd.f32 %v6008_v17, %v5945_v26  ;;  %v6027_v59 = vadd.f32 %v6026_v4, %v5957_v41  ;;  %v5972_v48 = vadd.f32 %v5971_v58, %v5970_v63 }
 0x383   :  { %v5978_v12 = vadd.f32 %v5976_v37, %v10135_v38  ;;  %v5992_v31 = vadd.f32 %v5991_v30, %v5942_v60  ;;  %v6007_v2 = vadd.f32 %v6006_v5, %v5936_v15  ;;  %v5994_v49 = vadd.f32 %v5993_v20, %v10135_v38 }
 0x384   :  { %v5979_v52 = vadd.f32 %v5977_v47, %v5951_v62  ;;  %v6010_v16 = vadd.f32 %v6009_v25, %v10135_v38  ;;  %v6028_v39 = vadd.f32 %v6027_v59, %v5960_v32 }
 0x385   :  { %v5980_v44 = vadd.f32 %v5978_v12, %v5954_v18  ;;  %v5995_v7 = vadd.f32 %v5992_v31, %v5951_v62  ;;  %v6011_v27 = vadd.f32 %v6007_v2, %v5951_v62  ;;  %v6022_v19 = vadd.f32 %v6007_v2, %v5939_v36 }
 0x386   :  { %v5981_v55 = vadd.f32 %v5979_v52, %v5957_v41  ;;  %v5997_v9 = vadd.f32 %v5994_v49, %v5957_v41  ;;  %v6015_v28 = vadd.f32 %v6010_v16, %v5963_v46  ;;  %v6029_v61 = vadd.f32 %v6028_v39, %v5963_v46 }
 0x387   :  { %v5982_v45 = vadd.f32 %v5980_v44, %v5960_v32  ;;  %v5996_v42 = vadd.f32 %v5995_v7, %v5954_v18  ;;  %v6012_v6 = vadd.f32 %v6011_v27, %v5954_v18  ;;  %v6023_v54 = vadd.f32 %v6022_v19, %v5942_v60 }
 0x388   :  { %v5983_v50 = vadd.f32 %v5981_v55, %v5963_v46  ;;  %v5998_v14 = vadd.f32 %v5997_v9, %v5960_v32  ;;  %v6016_v43 = vadd.f32 %v6015_v28, %v5966_v24  ;;  %v6030_v36 = vadd.f32 %v6029_v61, %v5966_v24 }
 0x389   :  { %v5984_v15 = vadd.f32 %v5982_v45, %v5966_v24  ;;  %v5999_v40 = vadd.f32 %v5996_v42, %v5963_v46  ;;  %v6013_v21 = vadd.f32 %v6012_v6, %v5957_v41  ;;  %v6024_v10 = vadd.f32 %v6023_v54, %v5945_v26 }
 0x38a   :  { %v5985_v29 = vadd.f32 %v5983_v50, %v5969_v13  ;;  %v6001_v23 = vadd.f32 %v5998_v14, %v5969_v13  ;;  %v6017_v33 = vadd.f32 %v6016_v43, %v5969_v13  ;;  %v6031_v60 = vadd.f32 %v6030_v36, %v5969_v13 }
 0x38b   :  { %v5986_v8 = vadd.f32 %v5984_v15, %v5972_v48  ;;  %v6000_v11 = vadd.f32 %v5999_v40, %v5966_v24  ;;  %v6014_v62 = vadd.f32 %v6013_v21, %v5960_v32  ;;  %v6025_v18 = vadd.f32 %v6024_v10, %v10135_v38 }
 0x38c   :  { %v6002_v1 = vadd.f32 %v6001_v23, %v5972_v48  ;;  %v6018_v57 = vadd.f32 %v6017_v33, %v5972_v48  ;;  %v6032_v0 = vadd.f32 %v6031_v60, %v5972_v48 }
 0x38d   :  { %v5987_v22 = vsub.f32 %v5985_v29, %v5986_v8 }
 0x38e   :  { %v6003_v35 = vsub.f32 %v6000_v11, %v6002_v1  ;;  %v6019_v56 = vsub.f32 %v6014_v62, %v6018_v57  ;;  %v6033_v26 = vsub.f32 %v6025_v18, %v6032_v0 }
 0x38f   :  { %5988 = vst [vmem:[%s10156_s3] sm:$0xff] %v5987_v22 }
 0x390   :  { %6152 = vst [vmem:[%s10156_s3 + $0x8] sm:$0xff] %v6003_v35 }
 0x391   :  { %6153 = vst [vmem:[%s10156_s3 + $0x10] sm:$0xff] %v6019_v56 }
 0x392   :  { %6154 = vst [vmem:[%s10156_s3 + $0x18] sm:$0xff] %v6033_v26 }
 0x393   :  { %6040 = vsyncpa [#allocation3], 1 }
 0x394   :  { %6041 = vsyncpa [#allocation5], 1 }

</bundles_post_ra>
